<compile_context>
chip_gen: v6e
topology: v6e:2x2x1
jax: 0.10.0
libtpu: 0.0.40
codegen_flags: <defaults>
</compile_context>

<pallas_src>
import functools

import jax
import jax.numpy as jnp
from jax import lax
from jax.experimental import pallas as pl
from jax.experimental.pallas import tpu as pltpu

_EPS = 1e-5
_LANES = 128


def _round_up(x, m):
    return (x + m - 1) // m * m


def _pad_to(a, axis, target):
    if a.shape[axis] == target:
        return a
    pads = [(0, 0)] * a.ndim
    pads[axis] = (0, target - a.shape[axis])
    return jnp.pad(a, pads)


def _space_to_depth_rows(x, s):
    """(N, Hp, Wp, C) -> (N, s*s*Hph, Wph, C) with
    out[n, (pi*s+pj)*Hph + ih, iw, c] == x[n, s*ih + pi, s*iw + pj, c]."""
    N, Hp, Wp, C = x.shape
    Hph = -(-Hp // s)
    Wph = -(-Wp // s)
    x = jnp.pad(x, ((0, 0), (0, Hph * s - Hp), (0, Wph * s - Wp), (0, 0)))
    x = x.reshape(N, Hph, s, Wph, s, C)
    x = jnp.transpose(x, (0, 2, 4, 1, 3, 5))
    return x.reshape(N, s * s * Hph, Wph, C), Hph, Wph


# ---------------------------------------------------------------------------
# Fused Pallas kernel: whole WRN block for NB images per grid step.
# ---------------------------------------------------------------------------
def _wrn_block_kernel(*refs, NB, stride, Hph, Ho, Wo, Cp, C1p, C2p,
                      compute_dtype, projection, fold_kw):
    idx = 0
    x_ref = refs[idx]; idx += 1
    if stride > 1:
        m_ref = refs[idx]; idx += 1
    s1_ref, b1_ref, w1_ref, s2_ref, b2_ref, w2_ref = refs[idx:idx + 6]
    idx += 6
    if projection:
        sp_ref, bp_ref, wp_ref = refs[idx:idx + 3]
        idx += 3
    o_ref, y1_ref, hpad_ref = refs[idx:idx + 3]

    s = stride
    M = NB * Ho * Wo
    f32 = jnp.float32

    # ---- BN1 + ReLU (f32 math), stored to VMEM scratch in compute_dtype.
    # The post-activation halo must be exactly zero (the module pads AFTER
    # BN+ReLU), hence the mask (stride>1) / explicit halo strips (stride 1).
    s1 = s1_ref[...].reshape(1, 1, 1, Cp)
    b1 = b1_ref[...].reshape(1, 1, 1, Cp)
    xv = x_ref[...].astype(f32)
    y1 = jnp.maximum(xv * s1 + b1, 0.0)
    if s > 1:
        # phase-interleaved halo -> precomputed mask.
        y1_ref[...] = (y1 * m_ref[...]).astype(compute_dtype)
    else:
        # stride 1: x comes in unpadded; zero only the thin halo strips
        # (W halo is 2-wide so bf16 stores stay sublane-aligned).
        zr = jnp.zeros((NB, 1, Wo + 4, Cp), compute_dtype)
        zc = jnp.zeros((NB, Ho + 2, 2, Cp), compute_dtype)
        y1_ref[:, 0:1, :, :] = zr
        y1_ref[:, Ho + 1:Ho + 2, :, :] = zr
        y1_ref[:, :, 0:2, :] = zc
        y1_ref[:, :, Wo + 2:Wo + 4, :] = zc
        y1_ref[:, 1:1 + Ho, 2:2 + Wo, :] = y1.astype(compute_dtype)

    # ---- conv1: 3x3 / stride s.  Taps are unit-stride slices of y1 scratch.
    def conv1_tap(kh, kw):
        if s > 1:
            r0 = ((kh % s) * s + (kw % s)) * Hph + kh // s
            c0 = kw // s
        else:
            r0, c0 = kh, kw + 1
        return y1_ref[:, r0:r0 + Ho, c0:c0 + Wo, :].reshape(M, Cp)

    acc1 = None
    if fold_kw:
        # kw folded into the contraction (K = 3*Cp): 3 deep MXU matmuls.
        for kh in range(3):
            lhs = jnp.concatenate([conv1_tap(kh, kw) for kw in range(3)], -1)
            d = jnp.dot(lhs, w1_ref[kh], preferred_element_type=f32)
            acc1 = d if acc1 is None else acc1 + d
    else:
        # v5e path: 9 accumulating K=Cp dots, no concatenate copy.
        for kh in range(3):
            for kw in range(3):
                d = jnp.dot(conv1_tap(kh, kw),
                            w1_ref[kh, kw * Cp:(kw + 1) * Cp, :],
                            preferred_element_type=f32)
                acc1 = d if acc1 is None else acc1 + d

    # ---- BN2 + ReLU into a zero-halo compute_dtype scratch for conv2.
    # Only the halo strips are re-zeroed each step (megacore-safe).
    hzr = jnp.zeros((NB, 1, Wo + 4, C1p), compute_dtype)
    hzc = jnp.zeros((NB, Ho + 2, 2, C1p), compute_dtype)
    hpad_ref[:, 0:1, :, :] = hzr
    hpad_ref[:, Ho + 1:Ho + 2, :, :] = hzr
    hpad_ref[:, :, 0:2, :] = hzc
    hpad_ref[:, :, Wo + 2:Wo + 4, :] = hzc
    y2 = jnp.maximum(acc1 * s2_ref[...] + b2_ref[...], 0.0)       # (M, C1p) f32
    hpad_ref[:, 1:1 + Ho, 2:2 + Wo, :] = (
        y2.reshape(NB, Ho, Wo, C1p).astype(compute_dtype))

    # ---- conv2: 3x3 / stride 1.
    def conv2_tap(kh, kw):
        return hpad_ref[:, kh:kh + Ho, kw + 1:kw + 1 + Wo, :].reshape(M, C1p)

    acc2 = None
    if fold_kw:
        for kh in range(3):
            lhs = jnp.concatenate([conv2_tap(kh, kw) for kw in range(3)], -1)
            d = jnp.dot(lhs, w2_ref[kh], preferred_element_type=f32)
            acc2 = d if acc2 is None else acc2 + d
    else:
        for kh in range(3):
            for kw in range(3):
                d = jnp.dot(conv2_tap(kh, kw),
                            w2_ref[kh, kw * C1p:(kw + 1) * C1p, :],
                            preferred_element_type=f32)
                acc2 = d if acc2 is None else acc2 + d

    # ---- shortcut: BN->ReLU->1x1 conv (stride s), or identity.
    if s > 1:
        r0 = ((1 % s) * s + (1 % s)) * Hph + 1 // s
        c0 = 1 // s
        xr = x_ref[:, r0:r0 + Ho, c0:c0 + Wo, :].reshape(M, Cp).astype(f32)
    else:
        xr = xv.reshape(M, Cp)
    if projection:
        yr = jnp.maximum(xr * sp_ref[...] + bp_ref[...], 0.0)
        res = jnp.dot(yr.astype(compute_dtype), wp_ref[...],
                      preferred_element_type=f32)
    else:
        res = xr   # identity: stride == 1 and Cp == C2p

    o_ref[...] = (acc2 + res).reshape(NB, Ho, Wo, C2p).astype(o_ref.dtype)


# ---------------------------------------------------------------------------
# Wrapper: layout plumbing (NCHW<->NHWC, channel/lane padding, stride phases).
# ---------------------------------------------------------------------------
def wrn_cifar_block_forward(x_nchw, params, *, stride, projection_shortcut,
                            use_dropout=False, compute_dtype=jnp.bfloat16,
                            images_per_step=4, fold_kw=None,
                            single_buffer_constants=True,
                            return_nhwc_padded=False):
    """Forward pass of WRNCifarBlock.  x_nchw: (N, Cin, H, W).

    Returns NCHW in compute_dtype (cast outside if f32 is needed), or the raw
    lane-padded NHWC kernel output if return_nhwc_padded=True (for chaining
    blocks without per-block slice/transpose passes).
    """
    # dropout is nn.Identity() when use_dropout=False (our configuration).
    # TODO(synk): training-mode dropout (keep_prob=0.7) not implemented.
    del use_dropout

    N, Cin, H, W = x_nchw.shape
    w1 = params["conv1"]["w"]
    w2 = params["conv2"]["w"]
    C1, C2 = w1.shape[-1], w2.shape[-1]
    s, pad = stride, 1
    Ho = (H + 2 * pad - 3) // s + 1
    Wo = (W + 2 * pad - 3) // s + 1

    if not projection_shortcut:
        assert s == 1 and Cin == C2, (
            "identity shortcut requires stride == 1 and Cin == block_channels[1]")

    Cp = _round_up(Cin, _LANES)
    C1p = _round_up(C1, _LANES)
    C2p = _round_up(C2, _LANES)

    if fold_kw is None:
        # v5e MXU is 128-deep, so K=Cp dots lose no MXU efficiency and the
        # concatenate copy can be skipped; deeper K helps v6e/v7x (256-deep).
        try:
            fold_kw = "v5" not in jax.devices()[0].device_kind.lower()
        except Exception:
            fold_kw = True

    # Images per grid step: NB must divide N (no wasted padded-batch compute)
    # and the grid length must stay >= 2 so the "parallel" batch axis actually
    # splits across the two TensorCores on v7x.
    NB = max(1, min(images_per_step, N))
    if N >= 2:
        NB = max(1, min(NB, N // 2))
    while NB > 1 and N % NB != 0:
        NB -= 1

    cd = jnp.dtype(compute_dtype)

    # NCHW -> NHWC in compute_dtype (halves input HBM DMA for bf16); pad
    # channels to a lane multiple (lane-dense loads / unmasked stores).
    x = jnp.transpose(x_nchw, (0, 2, 3, 1)).astype(compute_dtype)
    x = _pad_to(x, 3, Cp)

    if s > 1:
        # Spatial pre-pad once + space-to-depth so every in-kernel window
        # slice is unit stride; interior mask keeps the post-ReLU halo zero.
        xpad = jnp.pad(x, ((0, 0), (pad, pad), (pad, pad), (0, 0)))
        x_in, Hph, Wph = _space_to_depth_rows(xpad, s)
        PH = s * s * Hph
        mask = jnp.pad(jnp.ones((1, H, W, 1), jnp.float32),
                       ((0, 0), (pad, pad), (pad, pad), (0, 0)))
        mph, _, _ = _space_to_depth_rows(mask, s)
        x_block = (NB, PH, Wph, Cp)
        y1_scr = pltpu.VMEM((NB, PH, Wph, Cp), compute_dtype)
    else:
        Hph, Wph, PH = H, W, H          # unused on the stride-1 path
        mph = None
        x_in = x
        x_block = (NB, H, W, Cp)
        y1_scr = pltpu.VMEM((NB, Ho + 2, Wo + 4, Cp), compute_dtype)

    def bn_coeffs(p, cpad):
        scale = p["gamma"] / jnp.sqrt(p["var"] + _EPS)
        shift = p["beta"] - p["mean"] * scale
        return (_pad_to(scale, 0, cpad).reshape(1, cpad).astype(jnp.float32),
                _pad_to(shift, 0, cpad).reshape(1, cpad).astype(jnp.float32))

    def pack_w3x3(w, cin_p, cout_p):
        w = _pad_to(_pad_to(w, 2, cin_p), 3, cout_p)     # (3, 3, cin_p, cout_p)
        return w.reshape(3, 3 * cin_p, cout_p).astype(compute_dtype)

    s1, b1 = bn_coeffs(params["conv1"], Cp)
    s2, b2 = bn_coeffs(params["conv2"], C1p)
    w1p = pack_w3x3(w1, Cp, C1p)
    w2p = pack_w3x3(w2, C1p, C2p)

    args = [x_in]
    if s > 1:
        args.append(mph)
    args += [s1, b1, w1p, s2, b2, w2p]
    if projection_shortcut:
        sp, bp = bn_coeffs(params["proj"], Cp)
        wp = _pad_to(_pad_to(params["proj"]["w"], 2, Cp), 3, C2p)
        wp = wp.reshape(Cp, C2p).astype(compute_dtype)
        args += [sp, bp, wp]

    def build_specs(single_buf):
        # Constant index_map across the grid -> a single VMEM buffer is
        # enough; saves double-buffer VMEM for the weights (matters on the
        # 64 MiB-VMEM v7x at real WRN widths).  Falls back cleanly if the
        # running JAX does not accept pipeline_mode / Buffered(1).
        ck = dict(pipeline_mode=pl.Buffered(1)) if single_buf else {}
        specs = [pl.BlockSpec(x_block, lambda n: (n, 0, 0, 0))]
        if s > 1:
            specs.append(pl.BlockSpec((1, PH, Wph, 1), lambda n: (0, 0, 0, 0), **ck))
        specs += [
            pl.BlockSpec((1, Cp), lambda n: (0, 0), **ck),            # bn1 scale
            pl.BlockSpec((1, Cp), lambda n: (0, 0), **ck),            # bn1 shift
            pl.BlockSpec((3, 3 * Cp, C1p), lambda n: (0, 0, 0), **ck),   # w1
            pl.BlockSpec((1, C1p), lambda n: (0, 0), **ck),           # bn2 scale
            pl.BlockSpec((1, C1p), lambda n: (0, 0), **ck),           # bn2 shift
            pl.BlockSpec((3, 3 * C1p, C2p), lambda n: (0, 0, 0), **ck),  # w2
        ]
        if projection_shortcut:
            specs += [pl.BlockSpec((1, Cp), lambda n: (0, 0), **ck),
                      pl.BlockSpec((1, Cp), lambda n: (0, 0), **ck),
                      pl.BlockSpec((Cp, C2p), lambda n: (0, 0), **ck)]
        return specs

    # ---- scoped VMEM limit sized from the actual per-step working set.
    bpe = cd.itemsize
    M = NB * Ho * Wo
    x_blk_b = NB * (PH * Wph if s > 1 else H * W) * Cp * bpe
    out_blk_b = NB * Ho * Wo * C2p * bpe
    w_b = (3 * 3 * Cp * C1p + 3 * 3 * C1p * C2p
           + (Cp * C2p if projection_shortcut else 0)) * bpe
    bn_b = 2 * (Cp + C1p + (Cp if projection_shortcut else 0)) * 4
    mask_b = (PH * Wph * 4) if s > 1 else 0
    y1_b = (NB * PH * Wph * Cp if s > 1
            else NB * (Ho + 2) * (Wo + 4) * Cp) * bpe
    hpad_b = NB * (Ho + 2) * (Wo + 4) * C1p * bpe
    tmp_b = (M * 3 * max(Cp, C1p) * bpe if fold_kw else M * max(Cp, C1p) * bpe)
    tmp_b += 3 * M * max(C1p, C2p) * 4
    const_buf = 1 if single_buffer_constants else 2
    est = (2 * (x_blk_b + out_blk_b) + const_buf * (w_b + bn_b + mask_b)
           + y1_b + hpad_b + tmp_b)
    vmem_limit = max(int(est * 1.5) + (4 << 20), 32 << 20)
    try:
        vmem_limit = min(vmem_limit,
                         int(pltpu.get_tpu_info().vmem_capacity_bytes))
    except Exception:
        vmem_limit = min(vmem_limit, 128 << 20)

    scratch = [y1_scr, pltpu.VMEM((NB, Ho + 2, Wo + 4, C1p), compute_dtype)]

    kernel = functools.partial(
        _wrn_block_kernel, NB=NB, stride=s, Hph=Hph, Ho=Ho, Wo=Wo,
        Cp=Cp, C1p=C1p, C2p=C2p, compute_dtype=compute_dtype,
        projection=projection_shortcut, fold_kw=fold_kw)

    def run(single_buf):
        return pl.pallas_call(
            kernel,
            out_shape=jax.ShapeDtypeStruct((N, Ho, Wo, C2p), compute_dtype),
            grid_spec=pltpu.PrefetchScalarGridSpec(
                num_scalar_prefetch=0,
                grid=(N // NB,),
                in_specs=build_specs(single_buf),
                out_specs=pl.BlockSpec((NB, Ho, Wo, C2p), lambda n: (n, 0, 0, 0)),
                scratch_shapes=scratch,
            ),
            compiler_params=pltpu.CompilerParams(
                # Batch axis is fully independent -> megacore sharding on v7x;
                # harmless no-op on single-TC v5e/v6e.
                dimension_semantics=("parallel",),
                vmem_limit_bytes=vmem_limit,
            ),
        )(*args)

    if single_buffer_constants:
        try:
            out = run(True)
        except Exception:
            out = run(False)
    else:
        out = run(False)

    if return_nhwc_padded:
        # TODO(synk): keep the whole net NHWC / lane-padded so the slice +
        # NHWC->NCHW transpose below disappears between chained blocks.
        return out
    out = out[:, :, :, :C2]
    return jnp.transpose(out, (0, 3, 1, 2))   # NHWC -> NCHW


# ---------------------------------------------------------------------------
# Deterministic synthetic parameters & pure-JAX reference.
# ---------------------------------------------------------------------------
def make_bn_relu_conv_params(key, cin, cout, ksize):
    kg, kb, km, kv, kw = jax.random.split(key, 5)
    gamma = 1.0 + 0.1 * jax.random.normal(kg, (cin,), jnp.float32)
    beta = 0.1 * jax.random.normal(kb, (cin,), jnp.float32)
    mean = 0.1 * jax.random.normal(km, (cin,), jnp.float32)
    var = jax.nn.softplus(jax.random.normal(kv, (cin,), jnp.float32)) + 0.5
    w = jax.random.normal(kw, (ksize, ksize, cin, cout), jnp.float32)
    w = w / jnp.sqrt(jnp.float32(ksize * ksize * cin))
    return dict(gamma=gamma, beta=beta, mean=mean, var=var, w=w)


def _ref_bn_relu_conv(x, p, stride, pad):
    scale = p["gamma"] / jnp.sqrt(p["var"] + _EPS)
    shift = p["beta"] - p["mean"] * scale
    y = jnp.maximum(x * scale + shift, 0.0)
    return lax.conv_general_dilated(
        y, p["w"], window_strides=(stride, stride),
        padding=[(pad, pad), (pad, pad)],
        dimension_numbers=("NHWC", "HWIO", "NHWC"))


def wrn_cifar_block_reference(x_nchw, params, *, stride, projection_shortcut):
    x = jnp.transpose(x_nchw, (0, 2, 3, 1))
    res = (_ref_bn_relu_conv(x, params["proj"], stride, 0)
           if projection_shortcut else x)
    h = _ref_bn_relu_conv(x, params["conv1"], stride, 1)
    out = _ref_bn_relu_conv(h, params["conv2"], 1, 1) + res
    return jnp.transpose(out, (0, 3, 1, 2))


if __name__ == "__main__":
    key = jax.random.PRNGKey(0)
    N, Cin, H, W = 2, 4, 16, 16
    block_channels = (8, 8)
    stride = 2

    k_x, k1, k2, k3, k_x2, k4, k5 = jax.random.split(key, 7)
    x_nchw = jax.random.normal(k_x, (N, Cin, H, W), jnp.float32)
    params = {
        "conv1": make_bn_relu_conv_params(k1, Cin, block_channels[0], 3),
        "conv2": make_bn_relu_conv_params(k2, block_channels[0], block_channels[1], 3),
        "proj": make_bn_relu_conv_params(k3, Cin, block_channels[1], 1),
    }

    # ---- stride-2 projection block.
    ref = jax.block_until_ready(wrn_cifar_block_reference(
        x_nchw, params, stride=stride, projection_shortcut=True))

    out_f32 = jax.block_until_ready(wrn_cifar_block_forward(
        x_nchw, params, stride=stride, projection_shortcut=True,
        compute_dtype=jnp.float32))
    assert out_f32.shape == (N, block_channels[1], H // stride, W // stride), out_f32.shape
    if not jnp.allclose(out_f32, ref, atol=1e-4, rtol=1e-4):
        max_err = float(jnp.max(jnp.abs(out_f32 - ref)))
        raise AssertionError(f"f32 mismatch vs reference, max abs err = {max_err}")

    out_bf16 = jax.block_until_ready(wrn_cifar_block_forward(
        x_nchw, params, stride=stride, projection_shortcut=True,
        compute_dtype=jnp.bfloat16))
    if not jnp.allclose(out_bf16.astype(jnp.float32), ref, atol=1e-1, rtol=1e-1):
        max_err = float(jnp.max(jnp.abs(out_bf16.astype(jnp.float32) - ref)))
        raise AssertionError(f"bf16 mismatch vs reference, max abs err = {max_err}")

    # ---- stride-1 identity-shortcut block (second block of a WRN group):
    # exercises the unpadded-input / halo-strip path (no mask input).
    Cid, Hid, Wid = block_channels[1], H // stride, W // stride
    x_id = jax.random.normal(k_x2, (N, Cid, Hid, Wid), jnp.float32)
    params_id = {
        "conv1": make_bn_relu_conv_params(k4, Cid, block_channels[0], 3),
        "conv2": make_bn_relu_conv_params(k5, block_channels[0], block_channels[1], 3),
    }
    ref_id = jax.block_until_ready(wrn_cifar_block_reference(
        x_id, params_id, stride=1, projection_shortcut=False))
    out_id = jax.block_until_ready(wrn_cifar_block_forward(
        x_id, params_id, stride=1, projection_shortcut=False,
        compute_dtype=jnp.float32))
    if not jnp.allclose(out_id, ref_id, atol=1e-4, rtol=1e-4):
        max_err = float(jnp.max(jnp.abs(out_id - ref_id)))
        raise AssertionError(f"identity-block mismatch, max abs err = {max_err}")

    print("KERNEL_OK")
</pallas_src>

<mosaic_0001>
module attributes {stable_mosaic.version = 11 : i64} {
  func.func @_wrn_block_kernel(%arg0: i32, %arg1: memref<1x36x9x128xf32, #tpu.memory_space<vmem>>, %arg2: memref<1x36x9x1xf32, #tpu.memory_space<vmem>>, %arg3: memref<1x128xf32, #tpu.memory_space<vmem>>, %arg4: memref<1x128xf32, #tpu.memory_space<vmem>>, %arg5: memref<3x384x128xf32, #tpu.memory_space<vmem>>, %arg6: memref<1x128xf32, #tpu.memory_space<vmem>>, %arg7: memref<1x128xf32, #tpu.memory_space<vmem>>, %arg8: memref<3x384x128xf32, #tpu.memory_space<vmem>>, %arg9: memref<1x128xf32, #tpu.memory_space<vmem>>, %arg10: memref<1x128xf32, #tpu.memory_space<vmem>>, %arg11: memref<128x128xf32, #tpu.memory_space<vmem>>, %arg12: memref<1x8x8x128xf32, #tpu.memory_space<vmem>>, %arg13: memref<1x36x9x128xf32, #tpu.memory_space<vmem>>, %arg14: memref<1x10x12x128xf32, #tpu.memory_space<vmem>>) attributes {dimension_semantics = [#tpu.dimension_semantics<parallel>], iteration_bounds = array<i64: 2>, scalar_prefetch = 0 : i64, scratch_operands = 2 : i64, tpu.core_type = #tpu.core_type<tc>, window_params = [{transform_indices = @transform_0, window_bounds = array<i64: 1, 36, 9, 128>}, {pipeline_mode = #tpu.pipeline_mode<synchronous>, transform_indices = @transform_1, window_bounds = array<i64: 1, 36, 9, 1>}, {pipeline_mode = #tpu.pipeline_mode<synchronous>, transform_indices = @transform_2, window_bounds = array<i64: 1, 128>}, {pipeline_mode = #tpu.pipeline_mode<synchronous>, transform_indices = @transform_3, window_bounds = array<i64: 1, 128>}, {pipeline_mode = #tpu.pipeline_mode<synchronous>, transform_indices = @transform_4, window_bounds = array<i64: 3, 384, 128>}, {pipeline_mode = #tpu.pipeline_mode<synchronous>, transform_indices = @transform_5, window_bounds = array<i64: 1, 128>}, {pipeline_mode = #tpu.pipeline_mode<synchronous>, transform_indices = @transform_6, window_bounds = array<i64: 1, 128>}, {pipeline_mode = #tpu.pipeline_mode<synchronous>, transform_indices = @transform_7, window_bounds = array<i64: 3, 384, 128>}, {pipeline_mode = #tpu.pipeline_mode<synchronous>, transform_indices = @transform_8, window_bounds = array<i64: 1, 128>}, {pipeline_mode = #tpu.pipeline_mode<synchronous>, transform_indices = @transform_9, window_bounds = array<i64: 1, 128>}, {pipeline_mode = #tpu.pipeline_mode<synchronous>, transform_indices = @transform_10, window_bounds = array<i64: 128, 128>}, {transform_indices = @transform_11, window_bounds = array<i64: 1, 8, 8, 128>}]} {
    %c0 = arith.constant 0 : index
    %c0_0 = arith.constant 0 : index
    %0 = vector.load %arg3[%c0, %c0_0] : memref<1x128xf32, #tpu.memory_space<vmem>>, vector<1x128xf32>
    %1 = vector.shape_cast %0 : vector<1x128xf32> to vector<1x1x1x128xf32>
    %c0_1 = arith.constant 0 : index
    %c0_2 = arith.constant 0 : index
    %2 = vector.load %arg4[%c0_1, %c0_2] : memref<1x128xf32, #tpu.memory_space<vmem>>, vector<1x128xf32>
    %3 = vector.shape_cast %2 : vector<1x128xf32> to vector<1x1x1x128xf32>
    %c0_3 = arith.constant 0 : index
    %c0_4 = arith.constant 0 : index
    %c0_5 = arith.constant 0 : index
    %c0_6 = arith.constant 0 : index
    %4 = vector.load %arg1[%c0_3, %c0_4, %c0_5, %c0_6] : memref<1x36x9x128xf32, #tpu.memory_space<vmem>>, vector<1x36x9x128xf32>
    %5 = vector.broadcast %1 : vector<1x1x1x128xf32> to vector<1x36x9x128xf32>
    %6 = arith.mulf %4, %5 : vector<1x36x9x128xf32>
    %7 = vector.broadcast %3 : vector<1x1x1x128xf32> to vector<1x36x9x128xf32>
    %8 = arith.addf %6, %7 : vector<1x36x9x128xf32>
    %cst = arith.constant 0.000000e+00 : f32
    %9 = vector.broadcast %cst : f32 to vector<1x36x9x128xf32>
    %10 = arith.maximumf %8, %9 : vector<1x36x9x128xf32>
    %c0_7 = arith.constant 0 : index
    %c0_8 = arith.constant 0 : index
    %c0_9 = arith.constant 0 : index
    %c0_10 = arith.constant 0 : index
    %11 = vector.load %arg2[%c0_7, %c0_8, %c0_9, %c0_10] : memref<1x36x9x1xf32, #tpu.memory_space<vmem>>, vector<1x36x9x1xf32>
    %12 = vector.broadcast %11 : vector<1x36x9x1xf32> to vector<1x36x9x128xf32>
    %13 = arith.mulf %10, %12 : vector<1x36x9x128xf32>
    %c0_11 = arith.constant 0 : index
    %c0_12 = arith.constant 0 : index
    %c0_13 = arith.constant 0 : index
    %c0_14 = arith.constant 0 : index
    %14 = vector.load %arg13[%c0_11, %c0_12, %c0_13, %c0_14] : memref<1x36x9x128xf32, #tpu.memory_space<vmem>>, vector<1x36x9x128xf32>
    tpu.vector_store %arg13[%c0_11, %c0_12, %c0_13, %c0_14], %13 {strides = array<i32>} : memref<1x36x9x128xf32, #tpu.memory_space<vmem>>, vector<1x36x9x128xf32>,
    %c0_15 = arith.constant 0 : index
    %c0_16 = arith.constant 0 : index
    %c0_17 = arith.constant 0 : index
    %c0_18 = arith.constant 0 : index
    %15 = vector.load %arg13[%c0_15, %c0_16, %c0_17, %c0_18] : memref<1x36x9x128xf32, #tpu.memory_space<vmem>>, vector<1x8x8x128xf32>
    %16 = vector.shape_cast %15 : vector<1x8x8x128xf32> to vector<64x128xf32>
    %c0_19 = arith.constant 0 : index
    %c9 = arith.constant 9 : index
    %c0_20 = arith.constant 0 : index
    %c0_21 = arith.constant 0 : index
    %17 = vector.load %arg13[%c0_19, %c9, %c0_20, %c0_21] : memref<1x36x9x128xf32, #tpu.memory_space<vmem>>, vector<1x8x8x128xf32>
    %18 = vector.shape_cast %17 : vector<1x8x8x128xf32> to vector<64x128xf32>
    %c0_22 = arith.constant 0 : index
    %c0_23 = arith.constant 0 : index
    %c1 = arith.constant 1 : index
    %c0_24 = arith.constant 0 : index
    %19 = vector.load %arg13[%c0_22, %c0_23, %c1, %c0_24] : memref<1x36x9x128xf32, #tpu.memory_space<vmem>>, vector<1x8x8x128xf32>
    %20 = vector.shape_cast %19 : vector<1x8x8x128xf32> to vector<64x128xf32>
    %21 = tpu.concatenate %16, %18, %20 in 1 : vector<64x128xf32>, vector<64x128xf32>, vector<64x128xf32> -> vector<64x384xf32>
    %c0_25 = arith.constant 0 : index
    %c0_26 = arith.constant 0 : index
    %c0_27 = arith.constant 0 : index
    %22 = vector.load %arg5[%c0_25, %c0_26, %c0_27] : memref<3x384x128xf32, #tpu.memory_space<vmem>>, vector<1x384x128xf32>
    %23 = vector.shape_cast %22 : vector<1x384x128xf32> to vector<384x128xf32>
    %cst_28 = arith.constant dense<0.000000e+00> : vector<64x128xf32>
    %24 = tpu.matmul %21, %23, %cst_28 {dimension_numbers = #tpu.dot_dimension_numbers<[1], [0], [0], [1], [0, 0, 1, 1], [], []>} : vector<64x384xf32>, vector<384x128xf32>, vector<64x128xf32> -> vector<64x128xf32>
    %c0_29 = arith.constant 0 : index
    %c18 = arith.constant 18 : index
    %c0_30 = arith.constant 0 : index
    %c0_31 = arith.constant 0 : index
    %25 = vector.load %arg13[%c0_29, %c18, %c0_30, %c0_31] : memref<1x36x9x128xf32, #tpu.memory_space<vmem>>, vector<1x8x8x128xf32>
    %26 = vector.shape_cast %25 : vector<1x8x8x128xf32> to vector<64x128xf32>
    %c0_32 = arith.constant 0 : index
    %c27 = arith.constant 27 : index
    %c0_33 = arith.constant 0 : index
    %c0_34 = arith.constant 0 : index
    %27 = vector.load %arg13[%c0_32, %c27, %c0_33, %c0_34] : memref<1x36x9x128xf32, #tpu.memory_space<vmem>>, vector<1x8x8x128xf32>
    %28 = vector.shape_cast %27 : vector<1x8x8x128xf32> to vector<64x128xf32>
    %c0_35 = arith.constant 0 : index
    %c18_36 = arith.constant 18 : index
    %c1_37 = arith.constant 1 : index
    %c0_38 = arith.constant 0 : index
    %29 = vector.load %arg13[%c0_35, %c18_36, %c1_37, %c0_38] : memref<1x36x9x128xf32, #tpu.memory_space<vmem>>, vector<1x8x8x128xf32>
    %30 = vector.shape_cast %29 : vector<1x8x8x128xf32> to vector<64x128xf32>
    %31 = tpu.concatenate %26, %28, %30 in 1 : vector<64x128xf32>, vector<64x128xf32>, vector<64x128xf32> -> vector<64x384xf32>
    %c1_39 = arith.constant 1 : index
    %c0_40 = arith.constant 0 : index
    %c0_41 = arith.constant 0 : index
    %32 = vector.load %arg5[%c1_39, %c0_40, %c0_41] : memref<3x384x128xf32, #tpu.memory_space<vmem>>, vector<1x384x128xf32>
    %33 = vector.shape_cast %32 : vector<1x384x128xf32> to vector<384x128xf32>
    %cst_42 = arith.constant dense<0.000000e+00> : vector<64x128xf32>
    %34 = tpu.matmul %31, %33, %cst_42 {dimension_numbers = #tpu.dot_dimension_numbers<[1], [0], [0], [1], [0, 0, 1, 1], [], []>} : vector<64x384xf32>, vector<384x128xf32>, vector<64x128xf32> -> vector<64x128xf32>
    %35 = arith.addf %24, %34 : vector<64x128xf32>
    %c0_43 = arith.constant 0 : index
    %c1_44 = arith.constant 1 : index
    %c0_45 = arith.constant 0 : index
    %c0_46 = arith.constant 0 : index
    %36 = vector.load %arg13[%c0_43, %c1_44, %c0_45, %c0_46] : memref<1x36x9x128xf32, #tpu.memory_space<vmem>>, vector<1x8x8x128xf32>
    %37 = vector.shape_cast %36 : vector<1x8x8x128xf32> to vector<64x128xf32>
    %c0_47 = arith.constant 0 : index
    %c10 = arith.constant 10 : index
    %c0_48 = arith.constant 0 : index
    %c0_49 = arith.constant 0 : index
    %38 = vector.load %arg13[%c0_47, %c10, %c0_48, %c0_49] : memref<1x36x9x128xf32, #tpu.memory_space<vmem>>, vector<1x8x8x128xf32>
    %39 = vector.shape_cast %38 : vector<1x8x8x128xf32> to vector<64x128xf32>
    %c0_50 = arith.constant 0 : index
    %c1_51 = arith.constant 1 : index
    %c1_52 = arith.constant 1 : index
    %c0_53 = arith.constant 0 : index
    %40 = vector.load %arg13[%c0_50, %c1_51, %c1_52, %c0_53] : memref<1x36x9x128xf32, #tpu.memory_space<vmem>>, vector<1x8x8x128xf32>
    %41 = vector.shape_cast %40 : vector<1x8x8x128xf32> to vector<64x128xf32>
    %42 = tpu.concatenate %37, %39, %41 in 1 : vector<64x128xf32>, vector<64x128xf32>, vector<64x128xf32> -> vector<64x384xf32>
    %c2 = arith.constant 2 : index
    %c0_54 = arith.constant 0 : index
    %c0_55 = arith.constant 0 : index
    %43 = vector.load %arg5[%c2, %c0_54, %c0_55] : memref<3x384x128xf32, #tpu.memory_space<vmem>>, vector<1x384x128xf32>
    %44 = vector.shape_cast %43 : vector<1x384x128xf32> to vector<384x128xf32>
    %cst_56 = arith.constant dense<0.000000e+00> : vector<64x128xf32>
    %45 = tpu.matmul %42, %44, %cst_56 {dimension_numbers = #tpu.dot_dimension_numbers<[1], [0], [0], [1], [0, 0, 1, 1], [], []>} : vector<64x384xf32>, vector<384x128xf32>, vector<64x128xf32> -> vector<64x128xf32>
    %46 = arith.addf %35, %45 : vector<64x128xf32>
    %cst_57 = arith.constant 0.000000e+00 : f32
    %47 = vector.broadcast %cst_57 : f32 to vector<1x1x12x128xf32>
    %cst_58 = arith.constant 0.000000e+00 : f32
    %48 = vector.broadcast %cst_58 : f32 to vector<1x10x2x128xf32>
    %c0_59 = arith.constant 0 : index
    %c0_60 = arith.constant 0 : index
    %c0_61 = arith.constant 0 : index
    %c0_62 = arith.constant 0 : index
    %49 = vector.load %arg14[%c0_59, %c0_60, %c0_61, %c0_62] : memref<1x10x12x128xf32, #tpu.memory_space<vmem>>, vector<1x1x12x128xf32>
    tpu.vector_store %arg14[%c0_59, %c0_60, %c0_61, %c0_62], %47 {strides = array<i32>} : memref<1x10x12x128xf32, #tpu.memory_space<vmem>>, vector<1x1x12x128xf32>,
    %c0_63 = arith.constant 0 : index
    %c9_64 = arith.constant 9 : index
    %c0_65 = arith.constant 0 : index
    %c0_66 = arith.constant 0 : index
    %50 = vector.load %arg14[%c0_63, %c9_64, %c0_65, %c0_66] : memref<1x10x12x128xf32, #tpu.memory_space<vmem>>, vector<1x1x12x128xf32>
    tpu.vector_store %arg14[%c0_63, %c9_64, %c0_65, %c0_66], %47 {strides = array<i32>} : memref<1x10x12x128xf32, #tpu.memory_space<vmem>>, vector<1x1x12x128xf32>,
    %c0_67 = arith.constant 0 : index
    %c0_68 = arith.constant 0 : index
    %c0_69 = arith.constant 0 : index
    %c0_70 = arith.constant 0 : index
    %51 = vector.load %arg14[%c0_67, %c0_68, %c0_69, %c0_70] : memref<1x10x12x128xf32, #tpu.memory_space<vmem>>, vector<1x10x2x128xf32>
    tpu.vector_store %arg14[%c0_67, %c0_68, %c0_69, %c0_70], %48 {strides = array<i32>} : memref<1x10x12x128xf32, #tpu.memory_space<vmem>>, vector<1x10x2x128xf32>,
    %c0_71 = arith.constant 0 : index
    %c0_72 = arith.constant 0 : index
    %c10_73 = arith.constant 10 : index
    %c0_74 = arith.constant 0 : index
    %52 = vector.load %arg14[%c0_71, %c0_72, %c10_73, %c0_74] : memref<1x10x12x128xf32, #tpu.memory_space<vmem>>, vector<1x10x2x128xf32>
    tpu.vector_store %arg14[%c0_71, %c0_72, %c10_73, %c0_74], %48 {strides = array<i32>} : memref<1x10x12x128xf32, #tpu.memory_space<vmem>>, vector<1x10x2x128xf32>,
    %c0_75 = arith.constant 0 : index
    %c0_76 = arith.constant 0 : index
    %53 = vector.load %arg6[%c0_75, %c0_76] : memref<1x128xf32, #tpu.memory_space<vmem>>, vector<1x128xf32>
    %54 = vector.broadcast %53 : vector<1x128xf32> to vector<64x128xf32>
    %55 = arith.mulf %46, %54 : vector<64x128xf32>
    %c0_77 = arith.constant 0 : index
    %c0_78 = arith.constant 0 : index
    %56 = vector.load %arg7[%c0_77, %c0_78] : memref<1x128xf32, #tpu.memory_space<vmem>>, vector<1x128xf32>
    %57 = vector.broadcast %56 : vector<1x128xf32> to vector<64x128xf32>
    %58 = arith.addf %55, %57 : vector<64x128xf32>
    %cst_79 = arith.constant 0.000000e+00 : f32
    %59 = vector.broadcast %cst_79 : f32 to vector<64x128xf32>
    %60 = arith.maximumf %58, %59 : vector<64x128xf32>
    %61 = vector.shape_cast %60 : vector<64x128xf32> to vector<1x8x8x128xf32>
    %c0_80 = arith.constant 0 : index
    %c1_81 = arith.constant 1 : index
    %c2_82 = arith.constant 2 : index
    %c0_83 = arith.constant 0 : index
    %62 = vector.load %arg14[%c0_80, %c1_81, %c2_82, %c0_83] : memref<1x10x12x128xf32, #tpu.memory_space<vmem>>, vector<1x8x8x128xf32>
    tpu.vector_store %arg14[%c0_80, %c1_81, %c2_82, %c0_83], %61 {strides = array<i32>} : memref<1x10x12x128xf32, #tpu.memory_space<vmem>>, vector<1x8x8x128xf32>,
    %c0_84 = arith.constant 0 : index
    %c0_85 = arith.constant 0 : index
    %c1_86 = arith.constant 1 : index
    %c0_87 = arith.constant 0 : index
    %63 = vector.load %arg14[%c0_84, %c0_85, %c1_86, %c0_87] : memref<1x10x12x128xf32, #tpu.memory_space<vmem>>, vector<1x8x8x128xf32>
    %64 = vector.shape_cast %63 : vector<1x8x8x128xf32> to vector<64x128xf32>
    %c0_88 = arith.constant 0 : index
    %c0_89 = arith.constant 0 : index
    %c2_90 = arith.constant 2 : index
    %c0_91 = arith.constant 0 : index
    %65 = vector.load %arg14[%c0_88, %c0_89, %c2_90, %c0_91] : memref<1x10x12x128xf32, #tpu.memory_space<vmem>>, vector<1x8x8x128xf32>
    %66 = vector.shape_cast %65 : vector<1x8x8x128xf32> to vector<64x128xf32>
    %c0_92 = arith.constant 0 : index
    %c0_93 = arith.constant 0 : index
    %c3 = arith.constant 3 : index
    %c0_94 = arith.constant 0 : index
    %67 = vector.load %arg14[%c0_92, %c0_93, %c3, %c0_94] : memref<1x10x12x128xf32, #tpu.memory_space<vmem>>, vector<1x8x8x128xf32>
    %68 = vector.shape_cast %67 : vector<1x8x8x128xf32> to vector<64x128xf32>
    %69 = tpu.concatenate %64, %66, %68 in 1 : vector<64x128xf32>, vector<64x128xf32>, vector<64x128xf32> -> vector<64x384xf32>
    %c0_95 = arith.constant 0 : index
    %c0_96 = arith.constant 0 : index
    %c0_97 = arith.constant 0 : index
    %70 = vector.load %arg8[%c0_95, %c0_96, %c0_97] : memref<3x384x128xf32, #tpu.memory_space<vmem>>, vector<1x384x128xf32>
    %71 = vector.shape_cast %70 : vector<1x384x128xf32> to vector<384x128xf32>
    %cst_98 = arith.constant dense<0.000000e+00> : vector<64x128xf32>
    %72 = tpu.matmul %69, %71, %cst_98 {dimension_numbers = #tpu.dot_dimension_numbers<[1], [0], [0], [1], [0, 0, 1, 1], [], []>} : vector<64x384xf32>, vector<384x128xf32>, vector<64x128xf32> -> vector<64x128xf32>
    %c0_99 = arith.constant 0 : index
    %c1_100 = arith.constant 1 : index
    %c1_101 = arith.constant 1 : index
    %c0_102 = arith.constant 0 : index
    %73 = vector.load %arg14[%c0_99, %c1_100, %c1_101, %c0_102] : memref<1x10x12x128xf32, #tpu.memory_space<vmem>>, vector<1x8x8x128xf32>
    %74 = vector.shape_cast %73 : vector<1x8x8x128xf32> to vector<64x128xf32>
    %c0_103 = arith.constant 0 : index
    %c1_104 = arith.constant 1 : index
    %c2_105 = arith.constant 2 : index
    %c0_106 = arith.constant 0 : index
    %75 = vector.load %arg14[%c0_103, %c1_104, %c2_105, %c0_106] : memref<1x10x12x128xf32, #tpu.memory_space<vmem>>, vector<1x8x8x128xf32>
    %76 = vector.shape_cast %75 : vector<1x8x8x128xf32> to vector<64x128xf32>
    %c0_107 = arith.constant 0 : index
    %c1_108 = arith.constant 1 : index
    %c3_109 = arith.constant 3 : index
    %c0_110 = arith.constant 0 : index
    %77 = vector.load %arg14[%c0_107, %c1_108, %c3_109, %c0_110] : memref<1x10x12x128xf32, #tpu.memory_space<vmem>>, vector<1x8x8x128xf32>
    %78 = vector.shape_cast %77 : vector<1x8x8x128xf32> to vector<64x128xf32>
    %79 = tpu.concatenate %74, %76, %78 in 1 : vector<64x128xf32>, vector<64x128xf32>, vector<64x128xf32> -> vector<64x384xf32>
    %c1_111 = arith.constant 1 : index
    %c0_112 = arith.constant 0 : index
    %c0_113 = arith.constant 0 : index
    %80 = vector.load %arg8[%c1_111, %c0_112, %c0_113] : memref<3x384x128xf32, #tpu.memory_space<vmem>>, vector<1x384x128xf32>
    %81 = vector.shape_cast %80 : vector<1x384x128xf32> to vector<384x128xf32>
    %cst_114 = arith.constant dense<0.000000e+00> : vector<64x128xf32>
    %82 = tpu.matmul %79, %81, %cst_114 {dimension_numbers = #tpu.dot_dimension_numbers<[1], [0], [0], [1], [0, 0, 1, 1], [], []>} : vector<64x384xf32>, vector<384x128xf32>, vector<64x128xf32> -> vector<64x128xf32>
    %83 = arith.addf %72, %82 : vector<64x128xf32>
    %c0_115 = arith.constant 0 : index
    %c2_116 = arith.constant 2 : index
    %c1_117 = arith.constant 1 : index
    %c0_118 = arith.constant 0 : index
    %84 = vector.load %arg14[%c0_115, %c2_116, %c1_117, %c0_118] : memref<1x10x12x128xf32, #tpu.memory_space<vmem>>, vector<1x8x8x128xf32>
    %85 = vector.shape_cast %84 : vector<1x8x8x128xf32> to vector<64x128xf32>
    %c0_119 = arith.constant 0 : index
    %c2_120 = arith.constant 2 : index
    %c2_121 = arith.constant 2 : index
    %c0_122 = arith.constant 0 : index
    %86 = vector.load %arg14[%c0_119, %c2_120, %c2_121, %c0_122] : memref<1x10x12x128xf32, #tpu.memory_space<vmem>>, vector<1x8x8x128xf32>
    %87 = vector.shape_cast %86 : vector<1x8x8x128xf32> to vector<64x128xf32>
    %c0_123 = arith.constant 0 : index
    %c2_124 = arith.constant 2 : index
    %c3_125 = arith.constant 3 : index
    %c0_126 = arith.constant 0 : index
    %88 = vector.load %arg14[%c0_123, %c2_124, %c3_125, %c0_126] : memref<1x10x12x128xf32, #tpu.memory_space<vmem>>, vector<1x8x8x128xf32>
    %89 = vector.shape_cast %88 : vector<1x8x8x128xf32> to vector<64x128xf32>
    %90 = tpu.concatenate %85, %87, %89 in 1 : vector<64x128xf32>, vector<64x128xf32>, vector<64x128xf32> -> vector<64x384xf32>
    %c2_127 = arith.constant 2 : index
    %c0_128 = arith.constant 0 : index
    %c0_129 = arith.constant 0 : index
    %91 = vector.load %arg8[%c2_127, %c0_128, %c0_129] : memref<3x384x128xf32, #tpu.memory_space<vmem>>, vector<1x384x128xf32>
    %92 = vector.shape_cast %91 : vector<1x384x128xf32> to vector<384x128xf32>
    %cst_130 = arith.constant dense<0.000000e+00> : vector<64x128xf32>
    %93 = tpu.matmul %90, %92, %cst_130 {dimension_numbers = #tpu.dot_dimension_numbers<[1], [0], [0], [1], [0, 0, 1, 1], [], []>} : vector<64x384xf32>, vector<384x128xf32>, vector<64x128xf32> -> vector<64x128xf32>
    %94 = arith.addf %83, %93 : vector<64x128xf32>
    %c0_131 = arith.constant 0 : index
    %c27_132 = arith.constant 27 : index
    %c0_133 = arith.constant 0 : index
    %c0_134 = arith.constant 0 : index
    %95 = vector.load %arg1[%c0_131, %c27_132, %c0_133, %c0_134] : memref<1x36x9x128xf32, #tpu.memory_space<vmem>>, vector<1x8x8x128xf32>
    %96 = vector.shape_cast %95 : vector<1x8x8x128xf32> to vector<64x128xf32>
    %c0_135 = arith.constant 0 : index
    %c0_136 = arith.constant 0 : index
    %97 = vector.load %arg9[%c0_135, %c0_136] : memref<1x128xf32, #tpu.memory_space<vmem>>, vector<1x128xf32>
    %98 = vector.broadcast %97 : vector<1x128xf32> to vector<64x128xf32>
    %99 = arith.mulf %96, %98 : vector<64x128xf32>
    %c0_137 = arith.constant 0 : index
    %c0_138 = arith.constant 0 : index
    %100 = vector.load %arg10[%c0_137, %c0_138] : memref<1x128xf32, #tpu.memory_space<vmem>>, vector<1x128xf32>
    %101 = vector.broadcast %100 : vector<1x128xf32> to vector<64x128xf32>
    %102 = arith.addf %99, %101 : vector<64x128xf32>
    %cst_139 = arith.constant 0.000000e+00 : f32
    %103 = vector.broadcast %cst_139 : f32 to vector<64x128xf32>
    %104 = arith.maximumf %102, %103 : vector<64x128xf32>
    %c0_140 = arith.constant 0 : index
    %c0_141 = arith.constant 0 : index
    %105 = vector.load %arg11[%c0_140, %c0_141] : memref<128x128xf32, #tpu.memory_space<vmem>>, vector<128x128xf32>
    %cst_142 = arith.constant dense<0.000000e+00> : vector<64x128xf32>
    %106 = tpu.matmul %104, %105, %cst_142 {dimension_numbers = #tpu.dot_dimension_numbers<[1], [0], [0], [1], [0, 0, 1, 1], [], []>} : vector<64x128xf32>, vector<128x128xf32>, vector<64x128xf32> -> vector<64x128xf32>
    %107 = arith.addf %94, %106 : vector<64x128xf32>
    %108 = vector.shape_cast %107 : vector<64x128xf32> to vector<1x8x8x128xf32>
    %c0_143 = arith.constant 0 : index
    %c0_144 = arith.constant 0 : index
    %c0_145 = arith.constant 0 : index
    %c0_146 = arith.constant 0 : index
    %109 = vector.load %arg12[%c0_143, %c0_144, %c0_145, %c0_146] : memref<1x8x8x128xf32, #tpu.memory_space<vmem>>, vector<1x8x8x128xf32>
    tpu.vector_store %arg12[%c0_143, %c0_144, %c0_145, %c0_146], %108 {strides = array<i32>} : memref<1x8x8x128xf32, #tpu.memory_space<vmem>>, vector<1x8x8x128xf32>,
    return
  }
  func.func @transform_0(%arg0: i32) -> (i32, i32, i32, i32) {
    %c0_i32 = arith.constant 0 : i32
    %c0_i32_0 = arith.constant 0 : i32
    %c0_i32_1 = arith.constant 0 : i32
    %c0_i32_2 = arith.constant 0 : i32
    return %arg0, %c0_i32, %c0_i32_0, %c0_i32_1 : i32, i32, i32, i32
  }
  func.func @transform_1(%arg0: i32) -> (i32, i32, i32, i32) {
    %c0_i32 = arith.constant 0 : i32
    %c0_i32_0 = arith.constant 0 : i32
    %c0_i32_1 = arith.constant 0 : i32
    %c0_i32_2 = arith.constant 0 : i32
    %c0_i32_3 = arith.constant 0 : i32
    return %c0_i32, %c0_i32_0, %c0_i32_1, %c0_i32_2 : i32, i32, i32, i32
  }
  func.func @transform_2(%arg0: i32) -> (i32, i32) {
    %c0_i32 = arith.constant 0 : i32
    %c0_i32_0 = arith.constant 0 : i32
    %c0_i32_1 = arith.constant 0 : i32
    return %c0_i32, %c0_i32_0 : i32, i32
  }
  func.func @transform_3(%arg0: i32) -> (i32, i32) {
    %c0_i32 = arith.constant 0 : i32
    %c0_i32_0 = arith.constant 0 : i32
    %c0_i32_1 = arith.constant 0 : i32
    return %c0_i32, %c0_i32_0 : i32, i32
  }
  func.func @transform_4(%arg0: i32) -> (i32, i32, i32) {
    %c0_i32 = arith.constant 0 : i32
    %c0_i32_0 = arith.constant 0 : i32
    %c0_i32_1 = arith.constant 0 : i32
    %c0_i32_2 = arith.constant 0 : i32
    return %c0_i32, %c0_i32_0, %c0_i32_1 : i32, i32, i32
  }
  func.func @transform_5(%arg0: i32) -> (i32, i32) {
    %c0_i32 = arith.constant 0 : i32
    %c0_i32_0 = arith.constant 0 : i32
    %c0_i32_1 = arith.constant 0 : i32
    return %c0_i32, %c0_i32_0 : i32, i32
  }
  func.func @transform_6(%arg0: i32) -> (i32, i32) {
    %c0_i32 = arith.constant 0 : i32
    %c0_i32_0 = arith.constant 0 : i32
    %c0_i32_1 = arith.constant 0 : i32
    return %c0_i32, %c0_i32_0 : i32, i32
  }
  func.func @transform_7(%arg0: i32) -> (i32, i32, i32) {
    %c0_i32 = arith.constant 0 : i32
    %c0_i32_0 = arith.constant 0 : i32
    %c0_i32_1 = arith.constant 0 : i32
    %c0_i32_2 = arith.constant 0 : i32
    return %c0_i32, %c0_i32_0, %c0_i32_1 : i32, i32, i32
  }
  func.func @transform_8(%arg0: i32) -> (i32, i32) {
    %c0_i32 = arith.constant 0 : i32
    %c0_i32_0 = arith.constant 0 : i32
    %c0_i32_1 = arith.constant 0 : i32
    return %c0_i32, %c0_i32_0 : i32, i32
  }
  func.func @transform_9(%arg0: i32) -> (i32, i32) {
    %c0_i32 = arith.constant 0 : i32
    %c0_i32_0 = arith.constant 0 : i32
    %c0_i32_1 = arith.constant 0 : i32
    return %c0_i32, %c0_i32_0 : i32, i32
  }
  func.func @transform_10(%arg0: i32) -> (i32, i32) {
    %c0_i32 = arith.constant 0 : i32
    %c0_i32_0 = arith.constant 0 : i32
    %c0_i32_1 = arith.constant 0 : i32
    return %c0_i32, %c0_i32_0 : i32, i32
  }
  func.func @transform_11(%arg0: i32) -> (i32, i32, i32, i32) {
    %c0_i32 = arith.constant 0 : i32
    %c0_i32_0 = arith.constant 0 : i32
    %c0_i32_1 = arith.constant 0 : i32
    %c0_i32_2 = arith.constant 0 : i32
    return %arg0, %c0_i32, %c0_i32_0, %c0_i32_1 : i32, i32, i32, i32
  }
}

module attributes {stable_mosaic.version = 11 : i64} {
  func.func @_wrn_block_kernel(%arg0: i32, %arg1: memref<1x36x9x128xf32, #tpu.memory_space<vmem>>, %arg2: memref<1x36x9x1xf32, #tpu.memory_space<vmem>>, %arg3: memref<1x128xf32, #tpu.memory_space<vmem>>, %arg4: memref<1x128xf32, #tpu.memory_space<vmem>>, %arg5: memref<3x384x128xf32, #tpu.memory_space<vmem>>, %arg6: memref<1x128xf32, #tpu.memory_space<vmem>>, %arg7: memref<1x128xf32, #tpu.memory_space<vmem>>, %arg8: memref<3x384x128xf32, #tpu.memory_space<vmem>>, %arg9: memref<1x128xf32, #tpu.memory_space<vmem>>, %arg10: memref<1x128xf32, #tpu.memory_space<vmem>>, %arg11: memref<128x128xf32, #tpu.memory_space<vmem>>, %arg12: memref<1x8x8x128xf32, #tpu.memory_space<vmem>>, %arg13: memref<1x36x9x128xf32, #tpu.memory_space<vmem>>, %arg14: memref<1x10x12x128xf32, #tpu.memory_space<vmem>>) attributes {dimension_semantics = [#tpu.dimension_semantics<parallel>], iteration_bounds = array<i64: 2>, scalar_prefetch = 0 : i64, scratch_operands = 2 : i64, tpu.core_type = #tpu.core_type<tc>, window_params = [{transform_indices = @transform_0, window_bounds = array<i64: 1, 36, 9, 128>}, {pipeline_mode = #tpu.pipeline_mode<synchronous>, transform_indices = @transform_1, window_bounds = array<i64: 1, 36, 9, 1>}, {pipeline_mode = #tpu.pipeline_mode<synchronous>, transform_indices = @transform_2, window_bounds = array<i64: 1, 128>}, {pipeline_mode = #tpu.pipeline_mode<synchronous>, transform_indices = @transform_3, window_bounds = array<i64: 1, 128>}, {pipeline_mode = #tpu.pipeline_mode<synchronous>, transform_indices = @transform_4, window_bounds = array<i64: 3, 384, 128>}, {pipeline_mode = #tpu.pipeline_mode<synchronous>, transform_indices = @transform_5, window_bounds = array<i64: 1, 128>}, {pipeline_mode = #tpu.pipeline_mode<synchronous>, transform_indices = @transform_6, window_bounds = array<i64: 1, 128>}, {pipeline_mode = #tpu.pipeline_mode<synchronous>, transform_indices = @transform_7, window_bounds = array<i64: 3, 384, 128>}, {pipeline_mode = #tpu.pipeline_mode<synchronous>, transform_indices = @transform_8, window_bounds = array<i64: 1, 128>}, {pipeline_mode = #tpu.pipeline_mode<synchronous>, transform_indices = @transform_9, window_bounds = array<i64: 1, 128>}, {pipeline_mode = #tpu.pipeline_mode<synchronous>, transform_indices = @transform_10, window_bounds = array<i64: 128, 128>}, {transform_indices = @transform_11, window_bounds = array<i64: 1, 8, 8, 128>}]} {
    %c0 = arith.constant 0 : index
    %c0_0 = arith.constant 0 : index
    %0 = vector.load %arg3[%c0, %c0_0] : memref<1x128xf32, #tpu.memory_space<vmem>>, vector<1x128xf32>
    %1 = vector.shape_cast %0 : vector<1x128xf32> to vector<1x1x1x128xf32>
    %c0_1 = arith.constant 0 : index
    %c0_2 = arith.constant 0 : index
    %2 = vector.load %arg4[%c0_1, %c0_2] : memref<1x128xf32, #tpu.memory_space<vmem>>, vector<1x128xf32>
    %3 = vector.shape_cast %2 : vector<1x128xf32> to vector<1x1x1x128xf32>
    %c0_3 = arith.constant 0 : index
    %c0_4 = arith.constant 0 : index
    %c0_5 = arith.constant 0 : index
    %c0_6 = arith.constant 0 : index
    %4 = vector.load %arg1[%c0_3, %c0_4, %c0_5, %c0_6] : memref<1x36x9x128xf32, #tpu.memory_space<vmem>>, vector<1x36x9x128xf32>
    %5 = vector.broadcast %1 : vector<1x1x1x128xf32> to vector<1x36x9x128xf32>
    %6 = arith.mulf %4, %5 : vector<1x36x9x128xf32>
    %7 = vector.broadcast %3 : vector<1x1x1x128xf32> to vector<1x36x9x128xf32>
    %8 = arith.addf %6, %7 : vector<1x36x9x128xf32>
    %cst = arith.constant 0.000000e+00 : f32
    %9 = vector.broadcast %cst : f32 to vector<1x36x9x128xf32>
    %10 = arith.maximumf %8, %9 : vector<1x36x9x128xf32>
    %c0_7 = arith.constant 0 : index
    %c0_8 = arith.constant 0 : index
    %c0_9 = arith.constant 0 : index
    %c0_10 = arith.constant 0 : index
    %11 = vector.load %arg2[%c0_7, %c0_8, %c0_9, %c0_10] : memref<1x36x9x1xf32, #tpu.memory_space<vmem>>, vector<1x36x9x1xf32>
    %12 = vector.broadcast %11 : vector<1x36x9x1xf32> to vector<1x36x9x128xf32>
    %13 = arith.mulf %10, %12 : vector<1x36x9x128xf32>
    %c0_11 = arith.constant 0 : index
    %c0_12 = arith.constant 0 : index
    %c0_13 = arith.constant 0 : index
    %c0_14 = arith.constant 0 : index
    %14 = vector.load %arg13[%c0_11, %c0_12, %c0_13, %c0_14] : memref<1x36x9x128xf32, #tpu.memory_space<vmem>>, vector<1x36x9x128xf32>
    tpu.vector_store %arg13[%c0_11, %c0_12, %c0_13, %c0_14], %13 {strides = array<i32>} : memref<1x36x9x128xf32, #tpu.memory_space<vmem>>, vector<1x36x9x128xf32>,
    %c0_15 = arith.constant 0 : index
    %c0_16 = arith.constant 0 : index
    %c0_17 = arith.constant 0 : index
    %c0_18 = arith.constant 0 : index
    %15 = vector.load %arg13[%c0_15, %c0_16, %c0_17, %c0_18] : memref<1x36x9x128xf32, #tpu.memory_space<vmem>>, vector<1x8x8x128xf32>
    %16 = vector.shape_cast %15 : vector<1x8x8x128xf32> to vector<64x128xf32>
    %c0_19 = arith.constant 0 : index
    %c9 = arith.constant 9 : index
    %c0_20 = arith.constant 0 : index
    %c0_21 = arith.constant 0 : index
    %17 = vector.load %arg13[%c0_19, %c9, %c0_20, %c0_21] : memref<1x36x9x128xf32, #tpu.memory_space<vmem>>, vector<1x8x8x128xf32>
    %18 = vector.shape_cast %17 : vector<1x8x8x128xf32> to vector<64x128xf32>
    %c0_22 = arith.constant 0 : index
    %c0_23 = arith.constant 0 : index
    %c1 = arith.constant 1 : index
    %c0_24 = arith.constant 0 : index
    %19 = vector.load %arg13[%c0_22, %c0_23, %c1, %c0_24] : memref<1x36x9x128xf32, #tpu.memory_space<vmem>>, vector<1x8x8x128xf32>
    %20 = vector.shape_cast %19 : vector<1x8x8x128xf32> to vector<64x128xf32>
    %21 = tpu.concatenate %16, %18, %20 in 1 : vector<64x128xf32>, vector<64x128xf32>, vector<64x128xf32> -> vector<64x384xf32>
    %c0_25 = arith.constant 0 : index
    %c0_26 = arith.constant 0 : index
    %c0_27 = arith.constant 0 : index
    %22 = vector.load %arg5[%c0_25, %c0_26, %c0_27] : memref<3x384x128xf32, #tpu.memory_space<vmem>>, vector<1x384x128xf32>
    %23 = vector.shape_cast %22 : vector<1x384x128xf32> to vector<384x128xf32>
    %cst_28 = arith.constant dense<0.000000e+00> : vector<64x128xf32>
    %24 = tpu.matmul %21, %23, %cst_28 {dimension_numbers = #tpu.dot_dimension_numbers<[1], [0], [0], [1], [0, 0, 1, 1], [], []>} : vector<64x384xf32>, vector<384x128xf32>, vector<64x128xf32> -> vector<64x128xf32>
    %c0_29 = arith.constant 0 : index
    %c18 = arith.constant 18 : index
    %c0_30 = arith.constant 0 : index
    %c0_31 = arith.constant 0 : index
    %25 = vector.load %arg13[%c0_29, %c18, %c0_30, %c0_31] : memref<1x36x9x128xf32, #tpu.memory_space<vmem>>, vector<1x8x8x128xf32>
    %26 = vector.shape_cast %25 : vector<1x8x8x128xf32> to vector<64x128xf32>
    %c0_32 = arith.constant 0 : index
    %c27 = arith.constant 27 : index
    %c0_33 = arith.constant 0 : index
    %c0_34 = arith.constant 0 : index
    %27 = vector.load %arg13[%c0_32, %c27, %c0_33, %c0_34] : memref<1x36x9x128xf32, #tpu.memory_space<vmem>>, vector<1x8x8x128xf32>
    %28 = vector.shape_cast %27 : vector<1x8x8x128xf32> to vector<64x128xf32>
    %c0_35 = arith.constant 0 : index
    %c18_36 = arith.constant 18 : index
    %c1_37 = arith.constant 1 : index
    %c0_38 = arith.constant 0 : index
    %29 = vector.load %arg13[%c0_35, %c18_36, %c1_37, %c0_38] : memref<1x36x9x128xf32, #tpu.memory_space<vmem>>, vector<1x8x8x128xf32>
    %30 = vector.shape_cast %29 : vector<1x8x8x128xf32> to vector<64x128xf32>
    %31 = tpu.concatenate %26, %28, %30 in 1 : vector<64x128xf32>, vector<64x128xf32>, vector<64x128xf32> -> vector<64x384xf32>
    %c1_39 = arith.constant 1 : index
    %c0_40 = arith.constant 0 : index
    %c0_41 = arith.constant 0 : index
    %32 = vector.load %arg5[%c1_39, %c0_40, %c0_41] : memref<3x384x128xf32, #tpu.memory_space<vmem>>, vector<1x384x128xf32>
    %33 = vector.shape_cast %32 : vector<1x384x128xf32> to vector<384x128xf32>
    %cst_42 = arith.constant dense<0.000000e+00> : vector<64x128xf32>
    %34 = tpu.matmul %31, %33, %cst_42 {dimension_numbers = #tpu.dot_dimension_numbers<[1], [0], [0], [1], [0, 0, 1, 1], [], []>} : vector<64x384xf32>, vector<384x128xf32>, vector<64x128xf32> -> vector<64x128xf32>
    %35 = arith.addf %24, %34 : vector<64x128xf32>
    %c0_43 = arith.constant 0 : index
    %c1_44 = arith.constant 1 : index
    %c0_45 = arith.constant 0 : index
    %c0_46 = arith.constant 0 : index
    %36 = vector.load %arg13[%c0_43, %c1_44, %c0_45, %c0_46] : memref<1x36x9x128xf32, #tpu.memory_space<vmem>>, vector<1x8x8x128xf32>
    %37 = vector.shape_cast %36 : vector<1x8x8x128xf32> to vector<64x128xf32>
    %c0_47 = arith.constant 0 : index
    %c10 = arith.constant 10 : index
    %c0_48 = arith.constant 0 : index
    %c0_49 = arith.constant 0 : index
    %38 = vector.load %arg13[%c0_47, %c10, %c0_48, %c0_49] : memref<1x36x9x128xf32, #tpu.memory_space<vmem>>, vector<1x8x8x128xf32>
    %39 = vector.shape_cast %38 : vector<1x8x8x128xf32> to vector<64x128xf32>
    %c0_50 = arith.constant 0 : index
    %c1_51 = arith.constant 1 : index
    %c1_52 = arith.constant 1 : index
    %c0_53 = arith.constant 0 : index
    %40 = vector.load %arg13[%c0_50, %c1_51, %c1_52, %c0_53] : memref<1x36x9x128xf32, #tpu.memory_space<vmem>>, vector<1x8x8x128xf32>
    %41 = vector.shape_cast %40 : vector<1x8x8x128xf32> to vector<64x128xf32>
    %42 = tpu.concatenate %37, %39, %41 in 1 : vector<64x128xf32>, vector<64x128xf32>, vector<64x128xf32> -> vector<64x384xf32>
    %c2 = arith.constant 2 : index
    %c0_54 = arith.constant 0 : index
    %c0_55 = arith.constant 0 : index
    %43 = vector.load %arg5[%c2, %c0_54, %c0_55] : memref<3x384x128xf32, #tpu.memory_space<vmem>>, vector<1x384x128xf32>
    %44 = vector.shape_cast %43 : vector<1x384x128xf32> to vector<384x128xf32>
    %cst_56 = arith.constant dense<0.000000e+00> : vector<64x128xf32>
    %45 = tpu.matmul %42, %44, %cst_56 {dimension_numbers = #tpu.dot_dimension_numbers<[1], [0], [0], [1], [0, 0, 1, 1], [], []>} : vector<64x384xf32>, vector<384x128xf32>, vector<64x128xf32> -> vector<64x128xf32>
    %46 = arith.addf %35, %45 : vector<64x128xf32>
    %cst_57 = arith.constant 0.000000e+00 : f32
    %47 = vector.broadcast %cst_57 : f32 to vector<1x1x12x128xf32>
    %cst_58 = arith.constant 0.000000e+00 : f32
    %48 = vector.broadcast %cst_58 : f32 to vector<1x10x2x128xf32>
    %c0_59 = arith.constant 0 : index
    %c0_60 = arith.constant 0 : index
    %c0_61 = arith.constant 0 : index
    %c0_62 = arith.constant 0 : index
    %49 = vector.load %arg14[%c0_59, %c0_60, %c0_61, %c0_62] : memref<1x10x12x128xf32, #tpu.memory_space<vmem>>, vector<1x1x12x128xf32>
    tpu.vector_store %arg14[%c0_59, %c0_60, %c0_61, %c0_62], %47 {strides = array<i32>} : memref<1x10x12x128xf32, #tpu.memory_space<vmem>>, vector<1x1x12x128xf32>,
    %c0_63 = arith.constant 0 : index
    %c9_64 = arith.constant 9 : index
    %c0_65 = arith.constant 0 : index
    %c0_66 = arith.constant 0 : index
    %50 = vector.load %arg14[%c0_63, %c9_64, %c0_65, %c0_66] : memref<1x10x12x128xf32, #tpu.memory_space<vmem>>, vector<1x1x12x128xf32>
    tpu.vector_store %arg14[%c0_63, %c9_64, %c0_65, %c0_66], %47 {strides = array<i32>} : memref<1x10x12x128xf32, #tpu.memory_space<vmem>>, vector<1x1x12x128xf32>,
    %c0_67 = arith.constant 0 : index
    %c0_68 = arith.constant 0 : index
    %c0_69 = arith.constant 0 : index
    %c0_70 = arith.constant 0 : index
    %51 = vector.load %arg14[%c0_67, %c0_68, %c0_69, %c0_70] : memref<1x10x12x128xf32, #tpu.memory_space<vmem>>, vector<1x10x2x128xf32>
    tpu.vector_store %arg14[%c0_67, %c0_68, %c0_69, %c0_70], %48 {strides = array<i32>} : memref<1x10x12x128xf32, #tpu.memory_space<vmem>>, vector<1x10x2x128xf32>,
    %c0_71 = arith.constant 0 : index
    %c0_72 = arith.constant 0 : index
    %c10_73 = arith.constant 10 : index
    %c0_74 = arith.constant 0 : index
    %52 = vector.load %arg14[%c0_71, %c0_72, %c10_73, %c0_74] : memref<1x10x12x128xf32, #tpu.memory_space<vmem>>, vector<1x10x2x128xf32>
    tpu.vector_store %arg14[%c0_71, %c0_72, %c10_73, %c0_74], %48 {strides = array<i32>} : memref<1x10x12x128xf32, #tpu.memory_space<vmem>>, vector<1x10x2x128xf32>,
    %c0_75 = arith.constant 0 : index
    %c0_76 = arith.constant 0 : index
    %53 = vector.load %arg6[%c0_75, %c0_76] : memref<1x128xf32, #tpu.memory_space<vmem>>, vector<1x128xf32>
    %54 = vector.broadcast %53 : vector<1x128xf32> to vector<64x128xf32>
    %55 = arith.mulf %46, %54 : vector<64x128xf32>
    %c0_77 = arith.constant 0 : index
    %c0_78 = arith.constant 0 : index
    %56 = vector.load %arg7[%c0_77, %c0_78] : memref<1x128xf32, #tpu.memory_space<vmem>>, vector<1x128xf32>
    %57 = vector.broadcast %56 : vector<1x128xf32> to vector<64x128xf32>
    %58 = arith.addf %55, %57 : vector<64x128xf32>
    %cst_79 = arith.constant 0.000000e+00 : f32
    %59 = vector.broadcast %cst_79 : f32 to vector<64x128xf32>
    %60 = arith.maximumf %58, %59 : vector<64x128xf32>
    %61 = vector.shape_cast %60 : vector<64x128xf32> to vector<1x8x8x128xf32>
    %c0_80 = arith.constant 0 : index
    %c1_81 = arith.constant 1 : index
    %c2_82 = arith.constant 2 : index
    %c0_83 = arith.constant 0 : index
    %62 = vector.load %arg14[%c0_80, %c1_81, %c2_82, %c0_83] : memref<1x10x12x128xf32, #tpu.memory_space<vmem>>, vector<1x8x8x128xf32>
    tpu.vector_store %arg14[%c0_80, %c1_81, %c2_82, %c0_83], %61 {strides = array<i32>} : memref<1x10x12x128xf32, #tpu.memory_space<vmem>>, vector<1x8x8x128xf32>,
    %c0_84 = arith.constant 0 : index
    %c0_85 = arith.constant 0 : index
    %c1_86 = arith.constant 1 : index
    %c0_87 = arith.constant 0 : index
    %63 = vector.load %arg14[%c0_84, %c0_85, %c1_86, %c0_87] : memref<1x10x12x128xf32, #tpu.memory_space<vmem>>, vector<1x8x8x128xf32>
    %64 = vector.shape_cast %63 : vector<1x8x8x128xf32> to vector<64x128xf32>
    %c0_88 = arith.constant 0 : index
    %c0_89 = arith.constant 0 : index
    %c2_90 = arith.constant 2 : index
    %c0_91 = arith.constant 0 : index
    %65 = vector.load %arg14[%c0_88, %c0_89, %c2_90, %c0_91] : memref<1x10x12x128xf32, #tpu.memory_space<vmem>>, vector<1x8x8x128xf32>
    %66 = vector.shape_cast %65 : vector<1x8x8x128xf32> to vector<64x128xf32>
    %c0_92 = arith.constant 0 : index
    %c0_93 = arith.constant 0 : index
    %c3 = arith.constant 3 : index
    %c0_94 = arith.constant 0 : index
    %67 = vector.load %arg14[%c0_92, %c0_93, %c3, %c0_94] : memref<1x10x12x128xf32, #tpu.memory_space<vmem>>, vector<1x8x8x128xf32>
    %68 = vector.shape_cast %67 : vector<1x8x8x128xf32> to vector<64x128xf32>
    %69 = tpu.concatenate %64, %66, %68 in 1 : vector<64x128xf32>, vector<64x128xf32>, vector<64x128xf32> -> vector<64x384xf32>
    %c0_95 = arith.constant 0 : index
    %c0_96 = arith.constant 0 : index
    %c0_97 = arith.constant 0 : index
    %70 = vector.load %arg8[%c0_95, %c0_96, %c0_97] : memref<3x384x128xf32, #tpu.memory_space<vmem>>, vector<1x384x128xf32>
    %71 = vector.shape_cast %70 : vector<1x384x128xf32> to vector<384x128xf32>
    %cst_98 = arith.constant dense<0.000000e+00> : vector<64x128xf32>
    %72 = tpu.matmul %69, %71, %cst_98 {dimension_numbers = #tpu.dot_dimension_numbers<[1], [0], [0], [1], [0, 0, 1, 1], [], []>} : vector<64x384xf32>, vector<384x128xf32>, vector<64x128xf32> -> vector<64x128xf32>
    %c0_99 = arith.constant 0 : index
    %c1_100 = arith.constant 1 : index
    %c1_101 = arith.constant 1 : index
    %c0_102 = arith.constant 0 : index
    %73 = vector.load %arg14[%c0_99, %c1_100, %c1_101, %c0_102] : memref<1x10x12x128xf32, #tpu.memory_space<vmem>>, vector<1x8x8x128xf32>
    %74 = vector.shape_cast %73 : vector<1x8x8x128xf32> to vector<64x128xf32>
    %c0_103 = arith.constant 0 : index
    %c1_104 = arith.constant 1 : index
    %c2_105 = arith.constant 2 : index
    %c0_106 = arith.constant 0 : index
    %75 = vector.load %arg14[%c0_103, %c1_104, %c2_105, %c0_106] : memref<1x10x12x128xf32, #tpu.memory_space<vmem>>, vector<1x8x8x128xf32>
    %76 = vector.shape_cast %75 : vector<1x8x8x128xf32> to vector<64x128xf32>
    %c0_107 = arith.constant 0 : index
    %c1_108 = arith.constant 1 : index
    %c3_109 = arith.constant 3 : index
    %c0_110 = arith.constant 0 : index
    %77 = vector.load %arg14[%c0_107, %c1_108, %c3_109, %c0_110] : memref<1x10x12x128xf32, #tpu.memory_space<vmem>>, vector<1x8x8x128xf32>
    %78 = vector.shape_cast %77 : vector<1x8x8x128xf32> to vector<64x128xf32>
    %79 = tpu.concatenate %74, %76, %78 in 1 : vector<64x128xf32>, vector<64x128xf32>, vector<64x128xf32> -> vector<64x384xf32>
    %c1_111 = arith.constant 1 : index
    %c0_112 = arith.constant 0 : index
    %c0_113 = arith.constant 0 : index
    %80 = vector.load %arg8[%c1_111, %c0_112, %c0_113] : memref<3x384x128xf32, #tpu.memory_space<vmem>>, vector<1x384x128xf32>
    %81 = vector.shape_cast %80 : vector<1x384x128xf32> to vector<384x128xf32>
    %cst_114 = arith.constant dense<0.000000e+00> : vector<64x128xf32>
    %82 = tpu.matmul %79, %81, %cst_114 {dimension_numbers = #tpu.dot_dimension_numbers<[1], [0], [0], [1], [0, 0, 1, 1], [], []>} : vector<64x384xf32>, vector<384x128xf32>, vector<64x128xf32> -> vector<64x128xf32>
    %83 = arith.addf %72, %82 : vector<64x128xf32>
    %c0_115 = arith.constant 0 : index
    %c2_116 = arith.constant 2 : index
    %c1_117 = arith.constant 1 : index
    %c0_118 = arith.constant 0 : index
    %84 = vector.load %arg14[%c0_115, %c2_116, %c1_117, %c0_118] : memref<1x10x12x128xf32, #tpu.memory_space<vmem>>, vector<1x8x8x128xf32>
    %85 = vector.shape_cast %84 : vector<1x8x8x128xf32> to vector<64x128xf32>
    %c0_119 = arith.constant 0 : index
    %c2_120 = arith.constant 2 : index
    %c2_121 = arith.constant 2 : index
    %c0_122 = arith.constant 0 : index
    %86 = vector.load %arg14[%c0_119, %c2_120, %c2_121, %c0_122] : memref<1x10x12x128xf32, #tpu.memory_space<vmem>>, vector<1x8x8x128xf32>
    %87 = vector.shape_cast %86 : vector<1x8x8x128xf32> to vector<64x128xf32>
    %c0_123 = arith.constant 0 : index
    %c2_124 = arith.constant 2 : index
    %c3_125 = arith.constant 3 : index
    %c0_126 = arith.constant 0 : index
    %88 = vector.load %arg14[%c0_123, %c2_124, %c3_125, %c0_126] : memref<1x10x12x128xf32, #tpu.memory_space<vmem>>, vector<1x8x8x128xf32>
    %89 = vector.shape_cast %88 : vector<1x8x8x128xf32> to vector<64x128xf32>
    %90 = tpu.concatenate %85, %87, %89 in 1 : vector<64x128xf32>, vector<64x128xf32>, vector<64x128xf32> -> vector<64x384xf32>
    %c2_127 = arith.constant 2 : index
    %c0_128 = arith.constant 0 : index
    %c0_129 = arith.constant 0 : index
    %91 = vector.load %arg8[%c2_127, %c0_128, %c0_129] : memref<3x384x128xf32, #tpu.memory_space<vmem>>, vector<1x384x128xf32>
    %92 = vector.shape_cast %91 : vector<1x384x128xf32> to vector<384x128xf32>
    %cst_130 = arith.constant dense<0.000000e+00> : vector<64x128xf32>
    %93 = tpu.matmul %90, %92, %cst_130 {dimension_numbers = #tpu.dot_dimension_numbers<[1], [0], [0], [1], [0, 0, 1, 1], [], []>} : vector<64x384xf32>, vector<384x128xf32>, vector<64x128xf32> -> vector<64x128xf32>
    %94 = arith.addf %83, %93 : vector<64x128xf32>
    %c0_131 = arith.constant 0 : index
    %c27_132 = arith.constant 27 : index
    %c0_133 = arith.constant 0 : index
    %c0_134 = arith.constant 0 : index
    %95 = vector.load %arg1[%c0_131, %c27_132, %c0_133, %c0_134] : memref<1x36x9x128xf32, #tpu.memory_space<vmem>>, vector<1x8x8x128xf32>
    %96 = vector.shape_cast %95 : vector<1x8x8x128xf32> to vector<64x128xf32>
    %c0_135 = arith.constant 0 : index
    %c0_136 = arith.constant 0 : index
    %97 = vector.load %arg9[%c0_135, %c0_136] : memref<1x128xf32, #tpu.memory_space<vmem>>, vector<1x128xf32>
    %98 = vector.broadcast %97 : vector<1x128xf32> to vector<64x128xf32>
    %99 = arith.mulf %96, %98 : vector<64x128xf32>
    %c0_137 = arith.constant 0 : index
    %c0_138 = arith.constant 0 : index
    %100 = vector.load %arg10[%c0_137, %c0_138] : memref<1x128xf32, #tpu.memory_space<vmem>>, vector<1x128xf32>
    %101 = vector.broadcast %100 : vector<1x128xf32> to vector<64x128xf32>
    %102 = arith.addf %99, %101 : vector<64x128xf32>
    %cst_139 = arith.constant 0.000000e+00 : f32
    %103 = vector.broadcast %cst_139 : f32 to vector<64x128xf32>
    %104 = arith.maximumf %102, %103 : vector<64x128xf32>
    %c0_140 = arith.constant 0 : index
    %c0_141 = arith.constant 0 : index
    %105 = vector.load %arg11[%c0_140, %c0_141] : memref<128x128xf32, #tpu.memory_space<vmem>>, vector<128x128xf32>
    %cst_142 = arith.constant dense<0.000000e+00> : vector<64x128xf32>
    %106 = tpu.matmul %104, %105, %cst_142 {dimension_numbers = #tpu.dot_dimension_numbers<[1], [0], [0], [1], [0, 0, 1, 1], [], []>} : vector<64x128xf32>, vector<128x128xf32>, vector<64x128xf32> -> vector<64x128xf32>
    %107 = arith.addf %94, %106 : vector<64x128xf32>
    %108 = vector.shape_cast %107 : vector<64x128xf32> to vector<1x8x8x128xf32>
    %c0_143 = arith.constant 0 : index
    %c0_144 = arith.constant 0 : index
    %c0_145 = arith.constant 0 : index
    %c0_146 = arith.constant 0 : index
    %109 = vector.load %arg12[%c0_143, %c0_144, %c0_145, %c0_146] : memref<1x8x8x128xf32, #tpu.memory_space<vmem>>, vector<1x8x8x128xf32>
    tpu.vector_store %arg12[%c0_143, %c0_144, %c0_145, %c0_146], %108 {strides = array<i32>} : memref<1x8x8x128xf32, #tpu.memory_space<vmem>>, vector<1x8x8x128xf32>,
    return
  }
  func.func @transform_0(%arg0: i32) -> (i32, i32, i32, i32) {
    %c0_i32 = arith.constant 0 : i32
    %c0_i32_0 = arith.constant 0 : i32
    %c0_i32_1 = arith.constant 0 : i32
    %c0_i32_2 = arith.constant 0 : i32
    return %arg0, %c0_i32, %c0_i32_0, %c0_i32_1 : i32, i32, i32, i32
  }
  func.func @transform_1(%arg0: i32) -> (i32, i32, i32, i32) {
    %c0_i32 = arith.constant 0 : i32
    %c0_i32_0 = arith.constant 0 : i32
    %c0_i32_1 = arith.constant 0 : i32
    %c0_i32_2 = arith.constant 0 : i32
    %c0_i32_3 = arith.constant 0 : i32
    return %c0_i32, %c0_i32_0, %c0_i32_1, %c0_i32_2 : i32, i32, i32, i32
  }
  func.func @transform_2(%arg0: i32) -> (i32, i32) {
    %c0_i32 = arith.constant 0 : i32
    %c0_i32_0 = arith.constant 0 : i32
    %c0_i32_1 = arith.constant 0 : i32
    return %c0_i32, %c0_i32_0 : i32, i32
  }
  func.func @transform_3(%arg0: i32) -> (i32, i32) {
    %c0_i32 = arith.constant 0 : i32
    %c0_i32_0 = arith.constant 0 : i32
    %c0_i32_1 = arith.constant 0 : i32
    return %c0_i32, %c0_i32_0 : i32, i32
  }
  func.func @transform_4(%arg0: i32) -> (i32, i32, i32) {
    %c0_i32 = arith.constant 0 : i32
    %c0_i32_0 = arith.constant 0 : i32
    %c0_i32_1 = arith.constant 0 : i32
    %c0_i32_2 = arith.constant 0 : i32
    return %c0_i32, %c0_i32_0, %c0_i32_1 : i32, i32, i32
  }
  func.func @transform_5(%arg0: i32) -> (i32, i32) {
    %c0_i32 = arith.constant 0 : i32
    %c0_i32_0 = arith.constant 0 : i32
    %c0_i32_1 = arith.constant 0 : i32
    return %c0_i32, %c0_i32_0 : i32, i32
  }
  func.func @transform_6(%arg0: i32) -> (i32, i32) {
    %c0_i32 = arith.constant 0 : i32
    %c0_i32_0 = arith.constant 0 : i32
    %c0_i32_1 = arith.constant 0 : i32
    return %c0_i32, %c0_i32_0 : i32, i32
  }
  func.func @transform_7(%arg0: i32) -> (i32, i32, i32) {
    %c0_i32 = arith.constant 0 : i32
    %c0_i32_0 = arith.constant 0 : i32
    %c0_i32_1 = arith.constant 0 : i32
    %c0_i32_2 = arith.constant 0 : i32
    return %c0_i32, %c0_i32_0, %c0_i32_1 : i32, i32, i32
  }
  func.func @transform_8(%arg0: i32) -> (i32, i32) {
    %c0_i32 = arith.constant 0 : i32
    %c0_i32_0 = arith.constant 0 : i32
    %c0_i32_1 = arith.constant 0 : i32
    return %c0_i32, %c0_i32_0 : i32, i32
  }
  func.func @transform_9(%arg0: i32) -> (i32, i32) {
    %c0_i32 = arith.constant 0 : i32
    %c0_i32_0 = arith.constant 0 : i32
    %c0_i32_1 = arith.constant 0 : i32
    return %c0_i32, %c0_i32_0 : i32, i32
  }
  func.func @transform_10(%arg0: i32) -> (i32, i32) {
    %c0_i32 = arith.constant 0 : i32
    %c0_i32_0 = arith.constant 0 : i32
    %c0_i32_1 = arith.constant 0 : i32
    return %c0_i32, %c0_i32_0 : i32, i32
  }
  func.func @transform_11(%arg0: i32) -> (i32, i32, i32, i32) {
    %c0_i32 = arith.constant 0 : i32
    %c0_i32_0 = arith.constant 0 : i32
    %c0_i32_1 = arith.constant 0 : i32
    %c0_i32_2 = arith.constant 0 : i32
    return %arg0, %c0_i32, %c0_i32_0, %c0_i32_1 : i32, i32, i32, i32
  }
}

</mosaic_0001>

<bundles_post_ra>
// kernel: tpu_custom_call.1
= control target key start
LH: loop header
LB: loop body
LE: loop exit
PB: predicated region body
PF: predicated region fallthrough
CT: control target
= control target key end

     0   :  { %s6366_s0 = inlined_call_operand.vmem [shape: f32[2,36,9,128], index: 0, kind: input, shape index: {}]   ;;  %s6367_s1 = inlined_call_operand.vmem [shape: f32[1,36,9,1], index: 1, kind: input, shape index: {}]   ;;  %s6368_s2 = inlined_call_operand.vmem [shape: f32[1,128], index: 2, kind: input, shape index: {}]   ;;  %s6369_s3 = inlined_call_operand.vmem [shape: f32[1,128], index: 3, kind: input, shape index: {}]   ;;  %s6370_s4 = inlined_call_operand.vmem [shape: f32[3,384,128], index: 4, kind: input, shape index: {}]   ;;  %s6371_s5 = inlined_call_operand.vmem [shape: f32[1,128], index: 5, kind: input, shape index: {}]   ;;  %s6372_s6 = inlined_call_operand.vmem [shape: f32[1,128], index: 6, kind: input, shape index: {}]   ;;  %s6373_s7 = inlined_call_operand.vmem [shape: f32[3,384,128], index: 7, kind: input, shape index: {}]   ;;  %s6374_s8 = inlined_call_operand.vmem [shape: f32[1,128], index: 8, kind: input, shape index: {}]   ;;  %s6375_s9 = inlined_call_operand.vmem [shape: f32[1,128], index: 9, kind: input, shape index: {}]   ;;  %s6376_s10 = inlined_call_operand.hbm [shape: f32[128,128], index: 10, kind: input, shape index: {}]   ;;  %s6377_s11 = inlined_call_operand.hbm [shape: f32[2,8,8,128], index: 11, kind: output, shape index: {}]  }
   0x1   :  { %6379 = sst [smem:[#allocation20_spill]] %s6376_s10 }
   0x2   :  { %16 = vsyncpa [#allocation5], 0 }
   0x3   :  { %17 = vsyncpa [#allocation6], 0 }
   0x4   :  { %19 = vsyncpa [#allocation6 + $0x1], 0  ;;  %s4625_s17 = smov 0   ;;  %s4627_s18 = smov 0  }
   0x5   :  { %s4629_s19 = smov 0   ;;  %s4631_s20 = smov 0  }
   0x6 LB: > { %s4646_s21 = sadd.s32 4294967295, %s4555_s20   ;;  %s3340_s22 = sadd.s32 4294967294, %s4555_s20   ;;  %s4555_s20 = sphi %s4631_s20, %s6412_s20   ;;  %s4551_s19 = sphi %s4629_s19, %s6411_s19   ;;  %s4547_s18 = sphi %s4627_s18, %s6410_s18   ;;  %s4543_s17 = sphi %s4625_s17, %s6409_s17  }
   0x7   : > { %s4650_s23 = sadd.s32 1, %s4555_s20   ;;  %s268_s24 = sadd.s32 1, %s4551_s19 }
   0x8   : > { %s265_s25 = ssub.s32 %s4555_s20, %s4650_s23  ;;  %p278_p0 = scmp.ne.s32.totalorder %s4551_s19, %s4547_s18 }
   0x9   : > { %p266_p1 = scmp.eq.s32.totalorder %s265_s25, 0  ;;  %p279_p2 = scmp.eq.s32.totalorder %s4646_s21, 1 }
   0xa   : > { %p284_p3 = scmp.ne.s32.totalorder %s4547_s18, %s4543_s17  ;;  %p285_p4 = scmp.eq.s32.totalorder %s3340_s22, 1 }
   0xb   : > { %s4661_s26 = scalar_select %p266_p1, %s4551_s19, %s268_s24  }
   0xc   : > { %p4663_p5 = por %p279_p2, %p278_p0  ;;  %p4667_p6 = por %p285_p4, %p284_p3 }
   0xd   : > { %6380 = sst [smem:[#allocation10_spill]] %s4661_s26  ;;  %p3341_p7 = scmp.ge.s32.totalorder %s4555_s20, 1 }
   0xe   : > { %s6382_s28 = scalar_select %p4667_p6, 1, 0 }
   0xf   : > { %p292_p8 = scmp.lt.s32.totalorder %s4555_s20, 3  ;;  %p4419_p9 = scmp.eq.s32.totalorder %s4646_s21, 0 }
  0x10   : > { %s4557_s30 = smov [#allocation4]  }
  0x11   : > { %p4674_p10 = pnand %p3341_p7, %p292_p8  ;;  %s331_s12 = sshll.u32 %s4557_s30, 4  ;;  %s332_s12 = int_to_ptr.vmem [resolvable:$true] %s331_s12 }
  0x12   : > { %s4476_s13 = scalar_lea.vmem %s332_s12, 2048  ;;  %p4484_p3 = scmp.lt.s32.totalorder %s332_s12, %s332_s12 }
  0x13   : > { %p4411_p11 = pneg %p4674_p10  ;;  %p4477_p0 = scmp.ne.s32.totalorder %s332_s12, %s4476_s13 }
  0x14   : > { %p4485_p4 = scmp.lt.s32.totalorder %s4476_s13, %s4476_s13 }
  0x15   : > { %p4412_p12 = pnand %p4419_p9, %p4411_p11 }
  0x16   : > { %p4486_p6 = por %p4485_p4, %p4484_p3 }
  0x17   : > { %p4467_p13 = pneg %p4412_p12 }
  0x19   : > { %p4479_p1 = pnand %p4477_p0, %p4467_p13 }
  0x1b   : > { %p4480_p2 = pneg %p4479_p1 }
  0x1d   : > { %p4487_p7 = pnand %p4486_p6, %p4480_p2 }
  0x1f   : > { %4490 = shalt.err (!%p4487_p7)
}
  0x20   : > { %s4558_s14 = smov 128   ;;  %s4559_s15 = smov 8  }
  0x21   : > { %s6384_s10 = sld [smem:[#allocation20_spill]] }
  0x23   : > { %355 = sbr.rel (%p4674_p10) target bundleno = 834 (0x342), region = 64 }
  0x27   : > { %4414 = dma.hbm_to_vmem [thread:$0]  (!%p4412_p12), %s6384_s10, 2048, %s332_s12, [#allocation5], %s4558_s14, %s4558_s14, %s4559_s15  }
  0x28   : > { %4534 = dma.done.wait (%p4419_p9), [#allocation5], 2048  }
  0x29   : > { %4536 = vsyncadd (%p4419_p9), [#allocation5], 4294965248  ;;  %v4560_v0 = vmov 0   ;;  %v758_v1 = vld [vmem:[%s6367_s1 + $0x1c0] sm:$0xff]  ;;  %v756_v2 = vld [vmem:[%s6367_s1 + $0x1b0] sm:$0xff]  ;;  %p395_p6 = scmp.lt.s32.totalorder %s4646_s21, 1 }
  0x2a   : > { %4462 = vset.pattern.permute.xlu1 %v4560_v0  ;;  %4461 = vset.pattern.permute.xlu0 %v4560_v0  ;;  %v739_v3 = vld [vmem:[%s6367_s1 + $0x128] sm:$0x1]  ;;  %v738_v4 = vld [vmem:[%s6367_s1 + $0x120] sm:$0xff]  ;;  %v741_v5 = vld [vmem:[%s6367_s1 + $0x138] sm:$0x1]  ;;  %s3559_s13 = sshll.u32 %s4646_s21, 10 }
  0x2b   : > { %1056 = vperm.xlu1 %4462, %v758_v1   ;;  %1046 = vperm.xlu0 %4461, %v756_v2   ;;  %v740_v6 = vld [vmem:[%s6367_s1 + $0x130] sm:$0xff]  ;;  %v742_v7 = vld [vmem:[%s6367_s1 + $0x140] sm:$0xff]  ;;  %v3381_v13 = vld [vmem:[%s6370_s4 + $0x278] sm:$0xff]  ;;  %s396_s29 = scalar_select %p395_p6, %s4646_s21, 1 }
  0x2c   : > { %v760_v8 = vld [vmem:[%s6367_s1 + $0x1d0] sm:$0xff]  ;;  %v762_v10 = vld [vmem:[%s6367_s1 + $0x1e0] sm:$0xff]  ;;  %v3365_v14 = vld [vmem:[%s6370_s4 + $0x1f8] sm:$0xff]  ;;  %3560 = vmatprep.subr.mxu0 %v3381_v13  ;;  %s6322_s14 = scalar_lea.hbm %s6377_s11, %s3559_s13  ;;  %s4562_s24 = smov [#allocation7]  }
  0x2d   : > { %v744_v9 = vld [vmem:[%s6367_s1 + $0x150] sm:$0xff]  ;;  %v746_v11 = vld [vmem:[%s6367_s1 + $0x160] sm:$0xff]  ;;  %3561 = vmatpush3.msra.mxu0 %v3365_v14  ;;  %v3397_v17 = vld [vmem:[%s6370_s4 + $0x2f8] sm:$0xff]  ;;  %s4404_s22 = smul.u32 576, %s396_s29  ;;  %s4495_s25 = sshll.u32 %s4562_s24, 4  ;;  %s4496_s25 = int_to_ptr.vmem [resolvable:$false] %s4495_s25 }
  0x2e   : > { %v764_v12 = vld [vmem:[%s6367_s1 + $0x1f0] sm:$0xff]  ;;  %v3379_v18 = vld [vmem:[%s6370_s4 + $0x268] sm:$0xff]  ;;  %v766_v21 = vld [vmem:[%s6367_s1 + $0x200] sm:$0xff]  ;;  %4064 = vmatprep.subr.mxu1 %v3397_v17  ;;  %s4497_s10 = scalar_lea.vmem %s4496_s25, 2048 }
  0x2f   : > { %961 = vperm.xlu1 %4462, %v739_v3   ;;  %956 = vperm.xlu0 %4461, %v738_v4   ;;  %v3380_v15 = vld [vmem:[%s6370_s4 + $0x270] sm:$0xff]  ;;  %v3363_v22 = vld [vmem:[%s6370_s4 + $0x1e8] sm:$0xff]  ;;  %v3378_v23 = vld [vmem:[%s6370_s4 + $0x260] sm:$0xff]  ;;  %s5017_s12 = scalar_lea.vmem %s6366_s0, %s4404_s22 }
  0x30   : > { %v3364_v16 = vld [vmem:[%s6370_s4 + $0x1f0] sm:$0xff]  ;;  %3562 = vmatprep.subr.mxu0 %v3380_v15  ;;  %4065 = vmatpush3.msra.mxu1 %v3397_v17  ;;  %v3395_v24 = vld [vmem:[%s6370_s4 + $0x2e8] sm:$0xff]  ;;  %v3362_v25 = vld [vmem:[%s6370_s4 + $0x1e0] sm:$0xff] }
  0x31   : > { %v3396_v19 = vld [vmem:[%s6370_s4 + $0x2f0] sm:$0xff]  ;;  %3563 = vmatpush3.msra.mxu0 %v3364_v16  ;;  %v743_v26 = vld [vmem:[%s6367_s1 + $0x148] sm:$0x1]  ;;  %v3377_v28 = vld [vmem:[%s6370_s4 + $0x258] sm:$0xff] }
  0x32   : > { %v748_v20 = vld [vmem:[%s6367_s1 + $0x170] sm:$0xff]  ;;  %3564 = vmatprep.subr.mxu0 %v3379_v18  ;;  %4066 = vmatprep.subr.mxu1 %v3396_v19  ;;  %v3394_v29 = vld [vmem:[%s6370_s4 + $0x2e0] sm:$0xff]  ;;  %v3361_v30 = vld [vmem:[%s6370_s4 + $0x1d8] sm:$0xff] }
  0x33   : > { %971 = vperm.xlu1 %4462, %v741_v5   ;;  %966 = vperm.xlu0 %4461, %v740_v6   ;;  %v768_v27 = vld [vmem:[%s6367_s1 + $0x210] sm:$0xff]  ;;  %v3393_v32 = vld [vmem:[%s6370_s4 + $0x2d8] sm:$0xff]  ;;  %v750_v34 = vld [vmem:[%s6367_s1 + $0x180] sm:$0xff] }
  0x34   : > { %3565 = vmatpush3.msra.mxu0 %v3363_v22  ;;  %4067 = vmatpush3.msra.mxu1 %v3396_v19  ;;  %v3376_v31 = vld [vmem:[%s6370_s4 + $0x250] sm:$0xff]  ;;  %v745_v33 = vld [vmem:[%s6367_s1 + $0x158] sm:$0x1]  ;;  %v3375_v36 = vld [vmem:[%s6370_s4 + $0x248] sm:$0xff] }
  0x35   : > { %3566 = vmatprep.subr.mxu0 %v3378_v23  ;;  %4068 = vmatprep.subr.mxu1 %v3395_v24  ;;  %v3360_v35 = vld [vmem:[%s6370_s4 + $0x1d0] sm:$0xff]  ;;  %v3359_v38 = vld [vmem:[%s6370_s4 + $0x1c8] sm:$0xff]  ;;  %v770_v40 = vld [vmem:[%s6367_s1 + $0x220] sm:$0xff] }
  0x36   : > { %3567 = vmatpush3.msra.mxu0 %v3362_v25  ;;  %4069 = vmatpush3.msra.mxu1 %v3395_v24  ;;  %v3392_v37 = vld [vmem:[%s6370_s4 + $0x2d0] sm:$0xff]  ;;  %v747_v39 = vld [vmem:[%s6367_s1 + $0x168] sm:$0x1]  ;;  %v3374_v41 = vld [vmem:[%s6370_s4 + $0x240] sm:$0xff] }
  0x37   : > { %976 = vperm.xlu1 %4462, %v742_v7   ;;  %1066 = vperm.xlu0 %4461, %v760_v8   ;;  %v3391_v42 = vld [vmem:[%s6370_s4 + $0x2c8] sm:$0xff]  ;;  %v3358_v43 = vld [vmem:[%s6370_s4 + $0x1c0] sm:$0xff]  ;;  %v3373_v44 = vld [vmem:[%s6370_s4 + $0x238] sm:$0xff] }
  0x38   : > { %3568 = vmatprep.subr.mxu0 %v3377_v28  ;;  %4070 = vmatprep.subr.mxu1 %v3394_v29  ;;  %v3390_v45 = vld [vmem:[%s6370_s4 + $0x2c0] sm:$0xff]  ;;  %v749_v46 = vld [vmem:[%s6367_s1 + $0x178] sm:$0x1]  ;;  %v752_v47 = vld [vmem:[%s6367_s1 + $0x190] sm:$0xff] }
  0x39   : > { %3569 = vmatpush3.msra.mxu0 %v3361_v30  ;;  %4071 = vmatpush3.msra.mxu1 %v3394_v29  ;;  %v3357_v48 = vld [vmem:[%s6370_s4 + $0x1b8] sm:$0xff]  ;;  %v3372_v49 = vld [vmem:[%s6370_s4 + $0x230] sm:$0xff]  ;;  %v702_v53 = vld [vmem:[%s6367_s1] sm:$0xff] }
  0x3a   : > { %3570 = vmatprep.subr.mxu0 %v3376_v31  ;;  %4072 = vmatprep.subr.mxu1 %v3393_v32  ;;  %v3389_v50 = vld [vmem:[%s6370_s4 + $0x2b8] sm:$0xff]  ;;  %v3356_v51 = vld [vmem:[%s6370_s4 + $0x1b0] sm:$0xff]  ;;  %v3371_v54 = vld [vmem:[%s6370_s4 + $0x228] sm:$0xff] }
  0x3b   : > { %986 = vperm.xlu1 %4462, %v744_v9   ;;  %1076 = vperm.xlu0 %4461, %v762_v10   ;;  %v720_v52 = vld [vmem:[%s6367_s1 + $0x90] sm:$0xff]  ;;  %v3355_v56 = vld [vmem:[%s6370_s4 + $0x1a8] sm:$0xff]  ;;  %v3370_v57 = vld [vmem:[%s6370_s4 + $0x220] sm:$0xff] }
  0x3c   : > { %3571 = vmatpush3.msra.mxu0 %v3360_v35  ;;  %4073 = vmatpush3.msra.mxu1 %v3393_v32  ;;  %v3388_v55 = vld [vmem:[%s6370_s4 + $0x2b0] sm:$0xff]  ;;  %v3387_v58 = vld [vmem:[%s6370_s4 + $0x2a8] sm:$0xff]  ;;  %v753_v60 = vld [vmem:[%s6367_s1 + $0x198] sm:$0x1] }
  0x3d   : > { %3572 = vmatprep.subr.mxu0 %v3375_v36  ;;  %4074 = vmatprep.subr.mxu1 %v3392_v37  ;;  %v751_v59 = vld [vmem:[%s6367_s1 + $0x188] sm:$0x1]  ;;  %v3354_v61 = vld [vmem:[%s6370_s4 + $0x1a0] sm:$0xff]  ;;  %v3369_v62 = vld [vmem:[%s6370_s4 + $0x218] sm:$0xff] }
  0x3e   : > { %3573 = vmatpush3.msra.mxu0 %v3359_v38  ;;  %4075 = vmatpush3.msra.mxu1 %v3392_v37  ;;  %v3386_v63 = vld [vmem:[%s6370_s4 + $0x2a0] sm:$0xff]  ;;  %v3353_v0 = vld [vmem:[%s6370_s4 + $0x198] sm:$0xff]  ;;  %v703_v2 = vld [vmem:[%s6367_s1 + $0x8] sm:$0x1] }
  0x3f   : > { %996 = vperm.xlu1 %4462, %v746_v11   ;;  %1086 = vperm.xlu0 %4461, %v764_v12   ;;  %v722_v1 = vld [vmem:[%s6367_s1 + $0xa0] sm:$0xff]  ;;  %v3368_v3 = vld [vmem:[%s6370_s4 + $0x210] sm:$0xff]  ;;  %v3385_v4 = vld [vmem:[%s6370_s4 + $0x298] sm:$0xff] }
  0x40   : > { %3574 = vmatprep.subr.mxu0 %v3374_v41  ;;  %4076 = vmatprep.subr.mxu1 %v3391_v42  ;;  %v3352_v5 = vld [vmem:[%s6370_s4 + $0x190] sm:$0xff]  ;;  %v3367_v6 = vld [vmem:[%s6370_s4 + $0x208] sm:$0xff]  ;;  %v705_v9 = vld [vmem:[%s6367_s1 + $0x18] sm:$0x1] }
  0x41   : > { %3575 = vmatpush3.msra.mxu0 %v3358_v43  ;;  %4077 = vmatpush3.msra.mxu1 %v3391_v42  ;;  %v3384_v7 = vld [vmem:[%s6370_s4 + $0x290] sm:$0xff]  ;;  %v3351_v10 = vld [vmem:[%s6370_s4 + $0x188] sm:$0xff]  ;;  %v3366_v11 = vld [vmem:[%s6370_s4 + $0x200] sm:$0xff] }
  0x42   : > { %3576 = vmatprep.subr.mxu0 %v3373_v44  ;;  %4078 = vmatprep.subr.mxu1 %v3390_v45  ;;  %v704_v8 = vld [vmem:[%s6367_s1 + $0x10] sm:$0xff]  ;;  %v3383_v12 = vld [vmem:[%s6370_s4 + $0x288] sm:$0xff]  ;;  %v3350_v13 = vld [vmem:[%s6370_s4 + $0x180] sm:$0xff] }
  0x43   : > { %1006 = vperm.xlu1 %4462, %v748_v20   ;;  %1096 = vperm.xlu0 %4461, %v766_v21   ;;  %v724_v14 = vld [vmem:[%s6367_s1 + $0xb0] sm:$0xff]  ;;  %v706_v15 = vld [vmem:[%s6367_s1 + $0x20] sm:$0xff]  ;;  %v1334_v17 = vld [vmem:[%s6370_s4 + $0xf8] sm:$0xff] }
  0x44   : > { %3577 = vmatpush3.msra.mxu0 %v3357_v48  ;;  %4079 = vmatpush3.msra.mxu1 %v3390_v45  ;;  %v3382_v16 = vld [vmem:[%s6370_s4 + $0x280] sm:$0xff]  ;;  %v4937_v18 = vld [vmem:[%s6370_s4 + $0x178] sm:$0xff]  ;;  %v708_v20 = vld [vmem:[%s6367_s1 + $0x30] sm:$0xff] }
  0x45   : > { %3578 = vmatprep.subr.mxu0 %v3372_v49  ;;  %4080 = vmatprep.subr.mxu1 %v3389_v50  ;;  %v726_v19 = vld [vmem:[%s6367_s1 + $0xc0] sm:$0xff]  ;;  %v728_v21 = vld [vmem:[%s6367_s1 + $0xd0] sm:$0xff]  ;;  %v707_v25 = vld [vmem:[%s6367_s1 + $0x28] sm:$0x1] }
  0x46   : > { %3579 = vmatpush3.msra.mxu0 %v3356_v51  ;;  %4081 = vmatpush3.msra.mxu1 %v3389_v50  ;;  %v710_v22 = vld [vmem:[%s6367_s1 + $0x40] sm:$0xff]  ;;  %v712_v24 = vld [vmem:[%s6367_s1 + $0x50] sm:$0xff]  ;;  %v711_v29 = vld [vmem:[%s6367_s1 + $0x48] sm:$0x1] }
  0x47   : > { %981 = vperm.xlu1 %4462, %v743_v26   ;;  %1106 = vperm.xlu0 %4461, %v768_v27   ;;  %v730_v23 = vld [vmem:[%s6367_s1 + $0xe0] sm:$0xff]  ;;  %v732_v26 = vld [vmem:[%s6367_s1 + $0xf0] sm:$0xff]  ;;  %v709_v27 = vld [vmem:[%s6367_s1 + $0x38] sm:$0x1] }
  0x48   : > { %3580 = vmatprep.subr.mxu0 %v3371_v54  ;;  %4082 = vmatprep.subr.mxu1 %v3388_v55  ;;  %v714_v28 = vld [vmem:[%s6367_s1 + $0x60] sm:$0xff]  ;;  %v713_v31 = vld [vmem:[%s6367_s1 + $0x58] sm:$0x1]  ;;  %v716_v32 = vld [vmem:[%s6367_s1 + $0x70] sm:$0xff] }
  0x49   : > { %3581 = vmatpush3.msra.mxu0 %v3355_v56  ;;  %4083 = vmatpush3.msra.mxu1 %v3388_v55  ;;  %v734_v30 = vld [vmem:[%s6367_s1 + $0x100] sm:$0xff]  ;;  %v719_v36 = vld [vmem:[%s6367_s1 + $0x88] sm:$0x1]  ;;  %v736_v37 = vld [vmem:[%s6367_s1 + $0x110] sm:$0xff] }
  0x4a   : > { %3582 = vmatprep.subr.mxu0 %v3370_v57  ;;  %4084 = vmatprep.subr.mxu1 %v3387_v58  ;;  %v718_v35 = vld [vmem:[%s6367_s1 + $0x80] sm:$0xff]  ;;  %v721_v38 = vld [vmem:[%s6367_s1 + $0x98] sm:$0x1]  ;;  %v727_v41 = vld [vmem:[%s6367_s1 + $0xc8] sm:$0x1] }
  0x4b   : > { %991 = vperm.xlu1 %4462, %v745_v33   ;;  %1016 = vperm.xlu0 %4461, %v750_v34   ;;  %v715_v33 = vld [vmem:[%s6367_s1 + $0x68] sm:$0x1]  ;;  %v717_v34 = vld [vmem:[%s6367_s1 + $0x78] sm:$0x1]  ;;  %v5028_v45 = vld [vmem:[%s6368_s2] ss:$0 sm:$0xff] }
  0x4c   : > { %3583 = vmatpush3.msra.mxu0 %v3354_v61  ;;  %4085 = vmatpush3.msra.mxu1 %v3387_v58  ;;  %v729_v42 = vld [vmem:[%s6367_s1 + $0xd8] sm:$0x1]  ;;  %v731_v43 = vld [vmem:[%s6367_s1 + $0xe8] sm:$0x1]  ;;  %v438_v54 = vld [vmem:[%s5017_s12 + $0x120] sm:$0xff] }
  0x4d   : > { %3584 = vmatprep.subr.mxu0 %v3369_v62  ;;  %4086 = vmatprep.subr.mxu1 %v3386_v63  ;;  %v733_v44 = vld [vmem:[%s6367_s1 + $0xf8] sm:$0x1]  ;;  %v735_v48 = vld [vmem:[%s6367_s1 + $0x108] sm:$0x1]  ;;  %v516_v58 = vmul.f32 %v5028_v45, %v438_v54  ;;  %v440_v62 = vld [vmem:[%s5017_s12 + $0x130] sm:$0xff] }
  0x4e   : > { %3585 = vmatpush3.msra.mxu0 %v3353_v0  ;;  %4087 = vmatpush3.msra.mxu1 %v3386_v63  ;;  %v439_v51 = vld [vmem:[%s5017_s12 + $0x128] sm:$0x1]  ;;  %v1317_v54 = vld [vmem:[%s6370_s4 + $0x70] sm:$0xff] }
  0x4f   : > { %1001 = vperm.xlu1 %4462, %v747_v39   ;;  %1116 = vperm.xlu0 %4461, %v770_v40   ;;  %v723_v39 = vld [vmem:[%s6367_s1 + $0xa8] sm:$0x1]  ;;  %v725_v40 = vld [vmem:[%s6367_s1 + $0xb8] sm:$0x1]  ;;  %v517_v55 = vmul.f32 %v5028_v45, %v439_v51  ;;  %v448_v51 = vld [vmem:[%s5017_s12 + $0x170] sm:$0xff] }
  0x50   : > { %3586 = vmatprep.subr.mxu0 %v3368_v3  ;;  %4088 = vmatprep.subr.mxu1 %v3385_v4  ;;  %v755_v61 = vld [vmem:[%s6367_s1 + $0x1a8] sm:$0x1] }
  0x51   : > { %3587 = vmatpush3.msra.mxu0 %v3352_v5  ;;  %4089 = vmatpush3.msra.mxu1 %v3385_v4  ;;  %v518_v4 = vmul.f32 %v5028_v45, %v440_v62  ;;  %v442_v5 = vld [vmem:[%s5017_s12 + $0x140] sm:$0xff]  ;;  %v526_v62 = vmul.f32 %v5028_v45, %v448_v51  ;;  %v1312_v51 = vld [vmem:[%s6370_s4 + $0x48] sm:$0xff] }
  0x52   : > { %3588 = vmatprep.subr.mxu0 %v3367_v6  ;;  %4090 = vmatprep.subr.mxu1 %v3384_v7  ;;  %v460_v6 = vld [vmem:[%s5017_s12 + $0x1d0] sm:$0xff] }
  0x53   : > { %1011 = vperm.xlu1 %4462, %v749_v46   ;;  %1026 = vperm.xlu0 %4461, %v752_v47   ;;  %v458_v46 = vld [vmem:[%s5017_s12 + $0x1c0] sm:$0xff]  ;;  %v456_v47 = vld [vmem:[%s5017_s12 + $0x1b0] sm:$0xff] }
  0x54   : > { %3589 = vmatpush3.msra.mxu0 %v3351_v10  ;;  %4091 = vmatpush3.msra.mxu1 %v3384_v7  ;;  %v536_v49 = vmul.f32 %v5028_v45, %v458_v46  ;;  %v534_v50 = vmul.f32 %v5028_v45, %v456_v47  ;;  %v757_v7 = vld [vmem:[%s6367_s1 + $0x1b8] sm:$0x1] }
  0x55   : > { %3590 = vmatprep.subr.mxu0 %v3366_v11  ;;  %4092 = vmatprep.subr.mxu1 %v3383_v12 }
  0x56   : > { %3591 = vmatpush3.msra.mxu0 %v3350_v13  ;;  %4093 = vmatpush3.msra.mxu1 %v3383_v12  ;;  %v520_v13 = vmul.f32 %v5028_v45, %v442_v5  ;;  %v468_v5 = vld [vmem:[%s5017_s12 + $0x210] sm:$0xff] }
  0x57   : > { %866 = vperm.xlu0 %4461, %v720_v52   ;;  %776 = vperm.xlu1 %4462, %v702_v53   ;;  %v737_v52 = vld [vmem:[%s6367_s1 + $0x118] sm:$0x1]  ;;  %v5044_v53 = vld [vmem:[%s6369_s3] ss:$0 sm:$0xff] }
  0x58   : > { %4094 = vmatprep.subr.mxu1 %v3382_v16  ;;  %3640 = vmatprep.subr.mxu0 %v1334_v17  ;;  %v614_v56 = vadd.f32 %v5044_v53, %v536_v49  ;;  %v612_v57 = vadd.f32 %v5044_v53, %v534_v50  ;;  %v595_v63 = vadd.f32 %v5044_v53, %v517_v55  ;;  %v769_v55 = vld [vmem:[%s6367_s1 + $0x218] sm:$0x1] }
  0x59   : > { %4095 = vmatpush3.msra.mxu1 %v3382_v16  ;;  %v594_v3 = vadd.f32 %v5044_v53, %v516_v58 }
  0x5a   : > { %4108 = vmatprep.subr.mxu1 %v4937_v18  ;;  %v667_v11 = vmax.f32 %v595_v63, 0.0 }
  0x5b   : > { %1021 = vperm.xlu0 %4461, %v751_v59   ;;  %1031 = vperm.xlu1 %4462, %v753_v60   ;;  %v441_v59 = vld [vmem:[%s5017_s12 + $0x138] sm:$0x1]  ;;  %v754_v60 = vld [vmem:[%s6367_s1 + $0x1a0] sm:$0xff]  ;;  %v666_v17 = vmax.f32 %v594_v3, 0.0 }
  0x5c   : > { %v519_v0 = vmul.f32 %v5028_v45, %v441_v59 }
  0x5e   : > { %v597_v12 = vadd.f32 %v5044_v53, %v519_v0 }
  0x5f   : > { %876 = vperm.xlu0 %4461, %v722_v1   ;;  %781 = vperm.xlu1 %4462, %v703_v2   ;;  %v686_v1 = vmax.f32 %v614_v56, 0.0  ;;  %v684_v2 = vmax.f32 %v612_v57, 0.0  ;;  %v771_v56 = vld [vmem:[%s6367_s1 + $0x228] sm:$0x1] }
  0x60   : > { %v1332_v57 = vld [vmem:[%s6370_s4 + $0xe8] sm:$0xff] }
  0x63   : > { %786 = vperm.xlu0 %4461, %v704_v8   ;;  %791 = vperm.xlu1 %4462, %v705_v9   ;;  %v759_v8 = vld [vmem:[%s6367_s1 + $0x1c8] sm:$0x1] }
  0x67   : > { %886 = vperm.xlu0 %4461, %v724_v14   ;;  %796 = vperm.xlu1 %4462, %v706_v15   ;;  %v538_v14 = vmul.f32 %v5028_v45, %v460_v6 }
  0x6b   : > { %896 = vperm.xlu0 %4461, %v726_v19   ;;  %806 = vperm.xlu1 %4462, %v708_v20   ;;  %v596_v19 = vadd.f32 %v5044_v53, %v518_v4  ;;  %v444_v20 = vld [vmem:[%s5017_s12 + $0x150] sm:$0xff]  ;;  %v443_v4 = vld [vmem:[%s5017_s12 + $0x148] sm:$0x1] }
  0x6f   : > { %906 = vperm.xlu0 %4461, %v728_v21   ;;  %816 = vperm.xlu1 %4462, %v710_v22   ;;  %v761_v21 = vld [vmem:[%s6367_s1 + $0x1d8] sm:$0x1]  ;;  %v763_v22 = vld [vmem:[%s6367_s1 + $0x1e8] sm:$0x1] }
  0x73   : > { %916 = vperm.xlu0 %4461, %v730_v23   ;;  %826 = vperm.xlu1 %4462, %v712_v24   ;;  %v462_v23 = vld [vmem:[%s5017_s12 + $0x1e0] sm:$0xff] }
  0x77   : > { %801 = vperm.xlu0 %4461, %v707_v25   ;;  %926 = vperm.xlu1 %4462, %v732_v26   ;;  %v669_v26 = vmax.f32 %v597_v12, 0.0  ;;  %v604_v12 = vadd.f32 %v5044_v53, %v526_v62  ;;  %v1347_v62 = vld [vmem:[%s6370_s4 + $0x160] sm:$0xff] }
  0x7b   : > { %811 = vperm.xlu0 %4461, %v709_v27   ;;  %836 = vperm.xlu1 %4462, %v714_v28   ;;  %v598_v27 = vadd.f32 %v5044_v53, %v520_v13  ;;  %v616_v28 = vadd.f32 %v5044_v53, %v538_v14  ;;  %v521_v14 = vmul.f32 %v5028_v45, %v443_v4 }
  0x7d   : > { %v688_v49 = vmax.f32 %v616_v28, 0.0 }
  0x7f   : > { %821 = vperm.xlu0 %4461, %v711_v29   ;;  %936 = vperm.xlu1 %4462, %v734_v30   ;;  %v522_v29 = vmul.f32 %v5028_v45, %v444_v20 }
  0x83   : > { %831 = vperm.xlu0 %4461, %v713_v31   ;;  %846 = vperm.xlu1 %4462, %v716_v32   ;;  %v668_v32 = vmax.f32 %v596_v19, 0.0 }
  0x87   : > { %841 = vperm.xlu0 %4461, %v715_v33   ;;  %851 = vperm.xlu1 %4462, %v717_v34   ;;  %v540_v33 = vmul.f32 %v5028_v45, %v462_v23  ;;  %v446_v34 = vld [vmem:[%s5017_s12 + $0x160] sm:$0xff] }
  0x89   : > { %v618_v50 = vadd.f32 %v5044_v53, %v540_v33 }
  0x8b   : > { %856 = vperm.xlu0 %4461, %v718_v35   ;;  %861 = vperm.xlu1 %4462, %v719_v36   ;;  %v464_v35 = vld [vmem:[%s5017_s12 + $0x1f0] sm:$0xff]  ;;  %v1318_v36 = vld [vmem:[%s6370_s4 + $0x78] sm:$0xff] }
  0x8c   : > { %v542_v46 = vmul.f32 %v5028_v45, %v464_v35 }
  0x8e   : > { %v620_v3 = vadd.f32 %v5044_v53, %v542_v46 }
  0x8f   : > { %946 = vperm.xlu0 %4461, %v736_v37   ;;  %871 = vperm.xlu1 %4462, %v721_v38   ;;  %v765_v37 = vld [vmem:[%s6367_s1 + $0x1f8] sm:$0x1]  ;;  %v767_v38 = vld [vmem:[%s6367_s1 + $0x208] sm:$0x1] }
  0x90   : > { %v692_v20 = vmax.f32 %v620_v3, 0.0 }
  0x93   : > { %881 = vperm.xlu0 %4461, %v723_v39   ;;  %891 = vperm.xlu1 %4462, %v725_v40   ;;  %v1333_v39 = vld [vmem:[%s6370_s4 + $0xf0] sm:$0xff] }
  0x97   : > { %901 = vperm.xlu0 %4461, %v727_v41   ;;  %911 = vperm.xlu1 %4462, %v729_v42   ;;  %v670_v42 = vmax.f32 %v598_v27, 0.0  ;;  %v1349_v27 = vld [vmem:[%s6370_s4 + $0x170] sm:$0xff] }
  0x9b   : > { %921 = vperm.xlu0 %4461, %v731_v43   ;;  %931 = vperm.xlu1 %4462, %v733_v44   ;;  %v600_v43 = vadd.f32 %v5044_v53, %v522_v29  ;;  %v524_v44 = vmul.f32 %v5028_v45, %v446_v34  ;;  %v1314_v34 = vld [vmem:[%s6370_s4 + $0x58] sm:$0xff] }
  0x9f   : > { %941 = vperm.xlu0 %4461, %v735_v48   ;;  %951 = vperm.xlu1 %4462, %v737_v52   ;;  %v466_v52 = vld [vmem:[%s5017_s12 + $0x200] sm:$0xff] }
  0xa0   : > { %v544_v63 = vmul.f32 %v5028_v45, %v466_v52 }
  0xa2   : > { %v622_v13 = vadd.f32 %v5044_v53, %v544_v63 }
  0xa3   : > { %1036 = vperm.xlu0 %4461, %v754_v60   ;;  %1041 = vperm.xlu1 %4462, %v755_v61   ;;  %v672_v60 = vmax.f32 %v600_v43, 0.0  ;;  %v602_v61 = vadd.f32 %v5044_v53, %v524_v44  ;;  %v1328_v43 = vld [vmem:[%s6370_s4 + $0xc8] sm:$0xff] }
  0xa4   : > { %v1348_v44 = vld [vmem:[%s6370_s4 + $0x168] sm:$0xff] }
  0xa5   : > { %v674_v19 = vmax.f32 %v602_v61, 0.0  ;;  %v1326_v61 = vld [vmem:[%s6370_s4 + $0xb8] sm:$0xff] }
  0xa6   : > { %v1057_v9 = vpop.permute.xlu1 %1056  ;;  %v1047_v10 = vpop.permute.xlu0 %1046 }
  0xa7   : > { %v1190_v15 = vmul.f32 %v1057_v9, %v686_v1  ;;  %v1188_v16 = vmul.f32 %v1047_v10, %v684_v2  ;;  %1051 = vperm.xlu0 %4461, %v757_v7   ;;  %1061 = vperm.xlu1 %4462, %v759_v8   ;;  %v690_v2 = vmax.f32 %v618_v50, 0.0  ;;  %v772_v7 = vld [vmem:[%s6367_s1 + $0x230] sm:$0xff]  ;;  %v773_v8 = vld [vmem:[%s6367_s1 + $0x238] sm:$0x1]  ;;  %v1316_v9 = vld [vmem:[%s6370_s4 + $0x68] sm:$0xff] }
  0xa9   : > { %1490 = vmatprep.mubr.f32.mxu0 %v1188_v16 }
  0xaa   : > { %v962_v24 = vpop.permute.xlu1 %961  ;;  %v957_v25 = vpop.permute.xlu0 %956 }
  0xab   : > { %v1171_v30 = vmul.f32 %v962_v24, %v667_v11  ;;  %v1170_v31 = vmul.f32 %v957_v25, %v666_v17  ;;  %1071 = vperm.xlu0 %4461, %v761_v21   ;;  %1081 = vperm.xlu1 %4462, %v763_v22   ;;  %v1331_v21 = vld [vmem:[%s6370_s4 + $0xe0] sm:$0xff]  ;;  %v445_v22 = vld [vmem:[%s5017_s12 + $0x158] sm:$0x1] }
  0xac   : > { %v1315_v24 = vld [vmem:[%s6370_s4 + $0x60] sm:$0xff]  ;;  %v523_v33 = vmul.f32 %v5028_v45, %v445_v22 }
  0xad   : > { %1243 = vst [vmem:[#allocation2 + $0x128] sm:$0x1] %v1171_v30  ;;  %1242 = vst [vmem:[#allocation2 + $0x120] sm:$0xff] %v1170_v31  ;;  %1491 = vmatmul.mubr.f32.vlgmr.msra.gmra.mxu0 %v1170_v31  ;;  %v450_v25 = vld [vmem:[%s5017_s12 + $0x180] sm:$0xff]  ;;  %v676_v30 = vmax.f32 %v604_v12, 0.0  ;;  %v599_v31 = vadd.f32 %v5044_v53, %v521_v14  ;;  %v1309_v12 = vld [vmem:[%s6370_s4 + $0x30] sm:$0xff] }
  0xae   : > { %v972_v40 = vpop.permute.xlu1 %971  ;;  %v967_v41 = vpop.permute.xlu0 %966  ;;  %1495 = vmatprep.mubr.f32.mxu0 %v1190_v15  ;;  %3641 = vmatpush3.msra.mxu0 %v1318_v36  ;;  %v546_v15 = vmul.f32 %v5028_v45, %v468_v5  ;;  %v1310_v5 = vld [vmem:[%s6370_s4 + $0x38] sm:$0xff]  ;;  %v402_v14 = vld [vmem:[%s5017_s12] sm:$0xff] }
  0xaf   : > { %v1173_v47 = vmul.f32 %v972_v40, %v669_v26  ;;  %v1172_v48 = vmul.f32 %v967_v41, %v668_v32  ;;  %1091 = vperm.xlu0 %4461, %v765_v37   ;;  %1101 = vperm.xlu1 %4462, %v767_v38   ;;  %v1330_v26 = vld [vmem:[%s6370_s4 + $0xd8] sm:$0xff]  ;;  %v694_v37 = vmax.f32 %v622_v13, 0.0  ;;  %v528_v38 = vmul.f32 %v5028_v45, %v450_v25  ;;  %v447_v40 = vld [vmem:[%s5017_s12 + $0x168] sm:$0x1]  ;;  %v470_v41 = vld [vmem:[%s5017_s12 + $0x220] sm:$0xff] }
  0xb0   : > { %3642 = vmatprep.subr.mxu0 %v1333_v39  ;;  %v624_v32 = vadd.f32 %v5044_v53, %v546_v15  ;;  %v1329_v39 = vld [vmem:[%s6370_s4 + $0xd0] sm:$0xff]  ;;  %v548_v50 = vmul.f32 %v5028_v45, %v470_v41  ;;  %v1346_v13 = vld [vmem:[%s6370_s4 + $0x158] sm:$0xff]  ;;  %v1324_v15 = vld [vmem:[%s6370_s4 + $0xa8] sm:$0xff] }
  0xb1   : > { %1245 = vst [vmem:[#allocation2 + $0x138] sm:$0x1] %v1173_v47  ;;  %1244 = vst [vmem:[#allocation2 + $0x130] sm:$0xff] %v1172_v48  ;;  %1496 = vmatmul.mubr.f32.gmra.mxu0 %v1172_v48  ;;  %v671_v47 = vmax.f32 %v599_v31, 0.0  ;;  %v601_v48 = vadd.f32 %v5044_v53, %v523_v33  ;;  %v1323_v31 = vld [vmem:[%s6370_s4 + $0xa0] sm:$0xff] }
  0xb2   : > { %v977_v58 = vpop.permute.xlu1 %976  ;;  %v1067_v59 = vpop.permute.xlu0 %1066  ;;  %3643 = vmatpush3.msra.mxu0 %v1317_v54  ;;  %v1307_v33 = vld [vmem:[%s6370_s4 + $0x20] sm:$0xff] }
  0xb3   : > { %v1174_v0 = vmul.f32 %v977_v58, %v670_v42  ;;  %v1192_v1 = vmul.f32 %v1067_v59, %v688_v49  ;;  %1111 = vperm.xlu0 %4461, %v769_v55   ;;  %1121 = vperm.xlu1 %4462, %v771_v56   ;;  %v1313_v42 = vld [vmem:[%s6370_s4 + $0x50] sm:$0xff]  ;;  %v525_v49 = vmul.f32 %v5028_v45, %v447_v40  ;;  %v696_v55 = vmax.f32 %v624_v32, 0.0  ;;  %v449_v58 = vld [vmem:[%s5017_s12 + $0x178] sm:$0x1]  ;;  %v1344_v32 = vld [vmem:[%s6370_s4 + $0x148] sm:$0xff] }
  0xb4   : > { %v1369_v6 = vld [vmem:[#allocation2 + $0x121] sm:$0xff]  ;;  %3644 = vmatprep.subr.mxu0 %v1332_v57  ;;  %v606_v56 = vadd.f32 %v5044_v53, %v528_v38  ;;  %v452_v59 = vld [vmem:[%s5017_s12 + $0x190] sm:$0xff]  ;;  %v527_v3 = vmul.f32 %v5028_v45, %v449_v58 }
  0xb5   : > { %1246 = vst [vmem:[#allocation2 + $0x140] sm:$0xff] %v1174_v0  ;;  %4096 = vmatprep.mubr.f32.mxu1 %v1369_v6  ;;  %1500 = vmatprep.mubr.f32.mxu0 %v1192_v1  ;;  %v1327_v57 = vld [vmem:[%s6370_s4 + $0xc0] sm:$0xff]  ;;  %v673_v1 = vmax.f32 %v601_v48, 0.0  ;;  %v530_v4 = vmul.f32 %v5028_v45, %v452_v59  ;;  %v1306_v48 = vld [vmem:[%s6370_s4 + $0x18] sm:$0xff] }
  0xb6   : > { %v987_v10 = vpop.permute.xlu1 %986  ;;  %v1077_v11 = vpop.permute.xlu0 %1076  ;;  %1501 = vmatmul.mubr.f32.gmra.mxu0 %v1174_v0 }
  0xb7   : > { %v1176_v16 = vmul.f32 %v987_v10, %v672_v60  ;;  %v1194_v17 = vmul.f32 %v1077_v11, %v690_v2  ;;  %1126 = vperm.xlu0 %4461, %v772_v7   ;;  %1131 = vperm.xlu1 %4462, %v773_v8   ;;  %v1311_v60 = vld [vmem:[%s6370_s4 + $0x40] sm:$0xff]  ;;  %v603_v2 = vadd.f32 %v5044_v53, %v525_v49  ;;  %v678_v8 = vmax.f32 %v606_v56, 0.0  ;;  %v1325_v10 = vld [vmem:[%s6370_s4 + $0xb0] sm:$0xff]  ;;  %v403_v49 = vld [vmem:[%s5017_s12 + $0x8] sm:$0x1] }
  0xb8   : > { %v1370_v23 = vld [vmem:[#allocation2 + $0x131] sm:$0xff]  ;;  %3645 = vmatpush3.msra.mxu0 %v1316_v9  ;;  %v626_v9 = vadd.f32 %v5044_v53, %v548_v50 }
  0xb9   : > { %1248 = vst [vmem:[#allocation2 + $0x150] sm:$0xff] %v1176_v16  ;;  %4097 = vmatmul.mubr.f32.vlgmr.msra.gmra.mxu1 %v1370_v23  ;;  %1505 = vmatprep.mubr.f32.mxu0 %v1194_v17  ;;  %v420_v11 = vld [vmem:[%s5017_s12 + $0x90] sm:$0xff] }
  0xba   : > { %v997_v28 = vpop.permute.xlu1 %996  ;;  %v1087_v29 = vpop.permute.xlu0 %1086  ;;  %1506 = vmatmul.mubr.f32.gmra.mxu0 %v1176_v16  ;;  %3646 = vmatprep.subr.mxu0 %v1331_v21  ;;  %v608_v21 = vadd.f32 %v5044_v53, %v530_v4  ;;  %v498_v22 = vmul.f32 %v5028_v45, %v420_v11  ;;  %v1345_v23 = vld [vmem:[%s6370_s4 + $0x150] sm:$0xff] }
  0xbb   : > { %v1178_v35 = vmul.f32 %v997_v28, %v674_v19  ;;  %v1196_v36 = vmul.f32 %v1087_v29, %v692_v20  ;;  %3647 = vmatpush3.msra.mxu0 %v1315_v24  ;;  %4109 = vmatpush3.msra.mxu1 %v4937_v18  ;;  %v675_v19 = vmax.f32 %v603_v2, 0.0  ;;  %v605_v20 = vadd.f32 %v5044_v53, %v527_v3  ;;  %v1308_v28 = vld [vmem:[%s6370_s4 + $0x28] sm:$0xff]  ;;  %v1321_v50 = vld [vmem:[%s6370_s4 + $0x90] sm:$0xff] }
  0xbc   : > { %3648 = vmatprep.subr.mxu0 %v1330_v26  ;;  %4110 = vmatprep.subr.mxu1 %v1349_v27  ;;  %v698_v26 = vmax.f32 %v626_v9, 0.0  ;;  %v451_v29 = vld [vmem:[%s5017_s12 + $0x188] sm:$0x1]  ;;  %v1341_v4 = vld [vmem:[%s6370_s4 + $0x130] sm:$0xff] }
  0xbd   : > { %1250 = vst [vmem:[#allocation2 + $0x160] sm:$0xff] %v1178_v35  ;;  %1510 = vmatprep.mubr.f32.mxu0 %v1196_v36  ;;  %3649 = vmatpush3.msra.mxu0 %v1314_v34  ;;  %v677_v36 = vmax.f32 %v605_v20, 0.0  ;;  %v529_v38 = vmul.f32 %v5028_v45, %v451_v29  ;;  %v1320_v3 = vld [vmem:[%s6370_s4 + $0x88] sm:$0xff]  ;;  %v1339_v29 = vld [vmem:[%s6370_s4 + $0x120] sm:$0xff] }
  0xbe   : > { %v1007_v46 = vpop.permute.xlu1 %1006  ;;  %v1097_v18 = vpop.permute.xlu0 %1096  ;;  %1511 = vmatmul.mubr.f32.gmra.mxu0 %v1178_v35  ;;  %3650 = vmatprep.subr.mxu0 %v1329_v39 }
  0xbf   : > { %v1180_v52 = vmul.f32 %v1007_v46, %v676_v30  ;;  %v1198_v54 = vmul.f32 %v1097_v18, %v694_v37  ;;  %3651 = vmatpush3.msra.mxu0 %v1313_v42  ;;  %4111 = vmatpush3.msra.mxu1 %v1349_v27  ;;  %v480_v27 = vmul.f32 %v5028_v45, %v402_v14  ;;  %v453_v30 = vld [vmem:[%s5017_s12 + $0x198] sm:$0x1]  ;;  %v680_v42 = vmax.f32 %v608_v21, 0.0  ;;  %v1343_v46 = vld [vmem:[%s6370_s4 + $0x140] sm:$0xff]  ;;  %v1340_v21 = vld [vmem:[%s6370_s4 + $0x128] sm:$0xff] }
  0xc0   : > { %3652 = vmatprep.subr.mxu0 %v1328_v43  ;;  %4112 = vmatprep.subr.mxu1 %v1348_v44  ;;  %v576_v37 = vadd.f32 %v5044_v53, %v498_v22  ;;  %v531_v39 = vmul.f32 %v5028_v45, %v453_v30  ;;  %v422_v18 = vld [vmem:[%s5017_s12 + $0xa0] sm:$0xff]  ;;  %v607_v56 = vadd.f32 %v5044_v53, %v529_v38 }
  0xc1   : > { %1252 = vst [vmem:[#allocation2 + $0x170] sm:$0xff] %v1180_v52  ;;  %1515 = vmatprep.mubr.f32.mxu0 %v1198_v54  ;;  %3653 = vmatpush3.msra.mxu0 %v1312_v51  ;;  %v558_v43 = vadd.f32 %v5044_v53, %v480_v27  ;;  %v1342_v51 = vld [vmem:[%s6370_s4 + $0x138] sm:$0xff]  ;;  %v500_v58 = vmul.f32 %v5028_v45, %v422_v18  ;;  %v406_v22 = vld [vmem:[%s5017_s12 + $0x20] sm:$0xff]  ;;  %v1337_v18 = vld [vmem:[%s6370_s4 + $0x110] sm:$0xff] }
  0xc2   : > { %v982_v63 = vpop.permute.xlu1 %981  ;;  %v1107_v0 = vpop.permute.xlu0 %1106  ;;  %1516 = vmatmul.mubr.f32.gmra.mxu0 %v1180_v52  ;;  %3654 = vmatprep.subr.mxu0 %v1327_v57  ;;  %v609_v57 = vadd.f32 %v5044_v53, %v531_v39  ;;  %v1338_v39 = vld [vmem:[%s6370_s4 + $0x118] sm:$0xff] }
  0xc3   : > { %v1175_v6 = vmul.f32 %v982_v63, %v671_v47  ;;  %v1200_v7 = vmul.f32 %v1107_v0, %v696_v55  ;;  %3655 = vmatpush3.msra.mxu0 %v1311_v60  ;;  %4113 = vmatpush3.msra.mxu1 %v1348_v44  ;;  %v1322_v44 = vld [vmem:[%s6370_s4 + $0x98] sm:$0xff]  ;;  %v648_v55 = vmax.f32 %v576_v37, 0.0  ;;  %v481_v63 = vmul.f32 %v5028_v45, %v403_v49  ;;  %v404_v0 = vld [vmem:[%s5017_s12 + $0x10] sm:$0xff] }
  0xc4   : > { %3656 = vmatprep.subr.mxu0 %v1326_v61  ;;  %4114 = vmatprep.subr.mxu1 %v1347_v62  ;;  %v630_v61 = vmax.f32 %v558_v43, 0.0  ;;  %v578_v9 = vadd.f32 %v5044_v53, %v500_v58  ;;  %v482_v11 = vmul.f32 %v5028_v45, %v404_v0  ;;  %v3413_v37 = vld [vmem:[%s6370_s4 + $0x378] sm:$0xff]  ;;  %v428_v49 = vld [vmem:[%s5017_s12 + $0xd0] sm:$0xff]  ;;  %v3411_v58 = vld [vmem:[%s6370_s4 + $0x368] sm:$0xff] }
  0xc5   : > { %1247 = vst [vmem:[#allocation2 + $0x148] sm:$0x1] %v1175_v6  ;;  %1520 = vmatprep.mubr.f32.mxu0 %v1200_v7  ;;  %3657 = vmatpush3.msra.mxu0 %v1310_v5  ;;  %v1304_v5 = vld [vmem:[%s6370_s4 + $0x8] sm:$0xff] }
  0xc6   : > { %v992_v16 = vpop.permute.xlu1 %991  ;;  %v1017_v17 = vpop.permute.xlu0 %1016  ;;  %3658 = vmatprep.subr.mxu0 %v1325_v10  ;;  %4115 = vmatpush3.msra.mxu1 %v1347_v62  ;;  %v1305_v62 = vld [vmem:[%s6370_s4 + $0x10] sm:$0xff]  ;;  %v1319_v10 = vld [vmem:[%s6370_s4 + $0x80] sm:$0xff]  ;;  %v560_v27 = vadd.f32 %v5044_v53, %v482_v11 }
  0xc7   : > { %v1177_v24 = vmul.f32 %v992_v16, %v673_v1  ;;  %v1182_v25 = vmul.f32 %v1017_v17, %v678_v8  ;;  %3659 = vmatpush3.msra.mxu0 %v1309_v12  ;;  %4116 = vmatprep.subr.mxu1 %v1346_v13  ;;  %v405_v1 = vld [vmem:[%s5017_s12 + $0x18] sm:$0x1]  ;;  %v679_v8 = vmax.f32 %v607_v56, 0.0  ;;  %v559_v16 = vadd.f32 %v5044_v53, %v481_v63  ;;  %v1303_v17 = vld [vmem:[%s6370_s4] sm:$0xff]  ;;  %v3427_v56 = vld [vmem:[%s6370_s4 + $0x3e8] sm:$0xff] }
  0xc8   : > { %3660 = vmatprep.subr.mxu0 %v1324_v15  ;;  %4117 = vmatpush3.msra.mxu1 %v1346_v13  ;;  %v483_v12 = vmul.f32 %v5028_v45, %v405_v1  ;;  %v681_v15 = vmax.f32 %v609_v57, 0.0  ;;  %v1336_v57 = vld [vmem:[%s6370_s4 + $0x108] sm:$0xff]  ;;  %v1335_v1 = vld [vmem:[%s6370_s4 + $0x100] sm:$0xff] }
  0xc9   : > { %1249 = vst [vmem:[#allocation2 + $0x158] sm:$0x1] %v1177_v24  ;;  %1254 = vst [vmem:[#allocation2 + $0x180] sm:$0xff] %v1182_v25  ;;  %1521 = vmatmul.mubr.f32.gmra.mxu0 %v1182_v25  ;;  %4118 = vmatprep.subr.mxu1 %v1345_v23  ;;  %v3410_v11 = vld [vmem:[%s6370_s4 + $0x360] sm:$0xff] }
  0xca   : > { %v1002_v34 = vpop.permute.xlu1 %1001  ;;  %v1117_v35 = vpop.permute.xlu0 %1116  ;;  %3661 = vmatpush3.msra.mxu0 %v1308_v28  ;;  %4119 = vmatpush3.msra.mxu1 %v1345_v23  ;;  %v3429_v23 = vld [vmem:[%s6370_s4 + $0x3f8] sm:$0xff]  ;;  %v561_v28 = vadd.f32 %v5044_v53, %v483_v12 }
  0xcb   : > { %v1179_v40 = vmul.f32 %v1002_v34, %v675_v19  ;;  %v1202_v41 = vmul.f32 %v1117_v35, %v698_v26  ;;  %3662 = vmatprep.subr.mxu0 %v1323_v31  ;;  %4120 = vmatprep.subr.mxu1 %v1344_v32  ;;  %v424_v19 = vld [vmem:[%s5017_s12 + $0xb0] sm:$0xff]  ;;  %v650_v26 = vmax.f32 %v578_v9, 0.0  ;;  %v484_v34 = vmul.f32 %v5028_v45, %v406_v22  ;;  %v426_v35 = vld [vmem:[%s5017_s12 + $0xc0] sm:$0xff]  ;;  %v3445_v12 = vld [vmem:[%s6370_s4 + $0x478] sm:$0xff] }
  0xcc   : > { %v1371_v47 = vld [vmem:[#allocation2 + $0x141] sm:$0xff]  ;;  %3663 = vmatpush3.msra.mxu0 %v1307_v33  ;;  %4121 = vmatpush3.msra.mxu1 %v1344_v32  ;;  %v502_v30 = vmul.f32 %v5028_v45, %v424_v19  ;;  %v631_v33 = vmax.f32 %v559_v16, 0.0 }
  0xcd   : > { %1251 = vst [vmem:[#allocation2 + $0x168] sm:$0x1] %v1179_v40  ;;  %4099 = vmatprep.mubr.f32.mxu1 %v1371_v47  ;;  %1525 = vmatprep.mubr.f32.mxu0 %v1202_v41  ;;  %v3428_v40 = vld [vmem:[%s6370_s4 + $0x3f0] sm:$0xff]  ;;  %v504_v47 = vmul.f32 %v5028_v45, %v426_v35 }
  0xce   : > { %v1012_v52 = vpop.permute.xlu1 %1011  ;;  %v1027_v54 = vpop.permute.xlu0 %1026  ;;  %3664 = vmatprep.subr.mxu0 %v1322_v44  ;;  %4122 = vmatprep.subr.mxu1 %v1343_v46  ;;  %v3412_v41 = vld [vmem:[%s6370_s4 + $0x370] sm:$0xff]  ;;  %v632_v44 = vmax.f32 %v560_v27, 0.0 }
  0xcf   : > { %v1181_v59 = vmul.f32 %v1012_v52, %v677_v36  ;;  %v1184_v60 = vmul.f32 %v1027_v54, %v680_v42  ;;  %3665 = vmatpush3.msra.mxu0 %v1306_v48  ;;  %4123 = vmatpush3.msra.mxu1 %v1343_v46  ;;  %v408_v36 = vld [vmem:[%s5017_s12 + $0x30] sm:$0xff]  ;;  %v580_v46 = vadd.f32 %v5044_v53, %v502_v30  ;;  %v633_v52 = vmax.f32 %v561_v28, 0.0  ;;  %v3409_v28 = vld [vmem:[%s6370_s4 + $0x358] sm:$0xff] }
  0xd0   : > { %v1372_v2 = vld [vmem:[#allocation2 + $0x151] sm:$0xff]  ;;  %3666 = vmatprep.subr.mxu0 %v1321_v50  ;;  %4124 = vmatprep.subr.mxu1 %v1342_v51  ;;  %v486_v48 = vmul.f32 %v5028_v45, %v408_v36  ;;  %v562_v54 = vadd.f32 %v5044_v53, %v484_v34  ;;  %v582_v63 = vadd.f32 %v5044_v53, %v504_v47 }
  0xd1   : > { %1253 = vst [vmem:[#allocation2 + $0x178] sm:$0x1] %v1181_v59  ;;  %1256 = vst [vmem:[#allocation2 + $0x190] sm:$0xff] %v1184_v60  ;;  %4100 = vmatmul.mubr.f32.gmra.mxu1 %v1372_v2  ;;  %1526 = vmatmul.mubr.f32.gmra.mxu0 %v1184_v60  ;;  %v506_v59 = vmul.f32 %v5028_v45, %v428_v49  ;;  %v3426_v60 = vld [vmem:[%s6370_s4 + $0x3e0] sm:$0xff]  ;;  %v432_v27 = vld [vmem:[%s5017_s12 + $0xf0] sm:$0xff] }
  0xd2   : > { %v867_v6 = vpop.permute.xlu0 %866  ;;  %v777_v7 = vpop.permute.xlu1 %776  ;;  %3667 = vmatpush3.msra.mxu0 %v1305_v62  ;;  %4125 = vmatpush3.msra.mxu1 %v1342_v51  ;;  %v564_v0 = vadd.f32 %v5044_v53, %v486_v48  ;;  %v654_v16 = vmax.f32 %v582_v63, 0.0  ;;  %v3422_v63 = vld [vmem:[%s6370_s4 + $0x3c0] sm:$0xff] }
  0xd3   : > { %v1152_v13 = vmul.f32 %v867_v6, %v648_v55  ;;  %v1134_v14 = vmul.f32 %v777_v7, %v630_v61  ;;  %3668 = vmatprep.subr.mxu0 %v1320_v3  ;;  %4126 = vmatprep.subr.mxu1 %v1341_v4  ;;  %v410_v55 = vld [vmem:[%s5017_s12 + $0x40] sm:$0xff]  ;;  %v634_v6 = vmax.f32 %v562_v54, 0.0  ;;  %v3443_v54 = vld [vmem:[%s6370_s4 + $0x468] sm:$0xff] }
  0xd4   : > { %v1373_v20 = vld [vmem:[#allocation2 + $0x161] sm:$0xff]  ;;  %3669 = vmatpush3.msra.mxu0 %v1304_v5  ;;  %4127 = vmatpush3.msra.mxu1 %v1341_v4  ;;  %v488_v2 = vmul.f32 %v5028_v45, %v410_v55  ;;  %v652_v5 = vmax.f32 %v580_v46, 0.0 }
  0xd5   : > { %1206 = vst [vmem:[#allocation2] sm:$0xff] %v1134_v14  ;;  %4102 = vmatprep.mubr.f32.mxu1 %v1373_v20  ;;  %3670 = vmatprep.subr.mxu0 %v1319_v10  ;;  %v430_v7 = vld [vmem:[%s5017_s12 + $0xe0] sm:$0xff]  ;;  %v3423_v46 = vld [vmem:[%s6370_s4 + $0x3c8] sm:$0xff] }
  0xd6   : > { %v1022_v24 = vpop.permute.xlu0 %1021  ;;  %v1032_v25 = vpop.permute.xlu1 %1031  ;;  %3671 = vmatpush3.msra.mxu0 %v1303_v17  ;;  %1700 = vmatprep.mubr.f32.mxu0 %v1152_v13  ;;  %v3425_v13 = vld [vmem:[%s6370_s4 + $0x3d8] sm:$0xff]  ;;  %v584_v17 = vadd.f32 %v5044_v53, %v506_v59  ;;  %v566_v19 = vadd.f32 %v5044_v53, %v488_v2  ;;  %v508_v20 = vmul.f32 %v5028_v45, %v430_v7  ;;  %v411_v59 = vld [vmem:[%s5017_s12 + $0x48] sm:$0x1] }
  0xd7   : > { %v1183_v31 = vmul.f32 %v1022_v24, %v679_v8  ;;  %v1185_v32 = vmul.f32 %v1032_v25, %v681_v15  ;;  %4128 = vmatprep.subr.mxu1 %v1340_v21  ;;  %1701 = vmatmul.mubr.f32.vlgmr.msra.gmra.mxu0 %v1134_v14  ;;  %v412_v8 = vld [vmem:[%s5017_s12 + $0x50] sm:$0xff]  ;;  %v407_v25 = vld [vmem:[%s5017_s12 + $0x28] sm:$0x1]  ;;  %v3441_v7 = vld [vmem:[%s6370_s4 + $0x458] sm:$0xff] }
  0xd8   : > { %v1374_v38 = vld [vmem:[#allocation2 + $0x171] sm:$0xff]  ;;  %4129 = vmatpush3.msra.mxu1 %v1340_v21  ;;  %3720 = vmatprep.subr.mxu0 %v3429_v23  ;;  %v636_v23 = vmax.f32 %v564_v0, 0.0  ;;  %v490_v24 = vmul.f32 %v5028_v45, %v412_v8  ;;  %v586_v34 = vadd.f32 %v5044_v53, %v508_v20  ;;  %v485_v35 = vmul.f32 %v5028_v45, %v407_v25 }
  0xd9   : > { %1255 = vst [vmem:[#allocation2 + $0x188] sm:$0x1] %v1183_v31  ;;  %1257 = vst [vmem:[#allocation2 + $0x198] sm:$0x1] %v1185_v32  ;;  %4103 = vmatmul.mubr.f32.gmra.mxu1 %v1374_v38  ;;  %4130 = vmatprep.subr.mxu1 %v1339_v29  ;;  %v656_v32 = vmax.f32 %v584_v17, 0.0 }
  0xda   : > { %v877_v42 = vpop.permute.xlu0 %876  ;;  %v782_v43 = vpop.permute.xlu1 %781  ;;  %4131 = vmatpush3.msra.mxu1 %v1339_v29  ;;  %3721 = vmatpush3.msra.mxu0 %v3413_v37  ;;  %v3424_v29 = vld [vmem:[%s6370_s4 + $0x3d0] sm:$0xff]  ;;  %v568_v38 = vadd.f32 %v5044_v53, %v490_v24  ;;  %v658_v48 = vmax.f32 %v586_v34, 0.0  ;;  %v563_v49 = vadd.f32 %v5044_v53, %v485_v35  ;;  %v5465_v24 = vld [vmem:[%s6368_s2] ss:$0 sm:$0xff]  ;;  %v417_v34 = vld [vmem:[%s5017_s12 + $0x78] sm:$0x1] }
  0xdb   : > { %v5322_v50 = vmul.f32 %v877_v42, %v650_v26  ;;  %v1135_v51 = vmul.f32 %v782_v43, %v631_v33  ;;  %4132 = vmatprep.subr.mxu1 %v1338_v39  ;;  %3722 = vmatprep.subr.mxu0 %v3428_v40  ;;  %v638_v33 = vmax.f32 %v566_v19, 0.0  ;;  %v409_v40 = vld [vmem:[%s5017_s12 + $0x38] sm:$0x1]  ;;  %v3444_v43 = vld [vmem:[%s6370_s4 + $0x470] sm:$0xff]  ;;  %v5457_v19 = vld [vmem:[%s6369_s3] ss:$0 sm:$0xff] }
  0xdc   : > { %4133 = vmatpush3.msra.mxu1 %v1338_v39  ;;  %3723 = vmatpush3.msra.mxu0 %v3412_v41  ;;  %v510_v39 = vmul.f32 %v5028_v45, %v432_v27  ;;  %v414_v41 = vld [vmem:[%s5017_s12 + $0x60] sm:$0xff]  ;;  %v635_v2 = vmax.f32 %v563_v49, 0.0  ;;  %v3420_v27 = vld [vmem:[%s6370_s4 + $0x3b0] sm:$0xff] }
  0xdd   : > { %1207 = vst [vmem:[#allocation2 + $0x8] sm:$0x1] %v1135_v51  ;;  %4134 = vmatprep.subr.mxu1 %v1337_v18  ;;  %1705 = vmatprep.mubr.f32.mxu0 %v5322_v50  ;;  %v487_v51 = vmul.f32 %v5028_v45, %v409_v40  ;;  %v3404_v35 = vld [vmem:[%s6370_s4 + $0x330] sm:$0xff] }
  0xde   : > { %v787_v61 = vpop.permute.xlu0 %786  ;;  %v792_v62 = vpop.permute.xlu1 %791  ;;  %4135 = vmatpush3.msra.mxu1 %v1337_v18  ;;  %3724 = vmatprep.subr.mxu0 %v3427_v56 }
  0xdf   : > { %v5346_v3 = vmul.f32 %v787_v61, %v632_v44  ;;  %v1137_v4 = vmul.f32 %v792_v62, %v633_v52  ;;  %4136 = vmatprep.subr.mxu1 %v1336_v57  ;;  %3725 = vmatpush3.msra.mxu0 %v3411_v58  ;;  %v3408_v44 = vld [vmem:[%s6370_s4 + $0x350] sm:$0xff]  ;;  %v492_v52 = vmul.f32 %v5028_v45, %v414_v41  ;;  %v3442_v61 = vld [vmem:[%s6370_s4 + $0x460] sm:$0xff]  ;;  %v3407_v62 = vld [vmem:[%s6370_s4 + $0x348] sm:$0xff] }
  0xe0   : > { %v1375_v9 = vld [vmem:[#allocation2 + $0x181] sm:$0xff]  ;;  %v1376_v10 = vld [vmem:[#allocation2 + $0x191] sm:$0xff]  ;;  %4137 = vmatpush3.msra.mxu1 %v1336_v57  ;;  %3726 = vmatprep.subr.mxu0 %v3426_v60  ;;  %v640_v57 = vmax.f32 %v568_v38, 0.0  ;;  %v588_v58 = vadd.f32 %v5044_v53, %v510_v39 }
  0xe1   : > { %1208 = vst [vmem:[#allocation2 + $0x10] sm:$0xff] %v5346_v3  ;;  %1209 = vst [vmem:[#allocation2 + $0x18] sm:$0x1] %v1137_v4  ;;  %4105 = vmatprep.mubr.f32.mxu1 %v1375_v9  ;;  %4138 = vmatprep.subr.mxu1 %v1335_v1  ;;  %v434_v60 = vld [vmem:[%s5017_s12 + $0x100] sm:$0xff]  ;;  %v565_v4 = vadd.f32 %v5044_v53, %v487_v51  ;;  %v3419_v39 = vld [vmem:[%s6370_s4 + $0x3a8] sm:$0xff] }
  0xe2   : > { %v887_v14 = vpop.permute.xlu0 %886  ;;  %v797_v15 = vpop.permute.xlu1 %796  ;;  %4106 = vmatmul.mubr.f32.gmra.mxu1 %v1376_v10  ;;  %1706 = vmatmul.mubr.f32.gmra.mxu0 %v5346_v3  ;;  %v660_v10 = vmax.f32 %v588_v58, 0.0  ;;  %v3438_v38 = vld [vmem:[%s6370_s4 + $0x440] sm:$0xff] }
  0xe3   : > { %v5364_v21 = vmul.f32 %v887_v14, %v652_v5  ;;  %v5366_v22 = vmul.f32 %v797_v15, %v634_v6  ;;  %4139 = vmatpush3.msra.mxu1 %v1335_v1  ;;  %3727 = vmatpush3.msra.mxu0 %v3410_v11  ;;  %v489_v5 = vmul.f32 %v5028_v45, %v411_v59  ;;  %v416_v14 = vld [vmem:[%s5017_s12 + $0x70] sm:$0xff]  ;;  %v637_v17 = vmax.f32 %v565_v4, 0.0  ;;  %v3418_v58 = vld [vmem:[%s6370_s4 + $0x3a0] sm:$0xff]  ;;  %v419_v59 = vld [vmem:[%s5017_s12 + $0x88] sm:$0x1] }
  0xe4   : > { %v1295_v26 = vld [vmem:[#allocation2 + $0x1] sm:$0xff]  ;;  %4152 = vmatprep.subr.mxu1 %v3445_v12  ;;  %3728 = vmatprep.subr.mxu0 %v3425_v13  ;;  %v512_v6 = vmul.f32 %v5028_v45, %v434_v60  ;;  %v570_v11 = vadd.f32 %v5044_v53, %v492_v52  ;;  %v3440_v13 = vld [vmem:[%s6370_s4 + $0x450] sm:$0xff]  ;;  %v3421_v53 = vld [vmem:[%s6370_s4 + $0x3b8] sm:$0xff] }
  0xe5   : > { %1210 = vst [vmem:[#allocation2 + $0x20] sm:$0xff] %v5366_v22  ;;  %4140 = vmatprep.mubr.f32.mxu1 %v1295_v26  ;;  %1710 = vmatprep.mubr.f32.mxu0 %v5364_v21  ;;  %v3406_v45 = vld [vmem:[%s6370_s4 + $0x340] sm:$0xff]  ;;  %v567_v20 = vadd.f32 %v5457_v19, %v489_v5  ;;  %v3405_v26 = vld [vmem:[%s6370_s4 + $0x338] sm:$0xff]  ;;  %v3403_v52 = vld [vmem:[%s6370_s4 + $0x328] sm:$0xff] }
  0xe6   : > { %v897_v30 = vpop.permute.xlu0 %896  ;;  %v807_v31 = vpop.permute.xlu1 %806  ;;  %1711 = vmatmul.mubr.f32.gmra.mxu0 %v5366_v22  ;;  %v3402_v60 = vld [vmem:[%s6370_s4 + $0x320] sm:$0xff] }
  0xe7   : > { %v5382_v36 = vmul.f32 %v897_v30, %v654_v16  ;;  %v5384_v37 = vmul.f32 %v807_v31, %v636_v23  ;;  %3729 = vmatpush3.msra.mxu0 %v3409_v28  ;;  %v590_v23 = vadd.f32 %v5457_v19, %v512_v6  ;;  %v642_v30 = vmax.f32 %v570_v11, 0.0 }
  0xe8   : > { %v5390_v42 = vld [vmem:[#allocation2 + $0x11] sm:$0xff]  ;;  %3730 = vmatprep.subr.mxu0 %v3424_v29  ;;  %v494_v31 = vmul.f32 %v5465_v24, %v416_v14  ;;  %v497_v11 = vmul.f32 %v5465_v24, %v419_v59  ;;  %v3435_v14 = vld [vmem:[%s6370_s4 + $0x428] sm:$0xff]  ;;  %v3430_v59 = vld [vmem:[%s6370_s4 + $0x400] sm:$0xff] }
  0xe9   : > { %1212 = vst [vmem:[#allocation2 + $0x30] sm:$0xff] %v5384_v37  ;;  %4141 = vmatmul.mubr.f32.vlgmr.msra.gmra.mxu1 %v5390_v42  ;;  %1715 = vmatprep.mubr.f32.mxu0 %v5382_v36  ;;  %v662_v49 = vmax.f32 %v590_v23, 0.0  ;;  %v3400_v23 = vld [vmem:[%s6370_s4 + $0x310] sm:$0xff] }
  0xea   : > { %v907_v18 = vpop.permute.xlu0 %906  ;;  %v817_v47 = vpop.permute.xlu1 %816  ;;  %1716 = vmatmul.mubr.f32.gmra.mxu0 %v5384_v37  ;;  %4153 = vmatpush3.msra.mxu1 %v3445_v12  ;;  %v413_v12 = vld [vmem:[%s5017_s12 + $0x58] sm:$0x1]  ;;  %v572_v51 = vadd.f32 %v5457_v19, %v494_v31  ;;  %v3434_v31 = vld [vmem:[%s6370_s4 + $0x420] sm:$0xff] }
  0xeb   : > { %v5411_v55 = vmul.f32 %v907_v18, %v656_v32  ;;  %v5413_v56 = vmul.f32 %v817_v47, %v638_v33  ;;  %4154 = vmatprep.subr.mxu1 %v3444_v43  ;;  %3731 = vmatpush3.msra.mxu0 %v3408_v44  ;;  %v491_v25 = vmul.f32 %v5465_v24, %v413_v12  ;;  %v3439_v32 = vld [vmem:[%s6370_s4 + $0x448] sm:$0xff]  ;;  %v436_v12 = vld [vmem:[%s5017_s12 + $0x110] sm:$0xff] }
  0xec   : > { %4155 = vmatpush3.msra.mxu1 %v3444_v43  ;;  %3732 = vmatprep.subr.mxu0 %v3423_v46  ;;  %v415_v33 = vld [vmem:[%s5017_s12 + $0x68] sm:$0x1]  ;;  %v639_v43 = vmax.f32 %v567_v20, 0.0  ;;  %v495_v18 = vmul.f32 %v5465_v24, %v417_v34 }
  0xed   : > { %1214 = vst [vmem:[#allocation2 + $0x40] sm:$0xff] %v5413_v56  ;;  %1720 = vmatprep.mubr.f32.mxu0 %v5411_v55  ;;  %4156 = vmatprep.subr.mxu1 %v3443_v54  ;;  %v569_v44 = vadd.f32 %v5457_v19, %v491_v25  ;;  %v493_v46 = vmul.f32 %v5465_v24, %v415_v33  ;;  %v3399_v33 = vld [vmem:[%s6370_s4 + $0x308] sm:$0xff] }
  0xee   : > { %v917_v0 = vpop.permute.xlu0 %916  ;;  %v827_v1 = vpop.permute.xlu1 %826  ;;  %1721 = vmatmul.mubr.f32.gmra.mxu0 %v5413_v56  ;;  %4157 = vmatpush3.msra.mxu1 %v3443_v54  ;;  %v3437_v54 = vld [vmem:[%s6370_s4 + $0x438] sm:$0xff]  ;;  %v514_v25 = vmul.f32 %v5465_v24, %v436_v12 }
  0xef   : > { %v5436_v8 = vmul.f32 %v917_v0, %v658_v48  ;;  %v5438_v9 = vmul.f32 %v827_v1, %v640_v57  ;;  %4158 = vmatprep.subr.mxu1 %v3442_v61  ;;  %3733 = vmatpush3.msra.mxu0 %v3407_v62  ;;  %v418_v57 = vld [vmem:[%s5017_s12 + $0x80] sm:$0xff]  ;;  %v641_v0 = vmax.f32 %v569_v44, 0.0  ;;  %v571_v1 = vadd.f32 %v5457_v19, %v493_v46 }
  0xf0   : > { %4159 = vmatpush3.msra.mxu1 %v3442_v61  ;;  %3734 = vmatprep.subr.mxu0 %v3422_v63  ;;  %v3436_v61 = vld [vmem:[%s6370_s4 + $0x430] sm:$0xff]  ;;  %v496_v4 = vmul.f32 %v5465_v24, %v418_v57  ;;  %v3415_v24 = vld [vmem:[%s6370_s4 + $0x388] sm:$0xff]  ;;  %v3414_v46 = vld [vmem:[%s6370_s4 + $0x380] sm:$0xff] }
  0xf1   : > { %1216 = vst [vmem:[#allocation2 + $0x50] sm:$0xff] %v5438_v9  ;;  %1725 = vmatprep.mubr.f32.mxu0 %v5436_v8  ;;  %4160 = vmatprep.subr.mxu1 %v3441_v7 }
  0xf2   : > { %v802_v15 = vpop.permute.xlu0 %801  ;;  %v927_v16 = vpop.permute.xlu1 %926  ;;  %1726 = vmatmul.mubr.f32.gmra.mxu0 %v5438_v9  ;;  %4161 = vmatpush3.msra.mxu1 %v3441_v7  ;;  %v644_v7 = vmax.f32 %v572_v51, 0.0  ;;  %v574_v20 = vadd.f32 %v5457_v19, %v496_v4 }
  0xf3   : > { %v1139_v28 = vmul.f32 %v802_v15, %v635_v2  ;;  %v5474_v29 = vmul.f32 %v927_v16, %v660_v10  ;;  %3735 = vmatpush3.msra.mxu0 %v3406_v45  ;;  %4162 = vmatprep.subr.mxu1 %v3440_v13  ;;  %v573_v2 = vadd.f32 %v5457_v19, %v495_v18  ;;  %v3417_v10 = vld [vmem:[%s6370_s4 + $0x398] sm:$0xff] }
  0xf4   : > { %3736 = vmatprep.subr.mxu0 %v3421_v53  ;;  %4163 = vmatpush3.msra.mxu1 %v3440_v13  ;;  %v3401_v13 = vld [vmem:[%s6370_s4 + $0x318] sm:$0xff]  ;;  %v3416_v53 = vld [vmem:[%s6370_s4 + $0x390] sm:$0xff] }
  0xf5   : > { %1211 = vst [vmem:[#allocation2 + $0x28] sm:$0x1] %v1139_v28  ;;  %1730 = vmatprep.mubr.f32.mxu0 %v5474_v29  ;;  %3737 = vmatpush3.msra.mxu0 %v3405_v26  ;;  %v645_v28 = vmax.f32 %v573_v2, 0.0 }
  0xf6   : > { %v812_v40 = vpop.permute.xlu0 %811  ;;  %v837_v41 = vpop.permute.xlu1 %836  ;;  %4164 = vmatprep.subr.mxu1 %v3439_v32  ;;  %3738 = vmatprep.subr.mxu0 %v3420_v27 }
  0xf7   : > { %v1141_v47 = vmul.f32 %v812_v40, %v637_v17  ;;  %v5495_v48 = vmul.f32 %v837_v41, %v642_v30  ;;  %4165 = vmatpush3.msra.mxu1 %v3439_v32  ;;  %3739 = vmatpush3.msra.mxu0 %v3404_v35  ;;  %v643_v17 = vmax.f32 %v571_v1, 0.0  ;;  %v575_v30 = vadd.f32 %v5457_v19, %v497_v11  ;;  %v3433_v40 = vld [vmem:[%s6370_s4 + $0x418] sm:$0xff] }
  0xf8   : > { %4166 = vmatprep.subr.mxu1 %v3438_v38  ;;  %3740 = vmatprep.subr.mxu0 %v3419_v39  ;;  %v592_v39 = vadd.f32 %v5457_v19, %v514_v25  ;;  %v3398_v19 = vld [vmem:[%s6370_s4 + $0x300] sm:$0xff] }
  0xf9   : > { %1213 = vst [vmem:[#allocation2 + $0x38] sm:$0x1] %v1141_v47  ;;  %1218 = vst [vmem:[#allocation2 + $0x60] sm:$0xff] %v5495_v48  ;;  %1731 = vmatmul.mubr.f32.gmra.mxu0 %v5495_v48  ;;  %4167 = vmatpush3.msra.mxu1 %v3438_v38  ;;  %v646_v38 = vmax.f32 %v574_v20, 0.0  ;;  %v647_v44 = vmax.f32 %v575_v30, 0.0  ;;  %v3432_v47 = vld [vmem:[%s6370_s4 + $0x410] sm:$0xff] }
  0xfa   : > { %v822_v62 = vpop.permute.xlu0 %821  ;;  %v937_v63 = vpop.permute.xlu1 %936  ;;  %3741 = vmatpush3.msra.mxu0 %v3403_v52  ;;  %4168 = vmatprep.subr.mxu1 %v3437_v54  ;;  %v664_v52 = vmax.f32 %v592_v39, 0.0  ;;  %v3493_v20 = vld [vmem:[%s6373_s7 + $0x2e8] sm:$0xff]  ;;  %v3476_v25 = vld [vmem:[%s6373_s7 + $0x260] sm:$0xff]  ;;  %v3491_v30 = vld [vmem:[%s6373_s7 + $0x2d8] sm:$0xff] }
  0xfb   : > { %v1143_v5 = vmul.f32 %v822_v62, %v639_v43  ;;  %v5520_v6 = vmul.f32 %v937_v63, %v662_v49  ;;  %3742 = vmatprep.subr.mxu0 %v3418_v58  ;;  %4169 = vmatpush3.msra.mxu1 %v3437_v54  ;;  %v3472_v39 = vld [vmem:[%s6373_s7 + $0x240] sm:$0xff] }
  0xfc   : > { %v5527_v45 = vld [vmem:[#allocation2 + $0x21] sm:$0xff]  ;;  %3743 = vmatpush3.msra.mxu0 %v3402_v60  ;;  %4170 = vmatprep.subr.mxu1 %v3436_v61 }
  0xfd   : > { %1215 = vst [vmem:[#allocation2 + $0x48] sm:$0x1] %v1143_v5  ;;  %4143 = vmatprep.mubr.f32.mxu1 %v5527_v45  ;;  %1735 = vmatprep.mubr.f32.mxu0 %v5520_v6 }
  0xfe   : > { %v832_v15 = vpop.permute.xlu0 %831  ;;  %v847_v16 = vpop.permute.xlu1 %846  ;;  %3744 = vmatprep.subr.mxu0 %v3417_v10  ;;  %4171 = vmatpush3.msra.mxu1 %v3436_v61 }
  0xff   : > { %v1145_v26 = vmul.f32 %v832_v15, %v641_v0  ;;  %v5545_v27 = vmul.f32 %v847_v16, %v644_v7  ;;  %3745 = vmatpush3.msra.mxu0 %v3401_v13  ;;  %4172 = vmatprep.subr.mxu1 %v3435_v14  ;;  %v3495_v13 = vld [vmem:[%s6373_s7 + $0x2f8] sm:$0xff]  ;;  %v3494_v15 = vld [vmem:[%s6373_s7 + $0x2f0] sm:$0xff] }
 0x100   : > { %v5551_v32 = vld [vmem:[#allocation2 + $0x31] sm:$0xff]  ;;  %3746 = vmatprep.subr.mxu0 %v3416_v53  ;;  %4173 = vmatpush3.msra.mxu1 %v3435_v14 }
 0x101   : > { %1217 = vst [vmem:[#allocation2 + $0x58] sm:$0x1] %v1145_v26  ;;  %1220 = vst [vmem:[#allocation2 + $0x70] sm:$0xff] %v5545_v27  ;;  %4144 = vmatmul.mubr.f32.gmra.mxu1 %v5551_v32  ;;  %3747 = vmatpush3.msra.mxu0 %v3400_v23  ;;  %v3463_v14 = vld [vmem:[%s6373_s7 + $0x1f8] sm:$0xff]  ;;  %v3478_v53 = vld [vmem:[%s6373_s7 + $0x270] sm:$0xff] }
 0x102   : > { %v842_v34 = vpop.permute.xlu0 %841  ;;  %v852_v35 = vpop.permute.xlu1 %851  ;;  %4174 = vmatprep.subr.mxu1 %v3434_v31  ;;  %1736 = vmatmul.mubr.f32.gmra.mxu0 %v5545_v27  ;;  %v3462_v16 = vld [vmem:[%s6373_s7 + $0x1f0] sm:$0xff]  ;;  %v3461_v23 = vld [vmem:[%s6373_s7 + $0x1e8] sm:$0xff]  ;;  %v3492_v26 = vld [vmem:[%s6373_s7 + $0x2e0] sm:$0xff] }
 0x103   : > { %v1147_v41 = vmul.f32 %v842_v34, %v643_v17  ;;  %v1149_v43 = vmul.f32 %v852_v35, %v645_v28  ;;  %3748 = vmatprep.subr.mxu0 %v3415_v24  ;;  %4175 = vmatpush3.msra.mxu1 %v3434_v31  ;;  %v3477_v17 = vld [vmem:[%s6373_s7 + $0x268] sm:$0xff]  ;;  %v3475_v28 = vld [vmem:[%s6373_s7 + $0x258] sm:$0xff]  ;;  %v3490_v24 = vld [vmem:[%s6373_s7 + $0x2d0] sm:$0xff] }
 0x104   : > { %v1299_v18 = vld [vmem:[#allocation2 + $0x41] sm:$0xff]  ;;  %3749 = vmatpush3.msra.mxu0 %v3399_v33  ;;  %1985 = vmatprep.mubr.f32.mxu0 %v5322_v50  ;;  %v3459_v31 = vld [vmem:[%s6373_s7 + $0x1d8] sm:$0xff]  ;;  %v3458_v33 = vld [vmem:[%s6373_s7 + $0x1d0] sm:$0xff] }
 0x105   : > { %1219 = vst [vmem:[#allocation2 + $0x68] sm:$0x1] %v1147_v41  ;;  %1221 = vst [vmem:[#allocation2 + $0x78] sm:$0x1] %v1149_v43  ;;  %4146 = vmatprep.mubr.f32.mxu1 %v1299_v18  ;;  %4176 = vmatprep.subr.mxu1 %v3433_v40  ;;  %v3431_v50 = vld [vmem:[%s6370_s4 + $0x408] sm:$0xff]  ;;  %v3456_v41 = vld [vmem:[%s6373_s7 + $0x1c0] sm:$0xff] }
 0x106   : > { %v857_v49 = vpop.permute.xlu0 %856  ;;  %v862_v51 = vpop.permute.xlu1 %861  ;;  %3750 = vmatprep.subr.mxu0 %v3414_v46  ;;  %4177 = vmatpush3.msra.mxu1 %v3433_v40  ;;  %v3473_v34 = vld [vmem:[%s6373_s7 + $0x248] sm:$0xff]  ;;  %v3488_v40 = vld [vmem:[%s6373_s7 + $0x2c0] sm:$0xff]  ;;  %v3471_v43 = vld [vmem:[%s6373_s7 + $0x238] sm:$0xff] }
 0x107   : > { %v1150_v54 = vmul.f32 %v857_v49, %v646_v38  ;;  %v1151_v57 = vmul.f32 %v862_v51, %v647_v44  ;;  %3751 = vmatpush3.msra.mxu0 %v3398_v19  ;;  %4178 = vmatprep.subr.mxu1 %v3432_v47  ;;  %v3489_v35 = vld [vmem:[%s6373_s7 + $0x2c8] sm:$0xff]  ;;  %v3487_v44 = vld [vmem:[%s6373_s7 + $0x2b8] sm:$0xff]  ;;  %v3486_v19 = vld [vmem:[%s6373_s7 + $0x2b0] sm:$0xff] }
 0x108   : > { %v1300_v58 = vld [vmem:[#allocation2 + $0x51] sm:$0xff]  ;;  %1986 = vmatmul.mubr.f32.vlgmr.msra.gmra.mxu0 %v5346_v3  ;;  %4179 = vmatpush3.msra.mxu1 %v3432_v47  ;;  %v3457_v38 = vld [vmem:[%s6373_s7 + $0x1c8] sm:$0xff] }
 0x109   : > { %1222 = vst [vmem:[#allocation2 + $0x80] sm:$0xff] %v1150_v54  ;;  %1223 = vst [vmem:[#allocation2 + $0x88] sm:$0x1] %v1151_v57  ;;  %4147 = vmatmul.mubr.f32.gmra.mxu1 %v1300_v58  ;;  %1990 = vmatprep.mubr.f32.mxu0 %v5364_v21  ;;  %v3455_v46 = vld [vmem:[%s6373_s7 + $0x1b8] sm:$0xff]  ;;  %v3454_v47 = vld [vmem:[%s6373_s7 + $0x1b0] sm:$0xff] }
 0x10a   : > { %v947_v60 = vpop.permute.xlu0 %946  ;;  %v872_v61 = vpop.permute.xlu1 %871  ;;  %4180 = vmatprep.subr.mxu1 %v3431_v50  ;;  %v3469_v49 = vld [vmem:[%s6373_s7 + $0x228] sm:$0xff]  ;;  %v3484_v57 = vld [vmem:[%s6373_s7 + $0x2a0] sm:$0xff] }
 0x10b   : > { %v1168_v62 = vmul.f32 %v947_v60, %v664_v52  ;;  %4181 = vmatpush3.msra.mxu1 %v3431_v50  ;;  %v3485_v51 = vld [vmem:[%s6373_s7 + $0x2a8] sm:$0xff]  ;;  %v3452_v50 = vld [vmem:[%s6373_s7 + $0x1a0] sm:$0xff]  ;;  %v3483_v60 = vld [vmem:[%s6373_s7 + $0x298] sm:$0xff] }
 0x10c   : > { %v1301_v63 = vld [vmem:[#allocation2 + $0x61] sm:$0xff]  ;;  %v1302_v0 = vld [vmem:[#allocation2 + $0x71] sm:$0xff]  ;;  %4182 = vmatprep.subr.mxu1 %v3430_v59  ;;  %1991 = vmatmul.mubr.f32.gmra.mxu0 %v5366_v22 }
 0x10d   : > { %4149 = vmatprep.mubr.f32.mxu1 %v1301_v63  ;;  %4183 = vmatpush3.msra.mxu1 %v3430_v59  ;;  %v3453_v52 = vld [vmem:[%s6373_s7 + $0x1a8] sm:$0xff]  ;;  %v3467_v59 = vld [vmem:[%s6373_s7 + $0x218] sm:$0xff] }
 0x10e   : > { %v882_v3 = vpop.permute.xlu0 %881  ;;  %v892_v1 = vpop.permute.xlu1 %891  ;;  %4150 = vmatmul.mubr.f32.gmra.mxu1 %v1302_v0  ;;  %1995 = vmatprep.mubr.f32.mxu0 %v5382_v36  ;;  %v3451_v61 = vld [vmem:[%s6373_s7 + $0x198] sm:$0xff] }
 0x10f   : > { %4184 = vmatprep.mubr.f32.mxu1 %v5390_v42  ;;  %4196 = vmatprep.subr.mxu1 %v3495_v13  ;;  %v3465_v3 = vld [vmem:[%s6373_s7 + $0x208] sm:$0xff] }
 0x110   : > { %1996 = vmatmul.mubr.f32.gmra.mxu0 %v5384_v37  ;;  %v1871_v42 = vld [vmem:[#allocation2 + $0x81] sm:$0xff] }
 0x111   : > { %2000 = vmatprep.mubr.f32.mxu0 %v5411_v55  ;;  %v3481_v1 = vld [vmem:[%s6373_s7 + $0x288] sm:$0xff] }
 0x112   : > { %v902_v21 = vpop.permute.xlu0 %901  ;;  %v912_v2 = vpop.permute.xlu1 %911  ;;  %4185 = vmatmul.mubr.f32.vlgmr.msra.gmra.mxu1 %v5527_v45 }
 0x113   : > { %4187 = vmatprep.mubr.f32.mxu1 %v5551_v32  ;;  %4197 = vmatpush3.msra.mxu1 %v3495_v13  ;;  %v3474_v32 = vld [vmem:[%s6373_s7 + $0x250] sm:$0xff]  ;;  %v3449_v21 = vld [vmem:[%s6373_s7 + $0x188] sm:$0xff]  ;;  %v3464_v2 = vld [vmem:[%s6373_s7 + $0x200] sm:$0xff] }
 0x114   : > { %2001 = vmatmul.mubr.f32.gmra.mxu0 %v5413_v56  ;;  %4198 = vmatprep.subr.mxu1 %v3494_v15 }
 0x115   : > { %2005 = vmatprep.mubr.f32.mxu0 %v5436_v8  ;;  %4199 = vmatpush3.msra.mxu1 %v3494_v15 }
 0x116   : > { %v922_v22 = vpop.permute.xlu0 %921  ;;  %v932_v4 = vpop.permute.xlu1 %931  ;;  %4188 = vmatmul.mubr.f32.gmra.mxu1 %v1299_v18  ;;  %4200 = vmatprep.subr.mxu1 %v3493_v20  ;;  %v3470_v18 = vld [vmem:[%s6373_s7 + $0x230] sm:$0xff] }
 0x117   : > { %4190 = vmatprep.mubr.f32.mxu1 %v1300_v58  ;;  %4201 = vmatpush3.msra.mxu1 %v3493_v20  ;;  %v4561_v58 = vmov 0.0   ;;  %v3480_v22 = vld [vmem:[%s6373_s7 + $0x280] sm:$0xff] }
 0x118   : > { %2006 = vmatmul.mubr.f32.gmra.mxu0 %v5438_v9  ;;  %4202 = vmatprep.subr.mxu1 %v3492_v26  ;;  %2155 = vst [vmem:[#allocation3 + $0x1a] sm:$0x3] %v4561_v58  ;;  %2139 = vst [vmem:[#allocation3] sm:$0xff] %v4561_v58  ;;  %v3448_v4 = vld [vmem:[%s6373_s7 + $0x180] sm:$0xff] }
 0x119   : > { %2010 = vmatprep.mubr.f32.mxu0 %v5474_v29  ;;  %4203 = vmatpush3.msra.mxu1 %v3492_v26  ;;  %2140 = vst [vmem:[#allocation3 + $0x8] sm:$0xf] %v4561_v58  ;;  %2142 = vst [vmem:[#allocation3 + $0x90] sm:$0xff] %v4561_v58 }
 0x11a   : > { %v942_v36 = vpop.permute.xlu0 %941  ;;  %v952_v37 = vpop.permute.xlu1 %951  ;;  %4191 = vmatmul.mubr.f32.gmra.mxu1 %v1301_v63  ;;  %4204 = vmatprep.subr.mxu1 %v3491_v30  ;;  %2143 = vst [vmem:[#allocation3 + $0x98] sm:$0xf] %v4561_v58  ;;  %2145 = vst [vmem:[#allocation3 + $0x10] sm:$0x3] %v4561_v58  ;;  %v3482_v63 = vld [vmem:[%s6373_s7 + $0x290] sm:$0xff] }
 0x11b   : > { %4193 = vmatprep.mubr.f32.mxu1 %v1302_v0  ;;  %4205 = vmatpush3.msra.mxu1 %v3491_v30  ;;  %2146 = vst [vmem:[#allocation3 + $0x20] sm:$0x3] %v4561_v58  ;;  %2147 = vst [vmem:[#allocation3 + $0x30] sm:$0x3] %v4561_v58  ;;  %v3450_v0 = vld [vmem:[%s6373_s7 + $0x190] sm:$0xff]  ;;  %v2266_v36 = vld [vmem:[%s6373_s7 + $0xf8] sm:$0xff] }
 0x11c   : > { %2011 = vmatmul.mubr.f32.gmra.mxu0 %v5495_v48  ;;  %4206 = vmatprep.subr.mxu1 %v3490_v24  ;;  %2148 = vst [vmem:[#allocation3 + $0x40] sm:$0x3] %v4561_v58  ;;  %2149 = vst [vmem:[#allocation3 + $0x50] sm:$0x3] %v4561_v58  ;;  %v5748_v37 = vld [vmem:[%s6373_s7 + $0x178] sm:$0xff] }
 0x11d   : > { %2015 = vmatprep.mubr.f32.mxu0 %v5520_v6  ;;  %v3479_v6 = vld [vmem:[%s6373_s7 + $0x278] sm:$0xff]  ;;  %4207 = vmatpush3.msra.mxu1 %v3490_v24  ;;  %2150 = vst [vmem:[#allocation3 + $0x60] sm:$0x3] %v4561_v58  ;;  %2151 = vst [vmem:[#allocation3 + $0x70] sm:$0x3] %v4561_v58 }
 0x11e   : > { %v1037_v55 = vpop.permute.xlu0 %1036  ;;  %v1042_v56 = vpop.permute.xlu1 %1041  ;;  %4194 = vmatmul.mubr.f32.gmra.mxu1 %v1871_v42  ;;  %3800 = vmatprep.subr.mxu0 %v3479_v6  ;;  %2152 = vst [vmem:[#allocation3 + $0x80] sm:$0x3] %v4561_v58  ;;  %2156 = vst [vmem:[#allocation3 + $0x2a] sm:$0x3] %v4561_v58 }
 0x11f   : > { %3801 = vmatpush3.msra.mxu0 %v3463_v14  ;;  %4208 = vmatprep.subr.mxu1 %v3489_v35  ;;  %2157 = vst [vmem:[#allocation3 + $0x3a] sm:$0x3] %v4561_v58  ;;  %2158 = vst [vmem:[#allocation3 + $0x4a] sm:$0x3] %v4561_v58 }
 0x120   : > { %2016 = vmatmul.mubr.f32.gmra.mxu0 %v5545_v27  ;;  %3802 = vmatprep.subr.mxu0 %v3478_v53  ;;  %v3460_v27 = vld [vmem:[%s6373_s7 + $0x1e0] sm:$0xff]  ;;  %2159 = vst [vmem:[#allocation3 + $0x5a] sm:$0x3] %v4561_v58  ;;  %2160 = vst [vmem:[#allocation3 + $0x6a] sm:$0x3] %v4561_v58 }
 0x121   : > { %2020 = vmatprep.mubr.f32.mxu0 %v1168_v62  ;;  %3803 = vmatpush3.msra.mxu0 %v3462_v16  ;;  %2161 = vst [vmem:[#allocation3 + $0x7a] sm:$0x3] %v4561_v58  ;;  %2162 = vst [vmem:[#allocation3 + $0x8a] sm:$0x3] %v4561_v58  ;;  %v3466_v62 = vld [vmem:[%s6373_s7 + $0x210] sm:$0xff] }
 0x122   : > { %v1052_v8 = vpop.permute.xlu0 %1051  ;;  %v1062_v5 = vpop.permute.xlu1 %1061  ;;  %3804 = vmatprep.subr.mxu0 %v3477_v17  ;;  %4209 = vmatpush3.msra.mxu1 %v3489_v35  ;;  %2144 = vst [vmem:[#allocation3] sm:$0x3] %v4561_v58  ;;  %2153 = vst [vmem:[#allocation3 + $0x90] sm:$0x3] %v4561_v58 }
 0x123   : > { %3805 = vmatpush3.msra.mxu0 %v3461_v23  ;;  %4210 = vmatprep.subr.mxu1 %v3488_v40  ;;  %2154 = vst [vmem:[#allocation3 + $0xa] sm:$0x3] %v4561_v58  ;;  %2163 = vst [vmem:[#allocation3 + $0x9a] sm:$0x3] %v4561_v58 }
 0x124   : > { %2021 = vmatmul.mubr.f32.gmra.mxu0 %v1150_v54  ;;  %3806 = vmatprep.subr.mxu0 %v3476_v25  ;;  %v3468_v54 = vld [vmem:[%s6373_s7 + $0x220] sm:$0xff]  ;;  %6385 = vst [vmem:[#allocation11_spill] sm:$0xff] %v5748_v37 }
 0x125   : > { %3807 = vmatpush3.msra.mxu0 %v3460_v27  ;;  %4211 = vmatpush3.msra.mxu1 %v3488_v40 }
 0x126   : > { %v1072_v9 = vpop.permute.xlu0 %1071  ;;  %v1082_v29 = vpop.permute.xlu1 %1081  ;;  %3808 = vmatprep.subr.mxu0 %v3475_v28  ;;  %4212 = vmatprep.subr.mxu1 %v3487_v44 }
 0x127   : > { %3809 = vmatpush3.msra.mxu0 %v3459_v31  ;;  %4213 = vmatpush3.msra.mxu1 %v3487_v44 }
 0x128   : > { %3810 = vmatprep.subr.mxu0 %v3474_v32  ;;  %4214 = vmatprep.subr.mxu1 %v3486_v19 }
 0x129   : > { %3811 = vmatpush3.msra.mxu0 %v3458_v33  ;;  %4215 = vmatpush3.msra.mxu1 %v3486_v19 }
 0x12a   : > { %v1092_v7 = vpop.permute.xlu0 %1091  ;;  %v1102_v10 = vpop.permute.xlu1 %1101  ;;  %3812 = vmatprep.subr.mxu0 %v3473_v34  ;;  %4216 = vmatprep.subr.mxu1 %v3485_v51 }
 0x12b   : > { %3813 = vmatpush3.msra.mxu0 %v3457_v38  ;;  %4217 = vmatpush3.msra.mxu1 %v3485_v51 }
 0x12c   : > { %3814 = vmatprep.subr.mxu0 %v3472_v39  ;;  %4218 = vmatprep.subr.mxu1 %v3484_v57 }
 0x12d   : > { %3815 = vmatpush3.msra.mxu0 %v3456_v41  ;;  %4219 = vmatpush3.msra.mxu1 %v3484_v57 }
 0x12e   : > { %v1112_v11 = vpop.permute.xlu0 %1111  ;;  %v1122_v12 = vpop.permute.xlu1 %1121  ;;  %3816 = vmatprep.subr.mxu0 %v3471_v43  ;;  %4220 = vmatprep.subr.mxu1 %v3483_v60 }
 0x12f   : > { %3817 = vmatpush3.msra.mxu0 %v3455_v46  ;;  %4221 = vmatpush3.msra.mxu1 %v3483_v60 }
 0x130   : > { %3818 = vmatprep.subr.mxu0 %v3470_v18  ;;  %4222 = vmatprep.subr.mxu1 %v3482_v63 }
 0x131   : > { %3819 = vmatpush3.msra.mxu0 %v3454_v47  ;;  %4223 = vmatpush3.msra.mxu1 %v3482_v63 }
 0x132   : > { %v1127_v45 = vpop.permute.xlu0 %1126  ;;  %v1132_v48 = vpop.permute.xlu1 %1131  ;;  %3820 = vmatprep.subr.mxu0 %v3469_v49  ;;  %4224 = vmatprep.subr.mxu1 %v3481_v1 }
 0x133   : > { %3821 = vmatpush3.msra.mxu0 %v3453_v52  ;;  %4225 = vmatpush3.msra.mxu1 %v3481_v1 }
 0x134   : > { %3822 = vmatprep.subr.mxu0 %v3468_v54  ;;  %4226 = vmatprep.subr.mxu1 %v3480_v22 }
 0x135   : > { %3823 = vmatpush3.msra.mxu0 %v3452_v50  ;;  %4227 = vmatpush3.msra.mxu1 %v3480_v22 }
 0x136   : > { %3824 = vmatprep.subr.mxu0 %v3467_v59  ;;  %4240 = vmatprep.subr.mxu1 %v5748_v37 }
 0x137   : > { %3825 = vmatpush3.msra.mxu0 %v3451_v61 }
 0x138   : > { %3826 = vmatprep.subr.mxu0 %v3466_v62 }
 0x139   : > { %3827 = vmatpush3.msra.mxu0 %v3450_v0 }
 0x13a   : > { %3828 = vmatprep.subr.mxu0 %v3465_v3 }
 0x13b   : > { %3829 = vmatpush3.msra.mxu0 %v3449_v21 }
 0x13c   : > { %3830 = vmatprep.subr.mxu0 %v3464_v2 }
 0x13d   : > { %3831 = vmatpush3.msra.mxu0 %v3448_v4 }
 0x13e   : > { %3880 = vmatprep.subr.mxu0 %v2266_v36 }
 0x16d   : > { %v3592_v42 = vpop.f32.mrf.mxu0 }
 0x16f   : > { %v3593_v55 = vpop.f32.mrf.mxu0 }
 0x170   : > { %v3594_v56 = vadd.f32 %v3593_v55, %v3592_v42 }
 0x171   : > { %v3595_v8 = vpop.f32.mrf.mxu0 }
 0x173   : > { %v3596_v5 = vpop.f32.mrf.mxu0 }
 0x174   : > { %v3597_v60 = vadd.f32 %v3596_v5, %v3595_v8 }
 0x176   : > { %v3598_v9 = vpop.f32.mrf.mxu0 }
 0x178   : > { %v3599_v29 = vpop.f32.mrf.mxu0 }
 0x179   : > { %v5751_v7 = vadd.f32 %v3599_v29, %v3598_v9  ;;  %v4098_v25 = vpop.f32.mrf.mxu1 }
 0x17a   : > { %v3601_v10 = vpop.f32.mrf.mxu0  ;;  %v1603_v0 = vadd.f32 %v4098_v25, %v3597_v60 }
 0x17b   : > { %v1597_v28 = vpop.f32.mrf.mxu1 }
 0x17c   : > { %v3602_v11 = vpop.f32.mrf.mxu0  ;;  %v1598_v2 = vadd.f32 %v3594_v56, %v1597_v28  ;;  %v5806_v28 = vld [vmem:[%s6372_s6] ss:$0 sm:$0xff] }
 0x17d   : > { %v3603_v36 = vadd.f32 %v3602_v11, %v3601_v10 }
 0x17e   : > { %v5753_v12 = vpop.f32.mrf.mxu0 }
 0x180   : > { %v5755_v45 = vpop.f32.mrf.mxu0 }
 0x182   : > { %v5757_v48 = vpop.f32.mrf.mxu0 }
 0x184   : > { %v5759_v6 = vpop.f32.mrf.mxu0 }
 0x189   : > { %v5761_v13 = vpop.f32.mrf.mxu0 }
 0x18b   : > { %v5763_v14 = vpop.f32.mrf.mxu0 }
 0x191   : > { %v5765_v53 = vpop.f32.mrf.mxu0  ;;  %v4101_v31 = vpop.f32.mrf.mxu1 }
 0x193   : > { %v5767_v15 = vpop.f32.mrf.mxu0  ;;  %v1607_v33 = vpop.f32.mrf.mxu1 }
 0x197   : > { %v3672_v16 = vpop.f32.mrf.mxu0 }
 0x199   : > { %v3673_v17 = vpop.f32.mrf.mxu0  ;;  %v5769_v34 = vpop.f32.mrf.mxu1 }
 0x19a   : > { %v3674_v3 = vadd.f32 %v3673_v17, %v3672_v16  ;;  %v5801_v16 = vld [vmem:[%s6371_s5] ss:$0 sm:$0xff] }
 0x19b   : > { %v5771_v38 = vpop.f32.mrf.mxu1 }
 0x1a2   : > { %v3675_v20 = vpop.f32.mrf.mxu0  ;;  %v5775_v40 = vpop.f32.mrf.mxu1 }
 0x1a3   : > { %6386 = vst [vmem:[#allocation12_spill] sm:$0xff] %v5775_v40  ;;  %v1703_v40 = vadd.f32 %v3674_v3, %v1598_v2  ;;  %v3609_v3 = vadd.f32 %v5759_v6, %v5757_v48 }
 0x1a4   : > { %v3676_v23 = vpop.f32.mrf.mxu0  ;;  %v5779_v43 = vpop.f32.mrf.mxu1 }
 0x1a5   : > { %v3677_v61 = vadd.f32 %v3676_v23, %v3675_v20  ;;  %v1613_v20 = vadd.f32 %v4101_v31, %v3603_v36  ;;  %v1608_v23 = vadd.f32 %v5751_v7, %v1607_v33 }
 0x1a6   : > { %v3678_v26 = vpop.f32.mrf.mxu0 }
 0x1a7   : > { %v1708_v22 = vadd.f32 %v3677_v61, %v1603_v0 }
 0x1a8   : > { %v3679_v27 = vpop.f32.mrf.mxu0 }
 0x1a9   : > { %v4142_v46 = vpop.f32.mrf.mxu1  ;;  %v3680_v42 = vadd.f32 %v3679_v27, %v3678_v26 }
 0x1aa   : > { %v3681_v30 = vpop.f32.mrf.mxu0  ;;  %v1813_v37 = vadd.f32 %v4142_v46, %v1708_v22  ;;  %v1623_v22 = vadd.f32 %v5769_v34, %v3609_v3  ;;  %v2249_v3 = vld [vmem:[%s6373_s7 + $0x70] sm:$0xff] }
 0x1ab   : > { %v1807_v19 = vpop.f32.mrf.mxu1  ;;  %v1713_v27 = vadd.f32 %v3680_v42, %v1608_v23 }
 0x1ac   : > { %v3682_v32 = vpop.f32.mrf.mxu0  ;;  %v1808_v25 = vadd.f32 %v1807_v19, %v1703_v40 }
 0x1ad   : > { %v3683_v55 = vadd.f32 %v3682_v32, %v3681_v30 }
 0x1ae   : > { %v3684_v24 = vpop.f32.mrf.mxu0 }
 0x1af   : > { %v1718_v26 = vadd.f32 %v3683_v55, %v1613_v20 }
 0x1b0   : > { %v3685_v35 = vpop.f32.mrf.mxu0 }
 0x1b1   : > { %v3686_v40 = vadd.f32 %v3685_v35, %v3684_v24 }
 0x1b2   : > { %v5773_v39 = vpop.f32.mrf.mxu0 }
 0x1b4   : > { %v5777_v41 = vpop.f32.mrf.mxu0 }
 0x1b5   : > { %v3689_v2 = vadd.f32 %v5777_v41, %v5773_v39  ;;  %v3612_v39 = vadd.f32 %v5763_v14, %v5761_v13 }
 0x1b7   : > { %v1728_v41 = vadd.f32 %v3689_v2, %v1623_v22  ;;  %v1628_v13 = vadd.f32 %v3612_v39, %v5779_v43  ;;  %v2279_v39 = vld [vmem:[%s6373_s7 + $0x160] sm:$0xff] }
 0x1b9   : > { %v5781_v44 = vpop.f32.mrf.mxu0 }
 0x1bb   : > { %v5783_v18 = vpop.f32.mrf.mxu0 }
 0x1c1   : > { %v4145_v49 = vpop.f32.mrf.mxu1 }
 0x1c2   : > { %v5785_v47 = vpop.f32.mrf.mxu0 }
 0x1c3   : > { %v1817_v52 = vpop.f32.mrf.mxu1 }
 0x1c4   : > { %v5787_v51 = vpop.f32.mrf.mxu0  ;;  %v1818_v19 = vadd.f32 %v1817_v52, %v1713_v27 }
 0x1c8   : > { %v3752_v54 = vpop.f32.mrf.mxu0 }
 0x1c9   : > { %v5789_v57 = vpop.f32.mrf.mxu1 }
 0x1ca   : > { %v3753_v50 = vpop.f32.mrf.mxu0 }
 0x1cb   : > { %v5791_v58 = vpop.f32.mrf.mxu1  ;;  %v3754_v8 = vadd.f32 %v3753_v50, %v3752_v54  ;;  %v3606_v54 = vadd.f32 %v5755_v45, %v5753_v12 }
 0x1cc   : > { %v3755_v59 = vpop.f32.mrf.mxu0 }
 0x1ce   : > { %v5793_v62 = vpop.f32.mrf.mxu1  ;;  %v3756_v63 = vpop.f32.mrf.mxu0 }
 0x1cf   : > { %v3757_v4 = vadd.f32 %v3756_v63, %v3755_v59 }
 0x1d0   : > { %v5795_v1 = vpop.f32.mrf.mxu1  ;;  %v3758_v21 = vpop.f32.mrf.mxu0 }
 0x1d2   : > { %v4186_v9 = vpop.f32.mrf.mxu1  ;;  %v3759_v29 = vpop.f32.mrf.mxu0 }
 0x1d3   : > { %v2098_v5 = vadd.f32 %v4186_v9, %v3757_v4  ;;  %v3760_v33 = vadd.f32 %v3759_v29, %v3758_v21  ;;  %v1618_v21 = vadd.f32 %v3606_v54, %v5771_v38 }
 0x1d4   : > { %v2092_v56 = vpop.f32.mrf.mxu1  ;;  %v3761_v17 = vpop.f32.mrf.mxu0 }
 0x1d5   : > { %v2132_v10 = vadd.f32 %v2098_v5, %v1813_v37  ;;  %v2093_v11 = vadd.f32 %v3754_v8, %v2092_v56  ;;  %v1823_v37 = vadd.f32 %v4145_v49, %v1718_v26  ;;  %v1723_v4 = vadd.f32 %v3686_v40, %v1618_v21 }
 0x1d6   : > { %v4189_v30 = vpop.f32.mrf.mxu1  ;;  %v3762_v31 = vpop.f32.mrf.mxu0  ;;  %v3692_v5 = vadd.f32 %v5783_v18, %v5781_v44  ;;  %v3615_v18 = vadd.f32 %v5767_v15, %v5765_v53 }
 0x1d7   : > { %v2172_v7 = vmul.f32 %v5801_v16, %v2132_v10  ;;  %v2131_v32 = vadd.f32 %v2093_v11, %v1808_v25  ;;  %v3763_v46 = vadd.f32 %v3762_v31, %v3761_v17  ;;  %v1828_v9 = vadd.f32 %v5791_v58, %v1723_v4 }
 0x1d8   : > { %v2102_v50 = vpop.f32.mrf.mxu1  ;;  %v3764_v59 = vpop.f32.mrf.mxu0  ;;  %v1833_v58 = vadd.f32 %v5789_v57, %v1728_v41  ;;  %v3695_v11 = vadd.f32 %v5787_v51, %v5785_v47  ;;  %v1733_v43 = vadd.f32 %v3692_v5, %v1628_v13  ;;  %v2250_v51 = vld [vmem:[%s6373_s7 + $0x78] sm:$0xff]  ;;  %v2247_v41 = vld [vmem:[%s6373_s7 + $0x60] sm:$0xff]  ;;  %v2260_v13 = vld [vmem:[%s6373_s7 + $0xc8] sm:$0xff] }
 0x1d9   : > { %v2187_v60 = vadd.f32 %v5806_v28, %v2172_v7  ;;  %v2171_v61 = vmul.f32 %v5801_v16, %v2131_v32  ;;  %v2103_v63 = vadd.f32 %v3760_v33, %v2102_v50  ;;  %v2108_v0 = vadd.f32 %v4189_v30, %v3763_v46  ;;  %v6387_v7 = vld [vmem:[#allocation12_spill] sm:$0xff] }
 0x1da   : > { %v4192_v12 = vpop.f32.mrf.mxu1  ;;  %v3765_v45 = vpop.f32.mrf.mxu0  ;;  %v1633_v32 = vadd.f32 %v6387_v7, %v3615_v18  ;;  %v1838_v53 = vadd.f32 %v5795_v1, %v1733_v43  ;;  %v2259_v18 = vld [vmem:[%s6373_s7 + $0xc0] sm:$0xff]  ;;  %v2257_v7 = vld [vmem:[%s6373_s7 + $0xb0] sm:$0xff] }
 0x1db   : > { %v5818_v24 = vmax.f32 %v2187_v60, 0.0  ;;  %v2186_v35 = vadd.f32 %v5806_v28, %v2171_v61  ;;  %v2133_v49 = vadd.f32 %v2103_v63, %v1818_v19  ;;  %v2134_v52 = vadd.f32 %v2108_v0, %v1823_v37  ;;  %v2265_v61 = vld [vmem:[%s6373_s7 + $0xf0] sm:$0xff] }
 0x1dc   : > { %v2112_v36 = vpop.f32.mrf.mxu1  ;;  %v3766_v42 = vadd.f32 %v3765_v45, %v3764_v59  ;;  %v3767_v55 = vpop.f32.mrf.mxu0  ;;  %v1738_v54 = vadd.f32 %v3695_v11, %v1633_v32  ;;  %v2281_v63 = vld [vmem:[%s6373_s7 + $0x170] sm:$0xff]  ;;  %v6388_v45 = vld [vmem:[#allocation11_spill] sm:$0xff] }
 0x1dd   : > { %2204 = vst [vmem:[#allocation3 + $0x22] sm:$0xff] %v5818_v24  ;;  %v5823_v48 = vmax.f32 %v2186_v35, 0.0  ;;  %v2173_v6 = vmul.f32 %v5801_v16, %v2133_v49  ;;  %v2174_v38 = vmul.f32 %v5801_v16, %v2134_v52  ;;  %v2264_v49 = vld [vmem:[%s6373_s7 + $0xe8] sm:$0xff]  ;;  %v2275_v11 = vld [vmem:[%s6373_s7 + $0x140] sm:$0xff]  ;;  %v2273_v32 = vld [vmem:[%s6373_s7 + $0x130] sm:$0xff] }
 0x1de   : > { %v4195_v29 = vpop.f32.mrf.mxu1  ;;  %v2113_v34 = vadd.f32 %v3766_v42, %v2112_v36  ;;  %v3768_v8 = vpop.f32.mrf.mxu0  ;;  %v1843_v21 = vadd.f32 %v5793_v62, %v1738_v54  ;;  %v2280_v52 = vld [vmem:[%s6373_s7 + $0x168] sm:$0xff]  ;;  %v2255_v54 = vld [vmem:[%s6373_s7 + $0xa0] sm:$0xff] }
 0x1df   : > { %2203 = vst [vmem:[#allocation3 + $0x12] sm:$0xff] %v5823_v48  ;;  %v2188_v20 = vadd.f32 %v5806_v28, %v2173_v6  ;;  %v2189_v23 = vadd.f32 %v5806_v28, %v2174_v38  ;;  %v3769_v56 = vadd.f32 %v3768_v8, %v3767_v55  ;;  %2420 = vmatprep.mubr.f32.mxu0 %v5823_v48  ;;  %v2248_v36 = vld [vmem:[%s6373_s7 + $0x68] sm:$0xff]  ;;  %v2263_v55 = vld [vmem:[%s6373_s7 + $0xe0] sm:$0xff] }
 0x1e0   : > { %v2135_v14 = vadd.f32 %v2113_v34, %v1828_v9  ;;  %v3770_v17 = vpop.f32.mrf.mxu0  ;;  %v2122_v27 = vpop.f32.mrf.mxu1  ;;  %v2262_v9 = vld [vmem:[%s6373_s7 + $0xd8] sm:$0xff] }
 0x1e1   : > { %v5838_v25 = vmax.f32 %v2188_v20, 0.0  ;;  %v5840_v10 = vmax.f32 %v2189_v23, 0.0  ;;  %v2118_v44 = vadd.f32 %v4192_v12, %v3769_v56  ;;  %v2246_v34 = vld [vmem:[%s6373_s7 + $0x58] sm:$0xff]  ;;  %v2261_v20 = vld [vmem:[%s6373_s7 + $0xd0] sm:$0xff] }
 0x1e2   : > { %v2175_v26 = vmul.f32 %v5801_v16, %v2135_v14  ;;  %v3771_v30 = vpop.f32.mrf.mxu0  ;;  %v2277_v23 = vld [vmem:[%s6373_s7 + $0x150] sm:$0xff]  ;;  %v2276_v14 = vld [vmem:[%s6373_s7 + $0x148] sm:$0xff] }
 0x1e3   : > { %2205 = vst [vmem:[#allocation3 + $0x32] sm:$0xff] %v5838_v25  ;;  %2206 = vst [vmem:[#allocation3 + $0x42] sm:$0xff] %v5840_v10  ;;  %v2136_v57 = vadd.f32 %v2118_v44, %v1833_v58  ;;  %v3772_v31 = vadd.f32 %v3771_v30, %v3770_v17  ;;  %v2245_v56 = vld [vmem:[%s6373_s7 + $0x50] sm:$0xff]  ;;  %v2244_v58 = vld [vmem:[%s6373_s7 + $0x48] sm:$0xff] }
 0x1e4   : > { %v2190_v33 = vadd.f32 %v5806_v28, %v2175_v26  ;;  %v3773_v46 = vpop.f32.mrf.mxu0  ;;  %v5865_v1 = vld [vmem:[#allocation3 + $0x23] sm:$0xff]  ;;  %v2274_v30 = vld [vmem:[%s6373_s7 + $0x138] sm:$0xff] }
 0x1e5   : > { %v2176_v15 = vmul.f32 %v5801_v16, %v2136_v57  ;;  %v2123_v47 = vadd.f32 %v3772_v31, %v2122_v27  ;;  %v5897_v42 = vld [vmem:[#allocation3 + $0x21] sm:$0xff]  ;;  %v2258_v27 = vld [vmem:[%s6373_s7 + $0xb8] sm:$0xff] }
 0x1e6   : > { %v5856_v40 = vmax.f32 %v2190_v33, 0.0  ;;  %v5858_v37 = vld [vmem:[#allocation3 + $0x13] sm:$0xff]  ;;  %v3774_v50 = vpop.f32.mrf.mxu0  ;;  %v2243_v26 = vld [vmem:[%s6373_s7 + $0x40] sm:$0xff] }
 0x1e7   : > { %v5860_v19 = vld [vmem:[#allocation3 + $0x11] sm:$0xff]  ;;  %v2191_v59 = vadd.f32 %v5806_v28, %v2176_v15  ;;  %v2137_v60 = vadd.f32 %v2123_v47, %v1838_v53  ;;  %4228 = vmatprep.mubr.f32.mxu1 %v5858_v37  ;;  %v3775_v0 = vadd.f32 %v3774_v50, %v3773_v46  ;;  %v2256_v46 = vld [vmem:[%s6373_s7 + $0xa8] sm:$0xff]  ;;  %v2271_v50 = vld [vmem:[%s6373_s7 + $0x120] sm:$0xff] }
 0x1e8   : > { %2421 = vmatmul.mubr.f32.vlgmr.msra.gmra.mxu0 %v5860_v19  ;;  %2207 = vst [vmem:[#allocation3 + $0x52] sm:$0xff] %v5856_v40  ;;  %4229 = vmatmul.mubr.f32.vlgmr.msra.gmra.mxu1 %v5865_v1  ;;  %v2242_v57 = vld [vmem:[%s6373_s7 + $0x38] sm:$0xff]  ;;  %v2241_v33 = vld [vmem:[%s6373_s7 + $0x30] sm:$0xff]  ;;  %v2272_v53 = vld [vmem:[%s6373_s7 + $0x128] sm:$0xff] }
 0x1e9   : > { %3881 = vmatpush3.msra.mxu0 %v2250_v51  ;;  %v5879_v2 = vmax.f32 %v2191_v59, 0.0  ;;  %v2177_v12 = vmul.f32 %v5801_v16, %v2137_v60  ;;  %4241 = vmatpush3.msra.mxu1 %v6388_v45  ;;  %v2128_v35 = vadd.f32 %v4195_v29, %v3775_v0  ;;  %v2278_v29 = vld [vmem:[%s6373_s7 + $0x158] sm:$0xff]  ;;  %v2240_v47 = vld [vmem:[%s6373_s7 + $0x28] sm:$0xff]  ;;  %v2239_v59 = vld [vmem:[%s6373_s7 + $0x20] sm:$0xff] }
 0x1ea   : > { %2425 = vmatprep.mubr.f32.mxu0 %v5818_v24  ;;  %3882 = vmatprep.subr.mxu0 %v2265_v61  ;;  %v5890_v62 = vld [vmem:[#allocation3 + $0x33] sm:$0xff]  ;;  %v5955_v44 = vld [vmem:[#allocation3 + $0x41] sm:$0xff] }
 0x1eb   : > { %4242 = vmatprep.subr.mxu1 %v2281_v63  ;;  %2208 = vst [vmem:[#allocation3 + $0x62] sm:$0xff] %v5879_v2  ;;  %v2192_v22 = vadd.f32 %v5806_v28, %v2177_v12  ;;  %3883 = vmatpush3.msra.mxu0 %v2249_v3  ;;  %v2138_v4 = vadd.f32 %v2128_v35, %v1843_v21  ;;  %v5927_v5 = vld [vmem:[#allocation3 + $0x31] sm:$0xff]  ;;  %v2252_v35 = vld [vmem:[%s6373_s7 + $0x88] sm:$0xff] }
 0x1ec   : > { %4243 = vmatpush3.msra.mxu1 %v2281_v63  ;;  %3884 = vmatprep.subr.mxu0 %v2264_v49  ;;  %v2254_v60 = vld [vmem:[%s6373_s7 + $0x98] sm:$0xff]  ;;  %v2253_v21 = vld [vmem:[%s6373_s7 + $0x90] sm:$0xff]  ;;  %v2268_v49 = vld [vmem:[%s6373_s7 + $0x108] sm:$0xff] }
 0x1ed   : > { %4244 = vmatprep.subr.mxu1 %v2280_v52  ;;  %v5902_v6 = vmax.f32 %v2192_v22, 0.0  ;;  %v2178_v38 = vmul.f32 %v5801_v16, %v2138_v4  ;;  %2426 = vmatmul.mubr.f32.gmra.mxu0 %v5897_v42  ;;  %v2270_v61 = vld [vmem:[%s6373_s7 + $0x118] sm:$0xff]  ;;  %v2269_v12 = vld [vmem:[%s6373_s7 + $0x110] sm:$0xff]  ;;  %v2267_v22 = vld [vmem:[%s6373_s7 + $0x100] sm:$0xff] }
 0x1ee   : > { %4231 = vmatprep.mubr.f32.mxu1 %v5890_v62  ;;  %3885 = vmatpush3.msra.mxu0 %v2248_v36  ;;  %v2238_v0 = vld [vmem:[%s6373_s7 + $0x18] sm:$0xff]  ;;  %v2237_v45 = vld [vmem:[%s6373_s7 + $0x10] sm:$0xff]  ;;  %v2251_v36 = vld [vmem:[%s6373_s7 + $0x80] sm:$0xff] }
 0x1ef   : > { %4245 = vmatpush3.msra.mxu1 %v2280_v52  ;;  %2209 = vst [vmem:[#allocation3 + $0x72] sm:$0xff] %v5902_v6  ;;  %v2193_v16 = vadd.f32 %v5806_v28, %v2178_v38  ;;  %2430 = vmatprep.mubr.f32.mxu0 %v5838_v25  ;;  %v5930_v28 = vld [vmem:[#allocation3 + $0x43] sm:$0xff]  ;;  %v5950_v17 = vld [vmem:[#allocation3 + $0x53] sm:$0xff] }
 0x1f0   : > { %3886 = vmatprep.subr.mxu0 %v2263_v55  ;;  %4246 = vmatprep.subr.mxu1 %v2279_v39  ;;  %v5980_v31 = vld [vmem:[#allocation3 + $0x51] sm:$0xff]  ;;  %v2236_v52 = vld [vmem:[%s6373_s7 + $0x8] sm:$0xff]  ;;  %v2235_v55 = vld [vmem:[%s6373_s7] sm:$0xff] }
 0x1f1   : > { %3887 = vmatpush3.msra.mxu0 %v2247_v41  ;;  %v5925_v8 = vmax.f32 %v2193_v16, 0.0  ;;  %4247 = vmatpush3.msra.mxu1 %v2279_v39  ;;  %v2227_v38 = vld [vmem:[#allocation3 + $0x3] sm:$0xff]  ;;  %v3527_v41 = vld [vmem:[%s6373_s7 + $0x3f8] sm:$0xff] }
 0x1f2   : > { %3888 = vmatprep.subr.mxu0 %v2262_v9  ;;  %4248 = vmatprep.subr.mxu1 %v2278_v29  ;;  %v5975_v43 = vld [vmem:[#allocation3 + $0x63] sm:$0xff]  ;;  %v3543_v9 = vld [vmem:[%s6373_s7 + $0x478] sm:$0xff] }
 0x1f3   : > { %2431 = vmatmul.mubr.f32.gmra.mxu0 %v5927_v5  ;;  %2210 = vst [vmem:[#allocation3 + $0x82] sm:$0xff] %v5925_v8  ;;  %4232 = vmatmul.mubr.f32.gmra.mxu1 %v5930_v28  ;;  %v6005_v51 = vld [vmem:[#allocation3 + $0x61] sm:$0xff] }
 0x1f4   : > { %3889 = vmatpush3.msra.mxu0 %v2246_v34  ;;  %4249 = vmatpush3.msra.mxu1 %v2278_v29  ;;  %v2219_v39 = vld [vmem:[#allocation3 + $0x2] sm:$0xff]  ;;  %v3511_v29 = vld [vmem:[%s6373_s7 + $0x378] sm:$0xff]  ;;  %v3526_v34 = vld [vmem:[%s6373_s7 + $0x3f0] sm:$0xff] }
 0x1f5   : > { %2435 = vmatprep.mubr.f32.mxu0 %v5840_v10  ;;  %3890 = vmatprep.subr.mxu0 %v2261_v20  ;;  %v2211_v16 = vld [vmem:[#allocation3 + $0x1] sm:$0xff]  ;;  %v3542_v20 = vld [vmem:[%s6373_s7 + $0x470] sm:$0xff] }
 0x1f6   : > { %4250 = vmatprep.subr.mxu1 %v2277_v23  ;;  %3891 = vmatpush3.msra.mxu0 %v2245_v56  ;;  %v6000_v15 = vld [vmem:[#allocation3 + $0x73] sm:$0xff]  ;;  %v3541_v56 = vld [vmem:[%s6373_s7 + $0x468] sm:$0xff] }
 0x1f7   : > { %4251 = vmatpush3.msra.mxu1 %v2277_v23  ;;  %3892 = vmatprep.subr.mxu0 %v2260_v13  ;;  %v6030_v3 = vld [vmem:[#allocation3 + $0x71] sm:$0xff]  ;;  %v3525_v23 = vld [vmem:[%s6373_s7 + $0x3e8] sm:$0xff] }
 0x1f8   : > { %4252 = vmatprep.subr.mxu1 %v2276_v14  ;;  %2436 = vmatmul.mubr.f32.gmra.mxu0 %v5955_v44  ;;  %v3509_v13 = vld [vmem:[%s6373_s7 + $0x368] sm:$0xff] }
 0x1f9   : > { %4234 = vmatprep.mubr.f32.mxu1 %v5950_v17  ;;  %3893 = vmatpush3.msra.mxu0 %v2244_v58  ;;  %v3508_v58 = vld [vmem:[%s6373_s7 + $0x360] sm:$0xff] }
 0x1fa   : > { %4253 = vmatpush3.msra.mxu1 %v2276_v14  ;;  %2440 = vmatprep.mubr.f32.mxu0 %v5856_v40  ;;  %v6025_v63 = vld [vmem:[#allocation3 + $0x83] sm:$0xff] }
 0x1fb   : > { %3894 = vmatprep.subr.mxu0 %v2259_v18  ;;  %4254 = vmatprep.subr.mxu1 %v2275_v11  ;;  %v6056_v4 = vld [vmem:[#allocation3 + $0x81] sm:$0xff]  ;;  %v3523_v18 = vld [vmem:[%s6373_s7 + $0x3d8] sm:$0xff] }
 0x1fc   : > { %3895 = vmatpush3.msra.mxu0 %v2243_v26  ;;  %4255 = vmatpush3.msra.mxu1 %v2275_v11  ;;  %v3540_v14 = vld [vmem:[%s6373_s7 + $0x460] sm:$0xff]  ;;  %v3507_v11 = vld [vmem:[%s6373_s7 + $0x358] sm:$0xff]  ;;  %v3522_v26 = vld [vmem:[%s6373_s7 + $0x3d0] sm:$0xff] }
 0x1fd   : > { %3896 = vmatprep.subr.mxu0 %v2258_v27  ;;  %4256 = vmatprep.subr.mxu1 %v2274_v30  ;;  %v3538_v27 = vld [vmem:[%s6373_s7 + $0x450] sm:$0xff] }
 0x1fe   : > { %2441 = vmatmul.mubr.f32.gmra.mxu0 %v5980_v31  ;;  %4235 = vmatmul.mubr.f32.gmra.mxu1 %v5975_v43 }
 0x1ff   : > { %3897 = vmatpush3.msra.mxu0 %v2242_v57  ;;  %4257 = vmatpush3.msra.mxu1 %v2274_v30  ;;  %v3506_v30 = vld [vmem:[%s6373_s7 + $0x350] sm:$0xff]  ;;  %v3521_v57 = vld [vmem:[%s6373_s7 + $0x3c8] sm:$0xff] }
 0x200   : > { %2445 = vmatprep.mubr.f32.mxu0 %v5879_v2  ;;  %3898 = vmatprep.subr.mxu0 %v2257_v7  ;;  %v3537_v7 = vld [vmem:[%s6373_s7 + $0x448] sm:$0xff] }
 0x201   : > { %4258 = vmatprep.subr.mxu1 %v2273_v32  ;;  %3899 = vmatpush3.msra.mxu0 %v2241_v33  ;;  %v3520_v33 = vld [vmem:[%s6373_s7 + $0x3c0] sm:$0xff] }
 0x202   : > { %4259 = vmatpush3.msra.mxu1 %v2273_v32  ;;  %3900 = vmatprep.subr.mxu0 %v2256_v46  ;;  %v3505_v32 = vld [vmem:[%s6373_s7 + $0x348] sm:$0xff]  ;;  %v3536_v46 = vld [vmem:[%s6373_s7 + $0x440] sm:$0xff] }
 0x203   : > { %4260 = vmatprep.subr.mxu1 %v2272_v53  ;;  %2446 = vmatmul.mubr.f32.gmra.mxu0 %v6005_v51 }
 0x204   : > { %4237 = vmatprep.mubr.f32.mxu1 %v6000_v15  ;;  %3901 = vmatpush3.msra.mxu0 %v2240_v47  ;;  %v3519_v47 = vld [vmem:[%s6373_s7 + $0x3b8] sm:$0xff] }
 0x205   : > { %4261 = vmatpush3.msra.mxu1 %v2272_v53  ;;  %2450 = vmatprep.mubr.f32.mxu0 %v5902_v6  ;;  %v3504_v53 = vld [vmem:[%s6373_s7 + $0x340] sm:$0xff] }
 0x206   : > { %3902 = vmatprep.subr.mxu0 %v2255_v54  ;;  %4262 = vmatprep.subr.mxu1 %v2271_v50  ;;  %v3535_v54 = vld [vmem:[%s6373_s7 + $0x438] sm:$0xff] }
 0x207   : > { %3903 = vmatpush3.msra.mxu0 %v2239_v59  ;;  %4263 = vmatpush3.msra.mxu1 %v2271_v50  ;;  %v3503_v50 = vld [vmem:[%s6373_s7 + $0x338] sm:$0xff]  ;;  %v3534_v59 = vld [vmem:[%s6373_s7 + $0x430] sm:$0xff] }
 0x208   : > { %3904 = vmatprep.subr.mxu0 %v2254_v60  ;;  %4264 = vmatprep.subr.mxu1 %v2270_v61  ;;  %v3502_v60 = vld [vmem:[%s6373_s7 + $0x330] sm:$0xff] }
 0x209   : > { %2451 = vmatmul.mubr.f32.gmra.mxu0 %v6030_v3  ;;  %4238 = vmatmul.mubr.f32.gmra.mxu1 %v6025_v63 }
 0x20a   : > { %3905 = vmatpush3.msra.mxu0 %v2238_v0  ;;  %4265 = vmatpush3.msra.mxu1 %v2270_v61  ;;  %v3517_v61 = vld [vmem:[%s6373_s7 + $0x3a8] sm:$0xff] }
 0x20b   : > { %2455 = vmatprep.mubr.f32.mxu0 %v5925_v8  ;;  %3906 = vmatprep.subr.mxu0 %v2253_v21  ;;  %v3533_v0 = vld [vmem:[%s6373_s7 + $0x428] sm:$0xff] }
 0x20c   : > { %4266 = vmatprep.subr.mxu1 %v2269_v12  ;;  %3907 = vmatpush3.msra.mxu0 %v2237_v45  ;;  %v3501_v21 = vld [vmem:[%s6373_s7 + $0x328] sm:$0xff]  ;;  %v3532_v45 = vld [vmem:[%s6373_s7 + $0x420] sm:$0xff] }
 0x20d   : > { %4267 = vmatpush3.msra.mxu1 %v2269_v12  ;;  %3908 = vmatprep.subr.mxu0 %v2252_v35  ;;  %v3516_v12 = vld [vmem:[%s6373_s7 + $0x3a0] sm:$0xff] }
 0x20e   : > { %4268 = vmatprep.subr.mxu1 %v2268_v49  ;;  %2456 = vmatmul.mubr.f32.gmra.mxu0 %v6056_v4  ;;  %v3500_v35 = vld [vmem:[%s6373_s7 + $0x320] sm:$0xff] }
 0x20f   : > { %4269 = vmatpush3.msra.mxu1 %v2268_v49  ;;  %3909 = vmatpush3.msra.mxu0 %v2236_v52  ;;  %v3515_v49 = vld [vmem:[%s6373_s7 + $0x398] sm:$0xff] }
 0x210   : > { %4270 = vmatprep.subr.mxu1 %v2267_v22  ;;  %3910 = vmatprep.subr.mxu0 %v2251_v36  ;;  %v3531_v52 = vld [vmem:[%s6373_s7 + $0x418] sm:$0xff]  ;;  %v3514_v36 = vld [vmem:[%s6373_s7 + $0x390] sm:$0xff] }
 0x211   : > { %4271 = vmatpush3.msra.mxu1 %v2267_v22  ;;  %3911 = vmatpush3.msra.mxu0 %v2235_v55  ;;  %v3499_v22 = vld [vmem:[%s6373_s7 + $0x318] sm:$0xff]  ;;  %v3530_v55 = vld [vmem:[%s6373_s7 + $0x410] sm:$0xff] }
 0x212   : > { %4272 = vmatprep.mubr.f32.mxu1 %v2227_v38  ;;  %2630 = vmatprep.mubr.f32.mxu0 %v2219_v39  ;;  %v3498_v38 = vld [vmem:[%s6373_s7 + $0x310] sm:$0xff]  ;;  %v3513_v39 = vld [vmem:[%s6373_s7 + $0x388] sm:$0xff] }
 0x213   : > { %4273 = vmatmul.mubr.f32.vlgmr.msra.gmra.mxu1 %v5858_v37  ;;  %3960 = vmatprep.subr.mxu0 %v3527_v41  ;;  %v3510_v37 = vld [vmem:[%s6373_s7 + $0x370] sm:$0xff]  ;;  %v3529_v41 = vld [vmem:[%s6373_s7 + $0x408] sm:$0xff] }
 0x214   : > { %4284 = vmatprep.subr.mxu1 %v3543_v9  ;;  %2631 = vmatmul.mubr.f32.vlgmr.msra.gmra.mxu0 %v2211_v16  ;;  %v3512_v16 = vld [vmem:[%s6373_s7 + $0x380] sm:$0xff] }
 0x215   : > { %4275 = vmatprep.mubr.f32.mxu1 %v5865_v1  ;;  %3961 = vmatpush3.msra.mxu0 %v3511_v29  ;;  %v3528_v29 = vld [vmem:[%s6373_s7 + $0x400] sm:$0xff] }
 0x216   : > { %4285 = vmatpush3.msra.mxu1 %v3543_v9  ;;  %2635 = vmatprep.mubr.f32.mxu0 %v5823_v48  ;;  %v3524_v48 = vld [vmem:[%s6373_s7 + $0x3e0] sm:$0xff]  ;;  %v3497_v9 = vld [vmem:[%s6373_s7 + $0x308] sm:$0xff] }
 0x217   : > { %3962 = vmatprep.subr.mxu0 %v3526_v34  ;;  %4286 = vmatprep.subr.mxu1 %v3542_v20  ;;  %v3496_v34 = vld [vmem:[%s6373_s7 + $0x300] sm:$0xff] }
 0x218   : > { %3963 = vmatpush3.msra.mxu0 %v3510_v37  ;;  %4287 = vmatpush3.msra.mxu1 %v3542_v20  ;;  %v3130_v20 = vld [vmem:[#allocation4 + $0x78] sm:$0xff]  ;;  %v3129_v37 = vld [vmem:[#allocation4 + $0x70] sm:$0xff] }
 0x219   : > { %3964 = vmatprep.subr.mxu0 %v3525_v23  ;;  %4276 = vmatmul.mubr.f32.gmra.mxu1 %v5890_v62  ;;  %v3128_v23 = vld [vmem:[#allocation4 + $0x68] sm:$0xff] }
 0x21a   : > { %4288 = vmatprep.subr.mxu1 %v3541_v56  ;;  %2636 = vmatmul.mubr.f32.gmra.mxu0 %v5860_v19  ;;  %v3539_v19 = vld [vmem:[%s6373_s7 + $0x458] sm:$0xff] }
 0x21b   : > { %4278 = vmatprep.mubr.f32.mxu1 %v5930_v28  ;;  %3965 = vmatpush3.msra.mxu0 %v3509_v13 }
 0x21c   : > { %4289 = vmatpush3.msra.mxu1 %v3541_v56  ;;  %2640 = vmatprep.mubr.f32.mxu0 %v5818_v24  ;;  %v3546_v56 = vld [vmem:[%s5017_s12 + $0x1d0] sm:$0xff] }
 0x21d   : > { %3966 = vmatprep.subr.mxu0 %v3524_v48  ;;  %4290 = vmatprep.subr.mxu1 %v3540_v14 }
 0x21e   : > { %3967 = vmatpush3.msra.mxu0 %v3508_v58  ;;  %4291 = vmatpush3.msra.mxu1 %v3540_v14  ;;  %v3117_v14 = vld [vmem:[#allocation4 + $0x10] sm:$0xff] }
 0x21f   : > { %3968 = vmatprep.subr.mxu0 %v3523_v18  ;;  %4279 = vmatmul.mubr.f32.gmra.mxu1 %v5950_v17 }
 0x220   : > { %4292 = vmatprep.subr.mxu1 %v3539_v19  ;;  %2641 = vmatmul.mubr.f32.gmra.mxu0 %v5897_v42 }
 0x221   : > { %4281 = vmatprep.mubr.f32.mxu1 %v5975_v43  ;;  %3969 = vmatpush3.msra.mxu0 %v3507_v11 }
 0x222   : > { %4293 = vmatpush3.msra.mxu1 %v3539_v19  ;;  %2645 = vmatprep.mubr.f32.mxu0 %v5838_v25  ;;  %v3551_v19 = vld [vmem:[%s5017_s12 + $0x220] sm:$0xff] }
 0x223   : > { %3970 = vmatprep.subr.mxu0 %v3522_v26  ;;  %4294 = vmatprep.subr.mxu1 %v3538_v27  ;;  %v3547_v26 = vld [vmem:[%s5017_s12 + $0x1e0] sm:$0xff] }
 0x224   : > { %3971 = vmatpush3.msra.mxu0 %v3506_v30  ;;  %4295 = vmatpush3.msra.mxu1 %v3538_v27  ;;  %v2792_v27 = vld [vmem:[#allocation3 + $0x92] sm:$0xff] }
 0x225   : > { %3972 = vmatprep.subr.mxu0 %v3521_v57  ;;  %4282 = vmatmul.mubr.f32.gmra.mxu1 %v6000_v15  ;;  %v3116_v57 = vld [vmem:[#allocation4 + $0x8] sm:$0xff] }
 0x226   : > { %4296 = vmatprep.subr.mxu1 %v3537_v7  ;;  %2646 = vmatmul.mubr.f32.gmra.mxu0 %v5927_v5 }
 0x227   : > { %4297 = vmatpush3.msra.mxu1 %v3537_v7  ;;  %3973 = vmatpush3.msra.mxu0 %v3505_v32 }
 0x228   : > { %4316 = vmatprep.mubr.f32.mxu1 %v5865_v1  ;;  %2650 = vmatprep.mubr.f32.mxu0 %v5840_v10  ;;  %v3518_v1 = vld [vmem:[%s6373_s7 + $0x3b0] sm:$0xff] }
 0x229   : > { %3974 = vmatprep.subr.mxu0 %v3520_v33  ;;  %4298 = vmatprep.subr.mxu1 %v3536_v46 }
 0x22a   : > { %3975 = vmatpush3.msra.mxu0 %v3504_v53  ;;  %4299 = vmatpush3.msra.mxu1 %v3536_v46  ;;  %v2784_v46 = vld [vmem:[#allocation3 + $0x91] sm:$0xff] }
 0x22b   : > { %3976 = vmatprep.subr.mxu0 %v3519_v47  ;;  %4300 = vmatprep.subr.mxu1 %v3535_v54 }
 0x22c   : > { %2651 = vmatmul.mubr.f32.gmra.mxu0 %v5955_v44  ;;  %4301 = vmatpush3.msra.mxu1 %v3535_v54 }
 0x22d   : > { %3977 = vmatpush3.msra.mxu0 %v3503_v50  ;;  %2655 = vmatprep.mubr.f32.mxu0 %v5856_v40 }
 0x22e   : > { %3978 = vmatprep.subr.mxu0 %v3518_v1  ;;  %4302 = vmatprep.subr.mxu1 %v3534_v59 }
 0x22f   : > { %3979 = vmatpush3.msra.mxu0 %v3502_v60  ;;  %4303 = vmatpush3.msra.mxu1 %v3534_v59 }
 0x230   : > { %3980 = vmatprep.subr.mxu0 %v3517_v61  ;;  %4304 = vmatprep.subr.mxu1 %v3533_v0 }
 0x231   : > { %2656 = vmatmul.mubr.f32.gmra.mxu0 %v5980_v31  ;;  %4305 = vmatpush3.msra.mxu1 %v3533_v0 }
 0x232   : > { %3981 = vmatpush3.msra.mxu0 %v3501_v21  ;;  %2660 = vmatprep.mubr.f32.mxu0 %v5879_v2 }
 0x233   : > { %3982 = vmatprep.subr.mxu0 %v3516_v12  ;;  %4306 = vmatprep.subr.mxu1 %v3532_v45 }
 0x234   : > { %3983 = vmatpush3.msra.mxu0 %v3500_v35  ;;  %4307 = vmatpush3.msra.mxu1 %v3532_v45 }
 0x235   : > { %3984 = vmatprep.subr.mxu0 %v3515_v49  ;;  %4308 = vmatprep.subr.mxu1 %v3531_v52 }
 0x236   : > { %2661 = vmatmul.mubr.f32.gmra.mxu0 %v6005_v51  ;;  %4309 = vmatpush3.msra.mxu1 %v3531_v52 }
 0x237   : > { %3985 = vmatpush3.msra.mxu0 %v3499_v22  ;;  %2665 = vmatprep.mubr.f32.mxu0 %v5902_v6 }
 0x238   : > { %3986 = vmatprep.subr.mxu0 %v3514_v36  ;;  %4310 = vmatprep.subr.mxu1 %v3530_v55 }
 0x239   : > { %3987 = vmatpush3.msra.mxu0 %v3498_v38  ;;  %4311 = vmatpush3.msra.mxu1 %v3530_v55 }
 0x23a   : > { %3988 = vmatprep.subr.mxu0 %v3513_v39  ;;  %4312 = vmatprep.subr.mxu1 %v3529_v41 }
 0x23b   : > { %2666 = vmatmul.mubr.f32.gmra.mxu0 %v6030_v3  ;;  %4313 = vmatpush3.msra.mxu1 %v3529_v41 }
 0x23c   : > { %3989 = vmatpush3.msra.mxu0 %v3497_v9  ;;  %2914 = vmatprep.mubr.f32.mxu0 %v5818_v24  ;;  %v3127_v24 = vld [vmem:[#allocation4 + $0x60] sm:$0xff] }
 0x23d   : > { %3990 = vmatprep.subr.mxu0 %v3512_v16  ;;  %4314 = vmatprep.subr.mxu1 %v3528_v29 }
 0x23e   : > { %3991 = vmatpush3.msra.mxu0 %v3496_v34  ;;  %4315 = vmatpush3.msra.mxu1 %v3528_v29 }
 0x23f   : > { %4328 = vmatprep.subr.mxu0 %v3130_v20  ;;  %4317 = vmatmul.mubr.f32.vlgmr.msra.gmra.mxu1 %v5890_v62  ;;  %v3126_v62 = vld [vmem:[#allocation4 + $0x58] sm:$0xff] }
 0x240   : > { %4372 = vmatprep.subr.mxu1 %v3130_v20  ;;  %2915 = vmatmul.mubr.f32.vlgmr.msra.gmra.mxu0 %v5897_v42  ;;  %v3124_v42 = vld [vmem:[#allocation4 + $0x48] sm:$0xff] }
 0x241   : > { %4319 = vmatprep.mubr.f32.mxu1 %v5930_v28  ;;  %4329 = vmatpush3.msra.mxu0 %v3130_v20  ;;  %v3120_v28 = vld [vmem:[#allocation4 + $0x28] sm:$0xff] }
 0x242   : > { %4388 = vmatpush3.msra.mxu1 %v3130_v20  ;;  %2919 = vmatprep.mubr.f32.mxu0 %v5838_v25  ;;  %v3125_v25 = vld [vmem:[#allocation4 + $0x50] sm:$0xff] }
 0x243   : > { %4330 = vmatprep.subr.mxu0 %v3129_v37  ;;  %4373 = vmatprep.subr.mxu1 %v3129_v37 }
 0x244   : > { %4331 = vmatpush3.msra.mxu0 %v3129_v37  ;;  %4389 = vmatpush3.msra.mxu1 %v3129_v37 }
 0x245   : > { %4332 = vmatprep.subr.mxu0 %v3128_v23  ;;  %4320 = vmatmul.mubr.f32.gmra.mxu1 %v5950_v17  ;;  %v3548_v17 = vld [vmem:[%s5017_s12 + $0x1f0] sm:$0xff] }
 0x246   : > { %4374 = vmatprep.subr.mxu1 %v3128_v23  ;;  %2920 = vmatmul.mubr.f32.gmra.mxu0 %v5927_v5  ;;  %v3122_v5 = vld [vmem:[#allocation4 + $0x38] sm:$0xff] }
 0x247   : > { %4322 = vmatprep.mubr.f32.mxu1 %v5975_v43  ;;  %4333 = vmatpush3.msra.mxu0 %v3128_v23  ;;  %v3544_v43 = vld [vmem:[%s5017_s12 + $0x1b0] sm:$0xff] }
 0x248   : > { %4390 = vmatpush3.msra.mxu1 %v3128_v23  ;;  %2924 = vmatprep.mubr.f32.mxu0 %v5840_v10  ;;  %v3123_v10 = vld [vmem:[#allocation4 + $0x40] sm:$0xff] }
 0x249   : > { %4334 = vmatprep.subr.mxu0 %v3127_v24  ;;  %4375 = vmatprep.subr.mxu1 %v3127_v24 }
 0x24a   : > { %4335 = vmatpush3.msra.mxu0 %v3127_v24  ;;  %4391 = vmatpush3.msra.mxu1 %v3127_v24 }
 0x24b   : > { %4336 = vmatprep.subr.mxu0 %v3126_v62  ;;  %4323 = vmatmul.mubr.f32.gmra.mxu1 %v6000_v15  ;;  %v3545_v15 = vld [vmem:[%s5017_s12 + $0x1c0] sm:$0xff] }
 0x24c   : > { %4376 = vmatprep.subr.mxu1 %v3126_v62  ;;  %2925 = vmatmul.mubr.f32.gmra.mxu0 %v5955_v44  ;;  %v3552_v44 = vld [vmem:[%s6374_s8] ss:$0 sm:$0xff] }
 0x24d   : > { %4325 = vmatprep.mubr.f32.mxu1 %v6025_v63  ;;  %4337 = vmatpush3.msra.mxu0 %v3126_v62  ;;  %v3088_v63 = vmul.f32 %v3552_v44, %v3548_v17  ;;  %v3084_v13 = vmul.f32 %v3552_v44, %v3544_v43  ;;  %v3085_v58 = vmul.f32 %v3552_v44, %v3545_v15 }
 0x24e   : > { %4392 = vmatpush3.msra.mxu1 %v3126_v62  ;;  %2929 = vmatprep.mubr.f32.mxu0 %v5856_v40  ;;  %v3121_v40 = vld [vmem:[#allocation4 + $0x30] sm:$0xff]  ;;  %v3086_v11 = vmul.f32 %v3552_v44, %v3546_v56  ;;  %v3091_v33 = vmul.f32 %v3552_v44, %v3551_v19  ;;  %v3087_v54 = vmul.f32 %v3552_v44, %v3547_v26 }
 0x24f   : > { %4338 = vmatprep.subr.mxu0 %v3125_v25  ;;  %4377 = vmatprep.subr.mxu1 %v3125_v25 }
 0x250   : > { %4339 = vmatpush3.msra.mxu0 %v3125_v25  ;;  %4393 = vmatpush3.msra.mxu1 %v3125_v25 }
 0x251   : > { %4340 = vmatprep.subr.mxu0 %v3124_v42  ;;  %4378 = vmatprep.subr.mxu1 %v3124_v42 }
 0x252   : > { %2930 = vmatmul.mubr.f32.gmra.mxu0 %v5980_v31  ;;  %4394 = vmatpush3.msra.mxu1 %v3124_v42  ;;  %v3549_v31 = vld [vmem:[%s5017_s12 + $0x200] sm:$0xff] }
 0x253   : > { %4341 = vmatpush3.msra.mxu0 %v3124_v42  ;;  %2934 = vmatprep.mubr.f32.mxu0 %v5879_v2  ;;  %v3119_v2 = vld [vmem:[#allocation4 + $0x20] sm:$0xff]  ;;  %v3089_v48 = vmul.f32 %v3552_v44, %v3549_v31 }
 0x254   : > { %4342 = vmatprep.subr.mxu0 %v3123_v10  ;;  %4379 = vmatprep.subr.mxu1 %v3123_v10 }
 0x255   : > { %4343 = vmatpush3.msra.mxu0 %v3123_v10  ;;  %4395 = vmatpush3.msra.mxu1 %v3123_v10 }
 0x256   : > { %4344 = vmatprep.subr.mxu0 %v3122_v5  ;;  %4380 = vmatprep.subr.mxu1 %v3122_v5 }
 0x257   : > { %2935 = vmatmul.mubr.f32.gmra.mxu0 %v6005_v51  ;;  %4396 = vmatpush3.msra.mxu1 %v3122_v5  ;;  %v3550_v51 = vld [vmem:[%s5017_s12 + $0x210] sm:$0xff]  ;;  %s392_s12 = sand.u32 1, %s4547_s18  }
 0x258   : > { %4345 = vmatpush3.msra.mxu0 %v3122_v5  ;;  %2939 = vmatprep.mubr.f32.mxu0 %v5902_v6  ;;  %v3118_v6 = vld [vmem:[#allocation4 + $0x18] sm:$0xff]  ;;  %v3090_v18 = vmul.f32 %v3552_v44, %v3550_v51  ;;  %s3346_s26 = sshll.u32 %s392_s12, 6  ;;  %s6326_s15 = scalar_lea.sflag [#allocation6], %s392_s12 }
 0x259   : > { %4346 = vmatprep.subr.mxu0 %v3121_v40  ;;  %4381 = vmatprep.subr.mxu1 %v3121_v40  ;;  %s394_s22 = scalar_lea.vmem [#allocation7], %s3346_s26 }
 0x25a   : > { %4347 = vmatpush3.msra.mxu0 %v3121_v40  ;;  %4397 = vmatpush3.msra.mxu1 %v3121_v40  ;;  %s3266_s30 = sshll.u32 %s394_s22, 4  ;;  %s6317_s30 = int_to_ptr.vmem [resolvable:$true] %s3266_s30 }
 0x25b   : > { %4348 = vmatprep.subr.mxu0 %v3120_v28  ;;  %4382 = vmatprep.subr.mxu1 %v3120_v28  ;;  %s4491_s16 = scalar_lea.vmem %s6317_s30, 1024  ;;  %p4498_p11 = scmp.lt.s32.totalorder %s6317_s30, %s4496_s25 }
 0x25c   : > { %2940 = vmatmul.mubr.f32.gmra.mxu0 %v6030_v3  ;;  %4398 = vmatpush3.msra.mxu1 %v3120_v28  ;;  %v3553_v3 = vld [vmem:[%s6375_s9] ss:$0 sm:$0xff]  ;;  %p4492_p8 = scmp.ne.s32.totalorder %s6317_s30, %s4491_s16  ;;  %p4499_p12 = scmp.lt.s32.totalorder %s4497_s10, %s4491_s16 }
 0x25d   : > { %4349 = vmatpush3.msra.mxu0 %v3120_v28  ;;  %2944 = vmatprep.mubr.f32.mxu0 %v5925_v8  ;;  %v2800_v8 = vld [vmem:[#allocation3 + $0x93] sm:$0xff]  ;;  %v3103_v30 = vadd.f32 %v3553_v3, %v3088_v63  ;;  %v3099_v7 = vadd.f32 %v3553_v3, %v3084_v13  ;;  %v3104_v32 = vadd.f32 %v3553_v3, %v3089_v48 }
 0x25e   : > { %4350 = vmatprep.subr.mxu0 %v3119_v2  ;;  %4383 = vmatprep.subr.mxu1 %v3119_v2  ;;  %v3100_v53 = vadd.f32 %v3553_v3, %v3085_v58  ;;  %v3105_v47 = vadd.f32 %v3553_v3, %v3090_v18  ;;  %v3101_v50 = vadd.f32 %v3553_v3, %v3086_v11  ;;  %p4493_p9 = pnand %p4492_p8, %p4663_p5  ;;  %p4500_p13 = por %p4499_p12, %p4498_p11 }
 0x25f   : > { %4351 = vmatpush3.msra.mxu0 %v3119_v2  ;;  %4399 = vmatpush3.msra.mxu1 %v3119_v2  ;;  %v3111_v1 = vmax.f32 %v3103_v30, 0.0  ;;  %v3107_v59 = vmax.f32 %v3099_v7, 0.0  ;;  %v3112_v60 = vmax.f32 %v3104_v32, 0.0  ;;  %v3106_v61 = vadd.f32 %v3553_v3, %v3091_v33 }
 0x260   : > { %4352 = vmatprep.subr.mxu0 %v3118_v6  ;;  %4384 = vmatprep.subr.mxu1 %v3118_v6  ;;  %v3108_v0 = vmax.f32 %v3100_v53, 0.0  ;;  %v3113_v21 = vmax.f32 %v3105_v47, 0.0  ;;  %v3102_v12 = vadd.f32 %v3553_v3, %v3087_v54  ;;  %v3109_v45 = vmax.f32 %v3101_v50, 0.0  ;;  %p4494_p10 = pneg %p4493_p9 }
 0x261   : > { %2945 = vmatmul.mubr.f32.gmra.mxu0 %v6056_v4  ;;  %4400 = vmatpush3.msra.mxu1 %v3118_v6  ;;  %v3115_v4 = vld [vmem:[#allocation4] sm:$0xff]  ;;  %v3114_v35 = vmax.f32 %v3106_v61, 0.0 }
 0x262   : > { %4353 = vmatpush3.msra.mxu0 %v3118_v6  ;;  %4385 = vmatprep.subr.mxu1 %v3117_v14  ;;  %v3110_v49 = vmax.f32 %v3102_v12, 0.0  ;;  %p4501_p0 = pnand %p4500_p13, %p4494_p10 }
 0x263   : > { %4354 = vmatprep.subr.mxu0 %v3117_v14  ;;  %4326 = vmatmul.mubr.f32.gmra.mxu1 %v2800_v8 }
 0x264   : > { %4355 = vmatpush3.msra.mxu0 %v3117_v14  ;;  %4401 = vmatpush3.msra.mxu1 %v3117_v14 }
 0x265   : > { %2949 = vmatprep.mubr.f32.mxu0 %v2792_v27  ;;  %4356 = vmatprep.subr.mxu0 %v3116_v57 }
 0x266   : > { %4386 = vmatprep.subr.mxu1 %v3116_v57  ;;  %2950 = vmatmul.mubr.f32.gmra.mxu0 %v2784_v46 }
 0x267   : > { %4402 = vmatpush3.msra.mxu1 %v3116_v57  ;;  %4357 = vmatpush3.msra.mxu0 %v3116_v57 }
 0x268   : > { %4387 = vmatprep.subr.mxu1 %v3115_v4  ;;  %4358 = vmatprep.subr.mxu0 %v3115_v4 }
 0x269   : > { %4403 = vmatpush3.msra.mxu1 %v3115_v4  ;;  %4359 = vmatpush3.msra.mxu0 %v3115_v4 }
 0x26a   : > { %4366 = vmatprep.mubr.f32.mxu1 %v3111_v1  ;;  %4360 = vmatprep.mubr.f32.mxu0 %v3107_v59 }
 0x26b   : > { %4367 = vmatmul.mubr.f32.vlgmr.msra.gmra.mxu1 %v3112_v60  ;;  %4361 = vmatmul.mubr.f32.vlgmr.msra.gmra.mxu0 %v3108_v0 }
 0x26c   : > { %4369 = vmatprep.mubr.f32.mxu1 %v3113_v21  ;;  %4363 = vmatprep.mubr.f32.mxu0 %v3109_v45 }
 0x26f   : > { %4370 = vmatmul.mubr.f32.gmra.mxu1 %v3114_v35  ;;  %4364 = vmatmul.mubr.f32.gmra.mxu0 %v3110_v49 }
 0x2a8   : > { %v3832_v52 = vpop.f32.mrf.mxu0  ;;  %v4230_v17 = vpop.f32.mrf.mxu1 }
 0x2aa   : > { %v3833_v22 = vpop.f32.mrf.mxu0  ;;  %v2527_v31 = vpop.f32.mrf.mxu1 }
 0x2ab   : > { %v6265_v36 = vadd.f32 %v3833_v22, %v3832_v52 }
 0x2ad   : > { %v3835_v55 = vpop.f32.mrf.mxu0 }
 0x2af   : > { %v3836_v38 = vpop.f32.mrf.mxu0 }
 0x2b0   : > { %v6267_v39 = vadd.f32 %v3836_v38, %v3835_v55 }
 0x2b3   : > { %v3838_v41 = vpop.f32.mrf.mxu0  ;;  %v4233_v15 = vpop.f32.mrf.mxu1 }
 0x2b5   : > { %v3839_v9 = vpop.f32.mrf.mxu0  ;;  %v2537_v63 = vpop.f32.mrf.mxu1 }
 0x2b6   : > { %v6269_v16 = vadd.f32 %v3839_v9, %v3838_v41 }
 0x2b8   : > { %v3841_v29 = vpop.f32.mrf.mxu0 }
 0x2ba   : > { %v3842_v34 = vpop.f32.mrf.mxu0 }
 0x2bb   : > { %v6271_v20 = vadd.f32 %v3842_v34, %v3841_v29 }
 0x2be   : > { %v3844_v37 = vpop.f32.mrf.mxu0  ;;  %v4236_v13 = vpop.f32.mrf.mxu1 }
 0x2c0   : > { %v3845_v23 = vpop.f32.mrf.mxu0  ;;  %v2547_v14 = vpop.f32.mrf.mxu1 }
 0x2c1   : > { %v6273_v24 = vadd.f32 %v3845_v23, %v3844_v37 }
 0x2c3   : > { %v3847_v62 = vpop.f32.mrf.mxu0 }
 0x2c5   : > { %v3848_v25 = vpop.f32.mrf.mxu0 }
 0x2c6   : > { %v3849_v42 = vadd.f32 %v3848_v25, %v3847_v62  ;;  %v2528_v62 = vadd.f32 %v6265_v36, %v2527_v31 }
 0x2c9   : > { %v3850_v10 = vpop.f32.mrf.mxu0  ;;  %v4239_v18 = vpop.f32.mrf.mxu1 }
 0x2cb   : > { %v3851_v5 = vpop.f32.mrf.mxu0  ;;  %v2557_v11 = vpop.f32.mrf.mxu1 }
 0x2cc   : > { %v6275_v40 = vadd.f32 %v3851_v5, %v3850_v10 }
 0x2ce   : > { %v3853_v28 = vpop.f32.mrf.mxu0 }
 0x2d0   : > { %v3854_v2 = vpop.f32.mrf.mxu0 }
 0x2d1   : > { %v3855_v25 = vadd.f32 %v3854_v2, %v3853_v28 }
 0x2d3   : > { %v6281_v26 = vpop.f32.mrf.mxu1  ;;  %v2563_v31 = vadd.f32 %v4239_v18, %v3855_v25 }
 0x2d4   : > { %v3912_v44 = vpop.f32.mrf.mxu0  ;;  %6390 = vst [vmem:[#allocation11_spill] sm:$0xff] %v6281_v26 }
 0x2d5   : > { %v6283_v57 = vpop.f32.mrf.mxu1 }
 0x2d6   : > { %v3913_v43 = vpop.f32.mrf.mxu0  ;;  %6391 = vst [vmem:[#allocation13_spill] sm:$0xff] %v6283_v57 }
 0x2d7   : > { %v3914_v37 = vadd.f32 %v3913_v43, %v3912_v44  ;;  %v2548_v43 = vadd.f32 %v6273_v24, %v2547_v14 }
 0x2d9   : > { %v6285_v33 = vpop.f32.mrf.mxu1  ;;  %v2633_v36 = vadd.f32 %v3914_v37, %v2528_v62 }
 0x2da   : > { %v3915_v6 = vpop.f32.mrf.mxu0  ;;  %6392 = vst [vmem:[#allocation14_spill] sm:$0xff] %v6285_v33 }
 0x2db   : > { %v6287_v53 = vpop.f32.mrf.mxu1 }
 0x2dc   : > { %v3916_v51 = vpop.f32.mrf.mxu0  ;;  %6393 = vst [vmem:[#allocation15_spill] sm:$0xff] %v6287_v53  ;;  %v2533_v53 = vadd.f32 %v4230_v17, %v6267_v39 }
 0x2dd   : > { %v3917_v10 = vadd.f32 %v3916_v51, %v3915_v6 }
 0x2df   : > { %v4280_v54 = vpop.f32.mrf.mxu1  ;;  %v2638_v6 = vadd.f32 %v3917_v10, %v2533_v53 }
 0x2e0   : > { %v6277_v56 = vpop.f32.mrf.mxu0 }
 0x2e1   : > { %v6289_v1 = vpop.f32.mrf.mxu1 }
 0x2e2   : > { %v6279_v3 = vpop.f32.mrf.mxu0  ;;  %6394 = vst [vmem:[#allocation16_spill] sm:$0xff] %v6289_v1  ;;  %v2538_v1 = vadd.f32 %v6269_v16, %v2537_v63  ;;  %v2558_v16 = vadd.f32 %v6275_v40, %v2557_v11 }
 0x2e3   : > { %6389 = vst [vmem:[#allocation12_spill] sm:$0xff] %v6279_v3 }
 0x2e5   : > { %v6291_v60 = vpop.f32.mrf.mxu1 }
 0x2e6   : > { %v3921_v48 = vpop.f32.mrf.mxu0  ;;  %6395 = vst [vmem:[#allocation17_spill] sm:$0xff] %v6291_v60 }
 0x2e7   : > { %v6293_v0 = vpop.f32.mrf.mxu1 }
 0x2e8   : > { %v3922_v58 = vpop.f32.mrf.mxu0  ;;  %6396 = vst [vmem:[#allocation18_spill] sm:$0xff] %v6293_v0  ;;  %v2553_v0 = vadd.f32 %v4236_v13, %v3849_v42 }
 0x2e9   : > { %v3923_v39 = vadd.f32 %v3922_v58, %v3921_v48  ;;  %v6399_v58 = vld [vmem:[#allocation13_spill] sm:$0xff] }
 0x2ea   : > { %v6398_v63 = vld [vmem:[#allocation12_spill] sm:$0xff] }
 0x2eb   : > { %v3920_v13 = vadd.f32 %v6398_v63, %v6277_v56 }
 0x2ec   : > { %v3924_v19 = vpop.f32.mrf.mxu0 }
 0x2ee   : > { %v3925_v8 = vpop.f32.mrf.mxu0 }
 0x2ef   : > { %v3926_v33 = vadd.f32 %v3925_v8, %v3924_v19  ;;  %v6405_v37 = vld [vmem:[#allocation18_spill] sm:$0xff] }
 0x2f1   : > { %v3927_v27 = vpop.f32.mrf.mxu0  ;;  %v2653_v51 = vadd.f32 %v3926_v33, %v2548_v43 }
 0x2f3   : > { %v3928_v30 = vpop.f32.mrf.mxu0 }
 0x2f4   : > { %v3929_v23 = vadd.f32 %v3928_v30, %v3927_v27  ;;  %v2738_v30 = vadd.f32 %v6399_v58, %v2633_v36 }
 0x2f6   : > { %v3930_v7 = vpop.f32.mrf.mxu0  ;;  %v2658_v28 = vadd.f32 %v3929_v23, %v2553_v0 }
 0x2f8   : > { %v3931_v32 = vpop.f32.mrf.mxu0  ;;  %v2763_v48 = vadd.f32 %v4280_v54, %v2658_v28 }
 0x2fb   : > { %v3933_v46 = vpop.f32.mrf.mxu0 }
 0x2fd   : > { %v3934_v47 = vpop.f32.mrf.mxu0 }
 0x2fe   : > { %v3935_v26 = vadd.f32 %v3934_v47, %v3933_v46 }
 0x2ff   : > { %v4318_v12 = vpop.f32.mrf.mxu1 }
 0x300   : > { %v3992_v4 = vpop.f32.mrf.mxu0  ;;  %v2668_v19 = vadd.f32 %v3935_v26, %v2563_v31 }
 0x301   : > { %v3021_v49 = vpop.f32.mrf.mxu1 }
 0x302   : > { %v3993_v50 = vpop.f32.mrf.mxu0 }
 0x303   : > { %v3994_v42 = vadd.f32 %v3993_v50, %v3992_v4  ;;  %v2643_v50 = vadd.f32 %v3920_v13, %v2538_v1 }
 0x305   : > { %v4321_v22 = vpop.f32.mrf.mxu1  ;;  %v3022_v53 = vadd.f32 %v3994_v42, %v3021_v49 }
 0x306   : > { %v3995_v59 = vpop.f32.mrf.mxu0 }
 0x307   : > { %v6295_v41 = vpop.f32.mrf.mxu1 }
 0x308   : > { %v3996_v61 = vpop.f32.mrf.mxu0  ;;  %6397 = vst [vmem:[#allocation19_spill] sm:$0xff] %v6295_v41  ;;  %v2543_v41 = vadd.f32 %v4233_v15, %v6271_v20  ;;  %v3932_v20 = vadd.f32 %v3931_v32, %v3930_v7  ;;  %v6400_v32 = vld [vmem:[#allocation11_spill] sm:$0xff] }
 0x309   : > { %v3997_v57 = vadd.f32 %v3996_v61, %v3995_v59  ;;  %v2743_v33 = vadd.f32 %v6400_v32, %v2638_v6  ;;  %v6402_v61 = vld [vmem:[#allocation17_spill] sm:$0xff] }
 0x30a   : > { %v2648_v46 = vadd.f32 %v3923_v39, %v2543_v41  ;;  %v2663_v47 = vadd.f32 %v3932_v20, %v2558_v16  ;;  %v2773_v54 = vadd.f32 %v6402_v61, %v2668_v19  ;;  %v3060_v41 = vadd.f32 %v3022_v53, %v2738_v30 }
 0x30b   : > { %v4324_v34 = vpop.f32.mrf.mxu1  ;;  %v3027_v24 = vadd.f32 %v4318_v12, %v3997_v57  ;;  %v6401_v57 = vld [vmem:[#allocation16_spill] sm:$0xff] }
 0x30c   : > { %v3998_v21 = vpop.f32.mrf.mxu0  ;;  %v2758_v4 = vadd.f32 %v6401_v57, %v2653_v51  ;;  %v2768_v23 = vadd.f32 %v6405_v37, %v2663_v47 }
 0x30d   : > { %v3041_v3 = vpop.f32.mrf.mxu1 }
 0x30e   : > { %v3999_v45 = vpop.f32.mrf.mxu0 }
 0x30f   : > { %v4000_v40 = vadd.f32 %v3999_v45, %v3998_v21  ;;  %v6403_v45 = vld [vmem:[#allocation19_spill] sm:$0xff] }
 0x312   : > { %v4001_v35 = vpop.f32.mrf.mxu0 }
 0x314   : > { %v4002_v52 = vpop.f32.mrf.mxu0 }
 0x315   : > { %v4003_v14 = vadd.f32 %v4002_v52, %v4001_v35  ;;  %v3032_v52 = vadd.f32 %v4000_v40, %v6403_v45 }
 0x317   : > { %v4004_v55 = vpop.f32.mrf.mxu0 }
 0x319   : > { %v4005_v38 = vpop.f32.mrf.mxu0 }
 0x31a   : > { %v4006_v2 = vadd.f32 %v4005_v38, %v4004_v55 }
 0x31c   : > { %v4007_v9 = vpop.f32.mrf.mxu0  ;;  %v3042_v27 = vadd.f32 %v4006_v2, %v3041_v3  ;;  %v3037_v3 = vadd.f32 %v4321_v22, %v4003_v14 }
 0x31e   : > { %v4008_v29 = vpop.f32.mrf.mxu0  ;;  %v3064_v21 = vadd.f32 %v3042_v27, %v2758_v4 }
 0x31f   : > { %v4009_v60 = vadd.f32 %v4008_v29, %v4007_v9  ;;  %v6404_v9 = vld [vmem:[#allocation14_spill] sm:$0xff] }
 0x320   : > { %v2753_v29 = vadd.f32 %v6404_v9, %v2648_v46 }
 0x321   : > { %v4010_v5 = vpop.f32.mrf.mxu0  ;;  %v3047_v15 = vadd.f32 %v4324_v34, %v4009_v60  ;;  %v3061_v60 = vadd.f32 %v3027_v24, %v2743_v33 }
 0x322   : > { %v3063_v10 = vadd.f32 %v3037_v3, %v2753_v29 }
 0x323   : > { %v4011_v44 = vpop.f32.mrf.mxu0  ;;  %v4327_v17 = vpop.f32.mrf.mxu1  ;;  %v3065_v26 = vadd.f32 %v3047_v15, %v2763_v48 }
 0x324   : > { %v4012_v18 = vadd.f32 %v4011_v44, %v4010_v5  ;;  %v6406_v5 = vld [vmem:[#allocation15_spill] sm:$0xff] }
 0x325   : > { %v3051_v11 = vpop.f32.mrf.mxu1  ;;  %v2748_v44 = vadd.f32 %v6406_v5, %v2643_v50 }
 0x326   : > { %v4013_v8 = vpop.f32.mrf.mxu0  ;;  %v3052_v0 = vadd.f32 %v4012_v18, %v3051_v11 }
 0x327   : > { %v3062_v6 = vadd.f32 %v3032_v52, %v2748_v44 }
 0x328   : > { %v4014_v7 = vpop.f32.mrf.mxu0  ;;  %v3066_v28 = vadd.f32 %v3052_v0, %v2768_v23 }
 0x329   : > { %v4015_v56 = vadd.f32 %v4014_v7, %v4013_v8 }
 0x32b   : > { %v4368_v59 = vpop.f32.mrf.mxu1  ;;  %v3057_v12 = vadd.f32 %v4327_v17, %v4015_v56  ;;  %v4362_v49 = vpop.f32.mrf.mxu0 }
 0x32c   : > { %v3241_v35 = vadd.f32 %v4368_v59, %v3065_v26  ;;  %v3237_v55 = vadd.f32 %v4362_v49, %v3061_v60 }
 0x32d   : > { %v3217_v38 = vpop.f32.mrf.mxu1  ;;  %v3197_v22 = vpop.f32.mrf.mxu0  ;;  %v3067_v34 = vadd.f32 %v3057_v12, %v2773_v54 }
 0x32e   : > { %3249 = vst [vmem:[%s394_s22 + $0x28] sm:$0xff] %v3241_v35  ;;  %v3240_v1 = vadd.f32 %v3217_v38, %v3064_v21  ;;  %3245 = vst [vmem:[%s394_s22 + $0x8] sm:$0xff] %v3237_v55  ;;  %v3236_v62 = vadd.f32 %v3197_v22, %v3060_v41 }
 0x32f   : > { %v4371_v25 = vpop.f32.mrf.mxu1  ;;  %v4365_v36 = vpop.f32.mrf.mxu0 }
 0x330   : > { %3248 = vst [vmem:[%s394_s22 + $0x20] sm:$0xff] %v3240_v1  ;;  %v3243_v43 = vadd.f32 %v4371_v25, %v3067_v34  ;;  %3244 = vst [vmem:[%s394_s22] sm:$0xff] %v3236_v62  ;;  %v3239_v2 = vadd.f32 %v4365_v36, %v3063_v10 }
 0x331   : > { %v3227_v31 = vpop.f32.mrf.mxu1  ;;  %v3207_v42 = vpop.f32.mrf.mxu0 }
 0x332   : > { %3251 = vst [vmem:[%s394_s22 + $0x38] sm:$0xff] %v3243_v43  ;;  %v3242_v39 = vadd.f32 %v3227_v31, %v3066_v28  ;;  %3247 = vst [vmem:[%s394_s22 + $0x18] sm:$0xff] %v3239_v2  ;;  %v3238_v17 = vadd.f32 %v3207_v42, %v3062_v6 }
 0x334   : > { %3250 = vst [vmem:[%s394_s22 + $0x30] sm:$0xff] %v3242_v39  ;;  %3246 = vst [vmem:[%s394_s22 + $0x10] sm:$0xff] %v3238_v17 }
 0x335   : > { %4504 = shalt.err (!%p4501_p0)
}
 0x336   : > { %s4505_s12 = scalar_lea.hbm %s6322_s14, 1024  ;;  %s4509_s13 = scalar_lea.hbm %s6377_s11, 2048 }
 0x337   : > { %p4506_p1 = scmp.ne.s32.totalorder %s6322_s14, %s4505_s12  ;;  %p4510_p4 = scmp.lt.s32.totalorder %s6322_s14, %s6377_s11 }
 0x338   : > { %p4511_p7 = scmp.lt.s32.totalorder %s4509_s13, %s4505_s12 }
 0x339   : > { %p4507_p2 = pnand %p4506_p1, %p4663_p5 }
 0x33a   : > { %p4512_p6 = por %p4511_p7, %p4510_p4 }
 0x33b   : > { %p4508_p3 = pneg %p4507_p2 }
 0x33d   : > { %p4513_p8 = pnand %p4512_p6, %p4508_p3 }
 0x33f   : > { %4516 = shalt.err (!%p4513_p8)
}
 0x340   : > { %s4563_s16 = smov 128   ;;  %s4564_s24 = smov 8  }
 0x341   : > { %4409 = dma.vmem_to_hbm [thread:$0]  (%p4663_p5), %s6317_s30, 1024, %s6322_s14, %s6326_s15, %s4563_s16, %s4563_s16, %s4564_s24  }
 0x342 PF: > { %p4421_p9 = scmp.ge.s32.totalorder %s4555_s20, 2  ;;  %s3281_s25 = sand.u32 1, %s4543_s17  }
 0x343   : > { %p6407_p10 = scmp.ne.s32.totalorder %s6382_s28, 0  ;;  %s3282_s10 = scalar_lea.sflag [#allocation6], %s3281_s25 }
 0x345   : > { %p4416_p11 = pnand %p4421_p9, %p6407_p10 }
 0x347   : > { %p4417_p12 = pneg %p4416_p11 }
 0x349   : > { %4538 = dma.done.wait (%p4417_p12), %s3282_s10, 1024  }
 0x34a   : > { %4540 = vsyncadd (%p4417_p12), %s3282_s10, 4294966272  ;;  %s6408_s12 = sld [smem:[#allocation10_spill]]  ;;  %p22_p13 = scmp.ge.s32.totalorder %s4650_s23, 4  }
 0x34b   : > { %s6409_s17 = smov %s4547_s18  ;;  %s6410_s18 = smov %s4551_s19 }
 0x34c   : > { %s6412_s20 = smov %s4650_s23  ;;  %24 = sbr.rel (!%p22_p13) target bundleno = 6 (0x6), region = 117 }
 0x350   : > { %s6411_s19 = smov %s6408_s12 }
 0x351   :  { %3287 = vsyncpa [#allocation5], 1 }
 0x352   :  { %3289 = vsyncpa [#allocation5 + $0x1], 1 }
 0x353   :  { %3290 = vsyncpa [#allocation6], 1 }
 0x354   :  { %3292 = vsyncpa [#allocation6 + $0x1], 1 }

// kernel: tpu_custom_call.1
= control target key start
LH: loop header
LB: loop body
LE: loop exit
PB: predicated region body
PF: predicated region fallthrough
CT: control target
= control target key end

     0   :  { %s6366_s0 = inlined_call_operand.vmem [shape: f32[2,36,9,128], index: 0, kind: input, shape index: {}]   ;;  %s6367_s1 = inlined_call_operand.vmem [shape: f32[1,36,9,1], index: 1, kind: input, shape index: {}]   ;;  %s6368_s2 = inlined_call_operand.vmem [shape: f32[1,128], index: 2, kind: input, shape index: {}]   ;;  %s6369_s3 = inlined_call_operand.vmem [shape: f32[1,128], index: 3, kind: input, shape index: {}]   ;;  %s6370_s4 = inlined_call_operand.vmem [shape: f32[3,384,128], index: 4, kind: input, shape index: {}]   ;;  %s6371_s5 = inlined_call_operand.vmem [shape: f32[1,128], index: 5, kind: input, shape index: {}]   ;;  %s6372_s6 = inlined_call_operand.vmem [shape: f32[1,128], index: 6, kind: input, shape index: {}]   ;;  %s6373_s7 = inlined_call_operand.vmem [shape: f32[3,384,128], index: 7, kind: input, shape index: {}]   ;;  %s6374_s8 = inlined_call_operand.vmem [shape: f32[1,128], index: 8, kind: input, shape index: {}]   ;;  %s6375_s9 = inlined_call_operand.vmem [shape: f32[1,128], index: 9, kind: input, shape index: {}]   ;;  %s6376_s10 = inlined_call_operand.hbm [shape: f32[128,128], index: 10, kind: input, shape index: {}]   ;;  %s6377_s11 = inlined_call_operand.hbm [shape: f32[2,8,8,128], index: 11, kind: output, shape index: {}]  }
   0x1   :  { %6379 = sst [smem:[#allocation20_spill]] %s6376_s10 }
   0x2   :  { %16 = vsyncpa [#allocation5], 0 }
   0x3   :  { %17 = vsyncpa [#allocation6], 0 }
   0x4   :  { %19 = vsyncpa [#allocation6 + $0x1], 0  ;;  %s4625_s17 = smov 0   ;;  %s4627_s18 = smov 0  }
   0x5   :  { %s4629_s19 = smov 0   ;;  %s4631_s20 = smov 0  }
   0x6 LB: > { %s4646_s21 = sadd.s32 4294967295, %s4555_s20   ;;  %s3340_s22 = sadd.s32 4294967294, %s4555_s20   ;;  %s4555_s20 = sphi %s4631_s20, %s6412_s20   ;;  %s4551_s19 = sphi %s4629_s19, %s6411_s19   ;;  %s4547_s18 = sphi %s4627_s18, %s6410_s18   ;;  %s4543_s17 = sphi %s4625_s17, %s6409_s17  }
   0x7   : > { %s4650_s23 = sadd.s32 1, %s4555_s20   ;;  %s268_s24 = sadd.s32 1, %s4551_s19 }
   0x8   : > { %s265_s25 = ssub.s32 %s4555_s20, %s4650_s23  ;;  %p278_p0 = scmp.ne.s32.totalorder %s4551_s19, %s4547_s18 }
   0x9   : > { %p266_p1 = scmp.eq.s32.totalorder %s265_s25, 0  ;;  %p279_p2 = scmp.eq.s32.totalorder %s4646_s21, 1 }
   0xa   : > { %p284_p3 = scmp.ne.s32.totalorder %s4547_s18, %s4543_s17  ;;  %p285_p4 = scmp.eq.s32.totalorder %s3340_s22, 1 }
   0xb   : > { %s4661_s26 = scalar_select %p266_p1, %s4551_s19, %s268_s24  }
   0xc   : > { %p4663_p5 = por %p279_p2, %p278_p0  ;;  %p4667_p6 = por %p285_p4, %p284_p3 }
   0xd   : > { %6380 = sst [smem:[#allocation10_spill]] %s4661_s26  ;;  %p3341_p7 = scmp.ge.s32.totalorder %s4555_s20, 1 }
   0xe   : > { %s6382_s28 = scalar_select %p4667_p6, 1, 0 }
   0xf   : > { %p292_p8 = scmp.lt.s32.totalorder %s4555_s20, 3  ;;  %p4419_p9 = scmp.eq.s32.totalorder %s4646_s21, 0 }
  0x10   : > { %s4557_s30 = smov [#allocation4]  }
  0x11   : > { %p4674_p10 = pnand %p3341_p7, %p292_p8  ;;  %s331_s12 = sshll.u32 %s4557_s30, 4  ;;  %s332_s12 = int_to_ptr.vmem [resolvable:$true] %s331_s12 }
  0x12   : > { %s4476_s13 = scalar_lea.vmem %s332_s12, 2048  ;;  %p4484_p3 = scmp.lt.s32.totalorder %s332_s12, %s332_s12 }
  0x13   : > { %p4411_p11 = pneg %p4674_p10  ;;  %p4477_p0 = scmp.ne.s32.totalorder %s332_s12, %s4476_s13 }
  0x14   : > { %p4485_p4 = scmp.lt.s32.totalorder %s4476_s13, %s4476_s13 }
  0x15   : > { %p4412_p12 = pnand %p4419_p9, %p4411_p11 }
  0x16   : > { %p4486_p6 = por %p4485_p4, %p4484_p3 }
  0x17   : > { %p4467_p13 = pneg %p4412_p12 }
  0x19   : > { %p4479_p1 = pnand %p4477_p0, %p4467_p13 }
  0x1b   : > { %p4480_p2 = pneg %p4479_p1 }
  0x1d   : > { %p4487_p7 = pnand %p4486_p6, %p4480_p2 }
  0x1f   : > { %4490 = shalt.err (!%p4487_p7)
}
  0x20   : > { %s4558_s14 = smov 128   ;;  %s4559_s15 = smov 8  }
  0x21   : > { %s6384_s10 = sld [smem:[#allocation20_spill]] }
  0x23   : > { %355 = sbr.rel (%p4674_p10) target bundleno = 834 (0x342), region = 64 }
  0x27   : > { %4414 = dma.hbm_to_vmem [thread:$0]  (!%p4412_p12), %s6384_s10, 2048, %s332_s12, [#allocation5], %s4558_s14, %s4558_s14, %s4559_s15  }
  0x28   : > { %4534 = dma.done.wait (%p4419_p9), [#allocation5], 2048  }
  0x29   : > { %4536 = vsyncadd (%p4419_p9), [#allocation5], 4294965248  ;;  %v4560_v0 = vmov 0   ;;  %v758_v1 = vld [vmem:[%s6367_s1 + $0x1c0] sm:$0xff]  ;;  %v756_v2 = vld [vmem:[%s6367_s1 + $0x1b0] sm:$0xff]  ;;  %p395_p6 = scmp.lt.s32.totalorder %s4646_s21, 1 }
  0x2a   : > { %4462 = vset.pattern.permute.xlu1 %v4560_v0  ;;  %4461 = vset.pattern.permute.xlu0 %v4560_v0  ;;  %v739_v3 = vld [vmem:[%s6367_s1 + $0x128] sm:$0x1]  ;;  %v738_v4 = vld [vmem:[%s6367_s1 + $0x120] sm:$0xff]  ;;  %v741_v5 = vld [vmem:[%s6367_s1 + $0x138] sm:$0x1]  ;;  %s3559_s13 = sshll.u32 %s4646_s21, 10 }
  0x2b   : > { %1056 = vperm.xlu1 %4462, %v758_v1   ;;  %1046 = vperm.xlu0 %4461, %v756_v2   ;;  %v740_v6 = vld [vmem:[%s6367_s1 + $0x130] sm:$0xff]  ;;  %v742_v7 = vld [vmem:[%s6367_s1 + $0x140] sm:$0xff]  ;;  %v3381_v13 = vld [vmem:[%s6370_s4 + $0x278] sm:$0xff]  ;;  %s396_s29 = scalar_select %p395_p6, %s4646_s21, 1 }
  0x2c   : > { %v760_v8 = vld [vmem:[%s6367_s1 + $0x1d0] sm:$0xff]  ;;  %v762_v10 = vld [vmem:[%s6367_s1 + $0x1e0] sm:$0xff]  ;;  %v3365_v14 = vld [vmem:[%s6370_s4 + $0x1f8] sm:$0xff]  ;;  %3560 = vmatprep.subr.mxu0 %v3381_v13  ;;  %s6322_s14 = scalar_lea.hbm %s6377_s11, %s3559_s13  ;;  %s4562_s24 = smov [#allocation7]  }
  0x2d   : > { %v744_v9 = vld [vmem:[%s6367_s1 + $0x150] sm:$0xff]  ;;  %v746_v11 = vld [vmem:[%s6367_s1 + $0x160] sm:$0xff]  ;;  %3561 = vmatpush3.msra.mxu0 %v3365_v14  ;;  %v3397_v17 = vld [vmem:[%s6370_s4 + $0x2f8] sm:$0xff]  ;;  %s4404_s22 = smul.u32 576, %s396_s29  ;;  %s4495_s25 = sshll.u32 %s4562_s24, 4  ;;  %s4496_s25 = int_to_ptr.vmem [resolvable:$false] %s4495_s25 }
  0x2e   : > { %v764_v12 = vld [vmem:[%s6367_s1 + $0x1f0] sm:$0xff]  ;;  %v3379_v18 = vld [vmem:[%s6370_s4 + $0x268] sm:$0xff]  ;;  %v766_v21 = vld [vmem:[%s6367_s1 + $0x200] sm:$0xff]  ;;  %4064 = vmatprep.subr.mxu1 %v3397_v17  ;;  %s4497_s10 = scalar_lea.vmem %s4496_s25, 2048 }
  0x2f   : > { %961 = vperm.xlu1 %4462, %v739_v3   ;;  %956 = vperm.xlu0 %4461, %v738_v4   ;;  %v3380_v15 = vld [vmem:[%s6370_s4 + $0x270] sm:$0xff]  ;;  %v3363_v22 = vld [vmem:[%s6370_s4 + $0x1e8] sm:$0xff]  ;;  %v3378_v23 = vld [vmem:[%s6370_s4 + $0x260] sm:$0xff]  ;;  %s5017_s12 = scalar_lea.vmem %s6366_s0, %s4404_s22 }
  0x30   : > { %v3364_v16 = vld [vmem:[%s6370_s4 + $0x1f0] sm:$0xff]  ;;  %3562 = vmatprep.subr.mxu0 %v3380_v15  ;;  %4065 = vmatpush3.msra.mxu1 %v3397_v17  ;;  %v3395_v24 = vld [vmem:[%s6370_s4 + $0x2e8] sm:$0xff]  ;;  %v3362_v25 = vld [vmem:[%s6370_s4 + $0x1e0] sm:$0xff] }
  0x31   : > { %v3396_v19 = vld [vmem:[%s6370_s4 + $0x2f0] sm:$0xff]  ;;  %3563 = vmatpush3.msra.mxu0 %v3364_v16  ;;  %v743_v26 = vld [vmem:[%s6367_s1 + $0x148] sm:$0x1]  ;;  %v3377_v28 = vld [vmem:[%s6370_s4 + $0x258] sm:$0xff] }
  0x32   : > { %v748_v20 = vld [vmem:[%s6367_s1 + $0x170] sm:$0xff]  ;;  %3564 = vmatprep.subr.mxu0 %v3379_v18  ;;  %4066 = vmatprep.subr.mxu1 %v3396_v19  ;;  %v3394_v29 = vld [vmem:[%s6370_s4 + $0x2e0] sm:$0xff]  ;;  %v3361_v30 = vld [vmem:[%s6370_s4 + $0x1d8] sm:$0xff] }
  0x33   : > { %971 = vperm.xlu1 %4462, %v741_v5   ;;  %966 = vperm.xlu0 %4461, %v740_v6   ;;  %v768_v27 = vld [vmem:[%s6367_s1 + $0x210] sm:$0xff]  ;;  %v3393_v32 = vld [vmem:[%s6370_s4 + $0x2d8] sm:$0xff]  ;;  %v750_v34 = vld [vmem:[%s6367_s1 + $0x180] sm:$0xff] }
  0x34   : > { %3565 = vmatpush3.msra.mxu0 %v3363_v22  ;;  %4067 = vmatpush3.msra.mxu1 %v3396_v19  ;;  %v3376_v31 = vld [vmem:[%s6370_s4 + $0x250] sm:$0xff]  ;;  %v745_v33 = vld [vmem:[%s6367_s1 + $0x158] sm:$0x1]  ;;  %v3375_v36 = vld [vmem:[%s6370_s4 + $0x248] sm:$0xff] }
  0x35   : > { %3566 = vmatprep.subr.mxu0 %v3378_v23  ;;  %4068 = vmatprep.subr.mxu1 %v3395_v24  ;;  %v3360_v35 = vld [vmem:[%s6370_s4 + $0x1d0] sm:$0xff]  ;;  %v3359_v38 = vld [vmem:[%s6370_s4 + $0x1c8] sm:$0xff]  ;;  %v770_v40 = vld [vmem:[%s6367_s1 + $0x220] sm:$0xff] }
  0x36   : > { %3567 = vmatpush3.msra.mxu0 %v3362_v25  ;;  %4069 = vmatpush3.msra.mxu1 %v3395_v24  ;;  %v3392_v37 = vld [vmem:[%s6370_s4 + $0x2d0] sm:$0xff]  ;;  %v747_v39 = vld [vmem:[%s6367_s1 + $0x168] sm:$0x1]  ;;  %v3374_v41 = vld [vmem:[%s6370_s4 + $0x240] sm:$0xff] }
  0x37   : > { %976 = vperm.xlu1 %4462, %v742_v7   ;;  %1066 = vperm.xlu0 %4461, %v760_v8   ;;  %v3391_v42 = vld [vmem:[%s6370_s4 + $0x2c8] sm:$0xff]  ;;  %v3358_v43 = vld [vmem:[%s6370_s4 + $0x1c0] sm:$0xff]  ;;  %v3373_v44 = vld [vmem:[%s6370_s4 + $0x238] sm:$0xff] }
  0x38   : > { %3568 = vmatprep.subr.mxu0 %v3377_v28  ;;  %4070 = vmatprep.subr.mxu1 %v3394_v29  ;;  %v3390_v45 = vld [vmem:[%s6370_s4 + $0x2c0] sm:$0xff]  ;;  %v749_v46 = vld [vmem:[%s6367_s1 + $0x178] sm:$0x1]  ;;  %v752_v47 = vld [vmem:[%s6367_s1 + $0x190] sm:$0xff] }
  0x39   : > { %3569 = vmatpush3.msra.mxu0 %v3361_v30  ;;  %4071 = vmatpush3.msra.mxu1 %v3394_v29  ;;  %v3357_v48 = vld [vmem:[%s6370_s4 + $0x1b8] sm:$0xff]  ;;  %v3372_v49 = vld [vmem:[%s6370_s4 + $0x230] sm:$0xff]  ;;  %v702_v53 = vld [vmem:[%s6367_s1] sm:$0xff] }
  0x3a   : > { %3570 = vmatprep.subr.mxu0 %v3376_v31  ;;  %4072 = vmatprep.subr.mxu1 %v3393_v32  ;;  %v3389_v50 = vld [vmem:[%s6370_s4 + $0x2b8] sm:$0xff]  ;;  %v3356_v51 = vld [vmem:[%s6370_s4 + $0x1b0] sm:$0xff]  ;;  %v3371_v54 = vld [vmem:[%s6370_s4 + $0x228] sm:$0xff] }
  0x3b   : > { %986 = vperm.xlu1 %4462, %v744_v9   ;;  %1076 = vperm.xlu0 %4461, %v762_v10   ;;  %v720_v52 = vld [vmem:[%s6367_s1 + $0x90] sm:$0xff]  ;;  %v3355_v56 = vld [vmem:[%s6370_s4 + $0x1a8] sm:$0xff]  ;;  %v3370_v57 = vld [vmem:[%s6370_s4 + $0x220] sm:$0xff] }
  0x3c   : > { %3571 = vmatpush3.msra.mxu0 %v3360_v35  ;;  %4073 = vmatpush3.msra.mxu1 %v3393_v32  ;;  %v3388_v55 = vld [vmem:[%s6370_s4 + $0x2b0] sm:$0xff]  ;;  %v3387_v58 = vld [vmem:[%s6370_s4 + $0x2a8] sm:$0xff]  ;;  %v753_v60 = vld [vmem:[%s6367_s1 + $0x198] sm:$0x1] }
  0x3d   : > { %3572 = vmatprep.subr.mxu0 %v3375_v36  ;;  %4074 = vmatprep.subr.mxu1 %v3392_v37  ;;  %v751_v59 = vld [vmem:[%s6367_s1 + $0x188] sm:$0x1]  ;;  %v3354_v61 = vld [vmem:[%s6370_s4 + $0x1a0] sm:$0xff]  ;;  %v3369_v62 = vld [vmem:[%s6370_s4 + $0x218] sm:$0xff] }
  0x3e   : > { %3573 = vmatpush3.msra.mxu0 %v3359_v38  ;;  %4075 = vmatpush3.msra.mxu1 %v3392_v37  ;;  %v3386_v63 = vld [vmem:[%s6370_s4 + $0x2a0] sm:$0xff]  ;;  %v3353_v0 = vld [vmem:[%s6370_s4 + $0x198] sm:$0xff]  ;;  %v703_v2 = vld [vmem:[%s6367_s1 + $0x8] sm:$0x1] }
  0x3f   : > { %996 = vperm.xlu1 %4462, %v746_v11   ;;  %1086 = vperm.xlu0 %4461, %v764_v12   ;;  %v722_v1 = vld [vmem:[%s6367_s1 + $0xa0] sm:$0xff]  ;;  %v3368_v3 = vld [vmem:[%s6370_s4 + $0x210] sm:$0xff]  ;;  %v3385_v4 = vld [vmem:[%s6370_s4 + $0x298] sm:$0xff] }
  0x40   : > { %3574 = vmatprep.subr.mxu0 %v3374_v41  ;;  %4076 = vmatprep.subr.mxu1 %v3391_v42  ;;  %v3352_v5 = vld [vmem:[%s6370_s4 + $0x190] sm:$0xff]  ;;  %v3367_v6 = vld [vmem:[%s6370_s4 + $0x208] sm:$0xff]  ;;  %v705_v9 = vld [vmem:[%s6367_s1 + $0x18] sm:$0x1] }
  0x41   : > { %3575 = vmatpush3.msra.mxu0 %v3358_v43  ;;  %4077 = vmatpush3.msra.mxu1 %v3391_v42  ;;  %v3384_v7 = vld [vmem:[%s6370_s4 + $0x290] sm:$0xff]  ;;  %v3351_v10 = vld [vmem:[%s6370_s4 + $0x188] sm:$0xff]  ;;  %v3366_v11 = vld [vmem:[%s6370_s4 + $0x200] sm:$0xff] }
  0x42   : > { %3576 = vmatprep.subr.mxu0 %v3373_v44  ;;  %4078 = vmatprep.subr.mxu1 %v3390_v45  ;;  %v704_v8 = vld [vmem:[%s6367_s1 + $0x10] sm:$0xff]  ;;  %v3383_v12 = vld [vmem:[%s6370_s4 + $0x288] sm:$0xff]  ;;  %v3350_v13 = vld [vmem:[%s6370_s4 + $0x180] sm:$0xff] }
  0x43   : > { %1006 = vperm.xlu1 %4462, %v748_v20   ;;  %1096 = vperm.xlu0 %4461, %v766_v21   ;;  %v724_v14 = vld [vmem:[%s6367_s1 + $0xb0] sm:$0xff]  ;;  %v706_v15 = vld [vmem:[%s6367_s1 + $0x20] sm:$0xff]  ;;  %v1334_v17 = vld [vmem:[%s6370_s4 + $0xf8] sm:$0xff] }
  0x44   : > { %3577 = vmatpush3.msra.mxu0 %v3357_v48  ;;  %4079 = vmatpush3.msra.mxu1 %v3390_v45  ;;  %v3382_v16 = vld [vmem:[%s6370_s4 + $0x280] sm:$0xff]  ;;  %v4937_v18 = vld [vmem:[%s6370_s4 + $0x178] sm:$0xff]  ;;  %v708_v20 = vld [vmem:[%s6367_s1 + $0x30] sm:$0xff] }
  0x45   : > { %3578 = vmatprep.subr.mxu0 %v3372_v49  ;;  %4080 = vmatprep.subr.mxu1 %v3389_v50  ;;  %v726_v19 = vld [vmem:[%s6367_s1 + $0xc0] sm:$0xff]  ;;  %v728_v21 = vld [vmem:[%s6367_s1 + $0xd0] sm:$0xff]  ;;  %v707_v25 = vld [vmem:[%s6367_s1 + $0x28] sm:$0x1] }
  0x46   : > { %3579 = vmatpush3.msra.mxu0 %v3356_v51  ;;  %4081 = vmatpush3.msra.mxu1 %v3389_v50  ;;  %v710_v22 = vld [vmem:[%s6367_s1 + $0x40] sm:$0xff]  ;;  %v712_v24 = vld [vmem:[%s6367_s1 + $0x50] sm:$0xff]  ;;  %v711_v29 = vld [vmem:[%s6367_s1 + $0x48] sm:$0x1] }
  0x47   : > { %981 = vperm.xlu1 %4462, %v743_v26   ;;  %1106 = vperm.xlu0 %4461, %v768_v27   ;;  %v730_v23 = vld [vmem:[%s6367_s1 + $0xe0] sm:$0xff]  ;;  %v732_v26 = vld [vmem:[%s6367_s1 + $0xf0] sm:$0xff]  ;;  %v709_v27 = vld [vmem:[%s6367_s1 + $0x38] sm:$0x1] }
  0x48   : > { %3580 = vmatprep.subr.mxu0 %v3371_v54  ;;  %4082 = vmatprep.subr.mxu1 %v3388_v55  ;;  %v714_v28 = vld [vmem:[%s6367_s1 + $0x60] sm:$0xff]  ;;  %v713_v31 = vld [vmem:[%s6367_s1 + $0x58] sm:$0x1]  ;;  %v716_v32 = vld [vmem:[%s6367_s1 + $0x70] sm:$0xff] }
  0x49   : > { %3581 = vmatpush3.msra.mxu0 %v3355_v56  ;;  %4083 = vmatpush3.msra.mxu1 %v3388_v55  ;;  %v734_v30 = vld [vmem:[%s6367_s1 + $0x100] sm:$0xff]  ;;  %v719_v36 = vld [vmem:[%s6367_s1 + $0x88] sm:$0x1]  ;;  %v736_v37 = vld [vmem:[%s6367_s1 + $0x110] sm:$0xff] }
  0x4a   : > { %3582 = vmatprep.subr.mxu0 %v3370_v57  ;;  %4084 = vmatprep.subr.mxu1 %v3387_v58  ;;  %v718_v35 = vld [vmem:[%s6367_s1 + $0x80] sm:$0xff]  ;;  %v721_v38 = vld [vmem:[%s6367_s1 + $0x98] sm:$0x1]  ;;  %v727_v41 = vld [vmem:[%s6367_s1 + $0xc8] sm:$0x1] }
  0x4b   : > { %991 = vperm.xlu1 %4462, %v745_v33   ;;  %1016 = vperm.xlu0 %4461, %v750_v34   ;;  %v715_v33 = vld [vmem:[%s6367_s1 + $0x68] sm:$0x1]  ;;  %v717_v34 = vld [vmem:[%s6367_s1 + $0x78] sm:$0x1]  ;;  %v5028_v45 = vld [vmem:[%s6368_s2] ss:$0 sm:$0xff] }
  0x4c   : > { %3583 = vmatpush3.msra.mxu0 %v3354_v61  ;;  %4085 = vmatpush3.msra.mxu1 %v3387_v58  ;;  %v729_v42 = vld [vmem:[%s6367_s1 + $0xd8] sm:$0x1]  ;;  %v731_v43 = vld [vmem:[%s6367_s1 + $0xe8] sm:$0x1]  ;;  %v438_v54 = vld [vmem:[%s5017_s12 + $0x120] sm:$0xff] }
  0x4d   : > { %3584 = vmatprep.subr.mxu0 %v3369_v62  ;;  %4086 = vmatprep.subr.mxu1 %v3386_v63  ;;  %v733_v44 = vld [vmem:[%s6367_s1 + $0xf8] sm:$0x1]  ;;  %v735_v48 = vld [vmem:[%s6367_s1 + $0x108] sm:$0x1]  ;;  %v516_v58 = vmul.f32 %v5028_v45, %v438_v54  ;;  %v440_v62 = vld [vmem:[%s5017_s12 + $0x130] sm:$0xff] }
  0x4e   : > { %3585 = vmatpush3.msra.mxu0 %v3353_v0  ;;  %4087 = vmatpush3.msra.mxu1 %v3386_v63  ;;  %v439_v51 = vld [vmem:[%s5017_s12 + $0x128] sm:$0x1]  ;;  %v1317_v54 = vld [vmem:[%s6370_s4 + $0x70] sm:$0xff] }
  0x4f   : > { %1001 = vperm.xlu1 %4462, %v747_v39   ;;  %1116 = vperm.xlu0 %4461, %v770_v40   ;;  %v723_v39 = vld [vmem:[%s6367_s1 + $0xa8] sm:$0x1]  ;;  %v725_v40 = vld [vmem:[%s6367_s1 + $0xb8] sm:$0x1]  ;;  %v517_v55 = vmul.f32 %v5028_v45, %v439_v51  ;;  %v448_v51 = vld [vmem:[%s5017_s12 + $0x170] sm:$0xff] }
  0x50   : > { %3586 = vmatprep.subr.mxu0 %v3368_v3  ;;  %4088 = vmatprep.subr.mxu1 %v3385_v4  ;;  %v755_v61 = vld [vmem:[%s6367_s1 + $0x1a8] sm:$0x1] }
  0x51   : > { %3587 = vmatpush3.msra.mxu0 %v3352_v5  ;;  %4089 = vmatpush3.msra.mxu1 %v3385_v4  ;;  %v518_v4 = vmul.f32 %v5028_v45, %v440_v62  ;;  %v442_v5 = vld [vmem:[%s5017_s12 + $0x140] sm:$0xff]  ;;  %v526_v62 = vmul.f32 %v5028_v45, %v448_v51  ;;  %v1312_v51 = vld [vmem:[%s6370_s4 + $0x48] sm:$0xff] }
  0x52   : > { %3588 = vmatprep.subr.mxu0 %v3367_v6  ;;  %4090 = vmatprep.subr.mxu1 %v3384_v7  ;;  %v460_v6 = vld [vmem:[%s5017_s12 + $0x1d0] sm:$0xff] }
  0x53   : > { %1011 = vperm.xlu1 %4462, %v749_v46   ;;  %1026 = vperm.xlu0 %4461, %v752_v47   ;;  %v458_v46 = vld [vmem:[%s5017_s12 + $0x1c0] sm:$0xff]  ;;  %v456_v47 = vld [vmem:[%s5017_s12 + $0x1b0] sm:$0xff] }
  0x54   : > { %3589 = vmatpush3.msra.mxu0 %v3351_v10  ;;  %4091 = vmatpush3.msra.mxu1 %v3384_v7  ;;  %v536_v49 = vmul.f32 %v5028_v45, %v458_v46  ;;  %v534_v50 = vmul.f32 %v5028_v45, %v456_v47  ;;  %v757_v7 = vld [vmem:[%s6367_s1 + $0x1b8] sm:$0x1] }
  0x55   : > { %3590 = vmatprep.subr.mxu0 %v3366_v11  ;;  %4092 = vmatprep.subr.mxu1 %v3383_v12 }
  0x56   : > { %3591 = vmatpush3.msra.mxu0 %v3350_v13  ;;  %4093 = vmatpush3.msra.mxu1 %v3383_v12  ;;  %v520_v13 = vmul.f32 %v5028_v45, %v442_v5  ;;  %v468_v5 = vld [vmem:[%s5017_s12 + $0x210] sm:$0xff] }
  0x57   : > { %866 = vperm.xlu0 %4461, %v720_v52   ;;  %776 = vperm.xlu1 %4462, %v702_v53   ;;  %v737_v52 = vld [vmem:[%s6367_s1 + $0x118] sm:$0x1]  ;;  %v5044_v53 = vld [vmem:[%s6369_s3] ss:$0 sm:$0xff] }
  0x58   : > { %4094 = vmatprep.subr.mxu1 %v3382_v16  ;;  %3640 = vmatprep.subr.mxu0 %v1334_v17  ;;  %v614_v56 = vadd.f32 %v5044_v53, %v536_v49  ;;  %v612_v57 = vadd.f32 %v5044_v53, %v534_v50  ;;  %v595_v63 = vadd.f32 %v5044_v53, %v517_v55  ;;  %v769_v55 = vld [vmem:[%s6367_s1 + $0x218] sm:$0x1] }
  0x59   : > { %4095 = vmatpush3.msra.mxu1 %v3382_v16  ;;  %v594_v3 = vadd.f32 %v5044_v53, %v516_v58 }
  0x5a   : > { %4108 = vmatprep.subr.mxu1 %v4937_v18  ;;  %v667_v11 = vmax.f32 %v595_v63, 0.0 }
  0x5b   : > { %1021 = vperm.xlu0 %4461, %v751_v59   ;;  %1031 = vperm.xlu1 %4462, %v753_v60   ;;  %v441_v59 = vld [vmem:[%s5017_s12 + $0x138] sm:$0x1]  ;;  %v754_v60 = vld [vmem:[%s6367_s1 + $0x1a0] sm:$0xff]  ;;  %v666_v17 = vmax.f32 %v594_v3, 0.0 }
  0x5c   : > { %v519_v0 = vmul.f32 %v5028_v45, %v441_v59 }
  0x5e   : > { %v597_v12 = vadd.f32 %v5044_v53, %v519_v0 }
  0x5f   : > { %876 = vperm.xlu0 %4461, %v722_v1   ;;  %781 = vperm.xlu1 %4462, %v703_v2   ;;  %v686_v1 = vmax.f32 %v614_v56, 0.0  ;;  %v684_v2 = vmax.f32 %v612_v57, 0.0  ;;  %v771_v56 = vld [vmem:[%s6367_s1 + $0x228] sm:$0x1] }
  0x60   : > { %v1332_v57 = vld [vmem:[%s6370_s4 + $0xe8] sm:$0xff] }
  0x63   : > { %786 = vperm.xlu0 %4461, %v704_v8   ;;  %791 = vperm.xlu1 %4462, %v705_v9   ;;  %v759_v8 = vld [vmem:[%s6367_s1 + $0x1c8] sm:$0x1] }
  0x67   : > { %886 = vperm.xlu0 %4461, %v724_v14   ;;  %796 = vperm.xlu1 %4462, %v706_v15   ;;  %v538_v14 = vmul.f32 %v5028_v45, %v460_v6 }
  0x6b   : > { %896 = vperm.xlu0 %4461, %v726_v19   ;;  %806 = vperm.xlu1 %4462, %v708_v20   ;;  %v596_v19 = vadd.f32 %v5044_v53, %v518_v4  ;;  %v444_v20 = vld [vmem:[%s5017_s12 + $0x150] sm:$0xff]  ;;  %v443_v4 = vld [vmem:[%s5017_s12 + $0x148] sm:$0x1] }
  0x6f   : > { %906 = vperm.xlu0 %4461, %v728_v21   ;;  %816 = vperm.xlu1 %4462, %v710_v22   ;;  %v761_v21 = vld [vmem:[%s6367_s1 + $0x1d8] sm:$0x1]  ;;  %v763_v22 = vld [vmem:[%s6367_s1 + $0x1e8] sm:$0x1] }
  0x73   : > { %916 = vperm.xlu0 %4461, %v730_v23   ;;  %826 = vperm.xlu1 %4462, %v712_v24   ;;  %v462_v23 = vld [vmem:[%s5017_s12 + $0x1e0] sm:$0xff] }
  0x77   : > { %801 = vperm.xlu0 %4461, %v707_v25   ;;  %926 = vperm.xlu1 %4462, %v732_v26   ;;  %v669_v26 = vmax.f32 %v597_v12, 0.0  ;;  %v604_v12 = vadd.f32 %v5044_v53, %v526_v62  ;;  %v1347_v62 = vld [vmem:[%s6370_s4 + $0x160] sm:$0xff] }
  0x7b   : > { %811 = vperm.xlu0 %4461, %v709_v27   ;;  %836 = vperm.xlu1 %4462, %v714_v28   ;;  %v598_v27 = vadd.f32 %v5044_v53, %v520_v13  ;;  %v616_v28 = vadd.f32 %v5044_v53, %v538_v14  ;;  %v521_v14 = vmul.f32 %v5028_v45, %v443_v4 }
  0x7d   : > { %v688_v49 = vmax.f32 %v616_v28, 0.0 }
  0x7f   : > { %821 = vperm.xlu0 %4461, %v711_v29   ;;  %936 = vperm.xlu1 %4462, %v734_v30   ;;  %v522_v29 = vmul.f32 %v5028_v45, %v444_v20 }
  0x83   : > { %831 = vperm.xlu0 %4461, %v713_v31   ;;  %846 = vperm.xlu1 %4462, %v716_v32   ;;  %v668_v32 = vmax.f32 %v596_v19, 0.0 }
  0x87   : > { %841 = vperm.xlu0 %4461, %v715_v33   ;;  %851 = vperm.xlu1 %4462, %v717_v34   ;;  %v540_v33 = vmul.f32 %v5028_v45, %v462_v23  ;;  %v446_v34 = vld [vmem:[%s5017_s12 + $0x160] sm:$0xff] }
  0x89   : > { %v618_v50 = vadd.f32 %v5044_v53, %v540_v33 }
  0x8b   : > { %856 = vperm.xlu0 %4461, %v718_v35   ;;  %861 = vperm.xlu1 %4462, %v719_v36   ;;  %v464_v35 = vld [vmem:[%s5017_s12 + $0x1f0] sm:$0xff]  ;;  %v1318_v36 = vld [vmem:[%s6370_s4 + $0x78] sm:$0xff] }
  0x8c   : > { %v542_v46 = vmul.f32 %v5028_v45, %v464_v35 }
  0x8e   : > { %v620_v3 = vadd.f32 %v5044_v53, %v542_v46 }
  0x8f   : > { %946 = vperm.xlu0 %4461, %v736_v37   ;;  %871 = vperm.xlu1 %4462, %v721_v38   ;;  %v765_v37 = vld [vmem:[%s6367_s1 + $0x1f8] sm:$0x1]  ;;  %v767_v38 = vld [vmem:[%s6367_s1 + $0x208] sm:$0x1] }
  0x90   : > { %v692_v20 = vmax.f32 %v620_v3, 0.0 }
  0x93   : > { %881 = vperm.xlu0 %4461, %v723_v39   ;;  %891 = vperm.xlu1 %4462, %v725_v40   ;;  %v1333_v39 = vld [vmem:[%s6370_s4 + $0xf0] sm:$0xff] }
  0x97   : > { %901 = vperm.xlu0 %4461, %v727_v41   ;;  %911 = vperm.xlu1 %4462, %v729_v42   ;;  %v670_v42 = vmax.f32 %v598_v27, 0.0  ;;  %v1349_v27 = vld [vmem:[%s6370_s4 + $0x170] sm:$0xff] }
  0x9b   : > { %921 = vperm.xlu0 %4461, %v731_v43   ;;  %931 = vperm.xlu1 %4462, %v733_v44   ;;  %v600_v43 = vadd.f32 %v5044_v53, %v522_v29  ;;  %v524_v44 = vmul.f32 %v5028_v45, %v446_v34  ;;  %v1314_v34 = vld [vmem:[%s6370_s4 + $0x58] sm:$0xff] }
  0x9f   : > { %941 = vperm.xlu0 %4461, %v735_v48   ;;  %951 = vperm.xlu1 %4462, %v737_v52   ;;  %v466_v52 = vld [vmem:[%s5017_s12 + $0x200] sm:$0xff] }
  0xa0   : > { %v544_v63 = vmul.f32 %v5028_v45, %v466_v52 }
  0xa2   : > { %v622_v13 = vadd.f32 %v5044_v53, %v544_v63 }
  0xa3   : > { %1036 = vperm.xlu0 %4461, %v754_v60   ;;  %1041 = vperm.xlu1 %4462, %v755_v61   ;;  %v672_v60 = vmax.f32 %v600_v43, 0.0  ;;  %v602_v61 = vadd.f32 %v5044_v53, %v524_v44  ;;  %v1328_v43 = vld [vmem:[%s6370_s4 + $0xc8] sm:$0xff] }
  0xa4   : > { %v1348_v44 = vld [vmem:[%s6370_s4 + $0x168] sm:$0xff] }
  0xa5   : > { %v674_v19 = vmax.f32 %v602_v61, 0.0  ;;  %v1326_v61 = vld [vmem:[%s6370_s4 + $0xb8] sm:$0xff] }
  0xa6   : > { %v1057_v9 = vpop.permute.xlu1 %1056  ;;  %v1047_v10 = vpop.permute.xlu0 %1046 }
  0xa7   : > { %v1190_v15 = vmul.f32 %v1057_v9, %v686_v1  ;;  %v1188_v16 = vmul.f32 %v1047_v10, %v684_v2  ;;  %1051 = vperm.xlu0 %4461, %v757_v7   ;;  %1061 = vperm.xlu1 %4462, %v759_v8   ;;  %v690_v2 = vmax.f32 %v618_v50, 0.0  ;;  %v772_v7 = vld [vmem:[%s6367_s1 + $0x230] sm:$0xff]  ;;  %v773_v8 = vld [vmem:[%s6367_s1 + $0x238] sm:$0x1]  ;;  %v1316_v9 = vld [vmem:[%s6370_s4 + $0x68] sm:$0xff] }
  0xa9   : > { %1490 = vmatprep.mubr.f32.mxu0 %v1188_v16 }
  0xaa   : > { %v962_v24 = vpop.permute.xlu1 %961  ;;  %v957_v25 = vpop.permute.xlu0 %956 }
  0xab   : > { %v1171_v30 = vmul.f32 %v962_v24, %v667_v11  ;;  %v1170_v31 = vmul.f32 %v957_v25, %v666_v17  ;;  %1071 = vperm.xlu0 %4461, %v761_v21   ;;  %1081 = vperm.xlu1 %4462, %v763_v22   ;;  %v1331_v21 = vld [vmem:[%s6370_s4 + $0xe0] sm:$0xff]  ;;  %v445_v22 = vld [vmem:[%s5017_s12 + $0x158] sm:$0x1] }
  0xac   : > { %v1315_v24 = vld [vmem:[%s6370_s4 + $0x60] sm:$0xff]  ;;  %v523_v33 = vmul.f32 %v5028_v45, %v445_v22 }
  0xad   : > { %1243 = vst [vmem:[#allocation2 + $0x128] sm:$0x1] %v1171_v30  ;;  %1242 = vst [vmem:[#allocation2 + $0x120] sm:$0xff] %v1170_v31  ;;  %1491 = vmatmul.mubr.f32.vlgmr.msra.gmra.mxu0 %v1170_v31  ;;  %v450_v25 = vld [vmem:[%s5017_s12 + $0x180] sm:$0xff]  ;;  %v676_v30 = vmax.f32 %v604_v12, 0.0  ;;  %v599_v31 = vadd.f32 %v5044_v53, %v521_v14  ;;  %v1309_v12 = vld [vmem:[%s6370_s4 + $0x30] sm:$0xff] }
  0xae   : > { %v972_v40 = vpop.permute.xlu1 %971  ;;  %v967_v41 = vpop.permute.xlu0 %966  ;;  %1495 = vmatprep.mubr.f32.mxu0 %v1190_v15  ;;  %3641 = vmatpush3.msra.mxu0 %v1318_v36  ;;  %v546_v15 = vmul.f32 %v5028_v45, %v468_v5  ;;  %v1310_v5 = vld [vmem:[%s6370_s4 + $0x38] sm:$0xff]  ;;  %v402_v14 = vld [vmem:[%s5017_s12] sm:$0xff] }
  0xaf   : > { %v1173_v47 = vmul.f32 %v972_v40, %v669_v26  ;;  %v1172_v48 = vmul.f32 %v967_v41, %v668_v32  ;;  %1091 = vperm.xlu0 %4461, %v765_v37   ;;  %1101 = vperm.xlu1 %4462, %v767_v38   ;;  %v1330_v26 = vld [vmem:[%s6370_s4 + $0xd8] sm:$0xff]  ;;  %v694_v37 = vmax.f32 %v622_v13, 0.0  ;;  %v528_v38 = vmul.f32 %v5028_v45, %v450_v25  ;;  %v447_v40 = vld [vmem:[%s5017_s12 + $0x168] sm:$0x1]  ;;  %v470_v41 = vld [vmem:[%s5017_s12 + $0x220] sm:$0xff] }
  0xb0   : > { %3642 = vmatprep.subr.mxu0 %v1333_v39  ;;  %v624_v32 = vadd.f32 %v5044_v53, %v546_v15  ;;  %v1329_v39 = vld [vmem:[%s6370_s4 + $0xd0] sm:$0xff]  ;;  %v548_v50 = vmul.f32 %v5028_v45, %v470_v41  ;;  %v1346_v13 = vld [vmem:[%s6370_s4 + $0x158] sm:$0xff]  ;;  %v1324_v15 = vld [vmem:[%s6370_s4 + $0xa8] sm:$0xff] }
  0xb1   : > { %1245 = vst [vmem:[#allocation2 + $0x138] sm:$0x1] %v1173_v47  ;;  %1244 = vst [vmem:[#allocation2 + $0x130] sm:$0xff] %v1172_v48  ;;  %1496 = vmatmul.mubr.f32.gmra.mxu0 %v1172_v48  ;;  %v671_v47 = vmax.f32 %v599_v31, 0.0  ;;  %v601_v48 = vadd.f32 %v5044_v53, %v523_v33  ;;  %v1323_v31 = vld [vmem:[%s6370_s4 + $0xa0] sm:$0xff] }
  0xb2   : > { %v977_v58 = vpop.permute.xlu1 %976  ;;  %v1067_v59 = vpop.permute.xlu0 %1066  ;;  %3643 = vmatpush3.msra.mxu0 %v1317_v54  ;;  %v1307_v33 = vld [vmem:[%s6370_s4 + $0x20] sm:$0xff] }
  0xb3   : > { %v1174_v0 = vmul.f32 %v977_v58, %v670_v42  ;;  %v1192_v1 = vmul.f32 %v1067_v59, %v688_v49  ;;  %1111 = vperm.xlu0 %4461, %v769_v55   ;;  %1121 = vperm.xlu1 %4462, %v771_v56   ;;  %v1313_v42 = vld [vmem:[%s6370_s4 + $0x50] sm:$0xff]  ;;  %v525_v49 = vmul.f32 %v5028_v45, %v447_v40  ;;  %v696_v55 = vmax.f32 %v624_v32, 0.0  ;;  %v449_v58 = vld [vmem:[%s5017_s12 + $0x178] sm:$0x1]  ;;  %v1344_v32 = vld [vmem:[%s6370_s4 + $0x148] sm:$0xff] }
  0xb4   : > { %v1369_v6 = vld [vmem:[#allocation2 + $0x121] sm:$0xff]  ;;  %3644 = vmatprep.subr.mxu0 %v1332_v57  ;;  %v606_v56 = vadd.f32 %v5044_v53, %v528_v38  ;;  %v452_v59 = vld [vmem:[%s5017_s12 + $0x190] sm:$0xff]  ;;  %v527_v3 = vmul.f32 %v5028_v45, %v449_v58 }
  0xb5   : > { %1246 = vst [vmem:[#allocation2 + $0x140] sm:$0xff] %v1174_v0  ;;  %4096 = vmatprep.mubr.f32.mxu1 %v1369_v6  ;;  %1500 = vmatprep.mubr.f32.mxu0 %v1192_v1  ;;  %v1327_v57 = vld [vmem:[%s6370_s4 + $0xc0] sm:$0xff]  ;;  %v673_v1 = vmax.f32 %v601_v48, 0.0  ;;  %v530_v4 = vmul.f32 %v5028_v45, %v452_v59  ;;  %v1306_v48 = vld [vmem:[%s6370_s4 + $0x18] sm:$0xff] }
  0xb6   : > { %v987_v10 = vpop.permute.xlu1 %986  ;;  %v1077_v11 = vpop.permute.xlu0 %1076  ;;  %1501 = vmatmul.mubr.f32.gmra.mxu0 %v1174_v0 }
  0xb7   : > { %v1176_v16 = vmul.f32 %v987_v10, %v672_v60  ;;  %v1194_v17 = vmul.f32 %v1077_v11, %v690_v2  ;;  %1126 = vperm.xlu0 %4461, %v772_v7   ;;  %1131 = vperm.xlu1 %4462, %v773_v8   ;;  %v1311_v60 = vld [vmem:[%s6370_s4 + $0x40] sm:$0xff]  ;;  %v603_v2 = vadd.f32 %v5044_v53, %v525_v49  ;;  %v678_v8 = vmax.f32 %v606_v56, 0.0  ;;  %v1325_v10 = vld [vmem:[%s6370_s4 + $0xb0] sm:$0xff]  ;;  %v403_v49 = vld [vmem:[%s5017_s12 + $0x8] sm:$0x1] }
  0xb8   : > { %v1370_v23 = vld [vmem:[#allocation2 + $0x131] sm:$0xff]  ;;  %3645 = vmatpush3.msra.mxu0 %v1316_v9  ;;  %v626_v9 = vadd.f32 %v5044_v53, %v548_v50 }
  0xb9   : > { %1248 = vst [vmem:[#allocation2 + $0x150] sm:$0xff] %v1176_v16  ;;  %4097 = vmatmul.mubr.f32.vlgmr.msra.gmra.mxu1 %v1370_v23  ;;  %1505 = vmatprep.mubr.f32.mxu0 %v1194_v17  ;;  %v420_v11 = vld [vmem:[%s5017_s12 + $0x90] sm:$0xff] }
  0xba   : > { %v997_v28 = vpop.permute.xlu1 %996  ;;  %v1087_v29 = vpop.permute.xlu0 %1086  ;;  %1506 = vmatmul.mubr.f32.gmra.mxu0 %v1176_v16  ;;  %3646 = vmatprep.subr.mxu0 %v1331_v21  ;;  %v608_v21 = vadd.f32 %v5044_v53, %v530_v4  ;;  %v498_v22 = vmul.f32 %v5028_v45, %v420_v11  ;;  %v1345_v23 = vld [vmem:[%s6370_s4 + $0x150] sm:$0xff] }
  0xbb   : > { %v1178_v35 = vmul.f32 %v997_v28, %v674_v19  ;;  %v1196_v36 = vmul.f32 %v1087_v29, %v692_v20  ;;  %3647 = vmatpush3.msra.mxu0 %v1315_v24  ;;  %4109 = vmatpush3.msra.mxu1 %v4937_v18  ;;  %v675_v19 = vmax.f32 %v603_v2, 0.0  ;;  %v605_v20 = vadd.f32 %v5044_v53, %v527_v3  ;;  %v1308_v28 = vld [vmem:[%s6370_s4 + $0x28] sm:$0xff]  ;;  %v1321_v50 = vld [vmem:[%s6370_s4 + $0x90] sm:$0xff] }
  0xbc   : > { %3648 = vmatprep.subr.mxu0 %v1330_v26  ;;  %4110 = vmatprep.subr.mxu1 %v1349_v27  ;;  %v698_v26 = vmax.f32 %v626_v9, 0.0  ;;  %v451_v29 = vld [vmem:[%s5017_s12 + $0x188] sm:$0x1]  ;;  %v1341_v4 = vld [vmem:[%s6370_s4 + $0x130] sm:$0xff] }
  0xbd   : > { %1250 = vst [vmem:[#allocation2 + $0x160] sm:$0xff] %v1178_v35  ;;  %1510 = vmatprep.mubr.f32.mxu0 %v1196_v36  ;;  %3649 = vmatpush3.msra.mxu0 %v1314_v34  ;;  %v677_v36 = vmax.f32 %v605_v20, 0.0  ;;  %v529_v38 = vmul.f32 %v5028_v45, %v451_v29  ;;  %v1320_v3 = vld [vmem:[%s6370_s4 + $0x88] sm:$0xff]  ;;  %v1339_v29 = vld [vmem:[%s6370_s4 + $0x120] sm:$0xff] }
  0xbe   : > { %v1007_v46 = vpop.permute.xlu1 %1006  ;;  %v1097_v18 = vpop.permute.xlu0 %1096  ;;  %1511 = vmatmul.mubr.f32.gmra.mxu0 %v1178_v35  ;;  %3650 = vmatprep.subr.mxu0 %v1329_v39 }
  0xbf   : > { %v1180_v52 = vmul.f32 %v1007_v46, %v676_v30  ;;  %v1198_v54 = vmul.f32 %v1097_v18, %v694_v37  ;;  %3651 = vmatpush3.msra.mxu0 %v1313_v42  ;;  %4111 = vmatpush3.msra.mxu1 %v1349_v27  ;;  %v480_v27 = vmul.f32 %v5028_v45, %v402_v14  ;;  %v453_v30 = vld [vmem:[%s5017_s12 + $0x198] sm:$0x1]  ;;  %v680_v42 = vmax.f32 %v608_v21, 0.0  ;;  %v1343_v46 = vld [vmem:[%s6370_s4 + $0x140] sm:$0xff]  ;;  %v1340_v21 = vld [vmem:[%s6370_s4 + $0x128] sm:$0xff] }
  0xc0   : > { %3652 = vmatprep.subr.mxu0 %v1328_v43  ;;  %4112 = vmatprep.subr.mxu1 %v1348_v44  ;;  %v576_v37 = vadd.f32 %v5044_v53, %v498_v22  ;;  %v531_v39 = vmul.f32 %v5028_v45, %v453_v30  ;;  %v422_v18 = vld [vmem:[%s5017_s12 + $0xa0] sm:$0xff]  ;;  %v607_v56 = vadd.f32 %v5044_v53, %v529_v38 }
  0xc1   : > { %1252 = vst [vmem:[#allocation2 + $0x170] sm:$0xff] %v1180_v52  ;;  %1515 = vmatprep.mubr.f32.mxu0 %v1198_v54  ;;  %3653 = vmatpush3.msra.mxu0 %v1312_v51  ;;  %v558_v43 = vadd.f32 %v5044_v53, %v480_v27  ;;  %v1342_v51 = vld [vmem:[%s6370_s4 + $0x138] sm:$0xff]  ;;  %v500_v58 = vmul.f32 %v5028_v45, %v422_v18  ;;  %v406_v22 = vld [vmem:[%s5017_s12 + $0x20] sm:$0xff]  ;;  %v1337_v18 = vld [vmem:[%s6370_s4 + $0x110] sm:$0xff] }
  0xc2   : > { %v982_v63 = vpop.permute.xlu1 %981  ;;  %v1107_v0 = vpop.permute.xlu0 %1106  ;;  %1516 = vmatmul.mubr.f32.gmra.mxu0 %v1180_v52  ;;  %3654 = vmatprep.subr.mxu0 %v1327_v57  ;;  %v609_v57 = vadd.f32 %v5044_v53, %v531_v39  ;;  %v1338_v39 = vld [vmem:[%s6370_s4 + $0x118] sm:$0xff] }
  0xc3   : > { %v1175_v6 = vmul.f32 %v982_v63, %v671_v47  ;;  %v1200_v7 = vmul.f32 %v1107_v0, %v696_v55  ;;  %3655 = vmatpush3.msra.mxu0 %v1311_v60  ;;  %4113 = vmatpush3.msra.mxu1 %v1348_v44  ;;  %v1322_v44 = vld [vmem:[%s6370_s4 + $0x98] sm:$0xff]  ;;  %v648_v55 = vmax.f32 %v576_v37, 0.0  ;;  %v481_v63 = vmul.f32 %v5028_v45, %v403_v49  ;;  %v404_v0 = vld [vmem:[%s5017_s12 + $0x10] sm:$0xff] }
  0xc4   : > { %3656 = vmatprep.subr.mxu0 %v1326_v61  ;;  %4114 = vmatprep.subr.mxu1 %v1347_v62  ;;  %v630_v61 = vmax.f32 %v558_v43, 0.0  ;;  %v578_v9 = vadd.f32 %v5044_v53, %v500_v58  ;;  %v482_v11 = vmul.f32 %v5028_v45, %v404_v0  ;;  %v3413_v37 = vld [vmem:[%s6370_s4 + $0x378] sm:$0xff]  ;;  %v428_v49 = vld [vmem:[%s5017_s12 + $0xd0] sm:$0xff]  ;;  %v3411_v58 = vld [vmem:[%s6370_s4 + $0x368] sm:$0xff] }
  0xc5   : > { %1247 = vst [vmem:[#allocation2 + $0x148] sm:$0x1] %v1175_v6  ;;  %1520 = vmatprep.mubr.f32.mxu0 %v1200_v7  ;;  %3657 = vmatpush3.msra.mxu0 %v1310_v5  ;;  %v1304_v5 = vld [vmem:[%s6370_s4 + $0x8] sm:$0xff] }
  0xc6   : > { %v992_v16 = vpop.permute.xlu1 %991  ;;  %v1017_v17 = vpop.permute.xlu0 %1016  ;;  %3658 = vmatprep.subr.mxu0 %v1325_v10  ;;  %4115 = vmatpush3.msra.mxu1 %v1347_v62  ;;  %v1305_v62 = vld [vmem:[%s6370_s4 + $0x10] sm:$0xff]  ;;  %v1319_v10 = vld [vmem:[%s6370_s4 + $0x80] sm:$0xff]  ;;  %v560_v27 = vadd.f32 %v5044_v53, %v482_v11 }
  0xc7   : > { %v1177_v24 = vmul.f32 %v992_v16, %v673_v1  ;;  %v1182_v25 = vmul.f32 %v1017_v17, %v678_v8  ;;  %3659 = vmatpush3.msra.mxu0 %v1309_v12  ;;  %4116 = vmatprep.subr.mxu1 %v1346_v13  ;;  %v405_v1 = vld [vmem:[%s5017_s12 + $0x18] sm:$0x1]  ;;  %v679_v8 = vmax.f32 %v607_v56, 0.0  ;;  %v559_v16 = vadd.f32 %v5044_v53, %v481_v63  ;;  %v1303_v17 = vld [vmem:[%s6370_s4] sm:$0xff]  ;;  %v3427_v56 = vld [vmem:[%s6370_s4 + $0x3e8] sm:$0xff] }
  0xc8   : > { %3660 = vmatprep.subr.mxu0 %v1324_v15  ;;  %4117 = vmatpush3.msra.mxu1 %v1346_v13  ;;  %v483_v12 = vmul.f32 %v5028_v45, %v405_v1  ;;  %v681_v15 = vmax.f32 %v609_v57, 0.0  ;;  %v1336_v57 = vld [vmem:[%s6370_s4 + $0x108] sm:$0xff]  ;;  %v1335_v1 = vld [vmem:[%s6370_s4 + $0x100] sm:$0xff] }
  0xc9   : > { %1249 = vst [vmem:[#allocation2 + $0x158] sm:$0x1] %v1177_v24  ;;  %1254 = vst [vmem:[#allocation2 + $0x180] sm:$0xff] %v1182_v25  ;;  %1521 = vmatmul.mubr.f32.gmra.mxu0 %v1182_v25  ;;  %4118 = vmatprep.subr.mxu1 %v1345_v23  ;;  %v3410_v11 = vld [vmem:[%s6370_s4 + $0x360] sm:$0xff] }
  0xca   : > { %v1002_v34 = vpop.permute.xlu1 %1001  ;;  %v1117_v35 = vpop.permute.xlu0 %1116  ;;  %3661 = vmatpush3.msra.mxu0 %v1308_v28  ;;  %4119 = vmatpush3.msra.mxu1 %v1345_v23  ;;  %v3429_v23 = vld [vmem:[%s6370_s4 + $0x3f8] sm:$0xff]  ;;  %v561_v28 = vadd.f32 %v5044_v53, %v483_v12 }
  0xcb   : > { %v1179_v40 = vmul.f32 %v1002_v34, %v675_v19  ;;  %v1202_v41 = vmul.f32 %v1117_v35, %v698_v26  ;;  %3662 = vmatprep.subr.mxu0 %v1323_v31  ;;  %4120 = vmatprep.subr.mxu1 %v1344_v32  ;;  %v424_v19 = vld [vmem:[%s5017_s12 + $0xb0] sm:$0xff]  ;;  %v650_v26 = vmax.f32 %v578_v9, 0.0  ;;  %v484_v34 = vmul.f32 %v5028_v45, %v406_v22  ;;  %v426_v35 = vld [vmem:[%s5017_s12 + $0xc0] sm:$0xff]  ;;  %v3445_v12 = vld [vmem:[%s6370_s4 + $0x478] sm:$0xff] }
  0xcc   : > { %v1371_v47 = vld [vmem:[#allocation2 + $0x141] sm:$0xff]  ;;  %3663 = vmatpush3.msra.mxu0 %v1307_v33  ;;  %4121 = vmatpush3.msra.mxu1 %v1344_v32  ;;  %v502_v30 = vmul.f32 %v5028_v45, %v424_v19  ;;  %v631_v33 = vmax.f32 %v559_v16, 0.0 }
  0xcd   : > { %1251 = vst [vmem:[#allocation2 + $0x168] sm:$0x1] %v1179_v40  ;;  %4099 = vmatprep.mubr.f32.mxu1 %v1371_v47  ;;  %1525 = vmatprep.mubr.f32.mxu0 %v1202_v41  ;;  %v3428_v40 = vld [vmem:[%s6370_s4 + $0x3f0] sm:$0xff]  ;;  %v504_v47 = vmul.f32 %v5028_v45, %v426_v35 }
  0xce   : > { %v1012_v52 = vpop.permute.xlu1 %1011  ;;  %v1027_v54 = vpop.permute.xlu0 %1026  ;;  %3664 = vmatprep.subr.mxu0 %v1322_v44  ;;  %4122 = vmatprep.subr.mxu1 %v1343_v46  ;;  %v3412_v41 = vld [vmem:[%s6370_s4 + $0x370] sm:$0xff]  ;;  %v632_v44 = vmax.f32 %v560_v27, 0.0 }
  0xcf   : > { %v1181_v59 = vmul.f32 %v1012_v52, %v677_v36  ;;  %v1184_v60 = vmul.f32 %v1027_v54, %v680_v42  ;;  %3665 = vmatpush3.msra.mxu0 %v1306_v48  ;;  %4123 = vmatpush3.msra.mxu1 %v1343_v46  ;;  %v408_v36 = vld [vmem:[%s5017_s12 + $0x30] sm:$0xff]  ;;  %v580_v46 = vadd.f32 %v5044_v53, %v502_v30  ;;  %v633_v52 = vmax.f32 %v561_v28, 0.0  ;;  %v3409_v28 = vld [vmem:[%s6370_s4 + $0x358] sm:$0xff] }
  0xd0   : > { %v1372_v2 = vld [vmem:[#allocation2 + $0x151] sm:$0xff]  ;;  %3666 = vmatprep.subr.mxu0 %v1321_v50  ;;  %4124 = vmatprep.subr.mxu1 %v1342_v51  ;;  %v486_v48 = vmul.f32 %v5028_v45, %v408_v36  ;;  %v562_v54 = vadd.f32 %v5044_v53, %v484_v34  ;;  %v582_v63 = vadd.f32 %v5044_v53, %v504_v47 }
  0xd1   : > { %1253 = vst [vmem:[#allocation2 + $0x178] sm:$0x1] %v1181_v59  ;;  %1256 = vst [vmem:[#allocation2 + $0x190] sm:$0xff] %v1184_v60  ;;  %4100 = vmatmul.mubr.f32.gmra.mxu1 %v1372_v2  ;;  %1526 = vmatmul.mubr.f32.gmra.mxu0 %v1184_v60  ;;  %v506_v59 = vmul.f32 %v5028_v45, %v428_v49  ;;  %v3426_v60 = vld [vmem:[%s6370_s4 + $0x3e0] sm:$0xff]  ;;  %v432_v27 = vld [vmem:[%s5017_s12 + $0xf0] sm:$0xff] }
  0xd2   : > { %v867_v6 = vpop.permute.xlu0 %866  ;;  %v777_v7 = vpop.permute.xlu1 %776  ;;  %3667 = vmatpush3.msra.mxu0 %v1305_v62  ;;  %4125 = vmatpush3.msra.mxu1 %v1342_v51  ;;  %v564_v0 = vadd.f32 %v5044_v53, %v486_v48  ;;  %v654_v16 = vmax.f32 %v582_v63, 0.0  ;;  %v3422_v63 = vld [vmem:[%s6370_s4 + $0x3c0] sm:$0xff] }
  0xd3   : > { %v1152_v13 = vmul.f32 %v867_v6, %v648_v55  ;;  %v1134_v14 = vmul.f32 %v777_v7, %v630_v61  ;;  %3668 = vmatprep.subr.mxu0 %v1320_v3  ;;  %4126 = vmatprep.subr.mxu1 %v1341_v4  ;;  %v410_v55 = vld [vmem:[%s5017_s12 + $0x40] sm:$0xff]  ;;  %v634_v6 = vmax.f32 %v562_v54, 0.0  ;;  %v3443_v54 = vld [vmem:[%s6370_s4 + $0x468] sm:$0xff] }
  0xd4   : > { %v1373_v20 = vld [vmem:[#allocation2 + $0x161] sm:$0xff]  ;;  %3669 = vmatpush3.msra.mxu0 %v1304_v5  ;;  %4127 = vmatpush3.msra.mxu1 %v1341_v4  ;;  %v488_v2 = vmul.f32 %v5028_v45, %v410_v55  ;;  %v652_v5 = vmax.f32 %v580_v46, 0.0 }
  0xd5   : > { %1206 = vst [vmem:[#allocation2] sm:$0xff] %v1134_v14  ;;  %4102 = vmatprep.mubr.f32.mxu1 %v1373_v20  ;;  %3670 = vmatprep.subr.mxu0 %v1319_v10  ;;  %v430_v7 = vld [vmem:[%s5017_s12 + $0xe0] sm:$0xff]  ;;  %v3423_v46 = vld [vmem:[%s6370_s4 + $0x3c8] sm:$0xff] }
  0xd6   : > { %v1022_v24 = vpop.permute.xlu0 %1021  ;;  %v1032_v25 = vpop.permute.xlu1 %1031  ;;  %3671 = vmatpush3.msra.mxu0 %v1303_v17  ;;  %1700 = vmatprep.mubr.f32.mxu0 %v1152_v13  ;;  %v3425_v13 = vld [vmem:[%s6370_s4 + $0x3d8] sm:$0xff]  ;;  %v584_v17 = vadd.f32 %v5044_v53, %v506_v59  ;;  %v566_v19 = vadd.f32 %v5044_v53, %v488_v2  ;;  %v508_v20 = vmul.f32 %v5028_v45, %v430_v7  ;;  %v411_v59 = vld [vmem:[%s5017_s12 + $0x48] sm:$0x1] }
  0xd7   : > { %v1183_v31 = vmul.f32 %v1022_v24, %v679_v8  ;;  %v1185_v32 = vmul.f32 %v1032_v25, %v681_v15  ;;  %4128 = vmatprep.subr.mxu1 %v1340_v21  ;;  %1701 = vmatmul.mubr.f32.vlgmr.msra.gmra.mxu0 %v1134_v14  ;;  %v412_v8 = vld [vmem:[%s5017_s12 + $0x50] sm:$0xff]  ;;  %v407_v25 = vld [vmem:[%s5017_s12 + $0x28] sm:$0x1]  ;;  %v3441_v7 = vld [vmem:[%s6370_s4 + $0x458] sm:$0xff] }
  0xd8   : > { %v1374_v38 = vld [vmem:[#allocation2 + $0x171] sm:$0xff]  ;;  %4129 = vmatpush3.msra.mxu1 %v1340_v21  ;;  %3720 = vmatprep.subr.mxu0 %v3429_v23  ;;  %v636_v23 = vmax.f32 %v564_v0, 0.0  ;;  %v490_v24 = vmul.f32 %v5028_v45, %v412_v8  ;;  %v586_v34 = vadd.f32 %v5044_v53, %v508_v20  ;;  %v485_v35 = vmul.f32 %v5028_v45, %v407_v25 }
  0xd9   : > { %1255 = vst [vmem:[#allocation2 + $0x188] sm:$0x1] %v1183_v31  ;;  %1257 = vst [vmem:[#allocation2 + $0x198] sm:$0x1] %v1185_v32  ;;  %4103 = vmatmul.mubr.f32.gmra.mxu1 %v1374_v38  ;;  %4130 = vmatprep.subr.mxu1 %v1339_v29  ;;  %v656_v32 = vmax.f32 %v584_v17, 0.0 }
  0xda   : > { %v877_v42 = vpop.permute.xlu0 %876  ;;  %v782_v43 = vpop.permute.xlu1 %781  ;;  %4131 = vmatpush3.msra.mxu1 %v1339_v29  ;;  %3721 = vmatpush3.msra.mxu0 %v3413_v37  ;;  %v3424_v29 = vld [vmem:[%s6370_s4 + $0x3d0] sm:$0xff]  ;;  %v568_v38 = vadd.f32 %v5044_v53, %v490_v24  ;;  %v658_v48 = vmax.f32 %v586_v34, 0.0  ;;  %v563_v49 = vadd.f32 %v5044_v53, %v485_v35  ;;  %v5465_v24 = vld [vmem:[%s6368_s2] ss:$0 sm:$0xff]  ;;  %v417_v34 = vld [vmem:[%s5017_s12 + $0x78] sm:$0x1] }
  0xdb   : > { %v5322_v50 = vmul.f32 %v877_v42, %v650_v26  ;;  %v1135_v51 = vmul.f32 %v782_v43, %v631_v33  ;;  %4132 = vmatprep.subr.mxu1 %v1338_v39  ;;  %3722 = vmatprep.subr.mxu0 %v3428_v40  ;;  %v638_v33 = vmax.f32 %v566_v19, 0.0  ;;  %v409_v40 = vld [vmem:[%s5017_s12 + $0x38] sm:$0x1]  ;;  %v3444_v43 = vld [vmem:[%s6370_s4 + $0x470] sm:$0xff]  ;;  %v5457_v19 = vld [vmem:[%s6369_s3] ss:$0 sm:$0xff] }
  0xdc   : > { %4133 = vmatpush3.msra.mxu1 %v1338_v39  ;;  %3723 = vmatpush3.msra.mxu0 %v3412_v41  ;;  %v510_v39 = vmul.f32 %v5028_v45, %v432_v27  ;;  %v414_v41 = vld [vmem:[%s5017_s12 + $0x60] sm:$0xff]  ;;  %v635_v2 = vmax.f32 %v563_v49, 0.0  ;;  %v3420_v27 = vld [vmem:[%s6370_s4 + $0x3b0] sm:$0xff] }
  0xdd   : > { %1207 = vst [vmem:[#allocation2 + $0x8] sm:$0x1] %v1135_v51  ;;  %4134 = vmatprep.subr.mxu1 %v1337_v18  ;;  %1705 = vmatprep.mubr.f32.mxu0 %v5322_v50  ;;  %v487_v51 = vmul.f32 %v5028_v45, %v409_v40  ;;  %v3404_v35 = vld [vmem:[%s6370_s4 + $0x330] sm:$0xff] }
  0xde   : > { %v787_v61 = vpop.permute.xlu0 %786  ;;  %v792_v62 = vpop.permute.xlu1 %791  ;;  %4135 = vmatpush3.msra.mxu1 %v1337_v18  ;;  %3724 = vmatprep.subr.mxu0 %v3427_v56 }
  0xdf   : > { %v5346_v3 = vmul.f32 %v787_v61, %v632_v44  ;;  %v1137_v4 = vmul.f32 %v792_v62, %v633_v52  ;;  %4136 = vmatprep.subr.mxu1 %v1336_v57  ;;  %3725 = vmatpush3.msra.mxu0 %v3411_v58  ;;  %v3408_v44 = vld [vmem:[%s6370_s4 + $0x350] sm:$0xff]  ;;  %v492_v52 = vmul.f32 %v5028_v45, %v414_v41  ;;  %v3442_v61 = vld [vmem:[%s6370_s4 + $0x460] sm:$0xff]  ;;  %v3407_v62 = vld [vmem:[%s6370_s4 + $0x348] sm:$0xff] }
  0xe0   : > { %v1375_v9 = vld [vmem:[#allocation2 + $0x181] sm:$0xff]  ;;  %v1376_v10 = vld [vmem:[#allocation2 + $0x191] sm:$0xff]  ;;  %4137 = vmatpush3.msra.mxu1 %v1336_v57  ;;  %3726 = vmatprep.subr.mxu0 %v3426_v60  ;;  %v640_v57 = vmax.f32 %v568_v38, 0.0  ;;  %v588_v58 = vadd.f32 %v5044_v53, %v510_v39 }
  0xe1   : > { %1208 = vst [vmem:[#allocation2 + $0x10] sm:$0xff] %v5346_v3  ;;  %1209 = vst [vmem:[#allocation2 + $0x18] sm:$0x1] %v1137_v4  ;;  %4105 = vmatprep.mubr.f32.mxu1 %v1375_v9  ;;  %4138 = vmatprep.subr.mxu1 %v1335_v1  ;;  %v434_v60 = vld [vmem:[%s5017_s12 + $0x100] sm:$0xff]  ;;  %v565_v4 = vadd.f32 %v5044_v53, %v487_v51  ;;  %v3419_v39 = vld [vmem:[%s6370_s4 + $0x3a8] sm:$0xff] }
  0xe2   : > { %v887_v14 = vpop.permute.xlu0 %886  ;;  %v797_v15 = vpop.permute.xlu1 %796  ;;  %4106 = vmatmul.mubr.f32.gmra.mxu1 %v1376_v10  ;;  %1706 = vmatmul.mubr.f32.gmra.mxu0 %v5346_v3  ;;  %v660_v10 = vmax.f32 %v588_v58, 0.0  ;;  %v3438_v38 = vld [vmem:[%s6370_s4 + $0x440] sm:$0xff] }
  0xe3   : > { %v5364_v21 = vmul.f32 %v887_v14, %v652_v5  ;;  %v5366_v22 = vmul.f32 %v797_v15, %v634_v6  ;;  %4139 = vmatpush3.msra.mxu1 %v1335_v1  ;;  %3727 = vmatpush3.msra.mxu0 %v3410_v11  ;;  %v489_v5 = vmul.f32 %v5028_v45, %v411_v59  ;;  %v416_v14 = vld [vmem:[%s5017_s12 + $0x70] sm:$0xff]  ;;  %v637_v17 = vmax.f32 %v565_v4, 0.0  ;;  %v3418_v58 = vld [vmem:[%s6370_s4 + $0x3a0] sm:$0xff]  ;;  %v419_v59 = vld [vmem:[%s5017_s12 + $0x88] sm:$0x1] }
  0xe4   : > { %v1295_v26 = vld [vmem:[#allocation2 + $0x1] sm:$0xff]  ;;  %4152 = vmatprep.subr.mxu1 %v3445_v12  ;;  %3728 = vmatprep.subr.mxu0 %v3425_v13  ;;  %v512_v6 = vmul.f32 %v5028_v45, %v434_v60  ;;  %v570_v11 = vadd.f32 %v5044_v53, %v492_v52  ;;  %v3440_v13 = vld [vmem:[%s6370_s4 + $0x450] sm:$0xff]  ;;  %v3421_v53 = vld [vmem:[%s6370_s4 + $0x3b8] sm:$0xff] }
  0xe5   : > { %1210 = vst [vmem:[#allocation2 + $0x20] sm:$0xff] %v5366_v22  ;;  %4140 = vmatprep.mubr.f32.mxu1 %v1295_v26  ;;  %1710 = vmatprep.mubr.f32.mxu0 %v5364_v21  ;;  %v3406_v45 = vld [vmem:[%s6370_s4 + $0x340] sm:$0xff]  ;;  %v567_v20 = vadd.f32 %v5457_v19, %v489_v5  ;;  %v3405_v26 = vld [vmem:[%s6370_s4 + $0x338] sm:$0xff]  ;;  %v3403_v52 = vld [vmem:[%s6370_s4 + $0x328] sm:$0xff] }
  0xe6   : > { %v897_v30 = vpop.permute.xlu0 %896  ;;  %v807_v31 = vpop.permute.xlu1 %806  ;;  %1711 = vmatmul.mubr.f32.gmra.mxu0 %v5366_v22  ;;  %v3402_v60 = vld [vmem:[%s6370_s4 + $0x320] sm:$0xff] }
  0xe7   : > { %v5382_v36 = vmul.f32 %v897_v30, %v654_v16  ;;  %v5384_v37 = vmul.f32 %v807_v31, %v636_v23  ;;  %3729 = vmatpush3.msra.mxu0 %v3409_v28  ;;  %v590_v23 = vadd.f32 %v5457_v19, %v512_v6  ;;  %v642_v30 = vmax.f32 %v570_v11, 0.0 }
  0xe8   : > { %v5390_v42 = vld [vmem:[#allocation2 + $0x11] sm:$0xff]  ;;  %3730 = vmatprep.subr.mxu0 %v3424_v29  ;;  %v494_v31 = vmul.f32 %v5465_v24, %v416_v14  ;;  %v497_v11 = vmul.f32 %v5465_v24, %v419_v59  ;;  %v3435_v14 = vld [vmem:[%s6370_s4 + $0x428] sm:$0xff]  ;;  %v3430_v59 = vld [vmem:[%s6370_s4 + $0x400] sm:$0xff] }
  0xe9   : > { %1212 = vst [vmem:[#allocation2 + $0x30] sm:$0xff] %v5384_v37  ;;  %4141 = vmatmul.mubr.f32.vlgmr.msra.gmra.mxu1 %v5390_v42  ;;  %1715 = vmatprep.mubr.f32.mxu0 %v5382_v36  ;;  %v662_v49 = vmax.f32 %v590_v23, 0.0  ;;  %v3400_v23 = vld [vmem:[%s6370_s4 + $0x310] sm:$0xff] }
  0xea   : > { %v907_v18 = vpop.permute.xlu0 %906  ;;  %v817_v47 = vpop.permute.xlu1 %816  ;;  %1716 = vmatmul.mubr.f32.gmra.mxu0 %v5384_v37  ;;  %4153 = vmatpush3.msra.mxu1 %v3445_v12  ;;  %v413_v12 = vld [vmem:[%s5017_s12 + $0x58] sm:$0x1]  ;;  %v572_v51 = vadd.f32 %v5457_v19, %v494_v31  ;;  %v3434_v31 = vld [vmem:[%s6370_s4 + $0x420] sm:$0xff] }
  0xeb   : > { %v5411_v55 = vmul.f32 %v907_v18, %v656_v32  ;;  %v5413_v56 = vmul.f32 %v817_v47, %v638_v33  ;;  %4154 = vmatprep.subr.mxu1 %v3444_v43  ;;  %3731 = vmatpush3.msra.mxu0 %v3408_v44  ;;  %v491_v25 = vmul.f32 %v5465_v24, %v413_v12  ;;  %v3439_v32 = vld [vmem:[%s6370_s4 + $0x448] sm:$0xff]  ;;  %v436_v12 = vld [vmem:[%s5017_s12 + $0x110] sm:$0xff] }
  0xec   : > { %4155 = vmatpush3.msra.mxu1 %v3444_v43  ;;  %3732 = vmatprep.subr.mxu0 %v3423_v46  ;;  %v415_v33 = vld [vmem:[%s5017_s12 + $0x68] sm:$0x1]  ;;  %v639_v43 = vmax.f32 %v567_v20, 0.0  ;;  %v495_v18 = vmul.f32 %v5465_v24, %v417_v34 }
  0xed   : > { %1214 = vst [vmem:[#allocation2 + $0x40] sm:$0xff] %v5413_v56  ;;  %1720 = vmatprep.mubr.f32.mxu0 %v5411_v55  ;;  %4156 = vmatprep.subr.mxu1 %v3443_v54  ;;  %v569_v44 = vadd.f32 %v5457_v19, %v491_v25  ;;  %v493_v46 = vmul.f32 %v5465_v24, %v415_v33  ;;  %v3399_v33 = vld [vmem:[%s6370_s4 + $0x308] sm:$0xff] }
  0xee   : > { %v917_v0 = vpop.permute.xlu0 %916  ;;  %v827_v1 = vpop.permute.xlu1 %826  ;;  %1721 = vmatmul.mubr.f32.gmra.mxu0 %v5413_v56  ;;  %4157 = vmatpush3.msra.mxu1 %v3443_v54  ;;  %v3437_v54 = vld [vmem:[%s6370_s4 + $0x438] sm:$0xff]  ;;  %v514_v25 = vmul.f32 %v5465_v24, %v436_v12 }
  0xef   : > { %v5436_v8 = vmul.f32 %v917_v0, %v658_v48  ;;  %v5438_v9 = vmul.f32 %v827_v1, %v640_v57  ;;  %4158 = vmatprep.subr.mxu1 %v3442_v61  ;;  %3733 = vmatpush3.msra.mxu0 %v3407_v62  ;;  %v418_v57 = vld [vmem:[%s5017_s12 + $0x80] sm:$0xff]  ;;  %v641_v0 = vmax.f32 %v569_v44, 0.0  ;;  %v571_v1 = vadd.f32 %v5457_v19, %v493_v46 }
  0xf0   : > { %4159 = vmatpush3.msra.mxu1 %v3442_v61  ;;  %3734 = vmatprep.subr.mxu0 %v3422_v63  ;;  %v3436_v61 = vld [vmem:[%s6370_s4 + $0x430] sm:$0xff]  ;;  %v496_v4 = vmul.f32 %v5465_v24, %v418_v57  ;;  %v3415_v24 = vld [vmem:[%s6370_s4 + $0x388] sm:$0xff]  ;;  %v3414_v46 = vld [vmem:[%s6370_s4 + $0x380] sm:$0xff] }
  0xf1   : > { %1216 = vst [vmem:[#allocation2 + $0x50] sm:$0xff] %v5438_v9  ;;  %1725 = vmatprep.mubr.f32.mxu0 %v5436_v8  ;;  %4160 = vmatprep.subr.mxu1 %v3441_v7 }
  0xf2   : > { %v802_v15 = vpop.permute.xlu0 %801  ;;  %v927_v16 = vpop.permute.xlu1 %926  ;;  %1726 = vmatmul.mubr.f32.gmra.mxu0 %v5438_v9  ;;  %4161 = vmatpush3.msra.mxu1 %v3441_v7  ;;  %v644_v7 = vmax.f32 %v572_v51, 0.0  ;;  %v574_v20 = vadd.f32 %v5457_v19, %v496_v4 }
  0xf3   : > { %v1139_v28 = vmul.f32 %v802_v15, %v635_v2  ;;  %v5474_v29 = vmul.f32 %v927_v16, %v660_v10  ;;  %3735 = vmatpush3.msra.mxu0 %v3406_v45  ;;  %4162 = vmatprep.subr.mxu1 %v3440_v13  ;;  %v573_v2 = vadd.f32 %v5457_v19, %v495_v18  ;;  %v3417_v10 = vld [vmem:[%s6370_s4 + $0x398] sm:$0xff] }
  0xf4   : > { %3736 = vmatprep.subr.mxu0 %v3421_v53  ;;  %4163 = vmatpush3.msra.mxu1 %v3440_v13  ;;  %v3401_v13 = vld [vmem:[%s6370_s4 + $0x318] sm:$0xff]  ;;  %v3416_v53 = vld [vmem:[%s6370_s4 + $0x390] sm:$0xff] }
  0xf5   : > { %1211 = vst [vmem:[#allocation2 + $0x28] sm:$0x1] %v1139_v28  ;;  %1730 = vmatprep.mubr.f32.mxu0 %v5474_v29  ;;  %3737 = vmatpush3.msra.mxu0 %v3405_v26  ;;  %v645_v28 = vmax.f32 %v573_v2, 0.0 }
  0xf6   : > { %v812_v40 = vpop.permute.xlu0 %811  ;;  %v837_v41 = vpop.permute.xlu1 %836  ;;  %4164 = vmatprep.subr.mxu1 %v3439_v32  ;;  %3738 = vmatprep.subr.mxu0 %v3420_v27 }
  0xf7   : > { %v1141_v47 = vmul.f32 %v812_v40, %v637_v17  ;;  %v5495_v48 = vmul.f32 %v837_v41, %v642_v30  ;;  %4165 = vmatpush3.msra.mxu1 %v3439_v32  ;;  %3739 = vmatpush3.msra.mxu0 %v3404_v35  ;;  %v643_v17 = vmax.f32 %v571_v1, 0.0  ;;  %v575_v30 = vadd.f32 %v5457_v19, %v497_v11  ;;  %v3433_v40 = vld [vmem:[%s6370_s4 + $0x418] sm:$0xff] }
  0xf8   : > { %4166 = vmatprep.subr.mxu1 %v3438_v38  ;;  %3740 = vmatprep.subr.mxu0 %v3419_v39  ;;  %v592_v39 = vadd.f32 %v5457_v19, %v514_v25  ;;  %v3398_v19 = vld [vmem:[%s6370_s4 + $0x300] sm:$0xff] }
  0xf9   : > { %1213 = vst [vmem:[#allocation2 + $0x38] sm:$0x1] %v1141_v47  ;;  %1218 = vst [vmem:[#allocation2 + $0x60] sm:$0xff] %v5495_v48  ;;  %1731 = vmatmul.mubr.f32.gmra.mxu0 %v5495_v48  ;;  %4167 = vmatpush3.msra.mxu1 %v3438_v38  ;;  %v646_v38 = vmax.f32 %v574_v20, 0.0  ;;  %v647_v44 = vmax.f32 %v575_v30, 0.0  ;;  %v3432_v47 = vld [vmem:[%s6370_s4 + $0x410] sm:$0xff] }
  0xfa   : > { %v822_v62 = vpop.permute.xlu0 %821  ;;  %v937_v63 = vpop.permute.xlu1 %936  ;;  %3741 = vmatpush3.msra.mxu0 %v3403_v52  ;;  %4168 = vmatprep.subr.mxu1 %v3437_v54  ;;  %v664_v52 = vmax.f32 %v592_v39, 0.0  ;;  %v3493_v20 = vld [vmem:[%s6373_s7 + $0x2e8] sm:$0xff]  ;;  %v3476_v25 = vld [vmem:[%s6373_s7 + $0x260] sm:$0xff]  ;;  %v3491_v30 = vld [vmem:[%s6373_s7 + $0x2d8] sm:$0xff] }
  0xfb   : > { %v1143_v5 = vmul.f32 %v822_v62, %v639_v43  ;;  %v5520_v6 = vmul.f32 %v937_v63, %v662_v49  ;;  %3742 = vmatprep.subr.mxu0 %v3418_v58  ;;  %4169 = vmatpush3.msra.mxu1 %v3437_v54  ;;  %v3472_v39 = vld [vmem:[%s6373_s7 + $0x240] sm:$0xff] }
  0xfc   : > { %v5527_v45 = vld [vmem:[#allocation2 + $0x21] sm:$0xff]  ;;  %3743 = vmatpush3.msra.mxu0 %v3402_v60  ;;  %4170 = vmatprep.subr.mxu1 %v3436_v61 }
  0xfd   : > { %1215 = vst [vmem:[#allocation2 + $0x48] sm:$0x1] %v1143_v5  ;;  %4143 = vmatprep.mubr.f32.mxu1 %v5527_v45  ;;  %1735 = vmatprep.mubr.f32.mxu0 %v5520_v6 }
  0xfe   : > { %v832_v15 = vpop.permute.xlu0 %831  ;;  %v847_v16 = vpop.permute.xlu1 %846  ;;  %3744 = vmatprep.subr.mxu0 %v3417_v10  ;;  %4171 = vmatpush3.msra.mxu1 %v3436_v61 }
  0xff   : > { %v1145_v26 = vmul.f32 %v832_v15, %v641_v0  ;;  %v5545_v27 = vmul.f32 %v847_v16, %v644_v7  ;;  %3745 = vmatpush3.msra.mxu0 %v3401_v13  ;;  %4172 = vmatprep.subr.mxu1 %v3435_v14  ;;  %v3495_v13 = vld [vmem:[%s6373_s7 + $0x2f8] sm:$0xff]  ;;  %v3494_v15 = vld [vmem:[%s6373_s7 + $0x2f0] sm:$0xff] }
 0x100   : > { %v5551_v32 = vld [vmem:[#allocation2 + $0x31] sm:$0xff]  ;;  %3746 = vmatprep.subr.mxu0 %v3416_v53  ;;  %4173 = vmatpush3.msra.mxu1 %v3435_v14 }
 0x101   : > { %1217 = vst [vmem:[#allocation2 + $0x58] sm:$0x1] %v1145_v26  ;;  %1220 = vst [vmem:[#allocation2 + $0x70] sm:$0xff] %v5545_v27  ;;  %4144 = vmatmul.mubr.f32.gmra.mxu1 %v5551_v32  ;;  %3747 = vmatpush3.msra.mxu0 %v3400_v23  ;;  %v3463_v14 = vld [vmem:[%s6373_s7 + $0x1f8] sm:$0xff]  ;;  %v3478_v53 = vld [vmem:[%s6373_s7 + $0x270] sm:$0xff] }
 0x102   : > { %v842_v34 = vpop.permute.xlu0 %841  ;;  %v852_v35 = vpop.permute.xlu1 %851  ;;  %4174 = vmatprep.subr.mxu1 %v3434_v31  ;;  %1736 = vmatmul.mubr.f32.gmra.mxu0 %v5545_v27  ;;  %v3462_v16 = vld [vmem:[%s6373_s7 + $0x1f0] sm:$0xff]  ;;  %v3461_v23 = vld [vmem:[%s6373_s7 + $0x1e8] sm:$0xff]  ;;  %v3492_v26 = vld [vmem:[%s6373_s7 + $0x2e0] sm:$0xff] }
 0x103   : > { %v1147_v41 = vmul.f32 %v842_v34, %v643_v17  ;;  %v1149_v43 = vmul.f32 %v852_v35, %v645_v28  ;;  %3748 = vmatprep.subr.mxu0 %v3415_v24  ;;  %4175 = vmatpush3.msra.mxu1 %v3434_v31  ;;  %v3477_v17 = vld [vmem:[%s6373_s7 + $0x268] sm:$0xff]  ;;  %v3475_v28 = vld [vmem:[%s6373_s7 + $0x258] sm:$0xff]  ;;  %v3490_v24 = vld [vmem:[%s6373_s7 + $0x2d0] sm:$0xff] }
 0x104   : > { %v1299_v18 = vld [vmem:[#allocation2 + $0x41] sm:$0xff]  ;;  %3749 = vmatpush3.msra.mxu0 %v3399_v33  ;;  %1985 = vmatprep.mubr.f32.mxu0 %v5322_v50  ;;  %v3459_v31 = vld [vmem:[%s6373_s7 + $0x1d8] sm:$0xff]  ;;  %v3458_v33 = vld [vmem:[%s6373_s7 + $0x1d0] sm:$0xff] }
 0x105   : > { %1219 = vst [vmem:[#allocation2 + $0x68] sm:$0x1] %v1147_v41  ;;  %1221 = vst [vmem:[#allocation2 + $0x78] sm:$0x1] %v1149_v43  ;;  %4146 = vmatprep.mubr.f32.mxu1 %v1299_v18  ;;  %4176 = vmatprep.subr.mxu1 %v3433_v40  ;;  %v3431_v50 = vld [vmem:[%s6370_s4 + $0x408] sm:$0xff]  ;;  %v3456_v41 = vld [vmem:[%s6373_s7 + $0x1c0] sm:$0xff] }
 0x106   : > { %v857_v49 = vpop.permute.xlu0 %856  ;;  %v862_v51 = vpop.permute.xlu1 %861  ;;  %3750 = vmatprep.subr.mxu0 %v3414_v46  ;;  %4177 = vmatpush3.msra.mxu1 %v3433_v40  ;;  %v3473_v34 = vld [vmem:[%s6373_s7 + $0x248] sm:$0xff]  ;;  %v3488_v40 = vld [vmem:[%s6373_s7 + $0x2c0] sm:$0xff]  ;;  %v3471_v43 = vld [vmem:[%s6373_s7 + $0x238] sm:$0xff] }
 0x107   : > { %v1150_v54 = vmul.f32 %v857_v49, %v646_v38  ;;  %v1151_v57 = vmul.f32 %v862_v51, %v647_v44  ;;  %3751 = vmatpush3.msra.mxu0 %v3398_v19  ;;  %4178 = vmatprep.subr.mxu1 %v3432_v47  ;;  %v3489_v35 = vld [vmem:[%s6373_s7 + $0x2c8] sm:$0xff]  ;;  %v3487_v44 = vld [vmem:[%s6373_s7 + $0x2b8] sm:$0xff]  ;;  %v3486_v19 = vld [vmem:[%s6373_s7 + $0x2b0] sm:$0xff] }
 0x108   : > { %v1300_v58 = vld [vmem:[#allocation2 + $0x51] sm:$0xff]  ;;  %1986 = vmatmul.mubr.f32.vlgmr.msra.gmra.mxu0 %v5346_v3  ;;  %4179 = vmatpush3.msra.mxu1 %v3432_v47  ;;  %v3457_v38 = vld [vmem:[%s6373_s7 + $0x1c8] sm:$0xff] }
 0x109   : > { %1222 = vst [vmem:[#allocation2 + $0x80] sm:$0xff] %v1150_v54  ;;  %1223 = vst [vmem:[#allocation2 + $0x88] sm:$0x1] %v1151_v57  ;;  %4147 = vmatmul.mubr.f32.gmra.mxu1 %v1300_v58  ;;  %1990 = vmatprep.mubr.f32.mxu0 %v5364_v21  ;;  %v3455_v46 = vld [vmem:[%s6373_s7 + $0x1b8] sm:$0xff]  ;;  %v3454_v47 = vld [vmem:[%s6373_s7 + $0x1b0] sm:$0xff] }
 0x10a   : > { %v947_v60 = vpop.permute.xlu0 %946  ;;  %v872_v61 = vpop.permute.xlu1 %871  ;;  %4180 = vmatprep.subr.mxu1 %v3431_v50  ;;  %v3469_v49 = vld [vmem:[%s6373_s7 + $0x228] sm:$0xff]  ;;  %v3484_v57 = vld [vmem:[%s6373_s7 + $0x2a0] sm:$0xff] }
 0x10b   : > { %v1168_v62 = vmul.f32 %v947_v60, %v664_v52  ;;  %4181 = vmatpush3.msra.mxu1 %v3431_v50  ;;  %v3485_v51 = vld [vmem:[%s6373_s7 + $0x2a8] sm:$0xff]  ;;  %v3452_v50 = vld [vmem:[%s6373_s7 + $0x1a0] sm:$0xff]  ;;  %v3483_v60 = vld [vmem:[%s6373_s7 + $0x298] sm:$0xff] }
 0x10c   : > { %v1301_v63 = vld [vmem:[#allocation2 + $0x61] sm:$0xff]  ;;  %v1302_v0 = vld [vmem:[#allocation2 + $0x71] sm:$0xff]  ;;  %4182 = vmatprep.subr.mxu1 %v3430_v59  ;;  %1991 = vmatmul.mubr.f32.gmra.mxu0 %v5366_v22 }
 0x10d   : > { %4149 = vmatprep.mubr.f32.mxu1 %v1301_v63  ;;  %4183 = vmatpush3.msra.mxu1 %v3430_v59  ;;  %v3453_v52 = vld [vmem:[%s6373_s7 + $0x1a8] sm:$0xff]  ;;  %v3467_v59 = vld [vmem:[%s6373_s7 + $0x218] sm:$0xff] }
 0x10e   : > { %v882_v3 = vpop.permute.xlu0 %881  ;;  %v892_v1 = vpop.permute.xlu1 %891  ;;  %4150 = vmatmul.mubr.f32.gmra.mxu1 %v1302_v0  ;;  %1995 = vmatprep.mubr.f32.mxu0 %v5382_v36  ;;  %v3451_v61 = vld [vmem:[%s6373_s7 + $0x198] sm:$0xff] }
 0x10f   : > { %4184 = vmatprep.mubr.f32.mxu1 %v5390_v42  ;;  %4196 = vmatprep.subr.mxu1 %v3495_v13  ;;  %v3465_v3 = vld [vmem:[%s6373_s7 + $0x208] sm:$0xff] }
 0x110   : > { %1996 = vmatmul.mubr.f32.gmra.mxu0 %v5384_v37  ;;  %v1871_v42 = vld [vmem:[#allocation2 + $0x81] sm:$0xff] }
 0x111   : > { %2000 = vmatprep.mubr.f32.mxu0 %v5411_v55  ;;  %v3481_v1 = vld [vmem:[%s6373_s7 + $0x288] sm:$0xff] }
 0x112   : > { %v902_v21 = vpop.permute.xlu0 %901  ;;  %v912_v2 = vpop.permute.xlu1 %911  ;;  %4185 = vmatmul.mubr.f32.vlgmr.msra.gmra.mxu1 %v5527_v45 }
 0x113   : > { %4187 = vmatprep.mubr.f32.mxu1 %v5551_v32  ;;  %4197 = vmatpush3.msra.mxu1 %v3495_v13  ;;  %v3474_v32 = vld [vmem:[%s6373_s7 + $0x250] sm:$0xff]  ;;  %v3449_v21 = vld [vmem:[%s6373_s7 + $0x188] sm:$0xff]  ;;  %v3464_v2 = vld [vmem:[%s6373_s7 + $0x200] sm:$0xff] }
 0x114   : > { %2001 = vmatmul.mubr.f32.gmra.mxu0 %v5413_v56  ;;  %4198 = vmatprep.subr.mxu1 %v3494_v15 }
 0x115   : > { %2005 = vmatprep.mubr.f32.mxu0 %v5436_v8  ;;  %4199 = vmatpush3.msra.mxu1 %v3494_v15 }
 0x116   : > { %v922_v22 = vpop.permute.xlu0 %921  ;;  %v932_v4 = vpop.permute.xlu1 %931  ;;  %4188 = vmatmul.mubr.f32.gmra.mxu1 %v1299_v18  ;;  %4200 = vmatprep.subr.mxu1 %v3493_v20  ;;  %v3470_v18 = vld [vmem:[%s6373_s7 + $0x230] sm:$0xff] }
 0x117   : > { %4190 = vmatprep.mubr.f32.mxu1 %v1300_v58  ;;  %4201 = vmatpush3.msra.mxu1 %v3493_v20  ;;  %v4561_v58 = vmov 0.0   ;;  %v3480_v22 = vld [vmem:[%s6373_s7 + $0x280] sm:$0xff] }
 0x118   : > { %2006 = vmatmul.mubr.f32.gmra.mxu0 %v5438_v9  ;;  %4202 = vmatprep.subr.mxu1 %v3492_v26  ;;  %2155 = vst [vmem:[#allocation3 + $0x1a] sm:$0x3] %v4561_v58  ;;  %2139 = vst [vmem:[#allocation3] sm:$0xff] %v4561_v58  ;;  %v3448_v4 = vld [vmem:[%s6373_s7 + $0x180] sm:$0xff] }
 0x119   : > { %2010 = vmatprep.mubr.f32.mxu0 %v5474_v29  ;;  %4203 = vmatpush3.msra.mxu1 %v3492_v26  ;;  %2140 = vst [vmem:[#allocation3 + $0x8] sm:$0xf] %v4561_v58  ;;  %2142 = vst [vmem:[#allocation3 + $0x90] sm:$0xff] %v4561_v58 }
 0x11a   : > { %v942_v36 = vpop.permute.xlu0 %941  ;;  %v952_v37 = vpop.permute.xlu1 %951  ;;  %4191 = vmatmul.mubr.f32.gmra.mxu1 %v1301_v63  ;;  %4204 = vmatprep.subr.mxu1 %v3491_v30  ;;  %2143 = vst [vmem:[#allocation3 + $0x98] sm:$0xf] %v4561_v58  ;;  %2145 = vst [vmem:[#allocation3 + $0x10] sm:$0x3] %v4561_v58  ;;  %v3482_v63 = vld [vmem:[%s6373_s7 + $0x290] sm:$0xff] }
 0x11b   : > { %4193 = vmatprep.mubr.f32.mxu1 %v1302_v0  ;;  %4205 = vmatpush3.msra.mxu1 %v3491_v30  ;;  %2146 = vst [vmem:[#allocation3 + $0x20] sm:$0x3] %v4561_v58  ;;  %2147 = vst [vmem:[#allocation3 + $0x30] sm:$0x3] %v4561_v58  ;;  %v3450_v0 = vld [vmem:[%s6373_s7 + $0x190] sm:$0xff]  ;;  %v2266_v36 = vld [vmem:[%s6373_s7 + $0xf8] sm:$0xff] }
 0x11c   : > { %2011 = vmatmul.mubr.f32.gmra.mxu0 %v5495_v48  ;;  %4206 = vmatprep.subr.mxu1 %v3490_v24  ;;  %2148 = vst [vmem:[#allocation3 + $0x40] sm:$0x3] %v4561_v58  ;;  %2149 = vst [vmem:[#allocation3 + $0x50] sm:$0x3] %v4561_v58  ;;  %v5748_v37 = vld [vmem:[%s6373_s7 + $0x178] sm:$0xff] }
 0x11d   : > { %2015 = vmatprep.mubr.f32.mxu0 %v5520_v6  ;;  %v3479_v6 = vld [vmem:[%s6373_s7 + $0x278] sm:$0xff]  ;;  %4207 = vmatpush3.msra.mxu1 %v3490_v24  ;;  %2150 = vst [vmem:[#allocation3 + $0x60] sm:$0x3] %v4561_v58  ;;  %2151 = vst [vmem:[#allocation3 + $0x70] sm:$0x3] %v4561_v58 }
 0x11e   : > { %v1037_v55 = vpop.permute.xlu0 %1036  ;;  %v1042_v56 = vpop.permute.xlu1 %1041  ;;  %4194 = vmatmul.mubr.f32.gmra.mxu1 %v1871_v42  ;;  %3800 = vmatprep.subr.mxu0 %v3479_v6  ;;  %2152 = vst [vmem:[#allocation3 + $0x80] sm:$0x3] %v4561_v58  ;;  %2156 = vst [vmem:[#allocation3 + $0x2a] sm:$0x3] %v4561_v58 }
 0x11f   : > { %3801 = vmatpush3.msra.mxu0 %v3463_v14  ;;  %4208 = vmatprep.subr.mxu1 %v3489_v35  ;;  %2157 = vst [vmem:[#allocation3 + $0x3a] sm:$0x3] %v4561_v58  ;;  %2158 = vst [vmem:[#allocation3 + $0x4a] sm:$0x3] %v4561_v58 }
 0x120   : > { %2016 = vmatmul.mubr.f32.gmra.mxu0 %v5545_v27  ;;  %3802 = vmatprep.subr.mxu0 %v3478_v53  ;;  %v3460_v27 = vld [vmem:[%s6373_s7 + $0x1e0] sm:$0xff]  ;;  %2159 = vst [vmem:[#allocation3 + $0x5a] sm:$0x3] %v4561_v58  ;;  %2160 = vst [vmem:[#allocation3 + $0x6a] sm:$0x3] %v4561_v58 }
 0x121   : > { %2020 = vmatprep.mubr.f32.mxu0 %v1168_v62  ;;  %3803 = vmatpush3.msra.mxu0 %v3462_v16  ;;  %2161 = vst [vmem:[#allocation3 + $0x7a] sm:$0x3] %v4561_v58  ;;  %2162 = vst [vmem:[#allocation3 + $0x8a] sm:$0x3] %v4561_v58  ;;  %v3466_v62 = vld [vmem:[%s6373_s7 + $0x210] sm:$0xff] }
 0x122   : > { %v1052_v8 = vpop.permute.xlu0 %1051  ;;  %v1062_v5 = vpop.permute.xlu1 %1061  ;;  %3804 = vmatprep.subr.mxu0 %v3477_v17  ;;  %4209 = vmatpush3.msra.mxu1 %v3489_v35  ;;  %2144 = vst [vmem:[#allocation3] sm:$0x3] %v4561_v58  ;;  %2153 = vst [vmem:[#allocation3 + $0x90] sm:$0x3] %v4561_v58 }
 0x123   : > { %3805 = vmatpush3.msra.mxu0 %v3461_v23  ;;  %4210 = vmatprep.subr.mxu1 %v3488_v40  ;;  %2154 = vst [vmem:[#allocation3 + $0xa] sm:$0x3] %v4561_v58  ;;  %2163 = vst [vmem:[#allocation3 + $0x9a] sm:$0x3] %v4561_v58 }
 0x124   : > { %2021 = vmatmul.mubr.f32.gmra.mxu0 %v1150_v54  ;;  %3806 = vmatprep.subr.mxu0 %v3476_v25  ;;  %v3468_v54 = vld [vmem:[%s6373_s7 + $0x220] sm:$0xff]  ;;  %6385 = vst [vmem:[#allocation11_spill] sm:$0xff] %v5748_v37 }
 0x125   : > { %3807 = vmatpush3.msra.mxu0 %v3460_v27  ;;  %4211 = vmatpush3.msra.mxu1 %v3488_v40 }
 0x126   : > { %v1072_v9 = vpop.permute.xlu0 %1071  ;;  %v1082_v29 = vpop.permute.xlu1 %1081  ;;  %3808 = vmatprep.subr.mxu0 %v3475_v28  ;;  %4212 = vmatprep.subr.mxu1 %v3487_v44 }
 0x127   : > { %3809 = vmatpush3.msra.mxu0 %v3459_v31  ;;  %4213 = vmatpush3.msra.mxu1 %v3487_v44 }
 0x128   : > { %3810 = vmatprep.subr.mxu0 %v3474_v32  ;;  %4214 = vmatprep.subr.mxu1 %v3486_v19 }
 0x129   : > { %3811 = vmatpush3.msra.mxu0 %v3458_v33  ;;  %4215 = vmatpush3.msra.mxu1 %v3486_v19 }
 0x12a   : > { %v1092_v7 = vpop.permute.xlu0 %1091  ;;  %v1102_v10 = vpop.permute.xlu1 %1101  ;;  %3812 = vmatprep.subr.mxu0 %v3473_v34  ;;  %4216 = vmatprep.subr.mxu1 %v3485_v51 }
 0x12b   : > { %3813 = vmatpush3.msra.mxu0 %v3457_v38  ;;  %4217 = vmatpush3.msra.mxu1 %v3485_v51 }
 0x12c   : > { %3814 = vmatprep.subr.mxu0 %v3472_v39  ;;  %4218 = vmatprep.subr.mxu1 %v3484_v57 }
 0x12d   : > { %3815 = vmatpush3.msra.mxu0 %v3456_v41  ;;  %4219 = vmatpush3.msra.mxu1 %v3484_v57 }
 0x12e   : > { %v1112_v11 = vpop.permute.xlu0 %1111  ;;  %v1122_v12 = vpop.permute.xlu1 %1121  ;;  %3816 = vmatprep.subr.mxu0 %v3471_v43  ;;  %4220 = vmatprep.subr.mxu1 %v3483_v60 }
 0x12f   : > { %3817 = vmatpush3.msra.mxu0 %v3455_v46  ;;  %4221 = vmatpush3.msra.mxu1 %v3483_v60 }
 0x130   : > { %3818 = vmatprep.subr.mxu0 %v3470_v18  ;;  %4222 = vmatprep.subr.mxu1 %v3482_v63 }
 0x131   : > { %3819 = vmatpush3.msra.mxu0 %v3454_v47  ;;  %4223 = vmatpush3.msra.mxu1 %v3482_v63 }
 0x132   : > { %v1127_v45 = vpop.permute.xlu0 %1126  ;;  %v1132_v48 = vpop.permute.xlu1 %1131  ;;  %3820 = vmatprep.subr.mxu0 %v3469_v49  ;;  %4224 = vmatprep.subr.mxu1 %v3481_v1 }
 0x133   : > { %3821 = vmatpush3.msra.mxu0 %v3453_v52  ;;  %4225 = vmatpush3.msra.mxu1 %v3481_v1 }
 0x134   : > { %3822 = vmatprep.subr.mxu0 %v3468_v54  ;;  %4226 = vmatprep.subr.mxu1 %v3480_v22 }
 0x135   : > { %3823 = vmatpush3.msra.mxu0 %v3452_v50  ;;  %4227 = vmatpush3.msra.mxu1 %v3480_v22 }
 0x136   : > { %3824 = vmatprep.subr.mxu0 %v3467_v59  ;;  %4240 = vmatprep.subr.mxu1 %v5748_v37 }
 0x137   : > { %3825 = vmatpush3.msra.mxu0 %v3451_v61 }
 0x138   : > { %3826 = vmatprep.subr.mxu0 %v3466_v62 }
 0x139   : > { %3827 = vmatpush3.msra.mxu0 %v3450_v0 }
 0x13a   : > { %3828 = vmatprep.subr.mxu0 %v3465_v3 }
 0x13b   : > { %3829 = vmatpush3.msra.mxu0 %v3449_v21 }
 0x13c   : > { %3830 = vmatprep.subr.mxu0 %v3464_v2 }
 0x13d   : > { %3831 = vmatpush3.msra.mxu0 %v3448_v4 }
 0x13e   : > { %3880 = vmatprep.subr.mxu0 %v2266_v36 }
 0x16d   : > { %v3592_v42 = vpop.f32.mrf.mxu0 }
 0x16f   : > { %v3593_v55 = vpop.f32.mrf.mxu0 }
 0x170   : > { %v3594_v56 = vadd.f32 %v3593_v55, %v3592_v42 }
 0x171   : > { %v3595_v8 = vpop.f32.mrf.mxu0 }
 0x173   : > { %v3596_v5 = vpop.f32.mrf.mxu0 }
 0x174   : > { %v3597_v60 = vadd.f32 %v3596_v5, %v3595_v8 }
 0x176   : > { %v3598_v9 = vpop.f32.mrf.mxu0 }
 0x178   : > { %v3599_v29 = vpop.f32.mrf.mxu0 }
 0x179   : > { %v5751_v7 = vadd.f32 %v3599_v29, %v3598_v9  ;;  %v4098_v25 = vpop.f32.mrf.mxu1 }
 0x17a   : > { %v3601_v10 = vpop.f32.mrf.mxu0  ;;  %v1603_v0 = vadd.f32 %v4098_v25, %v3597_v60 }
 0x17b   : > { %v1597_v28 = vpop.f32.mrf.mxu1 }
 0x17c   : > { %v3602_v11 = vpop.f32.mrf.mxu0  ;;  %v1598_v2 = vadd.f32 %v3594_v56, %v1597_v28  ;;  %v5806_v28 = vld [vmem:[%s6372_s6] ss:$0 sm:$0xff] }
 0x17d   : > { %v3603_v36 = vadd.f32 %v3602_v11, %v3601_v10 }
 0x17e   : > { %v5753_v12 = vpop.f32.mrf.mxu0 }
 0x180   : > { %v5755_v45 = vpop.f32.mrf.mxu0 }
 0x182   : > { %v5757_v48 = vpop.f32.mrf.mxu0 }
 0x184   : > { %v5759_v6 = vpop.f32.mrf.mxu0 }
 0x189   : > { %v5761_v13 = vpop.f32.mrf.mxu0 }
 0x18b   : > { %v5763_v14 = vpop.f32.mrf.mxu0 }
 0x191   : > { %v5765_v53 = vpop.f32.mrf.mxu0  ;;  %v4101_v31 = vpop.f32.mrf.mxu1 }
 0x193   : > { %v5767_v15 = vpop.f32.mrf.mxu0  ;;  %v1607_v33 = vpop.f32.mrf.mxu1 }
 0x197   : > { %v3672_v16 = vpop.f32.mrf.mxu0 }
 0x199   : > { %v3673_v17 = vpop.f32.mrf.mxu0  ;;  %v5769_v34 = vpop.f32.mrf.mxu1 }
 0x19a   : > { %v3674_v3 = vadd.f32 %v3673_v17, %v3672_v16  ;;  %v5801_v16 = vld [vmem:[%s6371_s5] ss:$0 sm:$0xff] }
 0x19b   : > { %v5771_v38 = vpop.f32.mrf.mxu1 }
 0x1a2   : > { %v3675_v20 = vpop.f32.mrf.mxu0  ;;  %v5775_v40 = vpop.f32.mrf.mxu1 }
 0x1a3   : > { %6386 = vst [vmem:[#allocation12_spill] sm:$0xff] %v5775_v40  ;;  %v1703_v40 = vadd.f32 %v3674_v3, %v1598_v2  ;;  %v3609_v3 = vadd.f32 %v5759_v6, %v5757_v48 }
 0x1a4   : > { %v3676_v23 = vpop.f32.mrf.mxu0  ;;  %v5779_v43 = vpop.f32.mrf.mxu1 }
 0x1a5   : > { %v3677_v61 = vadd.f32 %v3676_v23, %v3675_v20  ;;  %v1613_v20 = vadd.f32 %v4101_v31, %v3603_v36  ;;  %v1608_v23 = vadd.f32 %v5751_v7, %v1607_v33 }
 0x1a6   : > { %v3678_v26 = vpop.f32.mrf.mxu0 }
 0x1a7   : > { %v1708_v22 = vadd.f32 %v3677_v61, %v1603_v0 }
 0x1a8   : > { %v3679_v27 = vpop.f32.mrf.mxu0 }
 0x1a9   : > { %v4142_v46 = vpop.f32.mrf.mxu1  ;;  %v3680_v42 = vadd.f32 %v3679_v27, %v3678_v26 }
 0x1aa   : > { %v3681_v30 = vpop.f32.mrf.mxu0  ;;  %v1813_v37 = vadd.f32 %v4142_v46, %v1708_v22  ;;  %v1623_v22 = vadd.f32 %v5769_v34, %v3609_v3  ;;  %v2249_v3 = vld [vmem:[%s6373_s7 + $0x70] sm:$0xff] }
 0x1ab   : > { %v1807_v19 = vpop.f32.mrf.mxu1  ;;  %v1713_v27 = vadd.f32 %v3680_v42, %v1608_v23 }
 0x1ac   : > { %v3682_v32 = vpop.f32.mrf.mxu0  ;;  %v1808_v25 = vadd.f32 %v1807_v19, %v1703_v40 }
 0x1ad   : > { %v3683_v55 = vadd.f32 %v3682_v32, %v3681_v30 }
 0x1ae   : > { %v3684_v24 = vpop.f32.mrf.mxu0 }
 0x1af   : > { %v1718_v26 = vadd.f32 %v3683_v55, %v1613_v20 }
 0x1b0   : > { %v3685_v35 = vpop.f32.mrf.mxu0 }
 0x1b1   : > { %v3686_v40 = vadd.f32 %v3685_v35, %v3684_v24 }
 0x1b2   : > { %v5773_v39 = vpop.f32.mrf.mxu0 }
 0x1b4   : > { %v5777_v41 = vpop.f32.mrf.mxu0 }
 0x1b5   : > { %v3689_v2 = vadd.f32 %v5777_v41, %v5773_v39  ;;  %v3612_v39 = vadd.f32 %v5763_v14, %v5761_v13 }
 0x1b7   : > { %v1728_v41 = vadd.f32 %v3689_v2, %v1623_v22  ;;  %v1628_v13 = vadd.f32 %v3612_v39, %v5779_v43  ;;  %v2279_v39 = vld [vmem:[%s6373_s7 + $0x160] sm:$0xff] }
 0x1b9   : > { %v5781_v44 = vpop.f32.mrf.mxu0 }
 0x1bb   : > { %v5783_v18 = vpop.f32.mrf.mxu0 }
 0x1c1   : > { %v4145_v49 = vpop.f32.mrf.mxu1 }
 0x1c2   : > { %v5785_v47 = vpop.f32.mrf.mxu0 }
 0x1c3   : > { %v1817_v52 = vpop.f32.mrf.mxu1 }
 0x1c4   : > { %v5787_v51 = vpop.f32.mrf.mxu0  ;;  %v1818_v19 = vadd.f32 %v1817_v52, %v1713_v27 }
 0x1c8   : > { %v3752_v54 = vpop.f32.mrf.mxu0 }
 0x1c9   : > { %v5789_v57 = vpop.f32.mrf.mxu1 }
 0x1ca   : > { %v3753_v50 = vpop.f32.mrf.mxu0 }
 0x1cb   : > { %v5791_v58 = vpop.f32.mrf.mxu1  ;;  %v3754_v8 = vadd.f32 %v3753_v50, %v3752_v54  ;;  %v3606_v54 = vadd.f32 %v5755_v45, %v5753_v12 }
 0x1cc   : > { %v3755_v59 = vpop.f32.mrf.mxu0 }
 0x1ce   : > { %v5793_v62 = vpop.f32.mrf.mxu1  ;;  %v3756_v63 = vpop.f32.mrf.mxu0 }
 0x1cf   : > { %v3757_v4 = vadd.f32 %v3756_v63, %v3755_v59 }
 0x1d0   : > { %v5795_v1 = vpop.f32.mrf.mxu1  ;;  %v3758_v21 = vpop.f32.mrf.mxu0 }
 0x1d2   : > { %v4186_v9 = vpop.f32.mrf.mxu1  ;;  %v3759_v29 = vpop.f32.mrf.mxu0 }
 0x1d3   : > { %v2098_v5 = vadd.f32 %v4186_v9, %v3757_v4  ;;  %v3760_v33 = vadd.f32 %v3759_v29, %v3758_v21  ;;  %v1618_v21 = vadd.f32 %v3606_v54, %v5771_v38 }
 0x1d4   : > { %v2092_v56 = vpop.f32.mrf.mxu1  ;;  %v3761_v17 = vpop.f32.mrf.mxu0 }
 0x1d5   : > { %v2132_v10 = vadd.f32 %v2098_v5, %v1813_v37  ;;  %v2093_v11 = vadd.f32 %v3754_v8, %v2092_v56  ;;  %v1823_v37 = vadd.f32 %v4145_v49, %v1718_v26  ;;  %v1723_v4 = vadd.f32 %v3686_v40, %v1618_v21 }
 0x1d6   : > { %v4189_v30 = vpop.f32.mrf.mxu1  ;;  %v3762_v31 = vpop.f32.mrf.mxu0  ;;  %v3692_v5 = vadd.f32 %v5783_v18, %v5781_v44  ;;  %v3615_v18 = vadd.f32 %v5767_v15, %v5765_v53 }
 0x1d7   : > { %v2172_v7 = vmul.f32 %v5801_v16, %v2132_v10  ;;  %v2131_v32 = vadd.f32 %v2093_v11, %v1808_v25  ;;  %v3763_v46 = vadd.f32 %v3762_v31, %v3761_v17  ;;  %v1828_v9 = vadd.f32 %v5791_v58, %v1723_v4 }
 0x1d8   : > { %v2102_v50 = vpop.f32.mrf.mxu1  ;;  %v3764_v59 = vpop.f32.mrf.mxu0  ;;  %v1833_v58 = vadd.f32 %v5789_v57, %v1728_v41  ;;  %v3695_v11 = vadd.f32 %v5787_v51, %v5785_v47  ;;  %v1733_v43 = vadd.f32 %v3692_v5, %v1628_v13  ;;  %v2250_v51 = vld [vmem:[%s6373_s7 + $0x78] sm:$0xff]  ;;  %v2247_v41 = vld [vmem:[%s6373_s7 + $0x60] sm:$0xff]  ;;  %v2260_v13 = vld [vmem:[%s6373_s7 + $0xc8] sm:$0xff] }
 0x1d9   : > { %v2187_v60 = vadd.f32 %v5806_v28, %v2172_v7  ;;  %v2171_v61 = vmul.f32 %v5801_v16, %v2131_v32  ;;  %v2103_v63 = vadd.f32 %v3760_v33, %v2102_v50  ;;  %v2108_v0 = vadd.f32 %v4189_v30, %v3763_v46  ;;  %v6387_v7 = vld [vmem:[#allocation12_spill] sm:$0xff] }
 0x1da   : > { %v4192_v12 = vpop.f32.mrf.mxu1  ;;  %v3765_v45 = vpop.f32.mrf.mxu0  ;;  %v1633_v32 = vadd.f32 %v6387_v7, %v3615_v18  ;;  %v1838_v53 = vadd.f32 %v5795_v1, %v1733_v43  ;;  %v2259_v18 = vld [vmem:[%s6373_s7 + $0xc0] sm:$0xff]  ;;  %v2257_v7 = vld [vmem:[%s6373_s7 + $0xb0] sm:$0xff] }
 0x1db   : > { %v5818_v24 = vmax.f32 %v2187_v60, 0.0  ;;  %v2186_v35 = vadd.f32 %v5806_v28, %v2171_v61  ;;  %v2133_v49 = vadd.f32 %v2103_v63, %v1818_v19  ;;  %v2134_v52 = vadd.f32 %v2108_v0, %v1823_v37  ;;  %v2265_v61 = vld [vmem:[%s6373_s7 + $0xf0] sm:$0xff] }
 0x1dc   : > { %v2112_v36 = vpop.f32.mrf.mxu1  ;;  %v3766_v42 = vadd.f32 %v3765_v45, %v3764_v59  ;;  %v3767_v55 = vpop.f32.mrf.mxu0  ;;  %v1738_v54 = vadd.f32 %v3695_v11, %v1633_v32  ;;  %v2281_v63 = vld [vmem:[%s6373_s7 + $0x170] sm:$0xff]  ;;  %v6388_v45 = vld [vmem:[#allocation11_spill] sm:$0xff] }
 0x1dd   : > { %2204 = vst [vmem:[#allocation3 + $0x22] sm:$0xff] %v5818_v24  ;;  %v5823_v48 = vmax.f32 %v2186_v35, 0.0  ;;  %v2173_v6 = vmul.f32 %v5801_v16, %v2133_v49  ;;  %v2174_v38 = vmul.f32 %v5801_v16, %v2134_v52  ;;  %v2264_v49 = vld [vmem:[%s6373_s7 + $0xe8] sm:$0xff]  ;;  %v2275_v11 = vld [vmem:[%s6373_s7 + $0x140] sm:$0xff]  ;;  %v2273_v32 = vld [vmem:[%s6373_s7 + $0x130] sm:$0xff] }
 0x1de   : > { %v4195_v29 = vpop.f32.mrf.mxu1  ;;  %v2113_v34 = vadd.f32 %v3766_v42, %v2112_v36  ;;  %v3768_v8 = vpop.f32.mrf.mxu0  ;;  %v1843_v21 = vadd.f32 %v5793_v62, %v1738_v54  ;;  %v2280_v52 = vld [vmem:[%s6373_s7 + $0x168] sm:$0xff]  ;;  %v2255_v54 = vld [vmem:[%s6373_s7 + $0xa0] sm:$0xff] }
 0x1df   : > { %2203 = vst [vmem:[#allocation3 + $0x12] sm:$0xff] %v5823_v48  ;;  %v2188_v20 = vadd.f32 %v5806_v28, %v2173_v6  ;;  %v2189_v23 = vadd.f32 %v5806_v28, %v2174_v38  ;;  %v3769_v56 = vadd.f32 %v3768_v8, %v3767_v55  ;;  %2420 = vmatprep.mubr.f32.mxu0 %v5823_v48  ;;  %v2248_v36 = vld [vmem:[%s6373_s7 + $0x68] sm:$0xff]  ;;  %v2263_v55 = vld [vmem:[%s6373_s7 + $0xe0] sm:$0xff] }
 0x1e0   : > { %v2135_v14 = vadd.f32 %v2113_v34, %v1828_v9  ;;  %v3770_v17 = vpop.f32.mrf.mxu0  ;;  %v2122_v27 = vpop.f32.mrf.mxu1  ;;  %v2262_v9 = vld [vmem:[%s6373_s7 + $0xd8] sm:$0xff] }
 0x1e1   : > { %v5838_v25 = vmax.f32 %v2188_v20, 0.0  ;;  %v5840_v10 = vmax.f32 %v2189_v23, 0.0  ;;  %v2118_v44 = vadd.f32 %v4192_v12, %v3769_v56  ;;  %v2246_v34 = vld [vmem:[%s6373_s7 + $0x58] sm:$0xff]  ;;  %v2261_v20 = vld [vmem:[%s6373_s7 + $0xd0] sm:$0xff] }
 0x1e2   : > { %v2175_v26 = vmul.f32 %v5801_v16, %v2135_v14  ;;  %v3771_v30 = vpop.f32.mrf.mxu0  ;;  %v2277_v23 = vld [vmem:[%s6373_s7 + $0x150] sm:$0xff]  ;;  %v2276_v14 = vld [vmem:[%s6373_s7 + $0x148] sm:$0xff] }
 0x1e3   : > { %2205 = vst [vmem:[#allocation3 + $0x32] sm:$0xff] %v5838_v25  ;;  %2206 = vst [vmem:[#allocation3 + $0x42] sm:$0xff] %v5840_v10  ;;  %v2136_v57 = vadd.f32 %v2118_v44, %v1833_v58  ;;  %v3772_v31 = vadd.f32 %v3771_v30, %v3770_v17  ;;  %v2245_v56 = vld [vmem:[%s6373_s7 + $0x50] sm:$0xff]  ;;  %v2244_v58 = vld [vmem:[%s6373_s7 + $0x48] sm:$0xff] }
 0x1e4   : > { %v2190_v33 = vadd.f32 %v5806_v28, %v2175_v26  ;;  %v3773_v46 = vpop.f32.mrf.mxu0  ;;  %v5865_v1 = vld [vmem:[#allocation3 + $0x23] sm:$0xff]  ;;  %v2274_v30 = vld [vmem:[%s6373_s7 + $0x138] sm:$0xff] }
 0x1e5   : > { %v2176_v15 = vmul.f32 %v5801_v16, %v2136_v57  ;;  %v2123_v47 = vadd.f32 %v3772_v31, %v2122_v27  ;;  %v5897_v42 = vld [vmem:[#allocation3 + $0x21] sm:$0xff]  ;;  %v2258_v27 = vld [vmem:[%s6373_s7 + $0xb8] sm:$0xff] }
 0x1e6   : > { %v5856_v40 = vmax.f32 %v2190_v33, 0.0  ;;  %v5858_v37 = vld [vmem:[#allocation3 + $0x13] sm:$0xff]  ;;  %v3774_v50 = vpop.f32.mrf.mxu0  ;;  %v2243_v26 = vld [vmem:[%s6373_s7 + $0x40] sm:$0xff] }
 0x1e7   : > { %v5860_v19 = vld [vmem:[#allocation3 + $0x11] sm:$0xff]  ;;  %v2191_v59 = vadd.f32 %v5806_v28, %v2176_v15  ;;  %v2137_v60 = vadd.f32 %v2123_v47, %v1838_v53  ;;  %4228 = vmatprep.mubr.f32.mxu1 %v5858_v37  ;;  %v3775_v0 = vadd.f32 %v3774_v50, %v3773_v46  ;;  %v2256_v46 = vld [vmem:[%s6373_s7 + $0xa8] sm:$0xff]  ;;  %v2271_v50 = vld [vmem:[%s6373_s7 + $0x120] sm:$0xff] }
 0x1e8   : > { %2421 = vmatmul.mubr.f32.vlgmr.msra.gmra.mxu0 %v5860_v19  ;;  %2207 = vst [vmem:[#allocation3 + $0x52] sm:$0xff] %v5856_v40  ;;  %4229 = vmatmul.mubr.f32.vlgmr.msra.gmra.mxu1 %v5865_v1  ;;  %v2242_v57 = vld [vmem:[%s6373_s7 + $0x38] sm:$0xff]  ;;  %v2241_v33 = vld [vmem:[%s6373_s7 + $0x30] sm:$0xff]  ;;  %v2272_v53 = vld [vmem:[%s6373_s7 + $0x128] sm:$0xff] }
 0x1e9   : > { %3881 = vmatpush3.msra.mxu0 %v2250_v51  ;;  %v5879_v2 = vmax.f32 %v2191_v59, 0.0  ;;  %v2177_v12 = vmul.f32 %v5801_v16, %v2137_v60  ;;  %4241 = vmatpush3.msra.mxu1 %v6388_v45  ;;  %v2128_v35 = vadd.f32 %v4195_v29, %v3775_v0  ;;  %v2278_v29 = vld [vmem:[%s6373_s7 + $0x158] sm:$0xff]  ;;  %v2240_v47 = vld [vmem:[%s6373_s7 + $0x28] sm:$0xff]  ;;  %v2239_v59 = vld [vmem:[%s6373_s7 + $0x20] sm:$0xff] }
 0x1ea   : > { %2425 = vmatprep.mubr.f32.mxu0 %v5818_v24  ;;  %3882 = vmatprep.subr.mxu0 %v2265_v61  ;;  %v5890_v62 = vld [vmem:[#allocation3 + $0x33] sm:$0xff]  ;;  %v5955_v44 = vld [vmem:[#allocation3 + $0x41] sm:$0xff] }
 0x1eb   : > { %4242 = vmatprep.subr.mxu1 %v2281_v63  ;;  %2208 = vst [vmem:[#allocation3 + $0x62] sm:$0xff] %v5879_v2  ;;  %v2192_v22 = vadd.f32 %v5806_v28, %v2177_v12  ;;  %3883 = vmatpush3.msra.mxu0 %v2249_v3  ;;  %v2138_v4 = vadd.f32 %v2128_v35, %v1843_v21  ;;  %v5927_v5 = vld [vmem:[#allocation3 + $0x31] sm:$0xff]  ;;  %v2252_v35 = vld [vmem:[%s6373_s7 + $0x88] sm:$0xff] }
 0x1ec   : > { %4243 = vmatpush3.msra.mxu1 %v2281_v63  ;;  %3884 = vmatprep.subr.mxu0 %v2264_v49  ;;  %v2254_v60 = vld [vmem:[%s6373_s7 + $0x98] sm:$0xff]  ;;  %v2253_v21 = vld [vmem:[%s6373_s7 + $0x90] sm:$0xff]  ;;  %v2268_v49 = vld [vmem:[%s6373_s7 + $0x108] sm:$0xff] }
 0x1ed   : > { %4244 = vmatprep.subr.mxu1 %v2280_v52  ;;  %v5902_v6 = vmax.f32 %v2192_v22, 0.0  ;;  %v2178_v38 = vmul.f32 %v5801_v16, %v2138_v4  ;;  %2426 = vmatmul.mubr.f32.gmra.mxu0 %v5897_v42  ;;  %v2270_v61 = vld [vmem:[%s6373_s7 + $0x118] sm:$0xff]  ;;  %v2269_v12 = vld [vmem:[%s6373_s7 + $0x110] sm:$0xff]  ;;  %v2267_v22 = vld [vmem:[%s6373_s7 + $0x100] sm:$0xff] }
 0x1ee   : > { %4231 = vmatprep.mubr.f32.mxu1 %v5890_v62  ;;  %3885 = vmatpush3.msra.mxu0 %v2248_v36  ;;  %v2238_v0 = vld [vmem:[%s6373_s7 + $0x18] sm:$0xff]  ;;  %v2237_v45 = vld [vmem:[%s6373_s7 + $0x10] sm:$0xff]  ;;  %v2251_v36 = vld [vmem:[%s6373_s7 + $0x80] sm:$0xff] }
 0x1ef   : > { %4245 = vmatpush3.msra.mxu1 %v2280_v52  ;;  %2209 = vst [vmem:[#allocation3 + $0x72] sm:$0xff] %v5902_v6  ;;  %v2193_v16 = vadd.f32 %v5806_v28, %v2178_v38  ;;  %2430 = vmatprep.mubr.f32.mxu0 %v5838_v25  ;;  %v5930_v28 = vld [vmem:[#allocation3 + $0x43] sm:$0xff]  ;;  %v5950_v17 = vld [vmem:[#allocation3 + $0x53] sm:$0xff] }
 0x1f0   : > { %3886 = vmatprep.subr.mxu0 %v2263_v55  ;;  %4246 = vmatprep.subr.mxu1 %v2279_v39  ;;  %v5980_v31 = vld [vmem:[#allocation3 + $0x51] sm:$0xff]  ;;  %v2236_v52 = vld [vmem:[%s6373_s7 + $0x8] sm:$0xff]  ;;  %v2235_v55 = vld [vmem:[%s6373_s7] sm:$0xff] }
 0x1f1   : > { %3887 = vmatpush3.msra.mxu0 %v2247_v41  ;;  %v5925_v8 = vmax.f32 %v2193_v16, 0.0  ;;  %4247 = vmatpush3.msra.mxu1 %v2279_v39  ;;  %v2227_v38 = vld [vmem:[#allocation3 + $0x3] sm:$0xff]  ;;  %v3527_v41 = vld [vmem:[%s6373_s7 + $0x3f8] sm:$0xff] }
 0x1f2   : > { %3888 = vmatprep.subr.mxu0 %v2262_v9  ;;  %4248 = vmatprep.subr.mxu1 %v2278_v29  ;;  %v5975_v43 = vld [vmem:[#allocation3 + $0x63] sm:$0xff]  ;;  %v3543_v9 = vld [vmem:[%s6373_s7 + $0x478] sm:$0xff] }
 0x1f3   : > { %2431 = vmatmul.mubr.f32.gmra.mxu0 %v5927_v5  ;;  %2210 = vst [vmem:[#allocation3 + $0x82] sm:$0xff] %v5925_v8  ;;  %4232 = vmatmul.mubr.f32.gmra.mxu1 %v5930_v28  ;;  %v6005_v51 = vld [vmem:[#allocation3 + $0x61] sm:$0xff] }
 0x1f4   : > { %3889 = vmatpush3.msra.mxu0 %v2246_v34  ;;  %4249 = vmatpush3.msra.mxu1 %v2278_v29  ;;  %v2219_v39 = vld [vmem:[#allocation3 + $0x2] sm:$0xff]  ;;  %v3511_v29 = vld [vmem:[%s6373_s7 + $0x378] sm:$0xff]  ;;  %v3526_v34 = vld [vmem:[%s6373_s7 + $0x3f0] sm:$0xff] }
 0x1f5   : > { %2435 = vmatprep.mubr.f32.mxu0 %v5840_v10  ;;  %3890 = vmatprep.subr.mxu0 %v2261_v20  ;;  %v2211_v16 = vld [vmem:[#allocation3 + $0x1] sm:$0xff]  ;;  %v3542_v20 = vld [vmem:[%s6373_s7 + $0x470] sm:$0xff] }
 0x1f6   : > { %4250 = vmatprep.subr.mxu1 %v2277_v23  ;;  %3891 = vmatpush3.msra.mxu0 %v2245_v56  ;;  %v6000_v15 = vld [vmem:[#allocation3 + $0x73] sm:$0xff]  ;;  %v3541_v56 = vld [vmem:[%s6373_s7 + $0x468] sm:$0xff] }
 0x1f7   : > { %4251 = vmatpush3.msra.mxu1 %v2277_v23  ;;  %3892 = vmatprep.subr.mxu0 %v2260_v13  ;;  %v6030_v3 = vld [vmem:[#allocation3 + $0x71] sm:$0xff]  ;;  %v3525_v23 = vld [vmem:[%s6373_s7 + $0x3e8] sm:$0xff] }
 0x1f8   : > { %4252 = vmatprep.subr.mxu1 %v2276_v14  ;;  %2436 = vmatmul.mubr.f32.gmra.mxu0 %v5955_v44  ;;  %v3509_v13 = vld [vmem:[%s6373_s7 + $0x368] sm:$0xff] }
 0x1f9   : > { %4234 = vmatprep.mubr.f32.mxu1 %v5950_v17  ;;  %3893 = vmatpush3.msra.mxu0 %v2244_v58  ;;  %v3508_v58 = vld [vmem:[%s6373_s7 + $0x360] sm:$0xff] }
 0x1fa   : > { %4253 = vmatpush3.msra.mxu1 %v2276_v14  ;;  %2440 = vmatprep.mubr.f32.mxu0 %v5856_v40  ;;  %v6025_v63 = vld [vmem:[#allocation3 + $0x83] sm:$0xff] }
 0x1fb   : > { %3894 = vmatprep.subr.mxu0 %v2259_v18  ;;  %4254 = vmatprep.subr.mxu1 %v2275_v11  ;;  %v6056_v4 = vld [vmem:[#allocation3 + $0x81] sm:$0xff]  ;;  %v3523_v18 = vld [vmem:[%s6373_s7 + $0x3d8] sm:$0xff] }
 0x1fc   : > { %3895 = vmatpush3.msra.mxu0 %v2243_v26  ;;  %4255 = vmatpush3.msra.mxu1 %v2275_v11  ;;  %v3540_v14 = vld [vmem:[%s6373_s7 + $0x460] sm:$0xff]  ;;  %v3507_v11 = vld [vmem:[%s6373_s7 + $0x358] sm:$0xff]  ;;  %v3522_v26 = vld [vmem:[%s6373_s7 + $0x3d0] sm:$0xff] }
 0x1fd   : > { %3896 = vmatprep.subr.mxu0 %v2258_v27  ;;  %4256 = vmatprep.subr.mxu1 %v2274_v30  ;;  %v3538_v27 = vld [vmem:[%s6373_s7 + $0x450] sm:$0xff] }
 0x1fe   : > { %2441 = vmatmul.mubr.f32.gmra.mxu0 %v5980_v31  ;;  %4235 = vmatmul.mubr.f32.gmra.mxu1 %v5975_v43 }
 0x1ff   : > { %3897 = vmatpush3.msra.mxu0 %v2242_v57  ;;  %4257 = vmatpush3.msra.mxu1 %v2274_v30  ;;  %v3506_v30 = vld [vmem:[%s6373_s7 + $0x350] sm:$0xff]  ;;  %v3521_v57 = vld [vmem:[%s6373_s7 + $0x3c8] sm:$0xff] }
 0x200   : > { %2445 = vmatprep.mubr.f32.mxu0 %v5879_v2  ;;  %3898 = vmatprep.subr.mxu0 %v2257_v7  ;;  %v3537_v7 = vld [vmem:[%s6373_s7 + $0x448] sm:$0xff] }
 0x201   : > { %4258 = vmatprep.subr.mxu1 %v2273_v32  ;;  %3899 = vmatpush3.msra.mxu0 %v2241_v33  ;;  %v3520_v33 = vld [vmem:[%s6373_s7 + $0x3c0] sm:$0xff] }
 0x202   : > { %4259 = vmatpush3.msra.mxu1 %v2273_v32  ;;  %3900 = vmatprep.subr.mxu0 %v2256_v46  ;;  %v3505_v32 = vld [vmem:[%s6373_s7 + $0x348] sm:$0xff]  ;;  %v3536_v46 = vld [vmem:[%s6373_s7 + $0x440] sm:$0xff] }
 0x203   : > { %4260 = vmatprep.subr.mxu1 %v2272_v53  ;;  %2446 = vmatmul.mubr.f32.gmra.mxu0 %v6005_v51 }
 0x204   : > { %4237 = vmatprep.mubr.f32.mxu1 %v6000_v15  ;;  %3901 = vmatpush3.msra.mxu0 %v2240_v47  ;;  %v3519_v47 = vld [vmem:[%s6373_s7 + $0x3b8] sm:$0xff] }
 0x205   : > { %4261 = vmatpush3.msra.mxu1 %v2272_v53  ;;  %2450 = vmatprep.mubr.f32.mxu0 %v5902_v6  ;;  %v3504_v53 = vld [vmem:[%s6373_s7 + $0x340] sm:$0xff] }
 0x206   : > { %3902 = vmatprep.subr.mxu0 %v2255_v54  ;;  %4262 = vmatprep.subr.mxu1 %v2271_v50  ;;  %v3535_v54 = vld [vmem:[%s6373_s7 + $0x438] sm:$0xff] }
 0x207   : > { %3903 = vmatpush3.msra.mxu0 %v2239_v59  ;;  %4263 = vmatpush3.msra.mxu1 %v2271_v50  ;;  %v3503_v50 = vld [vmem:[%s6373_s7 + $0x338] sm:$0xff]  ;;  %v3534_v59 = vld [vmem:[%s6373_s7 + $0x430] sm:$0xff] }
 0x208   : > { %3904 = vmatprep.subr.mxu0 %v2254_v60  ;;  %4264 = vmatprep.subr.mxu1 %v2270_v61  ;;  %v3502_v60 = vld [vmem:[%s6373_s7 + $0x330] sm:$0xff] }
 0x209   : > { %2451 = vmatmul.mubr.f32.gmra.mxu0 %v6030_v3  ;;  %4238 = vmatmul.mubr.f32.gmra.mxu1 %v6025_v63 }
 0x20a   : > { %3905 = vmatpush3.msra.mxu0 %v2238_v0  ;;  %4265 = vmatpush3.msra.mxu1 %v2270_v61  ;;  %v3517_v61 = vld [vmem:[%s6373_s7 + $0x3a8] sm:$0xff] }
 0x20b   : > { %2455 = vmatprep.mubr.f32.mxu0 %v5925_v8  ;;  %3906 = vmatprep.subr.mxu0 %v2253_v21  ;;  %v3533_v0 = vld [vmem:[%s6373_s7 + $0x428] sm:$0xff] }
 0x20c   : > { %4266 = vmatprep.subr.mxu1 %v2269_v12  ;;  %3907 = vmatpush3.msra.mxu0 %v2237_v45  ;;  %v3501_v21 = vld [vmem:[%s6373_s7 + $0x328] sm:$0xff]  ;;  %v3532_v45 = vld [vmem:[%s6373_s7 + $0x420] sm:$0xff] }
 0x20d   : > { %4267 = vmatpush3.msra.mxu1 %v2269_v12  ;;  %3908 = vmatprep.subr.mxu0 %v2252_v35  ;;  %v3516_v12 = vld [vmem:[%s6373_s7 + $0x3a0] sm:$0xff] }
 0x20e   : > { %4268 = vmatprep.subr.mxu1 %v2268_v49  ;;  %2456 = vmatmul.mubr.f32.gmra.mxu0 %v6056_v4  ;;  %v3500_v35 = vld [vmem:[%s6373_s7 + $0x320] sm:$0xff] }
 0x20f   : > { %4269 = vmatpush3.msra.mxu1 %v2268_v49  ;;  %3909 = vmatpush3.msra.mxu0 %v2236_v52  ;;  %v3515_v49 = vld [vmem:[%s6373_s7 + $0x398] sm:$0xff] }
 0x210   : > { %4270 = vmatprep.subr.mxu1 %v2267_v22  ;;  %3910 = vmatprep.subr.mxu0 %v2251_v36  ;;  %v3531_v52 = vld [vmem:[%s6373_s7 + $0x418] sm:$0xff]  ;;  %v3514_v36 = vld [vmem:[%s6373_s7 + $0x390] sm:$0xff] }
 0x211   : > { %4271 = vmatpush3.msra.mxu1 %v2267_v22  ;;  %3911 = vmatpush3.msra.mxu0 %v2235_v55  ;;  %v3499_v22 = vld [vmem:[%s6373_s7 + $0x318] sm:$0xff]  ;;  %v3530_v55 = vld [vmem:[%s6373_s7 + $0x410] sm:$0xff] }
 0x212   : > { %4272 = vmatprep.mubr.f32.mxu1 %v2227_v38  ;;  %2630 = vmatprep.mubr.f32.mxu0 %v2219_v39  ;;  %v3498_v38 = vld [vmem:[%s6373_s7 + $0x310] sm:$0xff]  ;;  %v3513_v39 = vld [vmem:[%s6373_s7 + $0x388] sm:$0xff] }
 0x213   : > { %4273 = vmatmul.mubr.f32.vlgmr.msra.gmra.mxu1 %v5858_v37  ;;  %3960 = vmatprep.subr.mxu0 %v3527_v41  ;;  %v3510_v37 = vld [vmem:[%s6373_s7 + $0x370] sm:$0xff]  ;;  %v3529_v41 = vld [vmem:[%s6373_s7 + $0x408] sm:$0xff] }
 0x214   : > { %4284 = vmatprep.subr.mxu1 %v3543_v9  ;;  %2631 = vmatmul.mubr.f32.vlgmr.msra.gmra.mxu0 %v2211_v16  ;;  %v3512_v16 = vld [vmem:[%s6373_s7 + $0x380] sm:$0xff] }
 0x215   : > { %4275 = vmatprep.mubr.f32.mxu1 %v5865_v1  ;;  %3961 = vmatpush3.msra.mxu0 %v3511_v29  ;;  %v3528_v29 = vld [vmem:[%s6373_s7 + $0x400] sm:$0xff] }
 0x216   : > { %4285 = vmatpush3.msra.mxu1 %v3543_v9  ;;  %2635 = vmatprep.mubr.f32.mxu0 %v5823_v48  ;;  %v3524_v48 = vld [vmem:[%s6373_s7 + $0x3e0] sm:$0xff]  ;;  %v3497_v9 = vld [vmem:[%s6373_s7 + $0x308] sm:$0xff] }
 0x217   : > { %3962 = vmatprep.subr.mxu0 %v3526_v34  ;;  %4286 = vmatprep.subr.mxu1 %v3542_v20  ;;  %v3496_v34 = vld [vmem:[%s6373_s7 + $0x300] sm:$0xff] }
 0x218   : > { %3963 = vmatpush3.msra.mxu0 %v3510_v37  ;;  %4287 = vmatpush3.msra.mxu1 %v3542_v20  ;;  %v3130_v20 = vld [vmem:[#allocation4 + $0x78] sm:$0xff]  ;;  %v3129_v37 = vld [vmem:[#allocation4 + $0x70] sm:$0xff] }
 0x219   : > { %3964 = vmatprep.subr.mxu0 %v3525_v23  ;;  %4276 = vmatmul.mubr.f32.gmra.mxu1 %v5890_v62  ;;  %v3128_v23 = vld [vmem:[#allocation4 + $0x68] sm:$0xff] }
 0x21a   : > { %4288 = vmatprep.subr.mxu1 %v3541_v56  ;;  %2636 = vmatmul.mubr.f32.gmra.mxu0 %v5860_v19  ;;  %v3539_v19 = vld [vmem:[%s6373_s7 + $0x458] sm:$0xff] }
 0x21b   : > { %4278 = vmatprep.mubr.f32.mxu1 %v5930_v28  ;;  %3965 = vmatpush3.msra.mxu0 %v3509_v13 }
 0x21c   : > { %4289 = vmatpush3.msra.mxu1 %v3541_v56  ;;  %2640 = vmatprep.mubr.f32.mxu0 %v5818_v24  ;;  %v3546_v56 = vld [vmem:[%s5017_s12 + $0x1d0] sm:$0xff] }
 0x21d   : > { %3966 = vmatprep.subr.mxu0 %v3524_v48  ;;  %4290 = vmatprep.subr.mxu1 %v3540_v14 }
 0x21e   : > { %3967 = vmatpush3.msra.mxu0 %v3508_v58  ;;  %4291 = vmatpush3.msra.mxu1 %v3540_v14  ;;  %v3117_v14 = vld [vmem:[#allocation4 + $0x10] sm:$0xff] }
 0x21f   : > { %3968 = vmatprep.subr.mxu0 %v3523_v18  ;;  %4279 = vmatmul.mubr.f32.gmra.mxu1 %v5950_v17 }
 0x220   : > { %4292 = vmatprep.subr.mxu1 %v3539_v19  ;;  %2641 = vmatmul.mubr.f32.gmra.mxu0 %v5897_v42 }
 0x221   : > { %4281 = vmatprep.mubr.f32.mxu1 %v5975_v43  ;;  %3969 = vmatpush3.msra.mxu0 %v3507_v11 }
 0x222   : > { %4293 = vmatpush3.msra.mxu1 %v3539_v19  ;;  %2645 = vmatprep.mubr.f32.mxu0 %v5838_v25  ;;  %v3551_v19 = vld [vmem:[%s5017_s12 + $0x220] sm:$0xff] }
 0x223   : > { %3970 = vmatprep.subr.mxu0 %v3522_v26  ;;  %4294 = vmatprep.subr.mxu1 %v3538_v27  ;;  %v3547_v26 = vld [vmem:[%s5017_s12 + $0x1e0] sm:$0xff] }
 0x224   : > { %3971 = vmatpush3.msra.mxu0 %v3506_v30  ;;  %4295 = vmatpush3.msra.mxu1 %v3538_v27  ;;  %v2792_v27 = vld [vmem:[#allocation3 + $0x92] sm:$0xff] }
 0x225   : > { %3972 = vmatprep.subr.mxu0 %v3521_v57  ;;  %4282 = vmatmul.mubr.f32.gmra.mxu1 %v6000_v15  ;;  %v3116_v57 = vld [vmem:[#allocation4 + $0x8] sm:$0xff] }
 0x226   : > { %4296 = vmatprep.subr.mxu1 %v3537_v7  ;;  %2646 = vmatmul.mubr.f32.gmra.mxu0 %v5927_v5 }
 0x227   : > { %4297 = vmatpush3.msra.mxu1 %v3537_v7  ;;  %3973 = vmatpush3.msra.mxu0 %v3505_v32 }
 0x228   : > { %4316 = vmatprep.mubr.f32.mxu1 %v5865_v1  ;;  %2650 = vmatprep.mubr.f32.mxu0 %v5840_v10  ;;  %v3518_v1 = vld [vmem:[%s6373_s7 + $0x3b0] sm:$0xff] }
 0x229   : > { %3974 = vmatprep.subr.mxu0 %v3520_v33  ;;  %4298 = vmatprep.subr.mxu1 %v3536_v46 }
 0x22a   : > { %3975 = vmatpush3.msra.mxu0 %v3504_v53  ;;  %4299 = vmatpush3.msra.mxu1 %v3536_v46  ;;  %v2784_v46 = vld [vmem:[#allocation3 + $0x91] sm:$0xff] }
 0x22b   : > { %3976 = vmatprep.subr.mxu0 %v3519_v47  ;;  %4300 = vmatprep.subr.mxu1 %v3535_v54 }
 0x22c   : > { %2651 = vmatmul.mubr.f32.gmra.mxu0 %v5955_v44  ;;  %4301 = vmatpush3.msra.mxu1 %v3535_v54 }
 0x22d   : > { %3977 = vmatpush3.msra.mxu0 %v3503_v50  ;;  %2655 = vmatprep.mubr.f32.mxu0 %v5856_v40 }
 0x22e   : > { %3978 = vmatprep.subr.mxu0 %v3518_v1  ;;  %4302 = vmatprep.subr.mxu1 %v3534_v59 }
 0x22f   : > { %3979 = vmatpush3.msra.mxu0 %v3502_v60  ;;  %4303 = vmatpush3.msra.mxu1 %v3534_v59 }
 0x230   : > { %3980 = vmatprep.subr.mxu0 %v3517_v61  ;;  %4304 = vmatprep.subr.mxu1 %v3533_v0 }
 0x231   : > { %2656 = vmatmul.mubr.f32.gmra.mxu0 %v5980_v31  ;;  %4305 = vmatpush3.msra.mxu1 %v3533_v0 }
 0x232   : > { %3981 = vmatpush3.msra.mxu0 %v3501_v21  ;;  %2660 = vmatprep.mubr.f32.mxu0 %v5879_v2 }
 0x233   : > { %3982 = vmatprep.subr.mxu0 %v3516_v12  ;;  %4306 = vmatprep.subr.mxu1 %v3532_v45 }
 0x234   : > { %3983 = vmatpush3.msra.mxu0 %v3500_v35  ;;  %4307 = vmatpush3.msra.mxu1 %v3532_v45 }
 0x235   : > { %3984 = vmatprep.subr.mxu0 %v3515_v49  ;;  %4308 = vmatprep.subr.mxu1 %v3531_v52 }
 0x236   : > { %2661 = vmatmul.mubr.f32.gmra.mxu0 %v6005_v51  ;;  %4309 = vmatpush3.msra.mxu1 %v3531_v52 }
 0x237   : > { %3985 = vmatpush3.msra.mxu0 %v3499_v22  ;;  %2665 = vmatprep.mubr.f32.mxu0 %v5902_v6 }
 0x238   : > { %3986 = vmatprep.subr.mxu0 %v3514_v36  ;;  %4310 = vmatprep.subr.mxu1 %v3530_v55 }
 0x239   : > { %3987 = vmatpush3.msra.mxu0 %v3498_v38  ;;  %4311 = vmatpush3.msra.mxu1 %v3530_v55 }
 0x23a   : > { %3988 = vmatprep.subr.mxu0 %v3513_v39  ;;  %4312 = vmatprep.subr.mxu1 %v3529_v41 }
 0x23b   : > { %2666 = vmatmul.mubr.f32.gmra.mxu0 %v6030_v3  ;;  %4313 = vmatpush3.msra.mxu1 %v3529_v41 }
 0x23c   : > { %3989 = vmatpush3.msra.mxu0 %v3497_v9  ;;  %2914 = vmatprep.mubr.f32.mxu0 %v5818_v24  ;;  %v3127_v24 = vld [vmem:[#allocation4 + $0x60] sm:$0xff] }
 0x23d   : > { %3990 = vmatprep.subr.mxu0 %v3512_v16  ;;  %4314 = vmatprep.subr.mxu1 %v3528_v29 }
 0x23e   : > { %3991 = vmatpush3.msra.mxu0 %v3496_v34  ;;  %4315 = vmatpush3.msra.mxu1 %v3528_v29 }
 0x23f   : > { %4328 = vmatprep.subr.mxu0 %v3130_v20  ;;  %4317 = vmatmul.mubr.f32.vlgmr.msra.gmra.mxu1 %v5890_v62  ;;  %v3126_v62 = vld [vmem:[#allocation4 + $0x58] sm:$0xff] }
 0x240   : > { %4372 = vmatprep.subr.mxu1 %v3130_v20  ;;  %2915 = vmatmul.mubr.f32.vlgmr.msra.gmra.mxu0 %v5897_v42  ;;  %v3124_v42 = vld [vmem:[#allocation4 + $0x48] sm:$0xff] }
 0x241   : > { %4319 = vmatprep.mubr.f32.mxu1 %v5930_v28  ;;  %4329 = vmatpush3.msra.mxu0 %v3130_v20  ;;  %v3120_v28 = vld [vmem:[#allocation4 + $0x28] sm:$0xff] }
 0x242   : > { %4388 = vmatpush3.msra.mxu1 %v3130_v20  ;;  %2919 = vmatprep.mubr.f32.mxu0 %v5838_v25  ;;  %v3125_v25 = vld [vmem:[#allocation4 + $0x50] sm:$0xff] }
 0x243   : > { %4330 = vmatprep.subr.mxu0 %v3129_v37  ;;  %4373 = vmatprep.subr.mxu1 %v3129_v37 }
 0x244   : > { %4331 = vmatpush3.msra.mxu0 %v3129_v37  ;;  %4389 = vmatpush3.msra.mxu1 %v3129_v37 }
 0x245   : > { %4332 = vmatprep.subr.mxu0 %v3128_v23  ;;  %4320 = vmatmul.mubr.f32.gmra.mxu1 %v5950_v17  ;;  %v3548_v17 = vld [vmem:[%s5017_s12 + $0x1f0] sm:$0xff] }
 0x246   : > { %4374 = vmatprep.subr.mxu1 %v3128_v23  ;;  %2920 = vmatmul.mubr.f32.gmra.mxu0 %v5927_v5  ;;  %v3122_v5 = vld [vmem:[#allocation4 + $0x38] sm:$0xff] }
 0x247   : > { %4322 = vmatprep.mubr.f32.mxu1 %v5975_v43  ;;  %4333 = vmatpush3.msra.mxu0 %v3128_v23  ;;  %v3544_v43 = vld [vmem:[%s5017_s12 + $0x1b0] sm:$0xff] }
 0x248   : > { %4390 = vmatpush3.msra.mxu1 %v3128_v23  ;;  %2924 = vmatprep.mubr.f32.mxu0 %v5840_v10  ;;  %v3123_v10 = vld [vmem:[#allocation4 + $0x40] sm:$0xff] }
 0x249   : > { %4334 = vmatprep.subr.mxu0 %v3127_v24  ;;  %4375 = vmatprep.subr.mxu1 %v3127_v24 }
 0x24a   : > { %4335 = vmatpush3.msra.mxu0 %v3127_v24  ;;  %4391 = vmatpush3.msra.mxu1 %v3127_v24 }
 0x24b   : > { %4336 = vmatprep.subr.mxu0 %v3126_v62  ;;  %4323 = vmatmul.mubr.f32.gmra.mxu1 %v6000_v15  ;;  %v3545_v15 = vld [vmem:[%s5017_s12 + $0x1c0] sm:$0xff] }
 0x24c   : > { %4376 = vmatprep.subr.mxu1 %v3126_v62  ;;  %2925 = vmatmul.mubr.f32.gmra.mxu0 %v5955_v44  ;;  %v3552_v44 = vld [vmem:[%s6374_s8] ss:$0 sm:$0xff] }
 0x24d   : > { %4325 = vmatprep.mubr.f32.mxu1 %v6025_v63  ;;  %4337 = vmatpush3.msra.mxu0 %v3126_v62  ;;  %v3088_v63 = vmul.f32 %v3552_v44, %v3548_v17  ;;  %v3084_v13 = vmul.f32 %v3552_v44, %v3544_v43  ;;  %v3085_v58 = vmul.f32 %v3552_v44, %v3545_v15 }
 0x24e   : > { %4392 = vmatpush3.msra.mxu1 %v3126_v62  ;;  %2929 = vmatprep.mubr.f32.mxu0 %v5856_v40  ;;  %v3121_v40 = vld [vmem:[#allocation4 + $0x30] sm:$0xff]  ;;  %v3086_v11 = vmul.f32 %v3552_v44, %v3546_v56  ;;  %v3091_v33 = vmul.f32 %v3552_v44, %v3551_v19  ;;  %v3087_v54 = vmul.f32 %v3552_v44, %v3547_v26 }
 0x24f   : > { %4338 = vmatprep.subr.mxu0 %v3125_v25  ;;  %4377 = vmatprep.subr.mxu1 %v3125_v25 }
 0x250   : > { %4339 = vmatpush3.msra.mxu0 %v3125_v25  ;;  %4393 = vmatpush3.msra.mxu1 %v3125_v25 }
 0x251   : > { %4340 = vmatprep.subr.mxu0 %v3124_v42  ;;  %4378 = vmatprep.subr.mxu1 %v3124_v42 }
 0x252   : > { %2930 = vmatmul.mubr.f32.gmra.mxu0 %v5980_v31  ;;  %4394 = vmatpush3.msra.mxu1 %v3124_v42  ;;  %v3549_v31 = vld [vmem:[%s5017_s12 + $0x200] sm:$0xff] }
 0x253   : > { %4341 = vmatpush3.msra.mxu0 %v3124_v42  ;;  %2934 = vmatprep.mubr.f32.mxu0 %v5879_v2  ;;  %v3119_v2 = vld [vmem:[#allocation4 + $0x20] sm:$0xff]  ;;  %v3089_v48 = vmul.f32 %v3552_v44, %v3549_v31 }
 0x254   : > { %4342 = vmatprep.subr.mxu0 %v3123_v10  ;;  %4379 = vmatprep.subr.mxu1 %v3123_v10 }
 0x255   : > { %4343 = vmatpush3.msra.mxu0 %v3123_v10  ;;  %4395 = vmatpush3.msra.mxu1 %v3123_v10 }
 0x256   : > { %4344 = vmatprep.subr.mxu0 %v3122_v5  ;;  %4380 = vmatprep.subr.mxu1 %v3122_v5 }
 0x257   : > { %2935 = vmatmul.mubr.f32.gmra.mxu0 %v6005_v51  ;;  %4396 = vmatpush3.msra.mxu1 %v3122_v5  ;;  %v3550_v51 = vld [vmem:[%s5017_s12 + $0x210] sm:$0xff]  ;;  %s392_s12 = sand.u32 1, %s4547_s18  }
 0x258   : > { %4345 = vmatpush3.msra.mxu0 %v3122_v5  ;;  %2939 = vmatprep.mubr.f32.mxu0 %v5902_v6  ;;  %v3118_v6 = vld [vmem:[#allocation4 + $0x18] sm:$0xff]  ;;  %v3090_v18 = vmul.f32 %v3552_v44, %v3550_v51  ;;  %s3346_s26 = sshll.u32 %s392_s12, 6  ;;  %s6326_s15 = scalar_lea.sflag [#allocation6], %s392_s12 }
 0x259   : > { %4346 = vmatprep.subr.mxu0 %v3121_v40  ;;  %4381 = vmatprep.subr.mxu1 %v3121_v40  ;;  %s394_s22 = scalar_lea.vmem [#allocation7], %s3346_s26 }
 0x25a   : > { %4347 = vmatpush3.msra.mxu0 %v3121_v40  ;;  %4397 = vmatpush3.msra.mxu1 %v3121_v40  ;;  %s3266_s30 = sshll.u32 %s394_s22, 4  ;;  %s6317_s30 = int_to_ptr.vmem [resolvable:$true] %s3266_s30 }
 0x25b   : > { %4348 = vmatprep.subr.mxu0 %v3120_v28  ;;  %4382 = vmatprep.subr.mxu1 %v3120_v28  ;;  %s4491_s16 = scalar_lea.vmem %s6317_s30, 1024  ;;  %p4498_p11 = scmp.lt.s32.totalorder %s6317_s30, %s4496_s25 }
 0x25c   : > { %2940 = vmatmul.mubr.f32.gmra.mxu0 %v6030_v3  ;;  %4398 = vmatpush3.msra.mxu1 %v3120_v28  ;;  %v3553_v3 = vld [vmem:[%s6375_s9] ss:$0 sm:$0xff]  ;;  %p4492_p8 = scmp.ne.s32.totalorder %s6317_s30, %s4491_s16  ;;  %p4499_p12 = scmp.lt.s32.totalorder %s4497_s10, %s4491_s16 }
 0x25d   : > { %4349 = vmatpush3.msra.mxu0 %v3120_v28  ;;  %2944 = vmatprep.mubr.f32.mxu0 %v5925_v8  ;;  %v2800_v8 = vld [vmem:[#allocation3 + $0x93] sm:$0xff]  ;;  %v3103_v30 = vadd.f32 %v3553_v3, %v3088_v63  ;;  %v3099_v7 = vadd.f32 %v3553_v3, %v3084_v13  ;;  %v3104_v32 = vadd.f32 %v3553_v3, %v3089_v48 }
 0x25e   : > { %4350 = vmatprep.subr.mxu0 %v3119_v2  ;;  %4383 = vmatprep.subr.mxu1 %v3119_v2  ;;  %v3100_v53 = vadd.f32 %v3553_v3, %v3085_v58  ;;  %v3105_v47 = vadd.f32 %v3553_v3, %v3090_v18  ;;  %v3101_v50 = vadd.f32 %v3553_v3, %v3086_v11  ;;  %p4493_p9 = pnand %p4492_p8, %p4663_p5  ;;  %p4500_p13 = por %p4499_p12, %p4498_p11 }
 0x25f   : > { %4351 = vmatpush3.msra.mxu0 %v3119_v2  ;;  %4399 = vmatpush3.msra.mxu1 %v3119_v2  ;;  %v3111_v1 = vmax.f32 %v3103_v30, 0.0  ;;  %v3107_v59 = vmax.f32 %v3099_v7, 0.0  ;;  %v3112_v60 = vmax.f32 %v3104_v32, 0.0  ;;  %v3106_v61 = vadd.f32 %v3553_v3, %v3091_v33 }
 0x260   : > { %4352 = vmatprep.subr.mxu0 %v3118_v6  ;;  %4384 = vmatprep.subr.mxu1 %v3118_v6  ;;  %v3108_v0 = vmax.f32 %v3100_v53, 0.0  ;;  %v3113_v21 = vmax.f32 %v3105_v47, 0.0  ;;  %v3102_v12 = vadd.f32 %v3553_v3, %v3087_v54  ;;  %v3109_v45 = vmax.f32 %v3101_v50, 0.0  ;;  %p4494_p10 = pneg %p4493_p9 }
 0x261   : > { %2945 = vmatmul.mubr.f32.gmra.mxu0 %v6056_v4  ;;  %4400 = vmatpush3.msra.mxu1 %v3118_v6  ;;  %v3115_v4 = vld [vmem:[#allocation4] sm:$0xff]  ;;  %v3114_v35 = vmax.f32 %v3106_v61, 0.0 }
 0x262   : > { %4353 = vmatpush3.msra.mxu0 %v3118_v6  ;;  %4385 = vmatprep.subr.mxu1 %v3117_v14  ;;  %v3110_v49 = vmax.f32 %v3102_v12, 0.0  ;;  %p4501_p0 = pnand %p4500_p13, %p4494_p10 }
 0x263   : > { %4354 = vmatprep.subr.mxu0 %v3117_v14  ;;  %4326 = vmatmul.mubr.f32.gmra.mxu1 %v2800_v8 }
 0x264   : > { %4355 = vmatpush3.msra.mxu0 %v3117_v14  ;;  %4401 = vmatpush3.msra.mxu1 %v3117_v14 }
 0x265   : > { %2949 = vmatprep.mubr.f32.mxu0 %v2792_v27  ;;  %4356 = vmatprep.subr.mxu0 %v3116_v57 }
 0x266   : > { %4386 = vmatprep.subr.mxu1 %v3116_v57  ;;  %2950 = vmatmul.mubr.f32.gmra.mxu0 %v2784_v46 }
 0x267   : > { %4402 = vmatpush3.msra.mxu1 %v3116_v57  ;;  %4357 = vmatpush3.msra.mxu0 %v3116_v57 }
 0x268   : > { %4387 = vmatprep.subr.mxu1 %v3115_v4  ;;  %4358 = vmatprep.subr.mxu0 %v3115_v4 }
 0x269   : > { %4403 = vmatpush3.msra.mxu1 %v3115_v4  ;;  %4359 = vmatpush3.msra.mxu0 %v3115_v4 }
 0x26a   : > { %4366 = vmatprep.mubr.f32.mxu1 %v3111_v1  ;;  %4360 = vmatprep.mubr.f32.mxu0 %v3107_v59 }
 0x26b   : > { %4367 = vmatmul.mubr.f32.vlgmr.msra.gmra.mxu1 %v3112_v60  ;;  %4361 = vmatmul.mubr.f32.vlgmr.msra.gmra.mxu0 %v3108_v0 }
 0x26c   : > { %4369 = vmatprep.mubr.f32.mxu1 %v3113_v21  ;;  %4363 = vmatprep.mubr.f32.mxu0 %v3109_v45 }
 0x26f   : > { %4370 = vmatmul.mubr.f32.gmra.mxu1 %v3114_v35  ;;  %4364 = vmatmul.mubr.f32.gmra.mxu0 %v3110_v49 }
 0x2a8   : > { %v3832_v52 = vpop.f32.mrf.mxu0  ;;  %v4230_v17 = vpop.f32.mrf.mxu1 }
 0x2aa   : > { %v3833_v22 = vpop.f32.mrf.mxu0  ;;  %v2527_v31 = vpop.f32.mrf.mxu1 }
 0x2ab   : > { %v6265_v36 = vadd.f32 %v3833_v22, %v3832_v52 }
 0x2ad   : > { %v3835_v55 = vpop.f32.mrf.mxu0 }
 0x2af   : > { %v3836_v38 = vpop.f32.mrf.mxu0 }
 0x2b0   : > { %v6267_v39 = vadd.f32 %v3836_v38, %v3835_v55 }
 0x2b3   : > { %v3838_v41 = vpop.f32.mrf.mxu0  ;;  %v4233_v15 = vpop.f32.mrf.mxu1 }
 0x2b5   : > { %v3839_v9 = vpop.f32.mrf.mxu0  ;;  %v2537_v63 = vpop.f32.mrf.mxu1 }
 0x2b6   : > { %v6269_v16 = vadd.f32 %v3839_v9, %v3838_v41 }
 0x2b8   : > { %v3841_v29 = vpop.f32.mrf.mxu0 }
 0x2ba   : > { %v3842_v34 = vpop.f32.mrf.mxu0 }
 0x2bb   : > { %v6271_v20 = vadd.f32 %v3842_v34, %v3841_v29 }
 0x2be   : > { %v3844_v37 = vpop.f32.mrf.mxu0  ;;  %v4236_v13 = vpop.f32.mrf.mxu1 }
 0x2c0   : > { %v3845_v23 = vpop.f32.mrf.mxu0  ;;  %v2547_v14 = vpop.f32.mrf.mxu1 }
 0x2c1   : > { %v6273_v24 = vadd.f32 %v3845_v23, %v3844_v37 }
 0x2c3   : > { %v3847_v62 = vpop.f32.mrf.mxu0 }
 0x2c5   : > { %v3848_v25 = vpop.f32.mrf.mxu0 }
 0x2c6   : > { %v3849_v42 = vadd.f32 %v3848_v25, %v3847_v62  ;;  %v2528_v62 = vadd.f32 %v6265_v36, %v2527_v31 }
 0x2c9   : > { %v3850_v10 = vpop.f32.mrf.mxu0  ;;  %v4239_v18 = vpop.f32.mrf.mxu1 }
 0x2cb   : > { %v3851_v5 = vpop.f32.mrf.mxu0  ;;  %v2557_v11 = vpop.f32.mrf.mxu1 }
 0x2cc   : > { %v6275_v40 = vadd.f32 %v3851_v5, %v3850_v10 }
 0x2ce   : > { %v3853_v28 = vpop.f32.mrf.mxu0 }
 0x2d0   : > { %v3854_v2 = vpop.f32.mrf.mxu0 }
 0x2d1   : > { %v3855_v25 = vadd.f32 %v3854_v2, %v3853_v28 }
 0x2d3   : > { %v6281_v26 = vpop.f32.mrf.mxu1  ;;  %v2563_v31 = vadd.f32 %v4239_v18, %v3855_v25 }
 0x2d4   : > { %v3912_v44 = vpop.f32.mrf.mxu0  ;;  %6390 = vst [vmem:[#allocation11_spill] sm:$0xff] %v6281_v26 }
 0x2d5   : > { %v6283_v57 = vpop.f32.mrf.mxu1 }
 0x2d6   : > { %v3913_v43 = vpop.f32.mrf.mxu0  ;;  %6391 = vst [vmem:[#allocation13_spill] sm:$0xff] %v6283_v57 }
 0x2d7   : > { %v3914_v37 = vadd.f32 %v3913_v43, %v3912_v44  ;;  %v2548_v43 = vadd.f32 %v6273_v24, %v2547_v14 }
 0x2d9   : > { %v6285_v33 = vpop.f32.mrf.mxu1  ;;  %v2633_v36 = vadd.f32 %v3914_v37, %v2528_v62 }
 0x2da   : > { %v3915_v6 = vpop.f32.mrf.mxu0  ;;  %6392 = vst [vmem:[#allocation14_spill] sm:$0xff] %v6285_v33 }
 0x2db   : > { %v6287_v53 = vpop.f32.mrf.mxu1 }
 0x2dc   : > { %v3916_v51 = vpop.f32.mrf.mxu0  ;;  %6393 = vst [vmem:[#allocation15_spill] sm:$0xff] %v6287_v53  ;;  %v2533_v53 = vadd.f32 %v4230_v17, %v6267_v39 }
 0x2dd   : > { %v3917_v10 = vadd.f32 %v3916_v51, %v3915_v6 }
 0x2df   : > { %v4280_v54 = vpop.f32.mrf.mxu1  ;;  %v2638_v6 = vadd.f32 %v3917_v10, %v2533_v53 }
 0x2e0   : > { %v6277_v56 = vpop.f32.mrf.mxu0 }
 0x2e1   : > { %v6289_v1 = vpop.f32.mrf.mxu1 }
 0x2e2   : > { %v6279_v3 = vpop.f32.mrf.mxu0  ;;  %6394 = vst [vmem:[#allocation16_spill] sm:$0xff] %v6289_v1  ;;  %v2538_v1 = vadd.f32 %v6269_v16, %v2537_v63  ;;  %v2558_v16 = vadd.f32 %v6275_v40, %v2557_v11 }
 0x2e3   : > { %6389 = vst [vmem:[#allocation12_spill] sm:$0xff] %v6279_v3 }
 0x2e5   : > { %v6291_v60 = vpop.f32.mrf.mxu1 }
 0x2e6   : > { %v3921_v48 = vpop.f32.mrf.mxu0  ;;  %6395 = vst [vmem:[#allocation17_spill] sm:$0xff] %v6291_v60 }
 0x2e7   : > { %v6293_v0 = vpop.f32.mrf.mxu1 }
 0x2e8   : > { %v3922_v58 = vpop.f32.mrf.mxu0  ;;  %6396 = vst [vmem:[#allocation18_spill] sm:$0xff] %v6293_v0  ;;  %v2553_v0 = vadd.f32 %v4236_v13, %v3849_v42 }
 0x2e9   : > { %v3923_v39 = vadd.f32 %v3922_v58, %v3921_v48  ;;  %v6399_v58 = vld [vmem:[#allocation13_spill] sm:$0xff] }
 0x2ea   : > { %v6398_v63 = vld [vmem:[#allocation12_spill] sm:$0xff] }
 0x2eb   : > { %v3920_v13 = vadd.f32 %v6398_v63, %v6277_v56 }
 0x2ec   : > { %v3924_v19 = vpop.f32.mrf.mxu0 }
 0x2ee   : > { %v3925_v8 = vpop.f32.mrf.mxu0 }
 0x2ef   : > { %v3926_v33 = vadd.f32 %v3925_v8, %v3924_v19  ;;  %v6405_v37 = vld [vmem:[#allocation18_spill] sm:$0xff] }
 0x2f1   : > { %v3927_v27 = vpop.f32.mrf.mxu0  ;;  %v2653_v51 = vadd.f32 %v3926_v33, %v2548_v43 }
 0x2f3   : > { %v3928_v30 = vpop.f32.mrf.mxu0 }
 0x2f4   : > { %v3929_v23 = vadd.f32 %v3928_v30, %v3927_v27  ;;  %v2738_v30 = vadd.f32 %v6399_v58, %v2633_v36 }
 0x2f6   : > { %v3930_v7 = vpop.f32.mrf.mxu0  ;;  %v2658_v28 = vadd.f32 %v3929_v23, %v2553_v0 }
 0x2f8   : > { %v3931_v32 = vpop.f32.mrf.mxu0  ;;  %v2763_v48 = vadd.f32 %v4280_v54, %v2658_v28 }
 0x2fb   : > { %v3933_v46 = vpop.f32.mrf.mxu0 }
 0x2fd   : > { %v3934_v47 = vpop.f32.mrf.mxu0 }
 0x2fe   : > { %v3935_v26 = vadd.f32 %v3934_v47, %v3933_v46 }
 0x2ff   : > { %v4318_v12 = vpop.f32.mrf.mxu1 }
 0x300   : > { %v3992_v4 = vpop.f32.mrf.mxu0  ;;  %v2668_v19 = vadd.f32 %v3935_v26, %v2563_v31 }
 0x301   : > { %v3021_v49 = vpop.f32.mrf.mxu1 }
 0x302   : > { %v3993_v50 = vpop.f32.mrf.mxu0 }
 0x303   : > { %v3994_v42 = vadd.f32 %v3993_v50, %v3992_v4  ;;  %v2643_v50 = vadd.f32 %v3920_v13, %v2538_v1 }
 0x305   : > { %v4321_v22 = vpop.f32.mrf.mxu1  ;;  %v3022_v53 = vadd.f32 %v3994_v42, %v3021_v49 }
 0x306   : > { %v3995_v59 = vpop.f32.mrf.mxu0 }
 0x307   : > { %v6295_v41 = vpop.f32.mrf.mxu1 }
 0x308   : > { %v3996_v61 = vpop.f32.mrf.mxu0  ;;  %6397 = vst [vmem:[#allocation19_spill] sm:$0xff] %v6295_v41  ;;  %v2543_v41 = vadd.f32 %v4233_v15, %v6271_v20  ;;  %v3932_v20 = vadd.f32 %v3931_v32, %v3930_v7  ;;  %v6400_v32 = vld [vmem:[#allocation11_spill] sm:$0xff] }
 0x309   : > { %v3997_v57 = vadd.f32 %v3996_v61, %v3995_v59  ;;  %v2743_v33 = vadd.f32 %v6400_v32, %v2638_v6  ;;  %v6402_v61 = vld [vmem:[#allocation17_spill] sm:$0xff] }
 0x30a   : > { %v2648_v46 = vadd.f32 %v3923_v39, %v2543_v41  ;;  %v2663_v47 = vadd.f32 %v3932_v20, %v2558_v16  ;;  %v2773_v54 = vadd.f32 %v6402_v61, %v2668_v19  ;;  %v3060_v41 = vadd.f32 %v3022_v53, %v2738_v30 }
 0x30b   : > { %v4324_v34 = vpop.f32.mrf.mxu1  ;;  %v3027_v24 = vadd.f32 %v4318_v12, %v3997_v57  ;;  %v6401_v57 = vld [vmem:[#allocation16_spill] sm:$0xff] }
 0x30c   : > { %v3998_v21 = vpop.f32.mrf.mxu0  ;;  %v2758_v4 = vadd.f32 %v6401_v57, %v2653_v51  ;;  %v2768_v23 = vadd.f32 %v6405_v37, %v2663_v47 }
 0x30d   : > { %v3041_v3 = vpop.f32.mrf.mxu1 }
 0x30e   : > { %v3999_v45 = vpop.f32.mrf.mxu0 }
 0x30f   : > { %v4000_v40 = vadd.f32 %v3999_v45, %v3998_v21  ;;  %v6403_v45 = vld [vmem:[#allocation19_spill] sm:$0xff] }
 0x312   : > { %v4001_v35 = vpop.f32.mrf.mxu0 }
 0x314   : > { %v4002_v52 = vpop.f32.mrf.mxu0 }
 0x315   : > { %v4003_v14 = vadd.f32 %v4002_v52, %v4001_v35  ;;  %v3032_v52 = vadd.f32 %v4000_v40, %v6403_v45 }
 0x317   : > { %v4004_v55 = vpop.f32.mrf.mxu0 }
 0x319   : > { %v4005_v38 = vpop.f32.mrf.mxu0 }
 0x31a   : > { %v4006_v2 = vadd.f32 %v4005_v38, %v4004_v55 }
 0x31c   : > { %v4007_v9 = vpop.f32.mrf.mxu0  ;;  %v3042_v27 = vadd.f32 %v4006_v2, %v3041_v3  ;;  %v3037_v3 = vadd.f32 %v4321_v22, %v4003_v14 }
 0x31e   : > { %v4008_v29 = vpop.f32.mrf.mxu0  ;;  %v3064_v21 = vadd.f32 %v3042_v27, %v2758_v4 }
 0x31f   : > { %v4009_v60 = vadd.f32 %v4008_v29, %v4007_v9  ;;  %v6404_v9 = vld [vmem:[#allocation14_spill] sm:$0xff] }
 0x320   : > { %v2753_v29 = vadd.f32 %v6404_v9, %v2648_v46 }
 0x321   : > { %v4010_v5 = vpop.f32.mrf.mxu0  ;;  %v3047_v15 = vadd.f32 %v4324_v34, %v4009_v60  ;;  %v3061_v60 = vadd.f32 %v3027_v24, %v2743_v33 }
 0x322   : > { %v3063_v10 = vadd.f32 %v3037_v3, %v2753_v29 }
 0x323   : > { %v4011_v44 = vpop.f32.mrf.mxu0  ;;  %v4327_v17 = vpop.f32.mrf.mxu1  ;;  %v3065_v26 = vadd.f32 %v3047_v15, %v2763_v48 }
 0x324   : > { %v4012_v18 = vadd.f32 %v4011_v44, %v4010_v5  ;;  %v6406_v5 = vld [vmem:[#allocation15_spill] sm:$0xff] }
 0x325   : > { %v3051_v11 = vpop.f32.mrf.mxu1  ;;  %v2748_v44 = vadd.f32 %v6406_v5, %v2643_v50 }
 0x326   : > { %v4013_v8 = vpop.f32.mrf.mxu0  ;;  %v3052_v0 = vadd.f32 %v4012_v18, %v3051_v11 }
 0x327   : > { %v3062_v6 = vadd.f32 %v3032_v52, %v2748_v44 }
 0x328   : > { %v4014_v7 = vpop.f32.mrf.mxu0  ;;  %v3066_v28 = vadd.f32 %v3052_v0, %v2768_v23 }
 0x329   : > { %v4015_v56 = vadd.f32 %v4014_v7, %v4013_v8 }
 0x32b   : > { %v4368_v59 = vpop.f32.mrf.mxu1  ;;  %v3057_v12 = vadd.f32 %v4327_v17, %v4015_v56  ;;  %v4362_v49 = vpop.f32.mrf.mxu0 }
 0x32c   : > { %v3241_v35 = vadd.f32 %v4368_v59, %v3065_v26  ;;  %v3237_v55 = vadd.f32 %v4362_v49, %v3061_v60 }
 0x32d   : > { %v3217_v38 = vpop.f32.mrf.mxu1  ;;  %v3197_v22 = vpop.f32.mrf.mxu0  ;;  %v3067_v34 = vadd.f32 %v3057_v12, %v2773_v54 }
 0x32e   : > { %3249 = vst [vmem:[%s394_s22 + $0x28] sm:$0xff] %v3241_v35  ;;  %v3240_v1 = vadd.f32 %v3217_v38, %v3064_v21  ;;  %3245 = vst [vmem:[%s394_s22 + $0x8] sm:$0xff] %v3237_v55  ;;  %v3236_v62 = vadd.f32 %v3197_v22, %v3060_v41 }
 0x32f   : > { %v4371_v25 = vpop.f32.mrf.mxu1  ;;  %v4365_v36 = vpop.f32.mrf.mxu0 }
 0x330   : > { %3248 = vst [vmem:[%s394_s22 + $0x20] sm:$0xff] %v3240_v1  ;;  %v3243_v43 = vadd.f32 %v4371_v25, %v3067_v34  ;;  %3244 = vst [vmem:[%s394_s22] sm:$0xff] %v3236_v62  ;;  %v3239_v2 = vadd.f32 %v4365_v36, %v3063_v10 }
 0x331   : > { %v3227_v31 = vpop.f32.mrf.mxu1  ;;  %v3207_v42 = vpop.f32.mrf.mxu0 }
 0x332   : > { %3251 = vst [vmem:[%s394_s22 + $0x38] sm:$0xff] %v3243_v43  ;;  %v3242_v39 = vadd.f32 %v3227_v31, %v3066_v28  ;;  %3247 = vst [vmem:[%s394_s22 + $0x18] sm:$0xff] %v3239_v2  ;;  %v3238_v17 = vadd.f32 %v3207_v42, %v3062_v6 }
 0x334   : > { %3250 = vst [vmem:[%s394_s22 + $0x30] sm:$0xff] %v3242_v39  ;;  %3246 = vst [vmem:[%s394_s22 + $0x10] sm:$0xff] %v3238_v17 }
 0x335   : > { %4504 = shalt.err (!%p4501_p0)
}
 0x336   : > { %s4505_s12 = scalar_lea.hbm %s6322_s14, 1024  ;;  %s4509_s13 = scalar_lea.hbm %s6377_s11, 2048 }
 0x337   : > { %p4506_p1 = scmp.ne.s32.totalorder %s6322_s14, %s4505_s12  ;;  %p4510_p4 = scmp.lt.s32.totalorder %s6322_s14, %s6377_s11 }
 0x338   : > { %p4511_p7 = scmp.lt.s32.totalorder %s4509_s13, %s4505_s12 }
 0x339   : > { %p4507_p2 = pnand %p4506_p1, %p4663_p5 }
 0x33a   : > { %p4512_p6 = por %p4511_p7, %p4510_p4 }
 0x33b   : > { %p4508_p3 = pneg %p4507_p2 }
 0x33d   : > { %p4513_p8 = pnand %p4512_p6, %p4508_p3 }
 0x33f   : > { %4516 = shalt.err (!%p4513_p8)
}
 0x340   : > { %s4563_s16 = smov 128   ;;  %s4564_s24 = smov 8  }
 0x341   : > { %4409 = dma.vmem_to_hbm [thread:$0]  (%p4663_p5), %s6317_s30, 1024, %s6322_s14, %s6326_s15, %s4563_s16, %s4563_s16, %s4564_s24  }
 0x342 PF: > { %p4421_p9 = scmp.ge.s32.totalorder %s4555_s20, 2  ;;  %s3281_s25 = sand.u32 1, %s4543_s17  }
 0x343   : > { %p6407_p10 = scmp.ne.s32.totalorder %s6382_s28, 0  ;;  %s3282_s10 = scalar_lea.sflag [#allocation6], %s3281_s25 }
 0x345   : > { %p4416_p11 = pnand %p4421_p9, %p6407_p10 }
 0x347   : > { %p4417_p12 = pneg %p4416_p11 }
 0x349   : > { %4538 = dma.done.wait (%p4417_p12), %s3282_s10, 1024  }
 0x34a   : > { %4540 = vsyncadd (%p4417_p12), %s3282_s10, 4294966272  ;;  %s6408_s12 = sld [smem:[#allocation10_spill]]  ;;  %p22_p13 = scmp.ge.s32.totalorder %s4650_s23, 4  }
 0x34b   : > { %s6409_s17 = smov %s4547_s18  ;;  %s6410_s18 = smov %s4551_s19 }
 0x34c   : > { %s6412_s20 = smov %s4650_s23  ;;  %24 = sbr.rel (!%p22_p13) target bundleno = 6 (0x6), region = 117 }
 0x350   : > { %s6411_s19 = smov %s6408_s12 }
 0x351   :  { %3287 = vsyncpa [#allocation5], 1 }
 0x352   :  { %3289 = vsyncpa [#allocation5 + $0x1], 1 }
 0x353   :  { %3290 = vsyncpa [#allocation6], 1 }
 0x354   :  { %3292 = vsyncpa [#allocation6 + $0x1], 1 }

</bundles_post_ra>
